<compile_context>
chip_gen: v5e
topology: v5e:2x2
jax: 0.10.0
libtpu: 0.0.40
codegen_flags: <defaults>
</compile_context>

<pallas_src>
import functools

import jax
import jax.numpy as jnp
import numpy as np
from jax.experimental import pallas as pl
from jax.experimental.pallas import tpu as pltpu

BN_EPS = 1e-5
LANE = 128
SUBLANE = 8


def _round_up(x, m):
    return ((x + m - 1) // m) * m


def _vmem_budget_bytes():
    """Generation-aware scoped-VMEM budget (v5e/v6e: 128 MiB, v7x: 64 MiB/TC)."""
    try:
        cap = int(pltpu.get_tpu_info().vmem_capacity_bytes)
    except Exception:
        cap = 64 * 1024 * 1024  # conservative fallback (safe on every gen)
    return max(16 * 1024 * 1024, min((cap * 3) // 4, 96 * 1024 * 1024))


_VMEM_BUDGET = _vmem_budget_bytes()


def _conv_tile_bytes(t, k3, cp):
    # double-buffered: window tile + weights + bf16 y tile + per-tile stats
    return 2 * ((t + 8) * k3 * 2 + 3 * k3 * cp * 2 + t * cp * 2 + 2 * cp * 4)


def _pick_tile(n_rows, fp_fn, budget, target=2048):
    cap = _round_up(max(n_rows, SUBLANE), SUBLANE)
    cands = sorted({min(cap, _round_up(c, SUBLANE)) for c in
                    (target, 1024, 512, 256, 128, 64, 32, 16, SUBLANE)},
                   reverse=True)
    for t in cands:
        if fp_fn(t) <= budget // 2:
            return t
    return SUBLANE


# ----------------------------------------------------------------------------
# Pass 1: fused im2col conv (3 shifted-window matmuls, f32 acc) + BN stats
# ----------------------------------------------------------------------------
def _conv3x3_stats_kernel(win_ref, w_ref, y_ref, sum_ref, ssq_ref, *,
                          tile_n, period, width, n_valid_rows):
    # win_ref: (tile_n + 8, 3*Cin) bf16 — overlapped row window
    #          win_ref[j] = xvf[i*tile_n + j - 1]  (zero out of range)
    # w_ref:   (3, 3*Cin, Cp) bf16 — one (3*Cin, Cp) matrix per horizontal tap
    # y_ref:   (tile_n, Cp) bf16 raw conv output (lane-dense)
    # sum_ref, ssq_ref: (1, 1, Cp) f32 per-tile partial BN statistics
    acc = jnp.dot(win_ref[pl.ds(0, tile_n), :], w_ref[0],
                  preferred_element_type=jnp.float32)
    acc = acc + jnp.dot(win_ref[pl.ds(1, tile_n), :], w_ref[1],
                        preferred_element_type=jnp.float32)
    acc = acc + jnp.dot(win_ref[pl.ds(2, tile_n), :], w_ref[2],
                        preferred_element_type=jnp.float32)
    # bf16 store halves the inter-pass HBM stream; stats stay f32 (below).
    y_ref[...] = acc.astype(y_ref.dtype)

    # Mask out rows that sit on the (zero) width-padding columns or past the
    # real pixel count, so the batch statistics only see valid pixels.
    row = (jax.lax.broadcasted_iota(jnp.int32, (tile_n, 1), 0)
           + pl.program_id(0) * tile_n)
    col = row % period
    valid = (col >= 1) & (col <= width) & (row < n_valid_rows)
    accm = acc * valid.astype(jnp.float32)
    sum_ref[...] = jnp.sum(accm, axis=0, keepdims=True).reshape(1, 1, -1)
    ssq_ref[...] = jnp.sum(accm * acc, axis=0, keepdims=True).reshape(1, 1, -1)


def _build_conv_windows(x_nhwc, tile_n):
    """Overlapped row-window layout for the fused-im2col conv kernel.

    windows[i, j, ky*C + c] = x_pad[b, y+ky, xp, c] for flat row
    r = i*tile_n + j - 1 = (b*H + y)*(W+2) + xp   (zeros out of range).
    """
    b, h, w, c = x_nhwc.shape
    p = w + 2
    xpad = jnp.pad(x_nhwc, ((0, 0), (1, 1), (1, 1), (0, 0)))
    xv = jnp.concatenate([xpad[:, ky:ky + h] for ky in range(3)], axis=-1)
    n_flat = b * h * p
    xvf = xv.reshape(n_flat, 3 * c)
    nt = pl.cdiv(n_flat, tile_n)
    total = (nt + 1) * tile_n
    xvf_p = jnp.pad(xvf, ((1, total - n_flat - 1), (0, 0)))
    core = xvf_p[:nt * tile_n].reshape(nt, tile_n, 3 * c)
    halo = xvf_p[tile_n:(nt + 1) * tile_n].reshape(nt, tile_n, 3 * c)[:, :8, :]
    return jnp.concatenate([core, halo], axis=1), n_flat, nt


def _conv3x3_batch_stats(x_nhwc, w_hwio, *, budget=_VMEM_BUDGET):
    """3x3 SAME conv (bias-free) + per-channel batch mean/var in one pass."""
    b, h, w, cin = x_nhwc.shape
    cout = w_hwio.shape[-1]
    cp = _round_up(cout, LANE)            # lane-dense output channels
    k3 = 3 * cin
    p = w + 2
    n_flat = b * h * p
    n_valid = b * h * w

    tile_n = _pick_tile(n_flat, lambda t: _conv_tile_bytes(t, k3, cp), budget)
    assert _conv_tile_bytes(tile_n, k3, cp) <= budget, "conv tile exceeds VMEM"

    windows, n_flat_, nt = _build_conv_windows(
        x_nhwc.astype(jnp.bfloat16), tile_n)
    assert n_flat_ == n_flat

    # w_taps[kx, ky*Cin + ci, co] = W[ky, kx, ci, co]
    w_taps = jnp.transpose(w_hwio, (1, 0, 2, 3)).reshape(3, k3, cout)
    w_taps = jnp.pad(w_taps, ((0, 0), (0, 0), (0, cp - cout))).astype(
        jnp.bfloat16)

    kernel = functools.partial(_conv3x3_stats_kernel, tile_n=tile_n,
                               period=p, width=w, n_valid_rows=n_flat)
    cost = pl.CostEstimate(
        flops=2 * nt * tile_n * 3 * k3 * cp,
        transcendentals=0,
        bytes_accessed=(windows.size * 2 + w_taps.size * 2
                        + nt * tile_n * cp * 2 + 2 * nt * cp * 4))

    y, s, sq = pl.pallas_call(
        kernel,
        out_shape=(jax.ShapeDtypeStruct((nt * tile_n, cp), jnp.bfloat16),
                   jax.ShapeDtypeStruct((nt, 1, cp), jnp.float32),
                   jax.ShapeDtypeStruct((nt, 1, cp), jnp.float32)),
        grid=(nt,),
        in_specs=[pl.BlockSpec((None, tile_n + 8, k3), lambda i: (i, 0, 0)),
                  pl.BlockSpec((3, k3, cp), lambda i: (0, 0, 0))],
        out_specs=(pl.BlockSpec((tile_n, cp), lambda i: (i, 0)),
                   pl.BlockSpec((1, 1, cp), lambda i: (i, 0, 0)),
                   pl.BlockSpec((1, 1, cp), lambda i: (i, 0, 0))),
        compiler_params=pltpu.CompilerParams(
            dimension_semantics=("parallel",),
            vmem_limit_bytes=budget),
        cost_estimate=cost,
    )(windows, w_taps)

    ssum = jnp.sum(s, axis=(0, 1))
    ssq = jnp.sum(sq, axis=(0, 1))
    mean = ssum / n_valid
    # TODO(synk): E[x^2]-E[x]^2 in f32 can lose precision for very large means;
    # a shifted two-pass variance would be needed if tolerances tighten.
    var = jnp.maximum(ssq / n_valid - mean * mean, 0.0)
    meta = dict(b=b, h=h, w=w, p=p, cout=cout, cp=cp, n_flat=n_flat,
                tile_n=tile_n, nt=nt)
    return y, mean, var, meta


def _extract_valid(y_flat, meta, cout=None):
    b, h, w, p = meta["b"], meta["h"], meta["w"], meta["p"]
    cout = meta["cout"] if cout is None else cout
    return y_flat[:meta["n_flat"]].reshape(b, h, p, -1)[:, :, 1:w + 1, :cout]


def _bn_fold(gamma, beta, mean, var, cp):
    gamma_p = jnp.pad(gamma, (0, cp - gamma.shape[0]))
    beta_p = jnp.pad(beta, (0, cp - beta.shape[0]))
    scale = gamma_p * jax.lax.rsqrt(var + BN_EPS)
    shift = beta_p - mean * scale
    return scale, shift


# ----------------------------------------------------------------------------
# Pass 2 (final stage only): fused normalize (single FMA) + ReLU
# ----------------------------------------------------------------------------
def _bn_relu_kernel(y_ref, scale_ref, shift_ref, o_ref):
    y = y_ref[...].astype(jnp.float32) * scale_ref[...] + shift_ref[...]
    o_ref[...] = jnp.maximum(y, 0.0).astype(o_ref.dtype)


def _bn_relu(y, scale, shift, *, tile_n, out_dtype, budget=_VMEM_BUDGET):
    n_pad, cp = y.shape
    assert n_pad % tile_n == 0
    nt = n_pad // tile_n
    out_bytes = jnp.dtype(out_dtype).itemsize
    fp = 2 * (tile_n * cp * (2 + out_bytes) + 2 * cp * 4)
    assert fp <= budget, "bn_relu tile exceeds VMEM budget"
    cost = pl.CostEstimate(
        flops=3 * n_pad * cp, transcendentals=0,
        bytes_accessed=n_pad * cp * (2 + out_bytes) + 2 * cp * 4)
    return pl.pallas_call(
        _bn_relu_kernel,
        out_shape=jax.ShapeDtypeStruct((n_pad, cp), out_dtype),
        grid=(nt,),
        in_specs=[pl.BlockSpec((tile_n, cp), lambda i: (i, 0)),
                  pl.BlockSpec((1, cp), lambda i: (0, 0)),
                  pl.BlockSpec((1, cp), lambda i: (0, 0))],
        out_specs=pl.BlockSpec((tile_n, cp), lambda i: (i, 0)),
        compiler_params=pltpu.CompilerParams(
            dimension_semantics=("parallel",),
            vmem_limit_bytes=budget),
        cost_estimate=cost,
    )(y, scale, shift)


# ----------------------------------------------------------------------------
# JAX glue (NHWC throughout)
# ----------------------------------------------------------------------------
def _interp_matrix(n_out, n_in):
    """Bilinear interpolation matrix, align_corners=True (numpy, const-folded)."""
    if n_in == 1:
        return jnp.ones((n_out, 1), jnp.float32)
    src = np.arange(n_out, dtype=np.float64) * (n_in - 1) / (n_out - 1)
    lo = np.clip(np.floor(src).astype(np.int64), 0, n_in - 2)
    frac = (src - lo).astype(np.float32)
    m = np.zeros((n_out, n_in), np.float32)
    m[np.arange(n_out), lo] += 1.0 - frac
    m[np.arange(n_out), lo + 1] += frac
    return jnp.asarray(m)


def _bilinear_upsample_2x_nhwc(x):
    b, h, w, c = x.shape
    a_h = _interp_matrix(2 * h, h)
    a_w = _interp_matrix(2 * w, w)
    up = jnp.einsum("oh,bhwc->bowc", a_h, x)
    up = jnp.einsum("pw,bowc->bopc", a_w, up)
    return up  # (B, 2H, 2W, C)


def init_up_params(key, in_channels, out_channels):
    mid_channels = in_channels // 2
    k1, k2, k3, k4 = jax.random.split(key, 4)
    return {
        "w1": jax.random.normal(k1, (3, 3, in_channels, mid_channels),
                                jnp.float32) * 0.1,
        "b1": jax.random.normal(k2, (mid_channels,), jnp.float32) * 0.1,
        "g1": jnp.ones((mid_channels,), jnp.float32),
        "beta1": jnp.zeros((mid_channels,), jnp.float32),
        "w2": jax.random.normal(k3, (3, 3, mid_channels, out_channels),
                                jnp.float32) * 0.1,
        "b2": jax.random.normal(k4, (out_channels,), jnp.float32) * 0.1,
        "g2": jnp.ones((out_channels,), jnp.float32),
        "beta2": jnp.zeros((out_channels,), jnp.float32),
    }


@jax.jit
def up_forward(x1, x2, params):
    """x1: (B, C1, H1, W1), x2: (B, C2, H2, W2), both NCHW. Returns NCHW."""
    x1 = jnp.transpose(x1, (0, 2, 3, 1))
    x2 = jnp.transpose(x2, (0, 2, 3, 1))
    # 1. bilinear 2x upsample of x1 (align_corners=True)
    x1u = _bilinear_upsample_2x_nhwc(x1)
    # 2. pad x1 to x2's spatial size
    diff_y = x2.shape[1] - x1u.shape[1]
    diff_x = x2.shape[2] - x1u.shape[2]
    x1u = jnp.pad(x1u, ((0, 0),
                        (diff_y // 2, diff_y - diff_y // 2),
                        (diff_x // 2, diff_x - diff_x // 2),
                        (0, 0)))
    # 3. channel concat: [x2, x1]
    x = jnp.concatenate([x2, x1u], axis=-1)            # (B, H, W, Cin)

    # 4. DoubleConv (conv bias dropped: exactly cancelled by training-mode BN)
    # --- stage 1: fused conv3x3 + batch stats (single Pallas pass) ---
    y1, mean1, var1, meta1 = _conv3x3_batch_stats(x, params["w1"])
    cmid = meta1["cout"]
    scale1, shift1 = _bn_fold(params["g1"], params["beta1"], mean1, var1,
                              meta1["cp"])
    # Stage-1 BN apply + ReLU is folded into the construction of stage 2's
    # conv windows (the data is being re-laid out anyway), saving a full
    # mem-bound pass over the intermediate activation.
    a1 = _extract_valid(y1, meta1).astype(jnp.float32)
    a1 = jnp.maximum(a1 * scale1[:cmid] + shift1[:cmid], 0.0)
    a1 = a1.astype(jnp.bfloat16)

    # --- stage 2: fused conv3x3 + batch stats, then fused BN+ReLU pass ---
    y2, mean2, var2, meta2 = _conv3x3_batch_stats(a1, params["w2"])
    scale2, shift2 = _bn_fold(params["g2"], params["beta2"], mean2, var2,
                              meta2["cp"])
    out = _bn_relu(y2, scale2.reshape(1, -1), shift2.reshape(1, -1),
                   tile_n=meta2["tile_n"], out_dtype=jnp.float32)
    out = _extract_valid(out, meta2)                   # (B, H, W, Cout) f32
    # 5. back to NCHW
    return jnp.transpose(out, (0, 3, 1, 2))


# ----------------------------------------------------------------------------
# Pure-JAX reference (f32, with conv bias) for a sanity check of the Pallas path
# ----------------------------------------------------------------------------
def _ref_conv_bn_relu(x_nhwc, w_hwio, bias, gamma, beta):
    y = jax.lax.conv_general_dilated(
        x_nhwc, w_hwio, window_strides=(1, 1), padding="SAME",
        dimension_numbers=("NHWC", "HWIO", "NHWC"))
    y = y + bias[None, None, None, :]
    mean = jnp.mean(y, axis=(0, 1, 2), keepdims=True)
    var = jnp.mean((y - mean) ** 2, axis=(0, 1, 2), keepdims=True)
    y = (y - mean) * jax.lax.rsqrt(var + BN_EPS)
    y = y * gamma[None, None, None, :] + beta[None, None, None, :]
    return jnp.maximum(y, 0.0)


def up_forward_ref(x1, x2, params):
    x1 = jnp.transpose(x1, (0, 2, 3, 1))
    x2 = jnp.transpose(x2, (0, 2, 3, 1))
    x1u = _bilinear_upsample_2x_nhwc(x1)
    diff_y = x2.shape[1] - x1u.shape[1]
    diff_x = x2.shape[2] - x1u.shape[2]
    x1u = jnp.pad(x1u, ((0, 0),
                        (diff_y // 2, diff_y - diff_y // 2),
                        (diff_x // 2, diff_x - diff_x // 2),
                        (0, 0)))
    x = jnp.concatenate([x2, x1u], axis=-1)
    y = _ref_conv_bn_relu(x, params["w1"], params["b1"], params["g1"],
                          params["beta1"])
    y = _ref_conv_bn_relu(y, params["w2"], params["b2"], params["g2"],
                          params["beta2"])
    return jnp.transpose(y, (0, 3, 1, 2))


if __name__ == "__main__":
    key = jax.random.PRNGKey(0)
    k_x1, k_x2, k_p = jax.random.split(key, 3)

    # Up(in_channels=8, out_channels=4, bilinear=True)
    in_channels, out_channels = 8, 4
    B, H2, W2 = 2, 16, 16
    x1 = jax.random.normal(k_x1, (B, in_channels // 2, H2 // 2, W2 // 2),
                           jnp.float32)
    x2 = jax.random.normal(k_x2, (B, in_channels // 2, H2, W2), jnp.float32)

    params = init_up_params(k_p, in_channels, out_channels)

    out = jax.block_until_ready(up_forward(x1, x2, params))
    assert out.shape == (B, out_channels, H2, W2), out.shape

    ref = jax.block_until_ready(up_forward_ref(x1, x2, params))
    # bf16 MXU inputs + bf16 intermediates vs. pure-f32 reference.
    np.testing.assert_allclose(np.asarray(out), np.asarray(ref),
                               rtol=5e-2, atol=5e-2)

    print("KERNEL_OK")
</pallas_src>

<mosaic_0001>
module attributes {stable_mosaic.version = 11 : i64} {
  func.func @_conv3x3_stats_kernel(%arg0: i32, %arg1: memref<1x584x24xbf16, #tpu.memory_space<vmem>>, %arg2: memref<3x24x128xbf16, #tpu.memory_space<vmem>>, %arg3: memref<576x128xbf16, #tpu.memory_space<vmem>>, %arg4: memref<1x1x128xf32, #tpu.memory_space<vmem>>, %arg5: memref<1x1x128xf32, #tpu.memory_space<vmem>>) attributes {dimension_semantics = [#tpu.dimension_semantics<parallel>], iteration_bounds = array<i64: 1>, scalar_prefetch = 0 : i64, scratch_operands = 0 : i64, tpu.core_type = #tpu.core_type<tc>, window_params = [{transform_indices = @transform_0, window_bounds = array<i64: 1, 584, 24>}, {pipeline_mode = #tpu.pipeline_mode<synchronous>, transform_indices = @transform_1, window_bounds = array<i64: 3, 24, 128>}, {transform_indices = @transform_2, window_bounds = array<i64: 576, 128>}, {transform_indices = @transform_3, window_bounds = array<i64: 1, 1, 128>}, {transform_indices = @transform_4, window_bounds = array<i64: 1, 1, 128>}]} {
    %c0 = arith.constant 0 : index
    %c0_0 = arith.constant 0 : index
    %c0_1 = arith.constant 0 : index
    %0 = vector.load %arg1[%c0, %c0_0, %c0_1] : memref<1x584x24xbf16, #tpu.memory_space<vmem>>, vector<1x576x24xbf16>
    %1 = vector.shape_cast %0 : vector<1x576x24xbf16> to vector<576x24xbf16>
    %c0_2 = arith.constant 0 : index
    %c0_3 = arith.constant 0 : index
    %c0_4 = arith.constant 0 : index
    %2 = vector.load %arg2[%c0_2, %c0_3, %c0_4] : memref<3x24x128xbf16, #tpu.memory_space<vmem>>, vector<1x24x128xbf16>
    %3 = vector.shape_cast %2 : vector<1x24x128xbf16> to vector<24x128xbf16>
    %cst = arith.constant dense<0.000000e+00> : vector<576x128xf32>
    %4 = tpu.matmul %1, %3, %cst {dimension_numbers = #tpu.dot_dimension_numbers<[1], [0], [0], [1], [0, 0, 1, 1], [], []>} : vector<576x24xbf16>, vector<24x128xbf16>, vector<576x128xf32> -> vector<576x128xf32>
    %c0_5 = arith.constant 0 : index
    %c1 = arith.constant 1 : index
    %c0_6 = arith.constant 0 : index
    %5 = vector.load %arg1[%c0_5, %c1, %c0_6] : memref<1x584x24xbf16, #tpu.memory_space<vmem>>, vector<1x576x24xbf16>
    %6 = vector.shape_cast %5 : vector<1x576x24xbf16> to vector<576x24xbf16>
    %c1_7 = arith.constant 1 : index
    %c0_8 = arith.constant 0 : index
    %c0_9 = arith.constant 0 : index
    %7 = vector.load %arg2[%c1_7, %c0_8, %c0_9] : memref<3x24x128xbf16, #tpu.memory_space<vmem>>, vector<1x24x128xbf16>
    %8 = vector.shape_cast %7 : vector<1x24x128xbf16> to vector<24x128xbf16>
    %cst_10 = arith.constant dense<0.000000e+00> : vector<576x128xf32>
    %9 = tpu.matmul %6, %8, %cst_10 {dimension_numbers = #tpu.dot_dimension_numbers<[1], [0], [0], [1], [0, 0, 1, 1], [], []>} : vector<576x24xbf16>, vector<24x128xbf16>, vector<576x128xf32> -> vector<576x128xf32>
    %10 = arith.addf %4, %9 : vector<576x128xf32>
    %c0_11 = arith.constant 0 : index
    %c2 = arith.constant 2 : index
    %c0_12 = arith.constant 0 : index
    %11 = vector.load %arg1[%c0_11, %c2, %c0_12] : memref<1x584x24xbf16, #tpu.memory_space<vmem>>, vector<1x576x24xbf16>
    %12 = vector.shape_cast %11 : vector<1x576x24xbf16> to vector<576x24xbf16>
    %c2_13 = arith.constant 2 : index
    %c0_14 = arith.constant 0 : index
    %c0_15 = arith.constant 0 : index
    %13 = vector.load %arg2[%c2_13, %c0_14, %c0_15] : memref<3x24x128xbf16, #tpu.memory_space<vmem>>, vector<1x24x128xbf16>
    %14 = vector.shape_cast %13 : vector<1x24x128xbf16> to vector<24x128xbf16>
    %cst_16 = arith.constant dense<0.000000e+00> : vector<576x128xf32>
    %15 = tpu.matmul %12, %14, %cst_16 {dimension_numbers = #tpu.dot_dimension_numbers<[1], [0], [0], [1], [0, 0, 1, 1], [], []>} : vector<576x24xbf16>, vector<24x128xbf16>, vector<576x128xf32> -> vector<576x128xf32>
    %16 = arith.addf %10, %15 : vector<576x128xf32>
    %17 = arith.truncf %16 : vector<576x128xf32> to vector<576x128xbf16>
    %c0_17 = arith.constant 0 : index
    %c0_18 = arith.constant 0 : index
    %18 = vector.load %arg3[%c0_17, %c0_18] : memref<576x128xbf16, #tpu.memory_space<vmem>>, vector<576x128xbf16>
    tpu.vector_store %arg3[%c0_17, %c0_18], %17 {strides = array<i32>} : memref<576x128xbf16, #tpu.memory_space<vmem>>, vector<576x128xbf16>,
    %19 = tpu.iota {dimensions = array<i32: 0>} : vector<576x1xi32>
    %c576_i32 = arith.constant 576 : i32
    %20 = arith.muli %arg0, %c576_i32 : i32
    %21 = vector.broadcast %20 : i32 to vector<576x1xi32>
    %22 = arith.addi %19, %21 : vector<576x1xi32>
    %c18_i32 = arith.constant 18 : i32
    %c0_i32 = arith.constant 0 : i32
    %23 = arith.cmpi eq, %c18_i32, %c0_i32 : i32
    %c1_i32 = arith.constant 1 : i32
    %24 = arith.select %23, %c1_i32, %c18_i32 : i32
    %25 = vector.broadcast %24 : i32 to vector<576x1xi32>
    %26 = arith.remsi %22, %25 : vector<576x1xi32>
    %c0_i32_19 = arith.constant 0 : i32
    %27 = vector.broadcast %c0_i32_19 : i32 to vector<576x1xi32>
    %28 = arith.cmpi ne, %26, %27 : vector<576x1xi32>
    %c0_i32_20 = arith.constant 0 : i32
    %29 = vector.broadcast %c0_i32_20 : i32 to vector<576x1xi32>
    %30 = arith.cmpi slt, %26, %29 : vector<576x1xi32>
    %c0_i32_21 = arith.constant 0 : i32
    %31 = arith.cmpi slt, %24, %c0_i32_21 : i32
    %32 = vector.broadcast %31 : i1 to vector<576x1xi1>
    %33 = vector.broadcast %32 : vector<576x1xi1> to vector<576x1xi1>
    %34 = arith.xori %30, %33 : vector<576x1xi1>
    %35 = arith.andi %34, %28 : vector<576x1xi1>
    %36 = vector.broadcast %24 : i32 to vector<576x1xi32>
    %37 = arith.addi %26, %36 : vector<576x1xi32>
    %38 = arith.select %35, %37, %26 : vector<576x1xi1>, vector<576x1xi32>
    %c1_i32_22 = arith.constant 1 : i32
    %39 = vector.broadcast %c1_i32_22 : i32 to vector<576x1xi32>
    %40 = arith.cmpi sge, %38, %39 : vector<576x1xi32>
    %c16_i32 = arith.constant 16 : i32
    %41 = vector.broadcast %c16_i32 : i32 to vector<576x1xi32>
    %42 = arith.cmpi sle, %38, %41 : vector<576x1xi32>
    %43 = arith.andi %40, %42 : vector<576x1xi1>
    %c576_i32_23 = arith.constant 576 : i32
    %44 = vector.broadcast %c576_i32_23 : i32 to vector<576x1xi32>
    %45 = arith.cmpi slt, %22, %44 : vector<576x1xi32>
    %46 = arith.andi %43, %45 : vector<576x1xi1>
    %47 = arith.extui %46 : vector<576x1xi1> to vector<576x1xi32>
    %48 = arith.sitofp %47 : vector<576x1xi32> to vector<576x1xf32>
    %49 = vector.broadcast %48 : vector<576x1xf32> to vector<576x128xf32>
    %50 = arith.mulf %16, %49 : vector<576x128xf32>
    %cst_24 = arith.constant dense<0.000000e+00> : vector<128xf32>
    %51 = vector.multi_reduction <add>, %50, %cst_24 [0] : vector<576x128xf32> to vector<128xf32>
    %52 = vector.shape_cast %51 : vector<128xf32> to vector<1x128xf32>
    %53 = vector.shape_cast %52 : vector<1x128xf32> to vector<1x1x128xf32>
    %c0_25 = arith.constant 0 : index
    %c0_26 = arith.constant 0 : index
    %c0_27 = arith.constant 0 : index
    %54 = vector.load %arg4[%c0_25, %c0_26, %c0_27] : memref<1x1x128xf32, #tpu.memory_space<vmem>>, vector<1x1x128xf32>
    tpu.vector_store %arg4[%c0_25, %c0_26, %c0_27], %53 {strides = array<i32>} : memref<1x1x128xf32, #tpu.memory_space<vmem>>, vector<1x1x128xf32>,
    %55 = arith.mulf %50, %16 : vector<576x128xf32>
    %cst_28 = arith.constant dense<0.000000e+00> : vector<128xf32>
    %56 = vector.multi_reduction <add>, %55, %cst_28 [0] : vector<576x128xf32> to vector<128xf32>
    %57 = vector.shape_cast %56 : vector<128xf32> to vector<1x128xf32>
    %58 = vector.shape_cast %57 : vector<1x128xf32> to vector<1x1x128xf32>
    %c0_29 = arith.constant 0 : index
    %c0_30 = arith.constant 0 : index
    %c0_31 = arith.constant 0 : index
    %59 = vector.load %arg5[%c0_29, %c0_30, %c0_31] : memref<1x1x128xf32, #tpu.memory_space<vmem>>, vector<1x1x128xf32>
    tpu.vector_store %arg5[%c0_29, %c0_30, %c0_31], %58 {strides = array<i32>} : memref<1x1x128xf32, #tpu.memory_space<vmem>>, vector<1x1x128xf32>,
    return
  }
  func.func @transform_0(%arg0: i32) -> (i32, i32, i32) {
    %c0_i32 = arith.constant 0 : i32
    %c0_i32_0 = arith.constant 0 : i32
    %c0_i32_1 = arith.constant 0 : i32
    return %arg0, %c0_i32, %c0_i32_0 : i32, i32, i32
  }
  func.func @transform_1(%arg0: i32) -> (i32, i32, i32) {
    %c0_i32 = arith.constant 0 : i32
    %c0_i32_0 = arith.constant 0 : i32
    %c0_i32_1 = arith.constant 0 : i32
    %c0_i32_2 = arith.constant 0 : i32
    return %c0_i32, %c0_i32_0, %c0_i32_1 : i32, i32, i32
  }
  func.func @transform_2(%arg0: i32) -> (i32, i32) {
    %c0_i32 = arith.constant 0 : i32
    %c0_i32_0 = arith.constant 0 : i32
    return %arg0, %c0_i32 : i32, i32
  }
  func.func @transform_3(%arg0: i32) -> (i32, i32, i32) {
    %c0_i32 = arith.constant 0 : i32
    %c0_i32_0 = arith.constant 0 : i32
    %c0_i32_1 = arith.constant 0 : i32
    return %arg0, %c0_i32, %c0_i32_0 : i32, i32, i32
  }
  func.func @transform_4(%arg0: i32) -> (i32, i32, i32) {
    %c0_i32 = arith.constant 0 : i32
    %c0_i32_0 = arith.constant 0 : i32
    %c0_i32_1 = arith.constant 0 : i32
    return %arg0, %c0_i32, %c0_i32_0 : i32, i32, i32
  }
}

module attributes {stable_mosaic.version = 11 : i64} {
  func.func @_conv3x3_stats_kernel(%arg0: i32, %arg1: memref<1x584x12xbf16, #tpu.memory_space<vmem>>, %arg2: memref<3x12x128xbf16, #tpu.memory_space<vmem>>, %arg3: memref<576x128xbf16, #tpu.memory_space<vmem>>, %arg4: memref<1x1x128xf32, #tpu.memory_space<vmem>>, %arg5: memref<1x1x128xf32, #tpu.memory_space<vmem>>) attributes {dimension_semantics = [#tpu.dimension_semantics<parallel>], iteration_bounds = array<i64: 1>, scalar_prefetch = 0 : i64, scratch_operands = 0 : i64, tpu.core_type = #tpu.core_type<tc>, window_params = [{transform_indices = @transform_0, window_bounds = array<i64: 1, 584, 12>}, {pipeline_mode = #tpu.pipeline_mode<synchronous>, transform_indices = @transform_1, window_bounds = array<i64: 3, 12, 128>}, {transform_indices = @transform_2, window_bounds = array<i64: 576, 128>}, {transform_indices = @transform_3, window_bounds = array<i64: 1, 1, 128>}, {transform_indices = @transform_4, window_bounds = array<i64: 1, 1, 128>}]} {
    %c0 = arith.constant 0 : index
    %c0_0 = arith.constant 0 : index
    %c0_1 = arith.constant 0 : index
    %0 = vector.load %arg1[%c0, %c0_0, %c0_1] : memref<1x584x12xbf16, #tpu.memory_space<vmem>>, vector<1x576x12xbf16>
    %1 = vector.shape_cast %0 : vector<1x576x12xbf16> to vector<576x12xbf16>
    %c0_2 = arith.constant 0 : index
    %c0_3 = arith.constant 0 : index
    %c0_4 = arith.constant 0 : index
    %2 = vector.load %arg2[%c0_2, %c0_3, %c0_4] : memref<3x12x128xbf16, #tpu.memory_space<vmem>>, vector<1x12x128xbf16>
    %3 = vector.shape_cast %2 : vector<1x12x128xbf16> to vector<12x128xbf16>
    %cst = arith.constant dense<0.000000e+00> : vector<576x128xf32>
    %4 = tpu.matmul %1, %3, %cst {dimension_numbers = #tpu.dot_dimension_numbers<[1], [0], [0], [1], [0, 0, 1, 1], [], []>} : vector<576x12xbf16>, vector<12x128xbf16>, vector<576x128xf32> -> vector<576x128xf32>
    %c0_5 = arith.constant 0 : index
    %c1 = arith.constant 1 : index
    %c0_6 = arith.constant 0 : index
    %5 = vector.load %arg1[%c0_5, %c1, %c0_6] : memref<1x584x12xbf16, #tpu.memory_space<vmem>>, vector<1x576x12xbf16>
    %6 = vector.shape_cast %5 : vector<1x576x12xbf16> to vector<576x12xbf16>
    %c1_7 = arith.constant 1 : index
    %c0_8 = arith.constant 0 : index
    %c0_9 = arith.constant 0 : index
    %7 = vector.load %arg2[%c1_7, %c0_8, %c0_9] : memref<3x12x128xbf16, #tpu.memory_space<vmem>>, vector<1x12x128xbf16>
    %8 = vector.shape_cast %7 : vector<1x12x128xbf16> to vector<12x128xbf16>
    %cst_10 = arith.constant dense<0.000000e+00> : vector<576x128xf32>
    %9 = tpu.matmul %6, %8, %cst_10 {dimension_numbers = #tpu.dot_dimension_numbers<[1], [0], [0], [1], [0, 0, 1, 1], [], []>} : vector<576x12xbf16>, vector<12x128xbf16>, vector<576x128xf32> -> vector<576x128xf32>
    %10 = arith.addf %4, %9 : vector<576x128xf32>
    %c0_11 = arith.constant 0 : index
    %c2 = arith.constant 2 : index
    %c0_12 = arith.constant 0 : index
    %11 = vector.load %arg1[%c0_11, %c2, %c0_12] : memref<1x584x12xbf16, #tpu.memory_space<vmem>>, vector<1x576x12xbf16>
    %12 = vector.shape_cast %11 : vector<1x576x12xbf16> to vector<576x12xbf16>
    %c2_13 = arith.constant 2 : index
    %c0_14 = arith.constant 0 : index
    %c0_15 = arith.constant 0 : index
    %13 = vector.load %arg2[%c2_13, %c0_14, %c0_15] : memref<3x12x128xbf16, #tpu.memory_space<vmem>>, vector<1x12x128xbf16>
    %14 = vector.shape_cast %13 : vector<1x12x128xbf16> to vector<12x128xbf16>
    %cst_16 = arith.constant dense<0.000000e+00> : vector<576x128xf32>
    %15 = tpu.matmul %12, %14, %cst_16 {dimension_numbers = #tpu.dot_dimension_numbers<[1], [0], [0], [1], [0, 0, 1, 1], [], []>} : vector<576x12xbf16>, vector<12x128xbf16>, vector<576x128xf32> -> vector<576x128xf32>
    %16 = arith.addf %10, %15 : vector<576x128xf32>
    %17 = arith.truncf %16 : vector<576x128xf32> to vector<576x128xbf16>
    %c0_17 = arith.constant 0 : index
    %c0_18 = arith.constant 0 : index
    %18 = vector.load %arg3[%c0_17, %c0_18] : memref<576x128xbf16, #tpu.memory_space<vmem>>, vector<576x128xbf16>
    tpu.vector_store %arg3[%c0_17, %c0_18], %17 {strides = array<i32>} : memref<576x128xbf16, #tpu.memory_space<vmem>>, vector<576x128xbf16>,
    %19 = tpu.iota {dimensions = array<i32: 0>} : vector<576x1xi32>
    %c576_i32 = arith.constant 576 : i32
    %20 = arith.muli %arg0, %c576_i32 : i32
    %21 = vector.broadcast %20 : i32 to vector<576x1xi32>
    %22 = arith.addi %19, %21 : vector<576x1xi32>
    %c18_i32 = arith.constant 18 : i32
    %c0_i32 = arith.constant 0 : i32
    %23 = arith.cmpi eq, %c18_i32, %c0_i32 : i32
    %c1_i32 = arith.constant 1 : i32
    %24 = arith.select %23, %c1_i32, %c18_i32 : i32
    %25 = vector.broadcast %24 : i32 to vector<576x1xi32>
    %26 = arith.remsi %22, %25 : vector<576x1xi32>
    %c0_i32_19 = arith.constant 0 : i32
    %27 = vector.broadcast %c0_i32_19 : i32 to vector<576x1xi32>
    %28 = arith.cmpi ne, %26, %27 : vector<576x1xi32>
    %c0_i32_20 = arith.constant 0 : i32
    %29 = vector.broadcast %c0_i32_20 : i32 to vector<576x1xi32>
    %30 = arith.cmpi slt, %26, %29 : vector<576x1xi32>
    %c0_i32_21 = arith.constant 0 : i32
    %31 = arith.cmpi slt, %24, %c0_i32_21 : i32
    %32 = vector.broadcast %31 : i1 to vector<576x1xi1>
    %33 = vector.broadcast %32 : vector<576x1xi1> to vector<576x1xi1>
    %34 = arith.xori %30, %33 : vector<576x1xi1>
    %35 = arith.andi %34, %28 : vector<576x1xi1>
    %36 = vector.broadcast %24 : i32 to vector<576x1xi32>
    %37 = arith.addi %26, %36 : vector<576x1xi32>
    %38 = arith.select %35, %37, %26 : vector<576x1xi1>, vector<576x1xi32>
    %c1_i32_22 = arith.constant 1 : i32
    %39 = vector.broadcast %c1_i32_22 : i32 to vector<576x1xi32>
    %40 = arith.cmpi sge, %38, %39 : vector<576x1xi32>
    %c16_i32 = arith.constant 16 : i32
    %41 = vector.broadcast %c16_i32 : i32 to vector<576x1xi32>
    %42 = arith.cmpi sle, %38, %41 : vector<576x1xi32>
    %43 = arith.andi %40, %42 : vector<576x1xi1>
    %c576_i32_23 = arith.constant 576 : i32
    %44 = vector.broadcast %c576_i32_23 : i32 to vector<576x1xi32>
    %45 = arith.cmpi slt, %22, %44 : vector<576x1xi32>
    %46 = arith.andi %43, %45 : vector<576x1xi1>
    %47 = arith.extui %46 : vector<576x1xi1> to vector<576x1xi32>
    %48 = arith.sitofp %47 : vector<576x1xi32> to vector<576x1xf32>
    %49 = vector.broadcast %48 : vector<576x1xf32> to vector<576x128xf32>
    %50 = arith.mulf %16, %49 : vector<576x128xf32>
    %cst_24 = arith.constant dense<0.000000e+00> : vector<128xf32>
    %51 = vector.multi_reduction <add>, %50, %cst_24 [0] : vector<576x128xf32> to vector<128xf32>
    %52 = vector.shape_cast %51 : vector<128xf32> to vector<1x128xf32>
    %53 = vector.shape_cast %52 : vector<1x128xf32> to vector<1x1x128xf32>
    %c0_25 = arith.constant 0 : index
    %c0_26 = arith.constant 0 : index
    %c0_27 = arith.constant 0 : index
    %54 = vector.load %arg4[%c0_25, %c0_26, %c0_27] : memref<1x1x128xf32, #tpu.memory_space<vmem>>, vector<1x1x128xf32>
    tpu.vector_store %arg4[%c0_25, %c0_26, %c0_27], %53 {strides = array<i32>} : memref<1x1x128xf32, #tpu.memory_space<vmem>>, vector<1x1x128xf32>,
    %55 = arith.mulf %50, %16 : vector<576x128xf32>
    %cst_28 = arith.constant dense<0.000000e+00> : vector<128xf32>
    %56 = vector.multi_reduction <add>, %55, %cst_28 [0] : vector<576x128xf32> to vector<128xf32>
    %57 = vector.shape_cast %56 : vector<128xf32> to vector<1x128xf32>
    %58 = vector.shape_cast %57 : vector<1x128xf32> to vector<1x1x128xf32>
    %c0_29 = arith.constant 0 : index
    %c0_30 = arith.constant 0 : index
    %c0_31 = arith.constant 0 : index
    %59 = vector.load %arg5[%c0_29, %c0_30, %c0_31] : memref<1x1x128xf32, #tpu.memory_space<vmem>>, vector<1x1x128xf32>
    tpu.vector_store %arg5[%c0_29, %c0_30, %c0_31], %58 {strides = array<i32>} : memref<1x1x128xf32, #tpu.memory_space<vmem>>, vector<1x1x128xf32>,
    return
  }
  func.func @transform_0(%arg0: i32) -> (i32, i32, i32) {
    %c0_i32 = arith.constant 0 : i32
    %c0_i32_0 = arith.constant 0 : i32
    %c0_i32_1 = arith.constant 0 : i32
    return %arg0, %c0_i32, %c0_i32_0 : i32, i32, i32
  }
  func.func @transform_1(%arg0: i32) -> (i32, i32, i32) {
    %c0_i32 = arith.constant 0 : i32
    %c0_i32_0 = arith.constant 0 : i32
    %c0_i32_1 = arith.constant 0 : i32
    %c0_i32_2 = arith.constant 0 : i32
    return %c0_i32, %c0_i32_0, %c0_i32_1 : i32, i32, i32
  }
  func.func @transform_2(%arg0: i32) -> (i32, i32) {
    %c0_i32 = arith.constant 0 : i32
    %c0_i32_0 = arith.constant 0 : i32
    return %arg0, %c0_i32 : i32, i32
  }
  func.func @transform_3(%arg0: i32) -> (i32, i32, i32) {
    %c0_i32 = arith.constant 0 : i32
    %c0_i32_0 = arith.constant 0 : i32
    %c0_i32_1 = arith.constant 0 : i32
    return %arg0, %c0_i32, %c0_i32_0 : i32, i32, i32
  }
  func.func @transform_4(%arg0: i32) -> (i32, i32, i32) {
    %c0_i32 = arith.constant 0 : i32
    %c0_i32_0 = arith.constant 0 : i32
    %c0_i32_1 = arith.constant 0 : i32
    return %arg0, %c0_i32, %c0_i32_0 : i32, i32, i32
  }
}

module attributes {stable_mosaic.version = 11 : i64} {
  func.func @_bn_relu_kernel(%arg0: i32, %arg1: memref<576x128xbf16, #tpu.memory_space<vmem>>, %arg2: memref<1x128xf32, #tpu.memory_space<vmem>>, %arg3: memref<1x128xf32, #tpu.memory_space<vmem>>, %arg4: memref<576x128xf32, #tpu.memory_space<vmem>>) attributes {dimension_semantics = [#tpu.dimension_semantics<parallel>], iteration_bounds = array<i64: 1>, scalar_prefetch = 0 : i64, scratch_operands = 0 : i64, tpu.core_type = #tpu.core_type<tc>, window_params = [{transform_indices = @transform_0, window_bounds = array<i64: 576, 128>}, {pipeline_mode = #tpu.pipeline_mode<synchronous>, transform_indices = @transform_1, window_bounds = array<i64: 1, 128>}, {pipeline_mode = #tpu.pipeline_mode<synchronous>, transform_indices = @transform_2, window_bounds = array<i64: 1, 128>}, {transform_indices = @transform_3, window_bounds = array<i64: 576, 128>}]} {
    %c0 = arith.constant 0 : index
    %c0_0 = arith.constant 0 : index
    %0 = vector.load %arg1[%c0, %c0_0] : memref<576x128xbf16, #tpu.memory_space<vmem>>, vector<576x128xbf16>
    %1 = arith.extf %0 : vector<576x128xbf16> to vector<576x128xf32>
    %c0_1 = arith.constant 0 : index
    %c0_2 = arith.constant 0 : index
    %2 = vector.load %arg2[%c0_1, %c0_2] : memref<1x128xf32, #tpu.memory_space<vmem>>, vector<1x128xf32>
    %3 = vector.broadcast %2 : vector<1x128xf32> to vector<576x128xf32>
    %4 = arith.mulf %1, %3 : vector<576x128xf32>
    %c0_3 = arith.constant 0 : index
    %c0_4 = arith.constant 0 : index
    %5 = vector.load %arg3[%c0_3, %c0_4] : memref<1x128xf32, #tpu.memory_space<vmem>>, vector<1x128xf32>
    %6 = vector.broadcast %5 : vector<1x128xf32> to vector<576x128xf32>
    %7 = arith.addf %4, %6 : vector<576x128xf32>
    %cst = arith.constant 0.000000e+00 : f32
    %8 = vector.broadcast %cst : f32 to vector<576x128xf32>
    %9 = arith.maximumf %7, %8 : vector<576x128xf32>
    %c0_5 = arith.constant 0 : index
    %c0_6 = arith.constant 0 : index
    %10 = vector.load %arg4[%c0_5, %c0_6] : memref<576x128xf32, #tpu.memory_space<vmem>>, vector<576x128xf32>
    tpu.vector_store %arg4[%c0_5, %c0_6], %9 {strides = array<i32>} : memref<576x128xf32, #tpu.memory_space<vmem>>, vector<576x128xf32>,
    return
  }
  func.func @transform_0(%arg0: i32) -> (i32, i32) {
    %c0_i32 = arith.constant 0 : i32
    %c0_i32_0 = arith.constant 0 : i32
    return %arg0, %c0_i32 : i32, i32
  }
  func.func @transform_1(%arg0: i32) -> (i32, i32) {
    %c0_i32 = arith.constant 0 : i32
    %c0_i32_0 = arith.constant 0 : i32
    %c0_i32_1 = arith.constant 0 : i32
    return %c0_i32, %c0_i32_0 : i32, i32
  }
  func.func @transform_2(%arg0: i32) -> (i32, i32) {
    %c0_i32 = arith.constant 0 : i32
    %c0_i32_0 = arith.constant 0 : i32
    %c0_i32_1 = arith.constant 0 : i32
    return %c0_i32, %c0_i32_0 : i32, i32
  }
  func.func @transform_3(%arg0: i32) -> (i32, i32) {
    %c0_i32 = arith.constant 0 : i32
    %c0_i32_0 = arith.constant 0 : i32
    return %arg0, %c0_i32 : i32, i32
  }
}

</mosaic_0001>

<bundles_post_ra>
// kernel: up_forward.3
= control target key start
LH: loop header
LB: loop body
LE: loop exit
PB: predicated region body
PF: predicated region fallthrough
CT: control target
= control target key end

     0   :  { %vm689_vm0 = vcmask 1043456   ;;  %vm278_vm1 = vsmask.f32 7424  ;;  %vm1163_vm2 = vcmask 1046528   ;;  %vm580_vm3 = vcmask 195584   ;;  %s8684_s1 = inlined_call_operand.vmem [shape: bf16[3,24,128], index: 1, kind: input, shape index: {}]   ;;  %s8685_s0 = inlined_call_operand.vmem [shape: bf16[1,584,24], index: 0, kind: input, shape index: {}]   ;;  %s8686_s2 = inlined_call_operand.vmem [shape: bf16[576,128], index: 2, kind: output, shape index: {0}]   ;;  %s8687_s3 = inlined_call_operand.vmem [shape: f32[1,1,128], index: 3, kind: output, shape index: {1}]   ;;  %s8688_s4 = inlined_call_operand.vmem [shape: f32[1,1,128], index: 4, kind: output, shape index: {2}]  }
   0x1   :  { %v5175_v0 = vld [vmem:[%s8684_s1 + $0x14] sm:$0xf]  ;;  %v89_v1 = vld [vmem:[%s8684_s1 + $0x8] sm:$0xf]  ;;  %v5398_v2 = vld [vmem:[%s8684_s1 + $0x20] sm:$0xf] }
   0x2   :  { %v576_v3 = vunpack.c.l.b16 %v5175_v0  ;;  %v887_v4 = vunpack.c.l.b16 %v89_v1  ;;  %v1242_v5 = vunpack.c.l.b16 %v5398_v2  ;;  %v5550_v6 = vld [vmem:[%s8685_s0] sm:$0xff]   ;;  %v5838_v7 = vld [vmem:[%s8685_s0 + $0x8] sm:$0xff]  ;;  %v5843_v8 = vld [vmem:[%s8685_s0 + $0xd8] sm:$0xff] }
   0x3   :  { %v280_v12 = vshrl.u32 %v5550_v6, 16  ;;  %v5538_v13 = vld [vmem:[%s8685_s0 + $0xe0] sm:$0xff]  ;;  %v282_v16 = vshll.u32 %v5550_v6, 16  ;;  %v287_v17 = vshll.u32 %v5838_v7, 16  ;;  %v495_v18 = vshll.u32 %v5843_v8, 16  ;;  %v5547_v24 = vld [vmem:[%s8684_s1 + $0xc] sm:$0xff] }
   0x4   :  { %v578_v9 = vpack.c.b16 %v576_v3, %v576_v3  ;;  %v889_v10 = vpack.c.b16 %v887_v4, %v887_v4  ;;  %v1244_v11 = vpack.c.b16 %v1242_v5, %v1242_v5  ;;  %v5733_v14 = vld [vmem:[%s8685_s0] sm:$0xf0]  ;;  %v5734_v15 = vld [vmem:[%s8685_s0] sm:$0xe]  ;;  %v499_v19 = vshrl.u32 %v5843_v8, 16  ;;  %v5548_v30 = vld [vmem:[%s8684_s1 + $0x18] sm:$0xff] }
   0x5   :  { %v503_v23 = vshll.u32 %v5538_v13, 16  ;;  %v284_v25 = vrot.slane %v282_v16, 1  ;;  %v289_v26 = vrot.slane %v287_v17, 1  ;;  %v5863_v27 = vrot.slane %v495_v18, 1  ;;  %v5546_v29 = vld [vmem:[%s8684_s1] sm:$0xff]  ;;  %v5512_v39 = vld [vmem:[%s8685_s0 + $0x10] sm:$0xff] }
   0x6   :  { %v691_v20 = vsel %vm689_vm0, %v578_v9, 0  ;;  %v964_v21 = vsel %vm689_vm0, %v889_v10, 0  ;;  %v1355_v22 = vsel %vm689_vm0, %v1244_v11, 0  ;;  %v5735_v28 = vor.u32 %v5734_v15, %v5733_v14  ;;  %v5539_v40 = vld [vmem:[%s8685_s0 + $0xe8] sm:$0xff]  ;;  %v5513_v53 = vld [vmem:[%s8685_s0 + $0x18] sm:$0xff]  ;;  %v5540_v54 = vld [vmem:[%s8685_s0 + $0xf0] sm:$0xff] }
   0x7   :  { %699 = vmatpush.bf16.msra.mxu0 %v691_v20  ;;  %5771 = vmatpush.bf16.msra.mxu3 %v691_v20  ;;  %v505_v31 = vrot.slane %v503_v23, 1  ;;  %v1165_v32 = vrot.slane %v5838_v7, 1  ;;  %v285_v33 = vor.u32 %v284_v25, %v280_v12  ;;  %v501_v34 = vor.u32 %v499_v19, %v5863_v27  ;;  %v5514_v3 = vld [vmem:[%s8685_s0 + $0x20] sm:$0xff]  ;;  %v5541_v4 = vld [vmem:[%s8685_s0 + $0xf8] sm:$0xff]  ;;  %v5515_v18 = vld [vmem:[%s8685_s0 + $0x28] sm:$0xff] }
   0x8   :  { %972 = vmatpush.bf16.msra.mxu1 %v964_v21  ;;  %1363 = vmatpush.bf16.msra.mxu2 %v1355_v22  ;;  %v1164_v35 = vrot.slane %v5735_v28, 1  ;;  %v291_v41 = vshrl.u32 %v5838_v7, 16  ;;  %v295_v42 = vshll.u32 %v5512_v39, 16  ;;  %v507_v43 = vshrl.u32 %v5538_v13, 16  ;;  %v5542_v19 = vld [vmem:[%s8685_s0 + $0x100] sm:$0xff] }
   0x9   :  { %v290_v36 = vsel %vm278_vm1, %v285_v33, %v289_v26  ;;  %v506_v37 = vsel %vm278_vm1, %v501_v34, %v505_v31  ;;  %v511_v44 = vshll.u32 %v5539_v40, 16  ;;  %v1167_v49 = vrot.slane %v5512_v39, 1  ;;  %v5937_v33 = vld [vmem:[%s8685_s0 + $0x30] sm:$0xff]  ;;  %v5543_v34 = vld [vmem:[%s8685_s0 + $0x108] sm:$0xff] }
   0xa   :  { %v1166_v38 = vsel %vm1163_vm2, %v1164_v35, %v1165_v32  ;;  %v293_v45 = vor.u32 %v291_v41, %v289_v26  ;;  %v297_v46 = vrot.slane %v295_v42, 1  ;;  %v509_v47 = vor.u32 %v507_v43, %v505_v31 }
   0xb   :  { %700 = vmatpush.bf16.msra.mxu0 %v5547_v24  ;;  %5772 = vmatpush.bf16.msra.mxu3 %v5547_v24  ;;  %v513_v48 = vrot.slane %v511_v44, 1  ;;  %v1168_v52 = vsel %vm1163_vm2, %v1165_v32, %v1167_v49  ;;  %v299_v55 = vshrl.u32 %v5512_v39, 16  ;;  %v303_v56 = vshll.u32 %v5513_v53, 16 }
   0xc   :  { %973 = vmatpush.bf16.msra.mxu1 %v5546_v29  ;;  %1364 = vmatpush.bf16.msra.mxu2 %v5548_v30  ;;  %v298_v50 = vsel %vm278_vm1, %v293_v45, %v297_v46  ;;  %v515_v57 = vshrl.u32 %v5539_v40, 16  ;;  %v519_v58 = vshll.u32 %v5540_v54, 16  ;;  %v1169_v63 = vrot.slane %v5513_v53, 1 }
   0xd   :  { %v514_v51 = vsel %vm278_vm1, %v509_v47, %v513_v48  ;;  %v301_v59 = vor.u32 %v299_v55, %v297_v46  ;;  %v305_v60 = vrot.slane %v303_v56, 1  ;;  %v307_v5 = vshrl.u32 %v5513_v53, 16 }
   0xe   :  { %5320 = vmatmul.msk.bf16.vlgmr.msra.gmra.mxu0 %vm580_vm3, %v290_v36  ;;  %5347 = vmatmul.msk.bf16.vlgmr.msra.gmra.mxu3 %vm580_vm3, %v506_v37  ;;  %v517_v61 = vor.u32 %v515_v57, %v513_v48  ;;  %v521_v62 = vrot.slane %v519_v58, 1  ;;  %v1170_v2 = vsel %vm1163_vm2, %v1167_v49, %v1169_v63  ;;  %v527_v9 = vshll.u32 %v5541_v4, 16 }
   0xf   :  { %5773 = vmatpush.bf16.msrb.mxu3 %v964_v21  ;;  %5360 = vmatmul.msk.bf16.vlgmr.msra.gmra.mxu1 %vm580_vm3, %v5550_v6  ;;  %v306_v0 = vsel %vm278_vm1, %v301_v59, %v305_v60  ;;  %v311_v6 = vshll.u32 %v5514_v3, 16  ;;  %v309_v10 = vor.u32 %v307_v5, %v305_v60  ;;  %v1171_v14 = vrot.slane %v5514_v3, 1  ;;  %v5966_v59 = vld [vmem:[%s8685_s0 + $0x40] sm:$0xff] }
  0x10   :  { %5403 = vmatmul.msk.bf16.vlgmr.msra.gmra.mxu2 %vm580_vm3, %v1166_v38  ;;  %v522_v1 = vsel %vm278_vm1, %v517_v61, %v521_v62  ;;  %v529_v13 = vrot.slane %v527_v9, 1  ;;  %v315_v20 = vshrl.u32 %v5514_v3, 16  ;;  %v319_v21 = vshll.u32 %v5515_v18, 16 }
  0x11   :  { %v313_v11 = vrot.slane %v311_v6, 1  ;;  %v1172_v17 = vsel %vm1163_vm2, %v1169_v63, %v1171_v14  ;;  %v535_v23 = vshll.u32 %v5542_v19, 16  ;;  %v323_v35 = vshrl.u32 %v5515_v18, 16 }
  0x12   :  { %v321_v25 = vrot.slane %v319_v21, 1  ;;  %v327_v36 = vshll.u32 %v5937_v33, 16  ;;  %v539_v37 = vshrl.u32 %v5542_v19, 16  ;;  %v543_v38 = vshll.u32 %v5543_v34, 16 }
  0x13   :  { %5774 = vmatpush.bf16.msrb.mxu3 %v5546_v29  ;;  %v314_v15 = vsel %vm278_vm1, %v309_v10, %v313_v11  ;;  %v317_v24 = vor.u32 %v315_v20, %v313_v11  ;;  %v537_v28 = vrot.slane %v535_v23, 1  ;;  %v1173_v29 = vrot.slane %v5515_v18, 1 }
  0x14   :  { %v1762_v40 = vlaneseq  ;;  %v325_v41 = vor.u32 %v323_v35, %v321_v25  ;;  %v329_v42 = vrot.slane %v327_v36, 1  ;;  %v545_v44 = vrot.slane %v543_v38, 1 }
  0x15   :  { %v1174_v32 = vsel %vm1163_vm2, %v1171_v14, %v1173_v29  ;;  %v541_v43 = vor.u32 %v539_v37, %v537_v28  ;;  %v1175_v46 = vrot.slane %v5937_v33, 1  ;;  %v331_v47 = vshrl.u32 %v5937_v33, 16 }
  0x16   :  { %v5948_v45 = vshrl.u32 %v1762_v40, 7  ;;  %v547_v58 = vshrl.u32 %v5543_v34, 16  ;;  %v343_v11 = vshll.u32 %v5966_v59, 16  ;;  %v5995_v40 = vld [vmem:[%s8685_s0 + $0x48] sm:$0xff] }
  0x17   :  { %5775 = vmatpush.bf16.msra.mxu3 %v1355_v22  ;;  %v531_v22 = vshrl.u32 %v5541_v4, 16  ;;  %v1176_v55 = vsel %vm1163_vm2, %v1173_v29, %v1175_v46  ;;  %v333_v56 = vor.u32 %v331_v47, %v329_v42  ;;  %v8696_v4 = vmov 0  }
  0x18   :  { %v1912_v49 = vand.u32 65535, %v5948_v45  ;;  %v549_v10 = vor.u32 %v547_v58, %v545_v44  ;;  %v5990_v38 = vadd.s32 16, %v5948_v45 }
  0x19   :  { %v533_v26 = vor.u32 %v531_v22, %v529_v13 }
  0x1a   :  { %v1915_v60 = vmul.u32 14564, %v1912_v49 }
  0x1b   :  { %5776 = vmatpush.bf16.msra.mxu3 %v5548_v30  ;;  %v322_v30 = vsel %vm278_vm1, %v317_v24, %v321_v25  ;;  %v538_v31 = vsel %vm278_vm1, %v533_v26, %v537_v28  ;;  %v345_v24 = vrot.slane %v343_v11, 1  ;;  %v90_v25 = vld [vmem:[%s8685_s0 + $0x120] sm:$0x1] }
  0x1e   :  { %5321 = vmatmul.msk.bf16.gmra.mxu0 %vm580_vm3, %v298_v50  ;;  %5348 = vmatmul.msk.bf16.gmra.mxu3 %vm580_vm3, %v514_v51  ;;  %v5544_v50 = vld [vmem:[%s8685_s0 + $0x110] sm:$0xff]  ;;  %v330_v51 = vsel %vm278_vm1, %v325_v41, %v329_v42 }
  0x1f   :  { %5361 = vmatmul.msk.bf16.gmra.mxu1 %vm580_vm3, %v5838_v7  ;;  %v523_v7 = vshrl.u32 %v5540_v54, 16  ;;  %v1916_v54 = vmul.u32 58254, %v1912_v49  ;;  %v551_v63 = vshll.u32 %v5544_v50, 16  ;;  %v555_v14 = vshrl.u32 %v5544_v50, 16 }
  0x20   :  { %5404 = vmatmul.msk.bf16.gmra.mxu2 %vm580_vm3, %v1168_v52  ;;  %v546_v52 = vsel %vm278_vm1, %v541_v43, %v545_v44  ;;  %v347_v50 = vshrl.u32 %v5966_v59, 16 }
  0x21   :  { %v525_v12 = vor.u32 %v523_v7, %v521_v62  ;;  %v1919_v62 = vshll.u32 %v1916_v54, 16  ;;  %v5978_v7 = vadd.s32 8, %v5948_v45 }
  0x22   :  { %v349_v58 = vor.u32 %v347_v50, %v345_v24  ;;  %v8690_v50 = vmov 0.0  }
  0x23   :  { %v530_v16 = vsel %vm278_vm1, %v525_v12, %v529_v13  ;;  %vm1923_vm4 = vc.u32 %v1915_v60, %v1919_v62  ;;  %v1925_v6 = vadd.s32 %v1919_v62, %v1915_v60  ;;  %v553_v13 = vrot.slane %v551_v63, 1 }
  0x24   :  { %v1924_v5 = vsel %vm1923_vm4, 1, %v8696_v4  ;;  %v1942_v19 = vshrl.u32 %v5978_v7, 16 }
  0x25   :  { %v554_v44 = vsel %vm278_vm1, %v549_v10, %v553_v13 }
  0x26   :  { %v1946_v29 = vmul.u32 14564, %v1942_v19  ;;  %v1947_v36 = vmul.u32 58254, %v1942_v19 }
  0x28   :  { %v1950_v37 = vshll.u32 %v1946_v29, 16 }
  0x2e   :  { %5322 = vmatmul.msk.bf16.gmra.mxu0 %vm580_vm3, %v306_v0  ;;  %5349 = vmatmul.msk.bf16.gmra.mxu3 %vm580_vm3, %v522_v1  ;;  %v5545_v0 = vld [vmem:[%s8685_s0 + $0x118] sm:$0xff] }
  0x2f   :  { %5362 = vmatmul.msk.bf16.gmra.mxu1 %vm580_vm3, %v5512_v39  ;;  %v5946_v39 = vld [vmem:[%s8685_s0 + $0x38] sm:$0xff] }
  0x30   :  { %5405 = vmatmul.msk.bf16.gmra.mxu2 %vm580_vm3, %v1170_v2  ;;  %v335_v48 = vshll.u32 %v5946_v39, 16  ;;  %v1177_v20 = vrot.slane %v5946_v39, 1 }
  0x32   :  { %v337_v57 = vrot.slane %v335_v48, 1  ;;  %v1178_v47 = vsel %vm1163_vm2, %v1175_v46, %v1177_v20  ;;  %v1179_v46 = vrot.slane %v5966_v59, 1 }
  0x34   :  { %v338_v9 = vsel %vm278_vm1, %v333_v56, %v337_v57  ;;  %v1970_v56 = vand.u32 65535, %v5990_v38 }
  0x36   :  { %v1973_v11 = vmul.u32 14564, %v1970_v56 }
  0x3e   :  { %5323 = vmatmul.msk.bf16.gmra.mxu0 %vm580_vm3, %v314_v15  ;;  %5350 = vmatmul.msk.bf16.gmra.mxu3 %vm580_vm3, %v530_v16  ;;  %v1941_v15 = vand.u32 65535, %v5978_v7  ;;  %v559_v16 = vshll.u32 %v5545_v0, 16 }
  0x3f   :  { %5363 = vmatmul.msk.bf16.gmra.mxu1 %vm580_vm3, %v5513_v53  ;;  %v1913_v53 = vshrl.u32 %v5948_v45, 16 }
  0x40   :  { %5406 = vmatmul.msk.bf16.gmra.mxu2 %vm580_vm3, %v1172_v17  ;;  %v1920_v17 = vshrl.u32 %v1916_v54, 16  ;;  %v1945_v23 = vmul.u32 58254, %v1941_v15  ;;  %v1944_v28 = vmul.u32 14564, %v1941_v15  ;;  %v561_v35 = vrot.slane %v559_v16, 1 }
  0x41   :  { %v1917_v61 = vmul.u32 14564, %v1913_v53  ;;  %v1918_v1 = vmul.u32 58254, %v1913_v53  ;;  %v6029_v15 = vadd.s32 24, %v5948_v45 }
  0x42   :  { %v1948_v34 = vshll.u32 %v1945_v23, 16  ;;  %v1949_v60 = vshrl.u32 %v1945_v23, 16 }
  0x43   :  { %v1921_v2 = vshll.u32 %v1917_v61, 16  ;;  %v1926_v12 = vadd.s32 %v1924_v5, %v1918_v1  ;;  %v1922_v26 = vshrl.u32 %v1917_v61, 16  ;;  %v1971_v5 = vshrl.u32 %v5990_v38, 16 }
  0x44   :  { %vm1952_vm6 = vc.u32 %v1944_v28, %v1948_v34  ;;  %v1954_v43 = vadd.s32 %v1948_v34, %v1944_v28 }
  0x45   :  { %vm1927_vm5 = vc.u32 %v1925_v6, %v1921_v2  ;;  %v1953_v49 = vsel %vm1952_vm6, 1, %v8696_v4  ;;  %v1951_v2 = vshrl.u32 %v1946_v29, 16  ;;  %v1181_v6 = vrot.slane %v5995_v40, 1 }
  0x46   :  { %vm1956_vm7 = vc.u32 %v1954_v43, %v1950_v37  ;;  %v6052_v37 = vadd.s32 32, %v5948_v45  ;;  %v6058_v43 = vld [vmem:[%s8685_s0 + $0x50] sm:$0xff] }
  0x4e   :  { %5324 = vmatmul.msk.bf16.gmra.mxu0 %vm580_vm3, %v322_v30  ;;  %5351 = vmatmul.msk.bf16.gmra.mxu3 %vm580_vm3, %v538_v31  ;;  %v557_v30 = vor.u32 %v555_v14, %v553_v13  ;;  %v240_v31 = vunpack.c.l.b16 %v90_v25  ;;  %v1976_v14 = vmul.u32 58254, %v1971_v5 }
  0x4f   :  { %5364 = vmatmul.msk.bf16.gmra.mxu1 %vm580_vm3, %v5514_v3  ;;  %v339_v3 = vshrl.u32 %v5946_v39, 16 }
  0x50   :  { %5407 = vmatmul.msk.bf16.gmra.mxu2 %vm580_vm3, %v1174_v32  ;;  %v5997_v41 = vpack.c.b16 %v240_v31, %v240_v31 }
  0x51   :  { %v341_v21 = vor.u32 %v339_v3, %v337_v57  ;;  %v6014_v57 = vsel %vm278_vm1, %v557_v30, %v561_v35  ;;  %v2000_v30 = vshrl.u32 %v6029_v15, 16 }
  0x52   :  { %v567_v53 = vshll.u32 %v5997_v41, 16 }
  0x53   :  { %v6006_v48 = vsel %vm278_vm1, %v341_v21, %v345_v24  ;;  %v1999_v21 = vand.u32 65535, %v6029_v15 }
  0x54   :  { %v569_v1 = vrot.slane %v567_v53, 1  ;;  %v2005_v53 = vmul.u32 58254, %v2000_v30 }
  0x55   :  { %v2003_v34 = vmul.u32 58254, %v1999_v21 }
  0x5e   :  { %5325 = vmatmul.msk.bf16.gmra.mxu0 %vm580_vm3, %v330_v51  ;;  %5352 = vmatmul.msk.bf16.gmra.mxu3 %vm580_vm3, %v546_v52  ;;  %v351_v51 = vshll.u32 %v5995_v40, 16  ;;  %v563_v52 = vshrl.u32 %v5545_v0, 16  ;;  %v1957_v0 = vsel %vm1956_vm7, 1, %v8696_v4 }
  0x5f   :  { %5365 = vmatmul.msk.bf16.gmra.mxu1 %vm580_vm3, %v5515_v18  ;;  %v1928_v18 = vsel %vm1927_vm5, 1, %v8696_v4 }
  0x60   :  { %5408 = vmatmul.msk.bf16.gmra.mxu2 %vm580_vm3, %v1176_v55  ;;  %v1930_v22 = vadd.s32 %v1928_v18, %v1926_v12  ;;  %v1955_v55 = vadd.s32 %v1953_v49, %v1947_v36  ;;  %v6017_v61 = vrot.slane %v351_v51, 1  ;;  %v565_v62 = vor.u32 %v563_v52, %v561_v35 }
  0x61   :  { %v1974_v12 = vmul.u32 58254, %v1970_v56  ;;  %v2002_v35 = vmul.u32 14564, %v1999_v21  ;;  %v6049_v36 = vmul.u32 14564, %v2000_v30  ;;  %v2006_v49 = vshll.u32 %v2003_v34, 16 }
  0x62   :  { %v1931_v32 = vadd.s32 %v1930_v22, %v1920_v17  ;;  %v1959_v3 = vadd.s32 %v1957_v0, %v1955_v55  ;;  %v6036_v18 = vsel %vm278_vm1, %v349_v58, %v6017_v61  ;;  %v6040_v22 = vsel %vm278_vm1, %v565_v62, %v569_v1 }
  0x63   :  { %v1977_v17 = vshll.u32 %v1974_v12, 16  ;;  %v355_v55 = vshrl.u32 %v5995_v40, 16  ;;  %v359_v56 = vshll.u32 %v6058_v43, 16  ;;  %vm2010_vm6 = vc.u32 %v2002_v35, %v2006_v49 }
  0x64   :  { %v1932_v42 = vadd.s32 %v1931_v32, %v1922_v26  ;;  %v1960_v13 = vadd.s32 %v1959_v3, %v1949_v60  ;;  %v1978_v32 = vshrl.u32 %v1974_v12, 16  ;;  %v2028_v58 = vand.u32 65535, %v6052_v37 }
  0x65   :  { %vm1981_vm11 = vc.u32 %v1973_v11, %v1977_v17  ;;  %v1983_v28 = vadd.s32 %v1977_v17, %v1973_v11  ;;  %v357_v62 = vor.u32 %v355_v55, %v6017_v61  ;;  %v2011_v0 = vsel %vm2010_vm6, 1, %v8696_v4 }
  0x66   :  { %v1933_v54 = vshrl.u32 %v1932_v42, 4  ;;  %v1961_v19 = vadd.s32 %v1960_v13, %v1951_v2  ;;  %v1982_v26 = vsel %vm1981_vm11, 1, %v8696_v4  ;;  %v6071_v1 = vrot.slane %v359_v56, 1 }
  0x67   :  { %v1984_v29 = vadd.s32 %v1982_v26, %v1976_v14  ;;  %v2007_v3 = vshrl.u32 %v2003_v34, 16  ;;  %v2009_v11 = vshrl.u32 %v6049_v36, 16  ;;  %v2029_v12 = vshrl.u32 %v6052_v37, 16 }
  0x68   :  { %v1934_v63 = vmul.u32 18, %v1933_v54  ;;  %v1962_v25 = vshrl.u32 %v1961_v19, 4  ;;  %v2008_v54 = vshll.u32 %v6049_v36, 16  ;;  %v2031_v13 = vmul.u32 14564, %v2028_v58 }
  0x69   :  { %v6097_v14 = vsel %vm278_vm1, %v357_v62, %v6071_v1  ;;  %v2033_v17 = vmul.u32 14564, %v2029_v12  ;;  %v2034_v19 = vmul.u32 58254, %v2029_v12  ;;  %v363_v62 = vshrl.u32 %v6058_v43, 16 }
  0x6a   :  { %v1935_v10 = vsub.s32 %v5948_v45, %v1934_v63  ;;  %v1963_v31 = vmul.u32 18, %v1962_v25  ;;  %v1183_v63 = vrot.slane %v6058_v43, 1 }
  0x6b   :  { %v2037_v26 = vshll.u32 %v2033_v17, 16  ;;  %v2038_v34 = vshrl.u32 %v2033_v17, 16  ;;  %v365_v12 = vor.u32 %v363_v62, %v6071_v1 }
  0x6c   :  { %vm3997_vm8 = vcmp.ne.s32.totalorder %v1935_v10, 0  ;;  %vm4069_vm9 = vcmp.lt.s32.totalorder %v1935_v10, 0  ;;  %v4213_v16 = vadd.s32 18, %v1935_v10  ;;  %v1964_v42 = vsub.s32 %v5978_v7, %v1963_v31 }
  0x6d   :  { %vm4141_vm10 = vmand %vm4069_vm9, %vm3997_vm8  ;;  %v6082_v61 = vsel %vm1163_vm2, %v1181_v6, %v1183_v63 }
  0x6e   :  { %5326 = vmatmul.msk.bf16.gmra.mxu0 %vm580_vm3, %v338_v9  ;;  %5353 = vmatmul.msk.bf16.gmra.mxu3 %vm580_vm3, %v554_v44  ;;  %v1975_v9 = vmul.u32 14564, %v1971_v5  ;;  %v4285_v23 = vsel %vm4141_vm10, %v4213_v16, %v1935_v10  ;;  %vm3998_vm0 = vcmp.ne.s32.totalorder %v1964_v42, 0  ;;  %vm4070_vm4 = vcmp.lt.s32.totalorder %v1964_v42, 0 }
  0x6f   :  { %5366 = vmatmul.msk.bf16.gmra.mxu1 %vm580_vm3, %v5937_v33  ;;  %v1180_v33 = vsel %vm1163_vm2, %v1177_v20, %v1179_v46  ;;  %vm4357_vm12 = vcmp.ge.s32.totalorder %v4285_v23, 1  ;;  %vm4429_vm13 = vcmp.le.s32.totalorder %v4285_v23, 16  ;;  %v6046_v20 = vsel %vm1163_vm2, %v1179_v46, %v1181_v6  ;;  %vm4142_vm5 = vmand %vm4070_vm4, %vm3998_vm0 }
  0x70   :  { %5409 = vmatmul.msk.bf16.gmra.mxu2 %vm580_vm3, %v1178_v47  ;;  %v1979_v24 = vshll.u32 %v1975_v9, 16  ;;  %vm4501_vm14 = vmand %vm4357_vm12, %vm4429_vm13  ;;  %v1980_v44 = vshrl.u32 %v1975_v9, 16  ;;  %v4214_v7 = vadd.s32 18, %v1964_v42  ;;  %v2012_v5 = vadd.s32 %v2006_v49, %v2002_v35 }
  0x71   :  { %v6062_v51 = vsel %vm4501_vm14, 1.0, %v8690_v50  ;;  %v2013_v10 = vadd.s32 %v2011_v0, %v2005_v53  ;;  %v2032_v6 = vmul.u32 58254, %v2028_v58  ;;  %v6093_v9 = vadd.s32 40, %v5948_v45  ;;  %v6112_v53 = vld [vmem:[%s8685_s0 + $0x58] sm:$0xff] }
  0x72   :  { %vm1985_vm15 = vc.u32 %v1983_v28, %v1979_v24  ;;  %v4286_v60 = vsel %vm4142_vm5, %v4214_v7, %v1964_v42  ;;  %vm2014_vm10 = vc.u32 %v2012_v5, %v2008_v54  ;;  %v367_v0 = vshll.u32 %v6112_v53, 16 }
  0x73   :  { %v1986_v47 = vsel %vm1985_vm15, 1, %v8696_v4  ;;  %vm4358_vm7 = vcmp.ge.s32.totalorder %v4286_v60, 1  ;;  %vm4430_vm8 = vcmp.le.s32.totalorder %v4286_v60, 16  ;;  %v2015_v16 = vsel %vm2014_vm10, 1, %v8696_v4 }
  0x74   :  { %v1988_v52 = vadd.s32 %v1986_v47, %v1984_v29  ;;  %vm4502_vm9 = vmand %vm4358_vm7, %vm4430_vm8  ;;  %v2035_v21 = vshll.u32 %v2032_v6, 16  ;;  %v2057_v23 = vand.u32 65535, %v6093_v9  ;;  %v2036_v25 = vshrl.u32 %v2032_v6, 16 }
  0x75   :  { %v2058_v28 = vshrl.u32 %v6093_v9, 16  ;;  %v1185_v6 = vrot.slane %v6112_v53, 1 }
  0x76   :  { %v1989_v46 = vadd.s32 %v1988_v52, %v1978_v32  ;;  %vm2039_vm11 = vc.u32 %v2031_v13, %v2035_v21  ;;  %v2041_v30 = vadd.s32 %v2035_v21, %v2031_v13  ;;  %v6103_v31 = vmul.u32 58254, %v2057_v23 }
  0x77   :  { %v2040_v36 = vsel %vm2039_vm11, 1, %v8696_v4  ;;  %v2060_v42 = vmul.u32 14564, %v2057_v23  ;;  %v6107_v49 = vmul.u32 14564, %v2058_v28  ;;  %v2063_v54 = vmul.u32 58254, %v2058_v28 }
  0x78   :  { %v1990_v2 = vadd.s32 %v1989_v46, %v1980_v44  ;;  %vm2043_vm15 = vc.u32 %v2041_v30, %v2037_v26  ;;  %v2042_v44 = vadd.s32 %v2040_v36, %v2034_v19  ;;  %v2064_v55 = vshll.u32 %v6103_v31, 16 }
  0x79   :  { %v2044_v47 = vsel %vm2043_vm15, 1, %v8696_v4  ;;  %v2066_v56 = vshll.u32 %v6107_v49, 16  ;;  %v6117_v46 = vadd.s32 48, %v5948_v45  ;;  %v2065_v5 = vshrl.u32 %v6103_v31, 16 }
  0x7a   :  { %v2046_v7 = vadd.s32 %v2044_v47, %v2042_v44  ;;  %vm2068_vm6 = vc.u32 %v2060_v42, %v2064_v55  ;;  %v6127_v13 = vrot.slane %v367_v0, 1  ;;  %v2067_v17 = vshrl.u32 %v6107_v49, 16 }
  0x7c   :  { %v6138_v1 = vsel %vm278_vm1, %v365_v12, %v6127_v13 }
  0x7e   :  { %5327 = vmatmul.msk.bf16.gmra.mxu0 %vm580_vm3, %v6006_v48  ;;  %5354 = vmatmul.msk.bf16.gmra.mxu3 %vm580_vm3, %v6014_v57  ;;  %v6088_v48 = vsel %vm4502_vm9, 1.0, %v8690_v50  ;;  %v1991_v57 = vshrl.u32 %v1990_v2, 4 }
  0x7f   :  { %5367 = vmatmul.msk.bf16.gmra.mxu1 %vm580_vm3, %v5946_v39 }
  0x80   :  { %5410 = vmatmul.msk.bf16.gmra.mxu2 %vm580_vm3, %v1180_v33  ;;  %v1992_v39 = vmul.u32 18, %v1991_v57  ;;  %v2017_v33 = vadd.s32 %v2015_v16, %v2013_v10  ;;  %v2070_v10 = vadd.s32 %v2064_v55, %v2060_v42 }
  0x82   :  { %v1993_v24 = vsub.s32 %v5990_v38, %v1992_v39  ;;  %v2018_v29 = vadd.s32 %v2017_v33, %v2007_v3  ;;  %v2047_v3 = vadd.s32 %v2046_v7, %v2036_v25  ;;  %v2069_v33 = vsel %vm2068_vm6, 1, %v8696_v4 }
  0x83   :  { %v2071_v19 = vadd.s32 %v2069_v33, %v2063_v54  ;;  %vm2072_vm10 = vc.u32 %v2070_v10, %v2066_v56 }
  0x84   :  { %vm3999_vm12 = vcmp.ne.s32.totalorder %v1993_v24, 0  ;;  %vm4071_vm13 = vcmp.lt.s32.totalorder %v1993_v24, 0  ;;  %v4215_v32 = vadd.s32 18, %v1993_v24  ;;  %v2019_v35 = vadd.s32 %v2018_v29, %v2009_v11 }
  0x85   :  { %vm4143_vm14 = vmand %vm4071_vm13, %vm3999_vm12  ;;  %v2048_v16 = vadd.s32 %v2047_v3, %v2038_v34  ;;  %v2073_v23 = vsel %vm2072_vm10, 1, %v8696_v4 }
  0x86   :  { %v4287_v38 = vsel %vm4143_vm14, %v4215_v32, %v1993_v24  ;;  %v2020_v52 = vshrl.u32 %v2019_v35, 4  ;;  %v2086_v24 = vand.u32 65535, %v6117_v46  ;;  %v2075_v26 = vadd.s32 %v2073_v23, %v2071_v19 }
  0x87   :  { %vm4359_vm0 = vcmp.ge.s32.totalorder %v4287_v38, 1  ;;  %vm4431_vm4 = vcmp.le.s32.totalorder %v4287_v38, 16 }
  0x88   :  { %vm4503_vm5 = vmand %vm4359_vm0, %vm4431_vm4  ;;  %v2021_v60 = vmul.u32 18, %v2020_v52  ;;  %v2090_v29 = vmul.u32 58254, %v2086_v24  ;;  %v2076_v42 = vadd.s32 %v2075_v26, %v2065_v5  ;;  %v6164_v52 = vadd.s32 56, %v5948_v45 }
  0x89   :  { %v6120_v58 = vsel %vm4503_vm5, 1.0, %v8690_v50 }
  0x8a   :  { %v2022_v11 = vsub.s32 %v6029_v15, %v2021_v60  ;;  %v2093_v44 = vshll.u32 %v2090_v29, 16  ;;  %v2094_v47 = vshrl.u32 %v2090_v29, 16  ;;  %v2077_v56 = vadd.s32 %v2076_v42, %v2067_v17 }
  0x8b   :  { %v702_v2 = vpop.f32.mrf.mxu0  ;;  %v371_v17 = vshrl.u32 %v6112_v53, 16 }
  0x8c   :  { %v975_v57 = vpop.f32.mrf.mxu1  ;;  %vm4000_vm7 = vcmp.ne.s32.totalorder %v2022_v11, 0  ;;  %vm4072_vm8 = vcmp.lt.s32.totalorder %v2022_v11, 0  ;;  %v4216_v15 = vadd.s32 18, %v2022_v11  ;;  %v2078_v5 = vshrl.u32 %v2077_v56, 4 }
  0x8d   :  { %v976_v39 = vadd.f32 %v975_v57, %v702_v2  ;;  %vm4144_vm9 = vmand %vm4072_vm8, %vm4000_vm7  ;;  %v2115_v2 = vand.u32 65535, %v6164_v52  ;;  %v2116_v57 = vshrl.u32 %v6164_v52, 16  ;;  %v373_v26 = vor.u32 %v371_v17, %v6127_v13 }
  0x8e   :  { %5328 = vmatmul.msk.bf16.gmra.mxu0 %vm580_vm3, %v6036_v18  ;;  %5355 = vmatmul.msk.bf16.gmra.mxu3 %vm580_vm3, %v6040_v22  ;;  %v6149_v18 = vsel %vm1163_vm2, %v1183_v63, %v1185_v6  ;;  %v2049_v22 = vshrl.u32 %v2048_v16, 4  ;;  %v4288_v21 = vsel %vm4144_vm9, %v4216_v15, %v2022_v11  ;;  %v2089_v63 = vmul.u32 14564, %v2086_v24 }
  0x8f   :  { %5368 = vmatmul.msk.bf16.gmra.mxu1 %vm580_vm3, %v5966_v59  ;;  %v2087_v59 = vshrl.u32 %v6117_v46, 16  ;;  %vm4360_vm11 = vcmp.ge.s32.totalorder %v4288_v21, 1  ;;  %vm4432_vm12 = vcmp.le.s32.totalorder %v4288_v21, 16  ;;  %v2118_v12 = vmul.u32 14564, %v2115_v2 }
  0x90   :  { %5411 = vmatmul.msk.bf16.gmra.mxu2 %vm580_vm3, %v6046_v20  ;;  %v2050_v20 = vmul.u32 18, %v2049_v22  ;;  %vm4504_vm13 = vmand %vm4360_vm11, %vm4432_vm12  ;;  %vm2097_vm4 = vc.u32 %v2089_v63, %v2093_v44  ;;  %v2099_v0 = vadd.s32 %v2093_v44, %v2089_v63  ;;  %v2079_v16 = vmul.u32 18, %v2078_v5 }
  0x91   :  { %v6154_v25 = vpop.f32.mrf.mxu3  ;;  %v6156_v30 = vmul.u32 14564, %v2087_v59  ;;  %v2092_v31 = vmul.u32 58254, %v2087_v59  ;;  %v6159_v35 = vsel %vm4504_vm13, 1.0, %v8690_v50  ;;  %v2098_v62 = vsel %vm2097_vm4, 1, %v8696_v4 }
  0x92   :  { %v2051_v36 = vsub.s32 %v6052_v37, %v2050_v20  ;;  %v6184_v24 = vmul.u32 58254, %v2115_v2  ;;  %v2080_v20 = vsub.s32 %v6093_v9, %v2079_v16  ;;  %v2120_v42 = vmul.u32 14564, %v2116_v57 }
  0x93   :  { %v1366_v28 = vpop.f32.mrf.mxu2  ;;  %v704_v34 = vpop.f32.mrf.mxu0  ;;  %v2095_v49 = vshll.u32 %v6156_v30, 16  ;;  %v2096_v60 = vshrl.u32 %v6156_v30, 16  ;;  %v2100_v10 = vadd.s32 %v2098_v62, %v2092_v31  ;;  %v6226_v5 = vadd.s32 72, %v5948_v45 }
  0x94   :  { %v1546_v32 = vadd.f32 %v1366_v28, %v976_v39  ;;  %v977_v38 = vpop.f32.mrf.mxu1  ;;  %vm4001_vm14 = vcmp.ne.s32.totalorder %v2051_v36, 0  ;;  %vm4073_vm15 = vcmp.lt.s32.totalorder %v2051_v36, 0  ;;  %v4217_v55 = vadd.s32 18, %v2051_v36 }
  0x95   :  { %v978_v7 = vadd.f32 %v977_v38, %v704_v34  ;;  %vm4145_vm0 = vmand %vm4073_vm15, %vm4001_vm14  ;;  %vm2101_vm7 = vc.u32 %v2099_v0, %v2095_v49  ;;  %vm4002_vm9 = vcmp.ne.s32.totalorder %v2080_v20, 0  ;;  %vm4074_vm10 = vcmp.lt.s32.totalorder %v2080_v20, 0 }
  0x96   :  { %v4861_v54 = vmul.f32 %v6062_v51, %v1546_v32  ;;  %v4289_v3 = vsel %vm4145_vm0, %v4217_v55, %v2051_v36  ;;  %v6173_v51 = vld [vmem:[%s8685_s0 + $0x60] sm:$0xff]  ;;  %v2102_v15 = vsel %vm2101_vm7, 1, %v8696_v4  ;;  %v4218_v9 = vadd.s32 18, %v2080_v20  ;;  %vm4146_vm11 = vmand %vm4074_vm10, %vm4002_vm9 }
  0x97   :  { %vm4361_vm5 = vcmp.ge.s32.totalorder %v4289_v3, 1  ;;  %vm4433_vm6 = vcmp.le.s32.totalorder %v4289_v3, 16  ;;  %v375_v33 = vshll.u32 %v6173_v51, 16  ;;  %v2104_v23 = vadd.s32 %v2102_v15, %v2100_v10 }
  0x98   :  { %v5011_v37 = vmul.f32 %v4861_v54, %v1546_v32  ;;  %vm4505_vm8 = vmand %vm4361_vm5, %vm4433_vm6  ;;  %v1187_v63 = vrot.slane %v6173_v51, 1  ;;  %v2121_v38 = vmul.u32 58254, %v2116_v57  ;;  %v2125_v55 = vshrl.u32 %v2120_v42, 16 }
  0x99   :  { %v6176_v11 = vpop.f32.mrf.mxu3  ;;  %v6182_v21 = vsel %vm4505_vm8, 1.0, %v8690_v50  ;;  %v6188_v28 = vrot.slane %v375_v33, 1  ;;  %v2105_v34 = vadd.s32 %v2104_v23, %v2094_v47  ;;  %v6223_v3 = vadd.s32 64, %v5948_v45 }
  0x9a   :  { %v2173_v23 = vand.u32 65535, %v6226_v5 }
  0x9b   :  { %v1368_v39 = vpop.f32.mrf.mxu2  ;;  %v707_v19 = vpop.f32.mrf.mxu0  ;;  %v6198_v13 = vsel %vm278_vm1, %v373_v26, %v6188_v28  ;;  %v2106_v36 = vadd.s32 %v2105_v34, %v2096_v60  ;;  %v2145_v33 = vshrl.u32 %v6223_v3, 16 }
  0x9c   :  { %v1547_v22 = vadd.f32 %v1368_v39, %v978_v7  ;;  %v980_v59 = vpop.f32.mrf.mxu1  ;;  %v2124_v7 = vshll.u32 %v2120_v42, 16 }
  0x9d   :  { %v981_v31 = vadd.f32 %v980_v59, %v707_v19  ;;  %v2107_v49 = vshrl.u32 %v2106_v36, 4 }
  0x9e   :  { %v5556_v29 = vpack.c.bf16 %v1547_v22, %v1546_v32  ;;  %v4862_v30 = vmul.f32 %v6088_v48, %v1547_v22  ;;  %5329 = vmatmul.msk.bf16.gmra.mxu0 %vm580_vm3, %v6097_v14  ;;  %5387 = vmatmul.msk.bf16.vlgmr.msrb.gmra.mxu3 %vm580_vm3, %v5843_v8  ;;  %v6212_v8 = vsel %vm1163_vm2, %v1185_v6, %v1187_v63 }
  0x9f   :  { %5369 = vmatmul.msk.bf16.gmra.mxu1 %vm580_vm3, %v5995_v40  ;;  %v4290_v14 = vsel %vm4146_vm11, %v4218_v9, %v2080_v20  ;;  %v2122_v40 = vshll.u32 %v6184_v24, 16  ;;  %v2108_v0 = vmul.u32 18, %v2107_v49  ;;  %v379_v9 = vshrl.u32 %v6173_v51, 16 }
  0xa0   :  { %5557 = vst [vmem:[%s8686_s2] sm:$0xff] %v5556_v29   ;;  %v4933_v48 = vadd.f32 %v4862_v30, %v4861_v54  ;;  %v5012_v32 = vmul.f32 %v4862_v30, %v1547_v22  ;;  %5412 = vmatmul.msk.bf16.gmra.mxu2 %vm580_vm3, %v6082_v61  ;;  %vm4362_vm12 = vcmp.ge.s32.totalorder %v4290_v14, 1  ;;  %vm4434_vm13 = vcmp.le.s32.totalorder %v4290_v14, 16 }
  0xa1   :  { %v6214_v47 = vpop.f32.mrf.mxu3  ;;  %vm4506_vm14 = vmand %vm4362_vm12, %vm4434_vm13  ;;  %v2123_v54 = vshrl.u32 %v6184_v24, 16  ;;  %vm2126_vm15 = vc.u32 %v2118_v12, %v2122_v40  ;;  %v2109_v16 = vsub.s32 %v6117_v46, %v2108_v0  ;;  %v6243_v30 = vmul.u32 14564, %v2145_v33 }
  0xa2   :  { %v5083_v44 = vadd.f32 %v5012_v32, %v5011_v37  ;;  %v6219_v60 = vsel %vm4506_vm14, 1.0, %v8690_v50  ;;  %v2128_v37 = vadd.s32 %v2122_v40, %v2118_v12  ;;  %v2127_v2 = vsel %vm2126_vm15, 1, %v8696_v4 }
  0xa3   :  { %v1371_v61 = vpop.f32.mrf.mxu2  ;;  %v709_v56 = vpop.f32.mrf.mxu0  ;;  %v2129_v39 = vadd.s32 %v2127_v2, %v2121_v38  ;;  %v2144_v12 = vand.u32 65535, %v6223_v3  ;;  %vm4003_vm4 = vcmp.ne.s32.totalorder %v2109_v16, 0  ;;  %vm4075_vm5 = vcmp.lt.s32.totalorder %v2109_v16, 0 }
  0xa4   :  { %v1548_v6 = vadd.f32 %v1371_v61, %v981_v31  ;;  %v982_v62 = vpop.f32.mrf.mxu1  ;;  %vm2130_vm0 = vc.u32 %v2128_v37, %v2124_v7  ;;  %v4219_v24 = vadd.s32 18, %v2109_v16  ;;  %vm4147_vm6 = vmand %vm4075_vm5, %vm4003_vm4  ;;  %v2150_v32 = vmul.u32 58254, %v2145_v33 }
  0xa5   :  { %v983_v57 = vadd.f32 %v982_v62, %v709_v56  ;;  %v2131_v17 = vsel %vm2130_vm0, 1, %v8696_v4  ;;  %v2147_v46 = vmul.u32 14564, %v2144_v12  ;;  %v6241_v29 = vmul.u32 58254, %v2144_v12 }
  0xa6   :  { %v4863_v10 = vmul.f32 %v6120_v58, %v1548_v6  ;;  %v2133_v19 = vadd.s32 %v2131_v17, %v2129_v39  ;;  %v6237_v58 = vld [vmem:[%s8685_s0 + $0x68] sm:$0xff]  ;;  %v4291_v34 = vsel %vm4147_vm6, %v4219_v24, %v2109_v16  ;;  %v2153_v2 = vshll.u32 %v6243_v30, 16 }
  0xa7   :  { %vm4363_vm7 = vcmp.ge.s32.totalorder %v4291_v34, 1  ;;  %vm4435_vm8 = vcmp.le.s32.totalorder %v4291_v34, 16  ;;  %v1189_v61 = vrot.slane %v6237_v58, 1  ;;  %v2151_v49 = vshll.u32 %v6241_v29, 16 }
  0xa8   :  { %v4934_v15 = vadd.f32 %v4933_v48, %v4863_v10  ;;  %v5013_v22 = vmul.f32 %v4863_v10, %v1548_v6  ;;  %v2134_v26 = vadd.s32 %v2133_v19, %v2123_v54  ;;  %v383_v48 = vshll.u32 %v6237_v58, 16  ;;  %vm4507_vm9 = vmand %vm4363_vm7, %vm4435_vm8 }
  0xa9   :  { %v6239_v20 = vpop.f32.mrf.mxu3  ;;  %v6254_v37 = vsel %vm4507_vm9, 1.0, %v8690_v50  ;;  %v2154_v10 = vshrl.u32 %v6243_v30, 16  ;;  %vm2155_vm10 = vc.u32 %v2147_v46, %v2151_v49  ;;  %v2174_v39 = vshrl.u32 %v6226_v5, 16 }
  0xaa   :  { %v5084_v59 = vadd.f32 %v5083_v44, %v5013_v22  ;;  %v2135_v42 = vadd.s32 %v2134_v26, %v2125_v55  ;;  %v381_v44 = vor.u32 %v379_v9, %v6188_v28  ;;  %v6248_v40 = vrot.slane %v383_v48, 1  ;;  %v5779_v28 = vld [vmem:[%s8685_s0 + $0xe0] sm:$0xff] }
  0xab   :  { %v1373_v31 = vpop.f32.mrf.mxu2  ;;  %v712_v36 = vpop.f32.mrf.mxu0  ;;  %v2156_v12 = vsel %vm2155_vm10, 1, %v8696_v4  ;;  %v2176_v33 = vmul.u32 14564, %v2173_v23  ;;  %v6290_v19 = vmul.u32 14564, %v2174_v39 }
  0xac   :  { %v1549_v14 = vadd.f32 %v1373_v31, %v983_v57  ;;  %v985_v38 = vpop.f32.mrf.mxu1  ;;  %v2136_v55 = vshrl.u32 %v2135_v42, 4  ;;  %v6264_v62 = vsel %vm278_vm1, %v381_v44, %v6248_v40  ;;  %v2157_v57 = vadd.s32 %v2151_v49, %v2147_v46 }
  0xad   :  { %v986_v56 = vadd.f32 %v985_v38, %v712_v36  ;;  %v2158_v22 = vadd.s32 %v2156_v12, %v2150_v32  ;;  %v2182_v48 = vshll.u32 %v6290_v19, 16  ;;  %v2183_v36 = vshrl.u32 %v6290_v19, 16 }
  0xae   :  { %v5561_v54 = vpack.c.bf16 %v1549_v14, %v1548_v6  ;;  %v4864_v7 = vmul.f32 %v6159_v35, %v1549_v14  ;;  %5330 = vmatmul.msk.bf16.gmra.mxu0 %vm580_vm3, %v6138_v1  ;;  %5388 = vmatmul.msk.bf16.gmra.mxu3 %vm580_vm3, %v5779_v28  ;;  %v6271_v35 = vsel %vm1163_vm2, %v1187_v63, %v1189_v61  ;;  %v2152_v1 = vshrl.u32 %v6241_v29, 16 }
  0xaf   :  { %5370 = vmatmul.msk.bf16.gmra.mxu1 %vm580_vm3, %v6058_v43  ;;  %v2137_v63 = vmul.u32 18, %v2136_v55  ;;  %vm2159_vm11 = vc.u32 %v2157_v57, %v2153_v2  ;;  %v2179_v29 = vmul.u32 58254, %v2174_v39 }
  0xb0   :  { %5736 = vst [vmem:[%s8686_s2 + $0x8] sm:$0xff] %v5561_v54   ;;  %v4935_v6 = vadd.f32 %v4934_v15, %v4864_v7  ;;  %v5014_v0 = vmul.f32 %v4864_v7, %v1549_v14  ;;  %5413 = vmatmul.msk.bf16.gmra.mxu2 %vm580_vm3, %v6149_v18  ;;  %v6287_v15 = vmul.u32 58254, %v2173_v23  ;;  %v2160_v46 = vsel %vm2159_vm11, 1, %v8696_v4  ;;  %v6302_v54 = vld [vmem:[%s8685_s0 + $0x70] sm:$0xff] }
  0xb1   :  { %v6284_v17 = vpop.f32.mrf.mxu3  ;;  %v2138_v18 = vsub.s32 %v6164_v52, %v2137_v63  ;;  %v2162_v23 = vadd.s32 %v2160_v46, %v2158_v22  ;;  %v6305_v7 = vadd.s32 80, %v5948_v45  ;;  %v391_v63 = vshll.u32 %v6302_v54, 16 }
  0xb2   :  { %v5085_v16 = vadd.f32 %v5084_v59, %v5014_v0  ;;  %v2180_v59 = vshll.u32 %v6287_v15, 16  ;;  %v2181_v52 = vshrl.u32 %v6287_v15, 16 }
  0xb3   :  { %v1376_v43 = vpop.f32.mrf.mxu2  ;;  %v714_v26 = vpop.f32.mrf.mxu0  ;;  %vm4004_vm12 = vcmp.ne.s32.totalorder %v2138_v18, 0  ;;  %vm4076_vm13 = vcmp.lt.s32.totalorder %v2138_v18, 0  ;;  %v4220_v31 = vadd.s32 18, %v2138_v18  ;;  %v2163_v14 = vadd.s32 %v2162_v23, %v2152_v1 }
  0xb4   :  { %v1550_v24 = vadd.f32 %v1376_v43, %v986_v56  ;;  %v987_v30 = vpop.f32.mrf.mxu1  ;;  %vm4148_vm14 = vmand %vm4076_vm13, %vm4004_vm12  ;;  %vm2184_vm15 = vc.u32 %v2176_v33, %v2180_v59  ;;  %v2202_v12 = vand.u32 65535, %v6305_v7  ;;  %v6321_v19 = vrot.slane %v391_v63, 1 }
  0xb5   :  { %v988_v9 = vadd.f32 %v987_v30, %v714_v26  ;;  %v4292_v32 = vsel %vm4148_vm14, %v4220_v31, %v2138_v18  ;;  %v2164_v44 = vadd.s32 %v2163_v14, %v2154_v10  ;;  %v2185_v49 = vsel %vm2184_vm15, 1, %v8696_v4  ;;  %v5780_v30 = vld [vmem:[%s8685_s0 + $0xe8] sm:$0xff] }
  0xb6   :  { %v4865_v34 = vmul.f32 %v6182_v21, %v1550_v24  ;;  %vm4364_vm0 = vcmp.ge.s32.totalorder %v4292_v32, 1  ;;  %vm4436_vm4 = vcmp.le.s32.totalorder %v4292_v32, 16  ;;  %v2186_v21 = vadd.s32 %v2180_v59, %v2176_v33 }
  0xb7   :  { %vm4508_vm5 = vmand %vm4364_vm0, %vm4436_vm4  ;;  %v2187_v1 = vadd.s32 %v2185_v49, %v2179_v29  ;;  %v2165_v2 = vshrl.u32 %v2164_v44, 4  ;;  %v387_v10 = vshrl.u32 %v6237_v58, 16  ;;  %v2203_v33 = vshrl.u32 %v6305_v7, 16 }
  0xb8   :  { %v4936_v42 = vadd.f32 %v4935_v6, %v4865_v34  ;;  %v5015_v38 = vmul.f32 %v4865_v34, %v1550_v24  ;;  %v6310_v55 = vsel %vm4508_vm5, 1.0, %v8690_v50  ;;  %v6313_v6 = vadd.s32 88, %v5948_v45 }
  0xb9   :  { %v6307_v28 = vpop.f32.mrf.mxu3  ;;  %vm2188_vm6 = vc.u32 %v2186_v21, %v2182_v48  ;;  %v2166_v43 = vmul.u32 18, %v2165_v2  ;;  %v389_v22 = vor.u32 %v387_v10, %v6248_v40  ;;  %v1191_v59 = vrot.slane %v6302_v54, 1 }
  0xba   :  { %v5086_v56 = vadd.f32 %v5085_v16, %v5015_v38  ;;  %v2189_v16 = vsel %vm2188_vm6, 1, %v8696_v4  ;;  %v2206_v32 = vmul.u32 58254, %v2202_v12  ;;  %v2208_v14 = vmul.u32 58254, %v2203_v33 }
  0xbb   :  { %v1378_v0 = vpop.f32.mrf.mxu2  ;;  %v717_v39 = vpop.f32.mrf.mxu0  ;;  %v2191_v18 = vadd.s32 %v2189_v16, %v2187_v1  ;;  %v2167_v31 = vsub.s32 %v6223_v3, %v2166_v43  ;;  %v6348_v3 = vsel %vm1163_vm2, %v1189_v61, %v1191_v59  ;;  %v2231_v44 = vand.u32 65535, %v6313_v6 }
  0xbc   :  { %v1551_v57 = vadd.f32 %v1378_v0, %v988_v9  ;;  %v990_v15 = vpop.f32.mrf.mxu1  ;;  %v2232_v61 = vshrl.u32 %v6313_v6, 16  ;;  %v2210_v0 = vshrl.u32 %v2206_v32, 16 }
  0xbd   :  { %v991_v29 = vadd.f32 %v990_v15, %v717_v39  ;;  %v2192_v40 = vadd.s32 %v2191_v18, %v2181_v52  ;;  %vm4005_vm7 = vcmp.ne.s32.totalorder %v2167_v31, 0  ;;  %vm4077_vm8 = vcmp.lt.s32.totalorder %v2167_v31, 0 }
  0xbe   :  { %v5566_v26 = vpack.c.bf16 %v1551_v57, %v1550_v24  ;;  %v4866_v46 = vmul.f32 %v6219_v60, %v1551_v57  ;;  %5331 = vmatmul.msk.bf16.gmra.mxu0 %vm580_vm3, %v6198_v13  ;;  %5389 = vmatmul.msk.bf16.gmra.mxu3 %vm580_vm3, %v5780_v30  ;;  %v6334_v24 = vsel %vm278_vm1, %v389_v22, %v6321_v19  ;;  %v2205_v60 = vmul.u32 14564, %v2202_v12  ;;  %vm4149_vm9 = vmand %vm4077_vm8, %vm4005_vm7 }
  0xbf   :  { %5371 = vmatmul.msk.bf16.gmra.mxu1 %vm580_vm3, %v6112_v53  ;;  %v4221_v34 = vadd.s32 18, %v2167_v31  ;;  %v2193_v9 = vadd.s32 %v2192_v40, %v2183_v36  ;;  %v6352_v53 = vmul.u32 14564, %v2203_v33  ;;  %v2209_v36 = vshll.u32 %v2206_v32, 16 }
  0xc0   :  { %5737 = vst [vmem:[%s8686_s2 + $0x10] sm:$0xff] %v5566_v26   ;;  %v4937_v23 = vadd.f32 %v4936_v42, %v4866_v46  ;;  %v5016_v13 = vmul.f32 %v4866_v46, %v1551_v57  ;;  %5414 = vmatmul.msk.bf16.gmra.mxu2 %vm580_vm3, %v6212_v8  ;;  %v2234_v15 = vmul.u32 14564, %v2231_v44  ;;  %v2235_v26 = vmul.u32 58254, %v2231_v44 }
  0xc1   :  { %v6350_v48 = vpop.f32.mrf.mxu3  ;;  %v4293_v42 = vsel %vm4149_vm9, %v4221_v34, %v2167_v31  ;;  %v2194_v38 = vshrl.u32 %v2193_v9, 4  ;;  %v2211_v2 = vshll.u32 %v6352_v53, 16  ;;  %v2212_v10 = vshrl.u32 %v6352_v53, 16 }
  0xc2   :  { %v5087_v52 = vadd.f32 %v5086_v56, %v5016_v13  ;;  %vm4365_vm10 = vcmp.ge.s32.totalorder %v4293_v42, 1  ;;  %vm4437_vm11 = vcmp.le.s32.totalorder %v4293_v42, 16  ;;  %vm2213_vm13 = vc.u32 %v2205_v60, %v2209_v36 }
  0xc3   :  { %v1381_v8 = vpop.f32.mrf.mxu2  ;;  %v719_v21 = vpop.f32.mrf.mxu0  ;;  %vm4509_vm12 = vmand %vm4365_vm10, %vm4437_vm11  ;;  %v2195_v1 = vmul.u32 18, %v2194_v38  ;;  %v2214_v12 = vsel %vm2213_vm13, 1, %v8696_v4  ;;  %v2215_v33 = vadd.s32 %v2209_v36, %v2205_v60  ;;  %v6367_v31 = vmul.u32 14564, %v2232_v61  ;;  %v6374_v38 = vld [vmem:[%s8685_s0 + $0x78] sm:$0xff] }
  0xc4   :  { %v1552_v49 = vadd.f32 %v1381_v8, %v991_v29  ;;  %v992_v56 = vpop.f32.mrf.mxu1  ;;  %v6360_v39 = vsel %vm4509_vm12, 1.0, %v8690_v50  ;;  %v2216_v22 = vadd.s32 %v2214_v12, %v2208_v14  ;;  %v2239_v34 = vshrl.u32 %v2235_v26, 16 }
  0xc5   :  { %v993_v57 = vadd.f32 %v992_v56, %v719_v21  ;;  %v2196_v16 = vsub.s32 %v6226_v5, %v2195_v1  ;;  %vm2217_vm0 = vc.u32 %v2215_v33, %v2211_v2  ;;  %v2237_v5 = vmul.u32 58254, %v2232_v61  ;;  %v5781_v56 = vld [vmem:[%s8685_s0 + $0xf0] sm:$0xff] }
  0xc6   :  { %v4867_v63 = vmul.f32 %v6254_v37, %v1552_v49  ;;  %v2218_v30 = vsel %vm2217_vm0, 1, %v8696_v4  ;;  %v2240_v53 = vshll.u32 %v6367_v31, 16  ;;  %v2241_v8 = vshrl.u32 %v6367_v31, 16 }
  0xc7   :  { %vm4006_vm14 = vcmp.ne.s32.totalorder %v2196_v16, 0  ;;  %vm4078_vm15 = vcmp.lt.s32.totalorder %v2196_v16, 0  ;;  %v4222_v46 = vadd.s32 18, %v2196_v16  ;;  %v2220_v13 = vadd.s32 %v2218_v30, %v2216_v22 }
  0xc8   :  { %v4938_v43 = vadd.f32 %v4937_v23, %v4867_v63  ;;  %v5017_v18 = vmul.f32 %v4867_v63, %v1552_v49  ;;  %vm4150_vm4 = vmand %vm4078_vm15, %vm4006_vm14  ;;  %v2238_v23 = vshll.u32 %v2235_v26, 16  ;;  %v6407_v26 = vadd.s32 104, %v5948_v45 }
  0xc9   :  { %v6364_v29 = vpop.f32.mrf.mxu3  ;;  %v4294_v60 = vsel %vm4150_vm4, %v4222_v46, %v2196_v16  ;;  %v2221_v14 = vadd.s32 %v2220_v13, %v2210_v0  ;;  %v399_v16 = vshll.u32 %v6374_v38, 16 }
  0xca   :  { %v5088_v37 = vadd.f32 %v5087_v52, %v5017_v18  ;;  %vm4366_vm5 = vcmp.ge.s32.totalorder %v4294_v60, 1  ;;  %vm4438_vm6 = vcmp.le.s32.totalorder %v4294_v60, 16  ;;  %vm2242_vm8 = vc.u32 %v2234_v15, %v2238_v23 }
  0xcb   :  { %v1383_v40 = vpop.f32.mrf.mxu2  ;;  %v722_v32 = vpop.f32.mrf.mxu0  ;;  %vm4510_vm7 = vmand %vm4366_vm5, %vm4438_vm6  ;;  %v2244_v42 = vadd.s32 %v2238_v23, %v2234_v15  ;;  %v2222_v1 = vadd.s32 %v2221_v14, %v2212_v10  ;;  %v2243_v0 = vsel %vm2242_vm8, 1, %v8696_v4  ;;  %v6402_v18 = vadd.s32 96, %v5948_v45 }
  0xcc   :  { %v1553_v9 = vadd.f32 %v1383_v40, %v993_v57  ;;  %v995_v52 = vpop.f32.mrf.mxu1  ;;  %v6378_v36 = vsel %vm4510_vm7, 1.0, %v8690_v50 }
  0xcd   :  { %v996_v21 = vadd.f32 %v995_v52, %v722_v32  ;;  %vm2246_vm9 = vc.u32 %v2244_v42, %v2240_v53  ;;  %v2223_v63 = vshrl.u32 %v2222_v1, 4  ;;  %v2261_v23 = vshrl.u32 %v6402_v18, 16 }
  0xce   :  { %v5571_v44 = vpack.c.bf16 %v1553_v9, %v1552_v49  ;;  %v4868_v61 = vmul.f32 %v6310_v55, %v1553_v9  ;;  %5332 = vmatmul.msk.bf16.gmra.mxu0 %vm580_vm3, %v6264_v62  ;;  %5390 = vmatmul.msk.bf16.gmra.mxu3 %vm580_vm3, %v5781_v56  ;;  %v395_v49 = vshrl.u32 %v6302_v54, 16  ;;  %v2245_v62 = vadd.s32 %v2243_v0, %v2237_v5 }
  0xcf   :  { %5372 = vmatmul.msk.bf16.gmra.mxu1 %vm580_vm3, %v6173_v51  ;;  %v2247_v10 = vsel %vm2246_vm9, 1, %v8696_v4  ;;  %v2224_v22 = vmul.u32 18, %v2223_v63  ;;  %v2260_v5 = vand.u32 65535, %v6402_v18  ;;  %v2266_v56 = vmul.u32 58254, %v2261_v23 }
  0xd0   :  { %5738 = vst [vmem:[%s8686_s2 + $0x18] sm:$0xff] %v5571_v44   ;;  %v4939_v55 = vadd.f32 %v4938_v43, %v4868_v61  ;;  %v5018_v2 = vmul.f32 %v4868_v61, %v1553_v9  ;;  %5415 = vmatmul.msk.bf16.gmra.mxu2 %vm580_vm3, %v6271_v35  ;;  %v397_v57 = vor.u32 %v395_v49, %v6321_v19  ;;  %v1193_v43 = vrot.slane %v6374_v38, 1 }
  0xd1   :  { %v6398_v33 = vpop.f32.mrf.mxu3  ;;  %v2249_v15 = vadd.s32 %v2247_v10, %v2245_v62  ;;  %v6404_v35 = vrot.slane %v399_v16, 1  ;;  %v6410_v19 = vadd.s32 112, %v5948_v45  ;;  %v2225_v60 = vsub.s32 %v6305_v7, %v2224_v22 }
  0xd2   :  { %v5089_v12 = vadd.f32 %v5088_v37, %v5018_v2  ;;  %v6417_v31 = vsel %vm1163_vm2, %v1191_v59, %v1193_v43  ;;  %v2263_v52 = vmul.u32 14564, %v2260_v5  ;;  %v2264_v14 = vmul.u32 58254, %v2260_v5 }
  0xd3   :  { %v1386_v51 = vpop.f32.mrf.mxu2  ;;  %v724_v37 = vpop.f32.mrf.mxu0  ;;  %v2250_v30 = vadd.s32 %v2249_v15, %v2239_v34  ;;  %v6423_v13 = vsel %vm278_vm1, %v397_v57, %v6404_v35  ;;  %v2289_v34 = vand.u32 65535, %v6407_v26  ;;  %vm4007_vm10 = vcmp.ne.s32.totalorder %v2225_v60, 0 }
  0xd4   :  { %v1554_v46 = vadd.f32 %v1386_v51, %v996_v21  ;;  %v997_v40 = vpop.f32.mrf.mxu1  ;;  %vm4079_vm11 = vcmp.lt.s32.totalorder %v2225_v60, 0  ;;  %v4223_v59 = vadd.s32 18, %v2225_v60  ;;  %v6428_v61 = vmul.u32 14564, %v2261_v23 }
  0xd5   :  { %v998_v32 = vadd.f32 %v997_v40, %v724_v37  ;;  %v2251_v53 = vadd.s32 %v2250_v30, %v2241_v8  ;;  %vm4151_vm12 = vmand %vm4079_vm11, %vm4007_vm10  ;;  %v2267_v1 = vshll.u32 %v2264_v14, 16  ;;  %v2268_v0 = vshrl.u32 %v2264_v14, 16 }
  0xd6   :  { %v4869_v9 = vmul.f32 %v6360_v39, %v1554_v46  ;;  %v4295_v21 = vsel %vm4151_vm12, %v4223_v59, %v2225_v60  ;;  %v2269_v62 = vshll.u32 %v6428_v61, 16  ;;  %v2290_v37 = vshrl.u32 %v6407_v26, 16 }
  0xd7   :  { %v2252_v7 = vshrl.u32 %v2251_v53, 4  ;;  %vm4367_vm13 = vcmp.ge.s32.totalorder %v4295_v21, 1  ;;  %vm4439_vm14 = vcmp.le.s32.totalorder %v4295_v21, 16  ;;  %vm2271_vm0 = vc.u32 %v2263_v52, %v2267_v1 }
  0xd8   :  { %v4940_v42 = vadd.f32 %v4939_v55, %v4869_v9  ;;  %v5019_v44 = vmul.f32 %v4869_v9, %v1554_v46  ;;  %vm4511_vm15 = vmand %vm4367_vm13, %vm4439_vm14  ;;  %v2270_v55 = vshrl.u32 %v6428_v61, 16  ;;  %v2273_v63 = vadd.s32 %v2267_v1, %v2263_v52 }
  0xd9   :  { %v6430_v2 = vpop.f32.mrf.mxu3  ;;  %v2253_v39 = vmul.u32 18, %v2252_v7  ;;  %v5449_v16 = vsel %vm4511_vm15, 1.0, %v8690_v50  ;;  %v2292_v30 = vmul.u32 14564, %v2289_v34  ;;  %v2294_v52 = vmul.u32 14564, %v2290_v37 }
  0xda   :  { %v5090_v49 = vadd.f32 %v5089_v12, %v5019_v44  ;;  %v2272_v12 = vsel %vm2271_vm0, 1, %v8696_v4  ;;  %vm2275_vm4 = vc.u32 %v2273_v63, %v2269_v62  ;;  %v2295_v59 = vmul.u32 58254, %v2290_v37 }
  0xdb   :  { %v1388_v8 = vpop.f32.mrf.mxu2  ;;  %v727_v57 = vpop.f32.mrf.mxu0  ;;  %v2254_v15 = vsub.s32 %v6313_v6, %v2253_v39  ;;  %v2274_v22 = vadd.s32 %v2272_v12, %v2266_v56  ;;  %v5782_v6 = vld [vmem:[%s8685_s0 + $0xf8] sm:$0xff]  ;;  %v2276_v9 = vsel %vm2275_vm4, 1, %v8696_v4  ;;  %v2298_v61 = vshll.u32 %v2294_v52, 16 }
  0xdc   :  { %v1555_v10 = vadd.f32 %v1388_v8, %v998_v32  ;;  %v1000_v51 = vpop.f32.mrf.mxu1  ;;  %v2293_v32 = vmul.u32 58254, %v2289_v34  ;;  %v6456_v34 = vld [vmem:[%s8685_s0 + $0x80] sm:$0xff]  ;;  %v2299_v21 = vshrl.u32 %v2294_v52, 16 }
  0xdd   :  { %v1001_v60 = vadd.f32 %v1000_v51, %v727_v57  ;;  %vm4008_vm5 = vcmp.ne.s32.totalorder %v2254_v15, 0  ;;  %vm4080_vm6 = vcmp.lt.s32.totalorder %v2254_v15, 0  ;;  %v4224_v23 = vadd.s32 18, %v2254_v15 }
  0xde   :  { %v5576_v5 = vpack.c.bf16 %v1555_v10, %v1554_v46  ;;  %v4870_v40 = vmul.f32 %v6378_v36, %v1555_v10  ;;  %5333 = vmatmul.msk.bf16.gmra.mxu0 %vm580_vm3, %v6334_v24  ;;  %5391 = vmatmul.msk.bf16.gmra.mxu3 %vm580_vm3, %v5782_v6  ;;  %vm4152_vm7 = vmand %vm4080_vm6, %vm4008_vm5  ;;  %v2278_v24 = vadd.s32 %v2276_v9, %v2274_v22  ;;  %v2296_v14 = vshll.u32 %v2293_v32, 16 }
  0xdf   :  { %5373 = vmatmul.msk.bf16.gmra.mxu1 %vm580_vm3, %v6237_v58  ;;  %v4296_v53 = vsel %vm4152_vm7, %v4224_v23, %v2254_v15  ;;  %v403_v57 = vshrl.u32 %v6374_v38, 16  ;;  %v1195_v22 = vrot.slane %v6456_v34, 1  ;;  %v2319_v9 = vshrl.u32 %v6410_v19, 16 }
  0xe0   :  { %5739 = vst [vmem:[%s8686_s2 + $0x20] sm:$0xff] %v5576_v5   ;;  %v4941_v36 = vadd.f32 %v4940_v42, %v4870_v40  ;;  %v5020_v46 = vmul.f32 %v4870_v40, %v1555_v10  ;;  %5416 = vmatmul.msk.bf16.gmra.mxu2 %vm580_vm3, %v6348_v3  ;;  %vm4368_vm8 = vcmp.ge.s32.totalorder %v4296_v53, 1  ;;  %vm4440_vm9 = vcmp.le.s32.totalorder %v4296_v53, 16 }
  0xe1   :  { %v6458_v42 = vpop.f32.mrf.mxu3  ;;  %v2279_v58 = vadd.s32 %v2278_v24, %v2268_v0  ;;  %vm4512_vm10 = vmand %vm4368_vm8, %vm4440_vm9  ;;  %v2297_v3 = vshrl.u32 %v2293_v32, 16  ;;  %vm2300_vm11 = vc.u32 %v2292_v30, %v2296_v14  ;;  %v407_v0 = vshll.u32 %v6456_v34, 16 }
  0xe2   :  { %v5091_v44 = vadd.f32 %v5090_v49, %v5020_v46  ;;  %8730 = vst [vmem:[#allocation2_spill] sm:$0xff] %v6458_v42  ;;  %v5450_v39 = vsel %vm4512_vm10, 1.0, %v8690_v50  ;;  %v2301_v62 = vsel %vm2300_vm11, 1, %v8696_v4  ;;  %v2302_v49 = vadd.s32 %v2296_v14, %v2292_v30 }
  0xe3   :  { %v1391_v7 = vpop.f32.mrf.mxu2  ;;  %v729_v1 = vpop.f32.mrf.mxu0  ;;  %v2280_v8 = vadd.s32 %v2279_v58, %v2270_v55  ;;  %v2303_v10 = vadd.s32 %v2301_v62, %v2295_v59  ;;  %v405_v37 = vor.u32 %v403_v57, %v6404_v35  ;;  %v6466_v5 = vrot.slane %v407_v0, 1  ;;  %v5783_v0 = vld [vmem:[%s8685_s0 + $0x100] sm:$0xff] }
  0xe4   :  { %v1556_v56 = vadd.f32 %v1391_v7, %v1001_v60  ;;  %v1002_v63 = vpop.f32.mrf.mxu1  ;;  %vm2304_vm12 = vc.u32 %v2302_v49, %v2298_v61  ;;  %v2318_v55 = vand.u32 65535, %v6410_v19  ;;  %v6479_v35 = vsel %vm1163_vm2, %v1193_v43, %v1195_v22 }
  0xe5   :  { %v1003_v12 = vadd.f32 %v1002_v63, %v729_v1  ;;  %v2281_v51 = vshrl.u32 %v2280_v8, 4  ;;  %v2305_v6 = vsel %vm2304_vm12, 1, %v8696_v4  ;;  %v6487_v14 = vmul.u32 14564, %v2319_v9 }
  0xe6   :  { %v4871_v15 = vmul.f32 %v5449_v16, %v1556_v56  ;;  %v2307_v23 = vadd.s32 %v2305_v6, %v2303_v10  ;;  %v6472_v16 = vsel %vm278_vm1, %v405_v37, %v6466_v5  ;;  %v2321_v24 = vmul.u32 14564, %v2318_v55 }
  0xe7   :  { %v2282_v30 = vmul.u32 18, %v2281_v51  ;;  %v6485_v53 = vmul.u32 58254, %v2318_v55  ;;  %v2324_v58 = vmul.u32 58254, %v2319_v9  ;;  %v6490_v7 = vadd.s32 120, %v5948_v45 }
  0xe8   :  { %v4942_v40 = vadd.f32 %v4941_v36, %v4871_v15  ;;  %v5021_v60 = vmul.f32 %v4871_v15, %v1556_v56  ;;  %v2308_v59 = vadd.s32 %v2307_v23, %v2297_v3  ;;  %v2327_v3 = vshll.u32 %v6487_v14, 16 }
  0xe9   :  { %v6482_v36 = vpop.f32.mrf.mxu3  ;;  %v2283_v46 = vsub.s32 %v6402_v18, %v2282_v30  ;;  %v2325_v18 = vshll.u32 %v6485_v53, 16  ;;  %v2326_v62 = vshrl.u32 %v6485_v53, 16  ;;  %v2328_v15 = vshrl.u32 %v6487_v14, 16 }
  0xea   :  { %v5092_v32 = vadd.f32 %v5091_v44, %v5021_v60  ;;  %8731 = vst [vmem:[#allocation3_spill] sm:$0xff] %v6482_v36  ;;  %v2309_v8 = vadd.s32 %v2308_v59, %v2299_v21  ;;  %v2348_v23 = vshrl.u32 %v6490_v7, 16 }
  0xeb   :  { %v1393_v52 = vpop.f32.mrf.mxu2  ;;  %v732_v61 = vpop.f32.mrf.mxu0  ;;  %vm4009_vm13 = vcmp.ne.s32.totalorder %v2283_v46, 0  ;;  %vm4081_vm14 = vcmp.lt.s32.totalorder %v2283_v46, 0  ;;  %v4225_v44 = vadd.s32 18, %v2283_v46  ;;  %vm2329_vm6 = vc.u32 %v2321_v24, %v2325_v18 }
  0xec   :  { %v1557_v43 = vadd.f32 %v1393_v52, %v1003_v12  ;;  %v1005_v1 = vpop.f32.mrf.mxu1  ;;  %vm4153_vm15 = vmand %vm4081_vm14, %vm4009_vm13  ;;  %v2310_v21 = vshrl.u32 %v2309_v8, 4  ;;  %v2330_v37 = vsel %vm2329_vm6, 1, %v8696_v4  ;;  %v2331_v55 = vadd.s32 %v2325_v18, %v2321_v24 }
  0xed   :  { %v1006_v10 = vadd.f32 %v1005_v1, %v732_v61  ;;  %v4297_v57 = vsel %vm4153_vm15, %v4225_v44, %v2283_v46  ;;  %v2332_v6 = vadd.s32 %v2330_v37, %v2324_v58  ;;  %v2353_v1 = vmul.u32 58254, %v2348_v23 }
  0xee   :  { %v5581_v63 = vpack.c.bf16 %v1557_v43, %v1556_v56  ;;  %v4872_v49 = vmul.f32 %v5450_v39, %v1557_v43  ;;  %5334 = vmatmul.msk.bf16.gmra.mxu0 %vm580_vm3, %v6423_v13  ;;  %5392 = vmatmul.msk.bf16.gmra.mxu3 %vm580_vm3, %v5783_v0  ;;  %vm4369_vm0 = vcmp.ge.s32.totalorder %v4297_v57, 1  ;;  %vm4441_vm4 = vcmp.le.s32.totalorder %v4297_v57, 16  ;;  %v6505_v56 = vld [vmem:[%s8685_s0 + $0x88] sm:$0xff] }
  0xef   :  { %5374 = vmatmul.msk.bf16.gmra.mxu1 %vm580_vm3, %v6302_v54  ;;  %vm4513_vm5 = vmand %vm4369_vm0, %vm4441_vm4  ;;  %v2311_v51 = vmul.u32 18, %v2310_v21  ;;  %vm2333_vm7 = vc.u32 %v2331_v55, %v2327_v3  ;;  %v415_v46 = vshll.u32 %v6505_v56, 16 }
  0xf0   :  { %5740 = vst [vmem:[%s8686_s2 + $0x28] sm:$0xff] %v5581_v63   ;;  %v4943_v13 = vadd.f32 %v4942_v40, %v4872_v49  ;;  %v5022_v39 = vmul.f32 %v4872_v49, %v1557_v43  ;;  %5417 = vmatmul.msk.bf16.gmra.mxu2 %vm580_vm3, %v6417_v31  ;;  %v5451_v12 = vsel %vm4513_vm5, 1.0, %v8690_v50  ;;  %v2347_v40 = vand.u32 65535, %v6490_v7 }
  0xf1   :  { %v6516_v30 = vpop.f32.mrf.mxu3  ;;  %v2312_v9 = vsub.s32 %v6407_v26, %v2311_v51  ;;  %v411_v31 = vshrl.u32 %v6456_v34, 16  ;;  %v2334_v24 = vsel %vm2333_vm7, 1, %v8696_v4  ;;  %v2352_v26 = vmul.u32 14564, %v2348_v23 }
  0xf2   :  { %v5093_v60 = vadd.f32 %v5092_v32, %v5022_v39  ;;  %8732 = vst [vmem:[#allocation4_spill] sm:$0xff] %v6516_v30  ;;  %v2350_v32 = vmul.u32 14564, %v2347_v40  ;;  %v2351_v59 = vmul.u32 58254, %v2347_v40  ;;  %v2336_v43 = vadd.s32 %v2334_v24, %v2332_v6  ;;  %v7050_v30 = vld [vmem:[%s8685_s0 + $0xc0] sm:$0xff] }
  0xf3   :  { %v1396_v54 = vpop.f32.mrf.mxu2  ;;  %v734_v52 = vpop.f32.mrf.mxu0  ;;  %vm4010_vm8 = vcmp.ne.s32.totalorder %v2312_v9, 0  ;;  %vm4082_vm9 = vcmp.lt.s32.totalorder %v2312_v9, 0  ;;  %v4226_v58 = vadd.s32 18, %v2312_v9  ;;  %v2356_v0 = vshll.u32 %v2352_v26, 16 }
  0xf4   :  { %v1558_v53 = vadd.f32 %v1396_v54, %v1006_v10  ;;  %v1007_v14 = vpop.f32.mrf.mxu1  ;;  %vm4154_vm10 = vmand %vm4082_vm9, %vm4010_vm8  ;;  %v2337_v18 = vadd.s32 %v2336_v43, %v2326_v62  ;;  %v2354_v3 = vshll.u32 %v2351_v59, 16  ;;  %v2355_v63 = vshrl.u32 %v2351_v59, 16  ;;  %v5784_v43 = vld [vmem:[%s8685_s0 + $0x108] sm:$0xff] }
  0xf5   :  { %v1008_v44 = vadd.f32 %v1007_v14, %v734_v52  ;;  %v4298_v8 = vsel %vm4154_vm10, %v4226_v58, %v2312_v9  ;;  %v2357_v21 = vshrl.u32 %v2352_v26, 16  ;;  %v6529_v23 = vrot.slane %v415_v46, 1 }
  0xf6   :  { %v4873_v61 = vmul.f32 %v5451_v12, %v1558_v53  ;;  %vm4370_vm11 = vcmp.ge.s32.totalorder %v4298_v8, 1  ;;  %vm4442_vm12 = vcmp.le.s32.totalorder %v4298_v8, 16  ;;  %v2338_v57 = vadd.s32 %v2337_v18, %v2328_v15 }
  0xf7   :  { %vm4514_vm13 = vmand %vm4370_vm11, %vm4442_vm12  ;;  %vm2358_vm14 = vc.u32 %v2350_v32, %v2354_v3  ;;  %v2360_v55 = vadd.s32 %v2354_v3, %v2350_v32  ;;  %v1197_v9 = vrot.slane %v6505_v56, 1 }
  0xf8   :  { %v4944_v49 = vadd.f32 %v4943_v13, %v4873_v61  ;;  %v5023_v10 = vmul.f32 %v4873_v61, %v1558_v53  ;;  %v5452_v12 = vsel %vm4514_vm13, 1.0, %v8690_v50  ;;  %v2359_v37 = vsel %vm2358_vm14, 1, %v8696_v4 }
  0xf9   :  { %v6524_v51 = vpop.f32.mrf.mxu3  ;;  %v2339_v6 = vshrl.u32 %v2338_v57, 4  ;;  %v2361_v40 = vadd.s32 %v2359_v37, %v2353_v1  ;;  %v413_v13 = vor.u32 %v411_v31, %v6466_v5  ;;  %vm2362_vm15 = vc.u32 %v2360_v55, %v2356_v0 }
  0xfa   :  { %v5094_v39 = vadd.f32 %v5093_v60, %v5023_v10  ;;  %8733 = vst [vmem:[#allocation5_spill] sm:$0xff] %v6524_v51  ;;  %v6533_v60 = vadd.s32 128, %v5948_v45  ;;  %v2363_v59 = vsel %vm2362_vm15, 1, %v8696_v4  ;;  %v6541_v5 = vadd.s32 136, %v5948_v45 }
  0xfb   :  { %v1398_v62 = vpop.f32.mrf.mxu2  ;;  %v737_v15 = vpop.f32.mrf.mxu0  ;;  %v2340_v24 = vmul.u32 18, %v2339_v6  ;;  %v6538_v32 = vsel %vm278_vm1, %v413_v13, %v6529_v23  ;;  %v2365_v58 = vadd.s32 %v2363_v59, %v2361_v40 }
  0xfc   :  { %v1559_v54 = vadd.f32 %v1398_v62, %v1008_v44  ;;  %v1010_v52 = vpop.f32.mrf.mxu1  ;;  %v2376_v44 = vand.u32 65535, %v6533_v60  ;;  %v2377_v26 = vshrl.u32 %v6533_v60, 16 }
  0xfd   :  { %v1011_v14 = vadd.f32 %v1010_v52, %v737_v15  ;;  %v2341_v61 = vsub.s32 %v6410_v19, %v2340_v24  ;;  %v2366_v19 = vadd.s32 %v2365_v58, %v2355_v63 }
  0xfe   :  { %v5586_v31 = vpack.c.bf16 %v1559_v54, %v1558_v53  ;;  %v4874_v46 = vmul.f32 %v5452_v12, %v1559_v54  ;;  %5335 = vmatmul.msk.bf16.gmra.mxu0 %vm580_vm3, %v6472_v16  ;;  %5393 = vmatmul.msk.bf16.gmra.mxu3 %vm580_vm3, %v5784_v43  ;;  %v6555_v53 = vsel %vm1163_vm2, %v1195_v22, %v1197_v9  ;;  %v2379_v8 = vmul.u32 14564, %v2376_v44 }
  0xff   :  { %5375 = vmatmul.msk.bf16.gmra.mxu1 %vm580_vm3, %v6374_v38  ;;  %vm4011_vm0 = vcmp.ne.s32.totalorder %v2341_v61, 0  ;;  %vm4083_vm4 = vcmp.lt.s32.totalorder %v2341_v61, 0  ;;  %v4227_v22 = vadd.s32 18, %v2341_v61  ;;  %v2367_v10 = vadd.s32 %v2366_v19, %v2357_v21 }
 0x100   :  { %5741 = vst [vmem:[%s8686_s2 + $0x30] sm:$0xff] %v5586_v31   ;;  %v4945_v16 = vadd.f32 %v4944_v49, %v4874_v46  ;;  %v5024_v1 = vmul.f32 %v4874_v46, %v1559_v54  ;;  %5418 = vmatmul.msk.bf16.gmra.mxu2 %vm580_vm3, %v6479_v35  ;;  %vm4155_vm5 = vmand %vm4083_vm4, %vm4011_vm0  ;;  %v2380_v57 = vmul.u32 58254, %v2376_v44  ;;  %v6568_v0 = vmul.u32 14564, %v2377_v26 }
 0x101   :  { %v6566_v3 = vpop.f32.mrf.mxu3  ;;  %v4299_v12 = vsel %vm4155_vm5, %v4227_v22, %v2341_v61  ;;  %v2382_v37 = vmul.u32 58254, %v2377_v26  ;;  %v2405_v38 = vand.u32 65535, %v6541_v5  ;;  %v2406_v35 = vshrl.u32 %v6541_v5, 16 }
 0x102   :  { %v5095_v18 = vadd.f32 %v5094_v39, %v5024_v1  ;;  %8734 = vst [vmem:[#allocation6_spill] sm:$0xff] %v6566_v3  ;;  %vm4371_vm6 = vcmp.ge.s32.totalorder %v4299_v12, 1  ;;  %vm4443_vm7 = vcmp.le.s32.totalorder %v4299_v12, 16  ;;  %v2368_v62 = vshrl.u32 %v2367_v10, 4 }
 0x103   :  { %v1401_v49 = vpop.f32.mrf.mxu2  ;;  %v739_v55 = vpop.f32.mrf.mxu0  ;;  %vm4515_vm8 = vmand %vm4371_vm6, %vm4443_vm7  ;;  %v2383_v6 = vshll.u32 %v2380_v57, 16  ;;  %v2384_v40 = vshrl.u32 %v2380_v57, 16  ;;  %v2385_v21 = vshll.u32 %v6568_v0, 16  ;;  %v2386_v13 = vshrl.u32 %v6568_v0, 16 }
 0x104   :  { %v1560_v63 = vadd.f32 %v1401_v49, %v1011_v14  ;;  %v1012_v39 = vpop.f32.mrf.mxu1  ;;  %v5453_v54 = vsel %vm4515_vm8, 1.0, %v8690_v50  ;;  %v2369_v52 = vmul.u32 18, %v2368_v62  ;;  %v2408_v24 = vmul.u32 14564, %v2405_v38 }
 0x105   :  { %v1013_v15 = vadd.f32 %v1012_v39, %v739_v55  ;;  %vm2387_vm9 = vc.u32 %v2379_v8, %v2383_v6  ;;  %v2389_v31 = vadd.s32 %v2383_v6, %v2379_v8  ;;  %v6575_v46 = vmul.u32 58254, %v2405_v38  ;;  %v6591_v55 = vld [vmem:[%s8685_s0 + $0x90] sm:$0xff] }
 0x106   :  { %v4875_v59 = vmul.f32 %v5453_v54, %v1560_v63  ;;  %v2370_v14 = vsub.s32 %v6490_v7, %v2369_v52  ;;  %v2388_v58 = vsel %vm2387_vm9, 1, %v8696_v4  ;;  %v6579_v43 = vmul.u32 14564, %v2406_v35  ;;  %v5785_v52 = vld [vmem:[%s8685_s0 + $0x110] sm:$0xff] }
 0x107   :  { %v2411_v61 = vmul.u32 58254, %v2406_v35  ;;  %v2390_v1 = vadd.s32 %v2388_v58, %v2382_v37  ;;  %vm2391_vm10 = vc.u32 %v2389_v31, %v2385_v21  ;;  %v2412_v0 = vshll.u32 %v6575_v46, 16 }
 0x108   :  { %v4946_v44 = vadd.f32 %v4945_v16, %v4875_v59  ;;  %v5025_v26 = vmul.f32 %v4875_v59, %v1560_v63  ;;  %vm4012_vm11 = vcmp.ne.s32.totalorder %v2370_v14, 0  ;;  %vm4084_vm12 = vcmp.lt.s32.totalorder %v2370_v14, 0 }
 0x109   :  { %v6581_v19 = vpop.f32.mrf.mxu3  ;;  %v4228_v22 = vadd.s32 18, %v2370_v14  ;;  %v2392_v8 = vsel %vm2391_vm10, 1, %v8696_v4  ;;  %vm4156_vm13 = vmand %vm4084_vm12, %vm4012_vm11  ;;  %v2413_v49 = vshrl.u32 %v6575_v46, 16  ;;  %v2414_v37 = vshll.u32 %v6579_v43, 16 }
 0x10a   :  { %8735 = vst [vmem:[#allocation7_spill] sm:$0xff] %v6581_v19  ;;  %v5096_v10 = vadd.f32 %v5095_v18, %v5025_v26  ;;  %v2394_v7 = vadd.s32 %v2392_v8, %v2390_v1  ;;  %v2415_v35 = vshrl.u32 %v6579_v43, 16  ;;  %vm2416_vm0 = vc.u32 %v2408_v24, %v2412_v0 }
 0x10b   :  { %v1403_v57 = vpop.f32.mrf.mxu2  ;;  %v4300_v16 = vsel %vm4156_vm13, %v4228_v22, %v2370_v14  ;;  %v742_v38 = vpop.f32.mrf.mxu0  ;;  %v2417_v21 = vsel %vm2416_vm0, 1, %v8696_v4  ;;  %v2418_v54 = vadd.s32 %v2412_v0, %v2408_v24  ;;  %v1199_v31 = vrot.slane %v6591_v55, 1 }
 0x10c   :  { %v1561_v12 = vadd.f32 %v1403_v57, %v1013_v15  ;;  %vm4372_vm14 = vcmp.ge.s32.totalorder %v4300_v16, 1  ;;  %vm4444_vm15 = vcmp.le.s32.totalorder %v4300_v16, 16  ;;  %v1015_v18 = vpop.f32.mrf.mxu1  ;;  %v2395_v62 = vadd.s32 %v2394_v7, %v2384_v40 }
 0x10d   :  { %vm4516_vm4 = vmand %vm4372_vm14, %vm4444_vm15  ;;  %v1016_v6 = vadd.f32 %v1015_v18, %v742_v38  ;;  %v2419_v40 = vadd.s32 %v2417_v21, %v2411_v61  ;;  %vm2420_vm5 = vc.u32 %v2418_v54, %v2414_v37  ;;  %v6614_v58 = vadd.s32 144, %v5948_v45 }
 0x10e   :  { %v5591_v39 = vpack.c.bf16 %v1561_v12, %v1560_v63  ;;  %v5454_v15 = vsel %vm4516_vm4, 1.0, %v8690_v50  ;;  %5336 = vmatmul.msk.bf16.gmra.mxu0 %vm580_vm3, %v6538_v32  ;;  %5394 = vmatmul.msk.bf16.gmra.mxu3 %vm580_vm3, %v5785_v52  ;;  %v2396_v59 = vadd.s32 %v2395_v62, %v2386_v13  ;;  %v419_v63 = vshrl.u32 %v6505_v56, 16 }
 0x10f   :  { %v4876_v24 = vmul.f32 %v5454_v15, %v1561_v12  ;;  %5376 = vmatmul.msk.bf16.gmra.mxu1 %vm580_vm3, %v6456_v34  ;;  %v423_v32 = vshll.u32 %v6591_v55, 16  ;;  %v2421_v46 = vsel %vm2420_vm5, 1, %v8696_v4  ;;  %v6625_v8 = vsel %vm1163_vm2, %v1197_v9, %v1199_v31 }
 0x110   :  { %5742 = vst [vmem:[%s8686_s2 + $0x38] sm:$0xff] %v5591_v39   ;;  %5419 = vmatmul.msk.bf16.gmra.mxu2 %vm580_vm3, %v6555_v53  ;;  %v2397_v13 = vshrl.u32 %v2396_v59, 4  ;;  %v421_v14 = vor.u32 %v419_v63, %v6529_v23  ;;  %v2423_v34 = vadd.s32 %v2421_v46, %v2419_v40  ;;  %v2434_v23 = vand.u32 65535, %v6614_v58 }
 0x111   :  { %v4947_v43 = vadd.f32 %v4946_v44, %v4876_v24  ;;  %v5026_v61 = vmul.f32 %v4876_v24, %v1561_v12  ;;  %v6616_v26 = vpop.f32.mrf.mxu3  ;;  %v6618_v1 = vrot.slane %v423_v32, 1  ;;  %v2435_v57 = vshrl.u32 %v6614_v58, 16 }
 0x112   :  { %8736 = vst [vmem:[#allocation8_spill] sm:$0xff] %v6616_v26  ;;  %v2398_v22 = vmul.u32 18, %v2397_v13  ;;  %v2424_v12 = vadd.s32 %v2423_v34, %v2413_v49  ;;  %v2437_v18 = vmul.u32 14564, %v2434_v23  ;;  %v2438_v62 = vmul.u32 58254, %v2434_v23 }
 0x113   :  { %v1406_v53 = vpop.f32.mrf.mxu2  ;;  %v6629_v44 = vadd.f32 %v5096_v10, %v5026_v61  ;;  %v744_v0 = vpop.f32.mrf.mxu0  ;;  %v426_v16 = vsel %vm278_vm1, %v421_v14, %v6618_v1  ;;  %v6634_v39 = vmul.u32 14564, %v2435_v57  ;;  %v2440_v54 = vmul.u32 58254, %v2435_v57 }
 0x114   :  { %v1562_v7 = vadd.f32 %v1406_v53, %v1016_v6  ;;  %v2399_v38 = vsub.s32 %v6533_v60, %v2398_v22  ;;  %v1017_v37 = vpop.f32.mrf.mxu1  ;;  %v2425_v21 = vadd.s32 %v2424_v12, %v2415_v35  ;;  %v6637_v15 = vadd.s32 152, %v5948_v45 }
 0x115   :  { %v1018_v9 = vadd.f32 %v1017_v37, %v744_v0  ;;  %v2441_v49 = vshll.u32 %v2438_v62, 16  ;;  %v2442_v52 = vshrl.u32 %v2438_v62, 16  ;;  %v2443_v60 = vshll.u32 %v6634_v39, 16 }
 0x116   :  { %vm4013_vm6 = vcmp.ne.s32.totalorder %v2399_v38, 0  ;;  %vm4085_vm7 = vcmp.lt.s32.totalorder %v2399_v38, 0  ;;  %v4229_v10 = vadd.s32 18, %v2399_v38  ;;  %v2426_v6 = vshrl.u32 %v2425_v21, 4 }
 0x117   :  { %vm4157_vm8 = vmand %vm4085_vm7, %vm4013_vm6  ;;  %v2444_v59 = vshrl.u32 %v6634_v39, 16  ;;  %vm2445_vm9 = vc.u32 %v2437_v18, %v2441_v49  ;;  %v2447_v63 = vadd.s32 %v2441_v49, %v2437_v18  ;;  %v2463_v35 = vand.u32 65535, %v6637_v15 }
 0x118   :  { %v4301_v40 = vsel %vm4157_vm8, %v4229_v10, %v2399_v38  ;;  %v2427_v24 = vmul.u32 18, %v2426_v6  ;;  %v2446_v32 = vsel %vm2445_vm9, 1, %v8696_v4  ;;  %v2464_v61 = vshrl.u32 %v6637_v15, 16 }
 0x119   :  { %vm4373_vm10 = vcmp.ge.s32.totalorder %v4301_v40, 1  ;;  %vm4445_vm11 = vcmp.le.s32.totalorder %v4301_v40, 16  ;;  %v6643_v13 = vpop.f32.mrf.mxu3  ;;  %v2448_v14 = vadd.s32 %v2446_v32, %v2440_v54  ;;  %vm2449_vm13 = vc.u32 %v2447_v63, %v2443_v60  ;;  %v6671_v60 = vld [vmem:[%s8685_s0 + $0x98] sm:$0xff] }
 0x11a   :  { %vm4517_vm12 = vmand %vm4373_vm10, %vm4445_vm11  ;;  %8737 = vst [vmem:[#allocation9_spill] sm:$0xff] %v6643_v13  ;;  %v2466_v34 = vmul.u32 14564, %v2463_v35  ;;  %v2428_v23 = vsub.s32 %v6541_v5, %v2427_v24  ;;  %v2450_v0 = vsel %vm2449_vm13, 1, %v8696_v4  ;;  %v6649_v18 = vmul.u32 58254, %v2463_v35  ;;  %v5786_v5 = vld [vmem:[%s8685_s0 + $0x118] sm:$0xff] }
 0x11b   :  { %v1408_v46 = vpop.f32.mrf.mxu2  ;;  %v5455_v53 = vsel %vm4517_vm12, 1.0, %v8690_v50  ;;  %v747_v57 = vpop.f32.mrf.mxu0  ;;  %v2452_v37 = vadd.s32 %v2450_v0, %v2448_v14  ;;  %v6651_v62 = vmul.u32 14564, %v2464_v61 }
 0x11c   :  { %v1563_v22 = vadd.f32 %v1408_v46, %v1018_v9  ;;  %v4877_v12 = vmul.f32 %v5455_v53, %v1562_v7  ;;  %v1020_v38 = vpop.f32.mrf.mxu1  ;;  %vm4014_vm14 = vcmp.ne.s32.totalorder %v2428_v23, 0  ;;  %vm4086_vm15 = vcmp.lt.s32.totalorder %v2428_v23, 0 }
 0x11d   :  { %v4230_v21 = vadd.s32 18, %v2428_v23  ;;  %vm4158_vm0 = vmand %vm4086_vm15, %vm4014_vm14  ;;  %v2472_v6 = vshll.u32 %v6651_v62, 16  ;;  %v1021_v24 = vadd.f32 %v1020_v38, %v747_v57 }
 0x11e   :  { %v5596_v39 = vpack.c.bf16 %v1563_v22, %v1562_v7  ;;  %v4948_v54 = vadd.f32 %v4947_v43, %v4877_v12  ;;  %v5027_v10 = vmul.f32 %v4877_v12, %v1562_v7  ;;  %5337 = vmatmul.msk.bf16.gmra.mxu0 %vm580_vm3, %v426_v16  ;;  %5395 = vmatmul.msk.bf16.gmra.mxu3 %vm580_vm3, %v5786_v5  ;;  %v2469_v7 = vmul.u32 58254, %v2464_v61 }
 0x11f   :  { %v4302_v9 = vsel %vm4158_vm0, %v4230_v21, %v2428_v23  ;;  %5377 = vmatmul.msk.bf16.gmra.mxu1 %vm580_vm3, %v6505_v56  ;;  %v2453_v43 = vadd.s32 %v2452_v37, %v2442_v52  ;;  %v2470_v16 = vshll.u32 %v6649_v18, 16  ;;  %v2471_v23 = vshrl.u32 %v6649_v18, 16  ;;  %v6689_v18 = vld [vmem:[%s8685_s0 + $0xd8] sm:$0xff] }
 0x120   :  { %5743 = vst [vmem:[%s8686_s2 + $0x40] sm:$0xff] %v5596_v39   ;;  %5420 = vmatmul.msk.bf16.gmra.mxu2 %vm580_vm3, %v6625_v8  ;;  %v5098_v49 = vadd.f32 %v6629_v44, %v5027_v10  ;;  %vm4374_vm4 = vcmp.ge.s32.totalorder %v4302_v9, 1  ;;  %vm4446_vm5 = vcmp.le.s32.totalorder %v4302_v9, 16  ;;  %v427_v44 = vshrl.u32 %v6591_v55, 16 }
 0x121   :  { %vm4518_vm6 = vmand %vm4374_vm4, %vm4446_vm5  ;;  %v2454_v56 = vadd.s32 %v2453_v43, %v2444_v59  ;;  %vm2474_vm7 = vc.u32 %v2466_v34, %v2470_v16  ;;  %v2476_v40 = vadd.s32 %v2470_v16, %v2466_v34  ;;  %v6676_v61 = vpop.f32.mrf.mxu3  ;;  %v431_v59 = vshll.u32 %v6671_v60, 16 }
 0x122   :  { %v5456_v8 = vsel %vm4518_vm6, 1.0, %v8690_v50  ;;  %v2475_v63 = vsel %vm2474_vm7, 1, %v8696_v4  ;;  %v1201_v34 = vrot.slane %v6671_v60, 1  ;;  %v2473_v39 = vshrl.u32 %v6651_v62, 16  ;;  %v6696_v62 = vld [vmem:[%s8685_s0 + $0xe0] sm:$0xff] }
 0x123   :  { %v1411_v52 = vpop.f32.mrf.mxu2  ;;  %v4878_v35 = vmul.f32 %v5456_v8, %v1563_v22  ;;  %v2455_v32 = vshrl.u32 %v2454_v56, 4  ;;  %v749_v46 = vpop.f32.mrf.mxu0  ;;  %v2477_v14 = vadd.s32 %v2475_v63, %v2469_v7  ;;  %vm2478_vm8 = vc.u32 %v2476_v40, %v2472_v6 }
 0x124   :  { %v1022_v53 = vpop.f32.mrf.mxu1  ;;  %v2479_v57 = vsel %vm2478_vm8, 1, %v8696_v4  ;;  %v429_v38 = vor.u32 %v427_v44, %v6618_v1  ;;  %v6684_v21 = vrot.slane %v431_v59, 1  ;;  %v8689_v10 = vrot.slane %v6689_v18, 1 }
 0x125   :  { %v4949_v0 = vadd.f32 %v4948_v54, %v4878_v35  ;;  %v5028_v12 = vmul.f32 %v4878_v35, %v1563_v22  ;;  %v2456_v37 = vmul.u32 18, %v2455_v32  ;;  %v2481_v22 = vadd.s32 %v2479_v57, %v2477_v14 }
 0x126   :  { %v1219_v1 = vrot.slane %v6696_v62, 1  ;;  %v1564_v9 = vadd.f32 %v1411_v52, %v1021_v24  ;;  %v1023_v43 = vadd.f32 %v1022_v53, %v749_v46  ;;  %v1202_v7 = vsel %vm1163_vm2, %v1199_v31, %v1201_v34 }
 0x127   :  { %v5099_v5 = vadd.f32 %v5098_v49, %v5028_v12  ;;  %v2457_v54 = vsub.s32 %v6614_v58, %v2456_v37  ;;  %v6705_v16 = vadd.s32 160, %v5948_v45  ;;  %v2482_v49 = vadd.s32 %v2481_v22, %v2471_v23 }
 0x128   :  { %v434_v56 = vsel %vm278_vm1, %v429_v38, %v6684_v21  ;;  %v6712_v52 = vadd.s32 168, %v5948_v45  ;;  %v1220_v24 = vsel %vm1163_vm2, %v8689_v10, %v1219_v1  ;;  %v6723_v12 = vadd.s32 176, %v5948_v45 }
 0x129   :  { %vm4015_vm9 = vcmp.ne.s32.totalorder %v2457_v54, 0  ;;  %vm4087_vm10 = vcmp.lt.s32.totalorder %v2457_v54, 0  ;;  %v4231_v58 = vadd.s32 18, %v2457_v54  ;;  %v2492_v40 = vand.u32 65535, %v6705_v16 }
 0x12a   :  { %vm4159_vm11 = vmand %vm4087_vm10, %vm4015_vm9  ;;  %v2493_v8 = vshrl.u32 %v6705_v16, 16  ;;  %v2483_v44 = vadd.s32 %v2482_v49, %v2473_v39  ;;  %v6726_v39 = vpop.f32.mrf.mxu3 }
 0x12b   :  { %v1413_v6 = vpop.f32.mrf.mxu2  ;;  %v4303_v31 = vsel %vm4159_vm11, %v4231_v58, %v2457_v54  ;;  %v752_v35 = vpop.f32.mrf.mxu0  ;;  %v2495_v46 = vmul.u32 14564, %v2492_v40  ;;  %v2496_v14 = vmul.u32 58254, %v2492_v40  ;;  %v2521_v54 = vand.u32 65535, %v6712_v52 }
 0x12c   :  { %v6714_v63 = vadd.f32 %v1413_v6, %v1023_v43  ;;  %vm4375_vm12 = vcmp.ge.s32.totalorder %v4303_v31, 1  ;;  %vm4447_vm13 = vcmp.le.s32.totalorder %v4303_v31, 16  ;;  %v1025_v32 = vpop.f32.mrf.mxu1  ;;  %v2484_v23 = vshrl.u32 %v2483_v44, 4 }
 0x12d   :  { %vm4519_vm14 = vmand %vm4375_vm12, %vm4447_vm13  ;;  %v2497_v59 = vmul.u32 14564, %v2493_v8  ;;  %v2498_v57 = vmul.u32 58254, %v2493_v8  ;;  %v2499_v38 = vshll.u32 %v2496_v14, 16  ;;  %v1026_v58 = vadd.f32 %v1025_v32, %v752_v35 }
 0x12e   :  { %v5601_v53 = vpack.c.bf16 %v6714_v63, %v1564_v9  ;;  %v5457_v37 = vsel %vm4519_vm14, 1.0, %v8690_v50  ;;  %5338 = vmatmul.msk.bf16.gmra.mxu0 %vm580_vm3, %v434_v56  ;;  %5430 = vmatmul.msk.bf16.vlgmr.msra.gmra.mxu3 %vm580_vm3, %v1220_v24  ;;  %v2485_v43 = vmul.u32 18, %v2484_v23  ;;  %v2500_v6 = vshrl.u32 %v2496_v14, 16 }
 0x12f   :  { %v4879_v22 = vmul.f32 %v5457_v37, %v1564_v9  ;;  %5378 = vmatmul.msk.bf16.gmra.mxu1 %vm580_vm3, %v6591_v55  ;;  %v2501_v49 = vshll.u32 %v2497_v59, 16  ;;  %vm2503_vm15 = vc.u32 %v2495_v46, %v2499_v38  ;;  %v2505_v56 = vadd.s32 %v2499_v38, %v2495_v46 }
 0x130   :  { %5744 = vst [vmem:[%s8686_s2 + $0x48] sm:$0xff] %v5601_v53   ;;  %5421 = vmatmul.msk.bf16.gmra.mxu2 %vm580_vm3, %v1202_v7  ;;  %v2522_v40 = vshrl.u32 %v6712_v52, 16  ;;  %v2486_v44 = vsub.s32 %v6637_v15, %v2485_v43  ;;  %v2504_v24 = vsel %vm2503_vm15, 1, %v8696_v4  ;;  %v2524_v35 = vmul.u32 14564, %v2521_v54 }
 0x131   :  { %v4950_v8 = vadd.f32 %v4949_v0, %v4879_v22  ;;  %v5029_v31 = vmul.f32 %v4879_v22, %v1564_v9  ;;  %v2506_v23 = vadd.s32 %v2504_v24, %v2498_v57  ;;  %vm2507_vm0 = vc.u32 %v2505_v56, %v2501_v49  ;;  %v6746_v57 = vld [vmem:[%s8685_s0 + $0xa0] sm:$0xff] }
 0x132   :  { %v2525_v32 = vmul.u32 58254, %v2521_v54  ;;  %vm4016_vm4 = vcmp.ne.s32.totalorder %v2486_v44, 0  ;;  %vm4088_vm5 = vcmp.lt.s32.totalorder %v2486_v44, 0  ;;  %v4232_v7 = vadd.s32 18, %v2486_v44  ;;  %v6749_v24 = vpop.f32.mrf.mxu3 }
 0x133   :  { %v1416_v53 = vpop.f32.mrf.mxu2  ;;  %v5100_v55 = vadd.f32 %v5099_v5, %v5029_v31  ;;  %v754_v14 = vpop.f32.mrf.mxu0  ;;  %vm4160_vm6 = vmand %vm4088_vm5, %vm4016_vm4  ;;  %v2502_v37 = vshrl.u32 %v2497_v59, 16  ;;  %v2508_v0 = vsel %vm2507_vm0, 1, %v8696_v4  ;;  %v2526_v15 = vmul.u32 14564, %v2522_v40 }
 0x134   :  { %v6740_v46 = vadd.f32 %v1416_v53, %v1026_v58  ;;  %v1027_v9 = vpop.f32.mrf.mxu1  ;;  %v4304_v38 = vsel %vm4160_vm6, %v4232_v7, %v2486_v44  ;;  %v2510_v54 = vadd.s32 %v2508_v0, %v2506_v23  ;;  %v2527_v5 = vmul.u32 58254, %v2522_v40 }
 0x135   :  { %v2528_v22 = vshll.u32 %v2525_v32, 16  ;;  %vm4376_vm7 = vcmp.ge.s32.totalorder %v4304_v38, 1  ;;  %vm4448_vm8 = vcmp.le.s32.totalorder %v4304_v38, 16  ;;  %v1028_v43 = vadd.f32 %v1027_v9, %v754_v14 }
 0x136   :  { %v2530_v49 = vshll.u32 %v2526_v15, 16  ;;  %vm4520_vm9 = vmand %vm4376_vm7, %vm4448_vm8  ;;  %v2511_v58 = vadd.s32 %v2510_v54, %v2500_v6  ;;  %v2529_v59 = vshrl.u32 %v2525_v32, 16  ;;  %v435_v44 = vshrl.u32 %v6671_v60, 16 }
 0x137   :  { %vm2532_vm10 = vc.u32 %v2524_v35, %v2528_v22  ;;  %v2534_v56 = vadd.s32 %v2528_v22, %v2524_v35  ;;  %v5458_v31 = vsel %vm4520_vm9, 1.0, %v8690_v50  ;;  %v439_v40 = vshll.u32 %v6746_v57, 16 }
 0x138   :  { %v2533_v53 = vsel %vm2532_vm10, 1, %v8696_v4  ;;  %v4880_v23 = vmul.f32 %v5458_v31, %v6714_v63  ;;  %v2512_v7 = vadd.s32 %v2511_v58, %v2502_v37  ;;  %v2531_v6 = vshrl.u32 %v2526_v15, 16 }
 0x139   :  { %v2535_v14 = vadd.s32 %v2533_v53, %v2527_v5  ;;  %vm2536_vm11 = vc.u32 %v2534_v56, %v2530_v49  ;;  %v437_v35 = vor.u32 %v435_v44, %v6684_v21  ;;  %v6757_v9 = vrot.slane %v439_v40, 1  ;;  %v6770_v21 = vld [vmem:[%s8685_s0 + $0xe8] sm:$0xff] }
 0x13a   :  { %v2537_v32 = vsel %vm2536_vm11, 1, %v8696_v4  ;;  %v6759_v38 = vadd.f32 %v4950_v8, %v4880_v23  ;;  %v5030_v54 = vmul.f32 %v4880_v23, %v6714_v63  ;;  %v2513_v22 = vshrl.u32 %v2512_v7, 4 }
 0x13b   :  { %v1418_v0 = vpop.f32.mrf.mxu2  ;;  %v757_v50 = vpop.f32.mrf.mxu0  ;;  %v2539_v31 = vadd.s32 %v2537_v32, %v2535_v14  ;;  %v442_v5 = vsel %vm278_vm1, %v437_v35, %v6757_v9  ;;  %v8693_v15 = vrot.slane %v6746_v57, 1  ;;  %v8692_v8 = vrot.slane %v6770_v21, 1 }
 0x13c   :  { %v6762_v10 = vadd.f32 %v1418_v0, %v1028_v43  ;;  %v1030_v37 = vpop.f32.mrf.mxu1  ;;  %v6773_v49 = vadd.f32 %v5100_v55, %v5030_v54  ;;  %v2514_v63 = vmul.u32 18, %v2513_v22  ;;  %v2550_v53 = vand.u32 65535, %v6723_v12 }
 0x13d   :  { %v2540_v58 = vadd.s32 %v2539_v31, %v2529_v59  ;;  %v1204_v56 = vsel %vm1163_vm2, %v1201_v34, %v8693_v15  ;;  %v1222_v55 = vsel %vm1163_vm2, %v1219_v1, %v8692_v8  ;;  %v1031_v59 = vadd.f32 %v1030_v37, %v757_v50  ;;  %v6801_v50 = vpop.f32.mrf.mxu3 }
 0x13e   :  { %v5606_v43 = vpack.c.bf16 %v6762_v10, %v6740_v46  ;;  %5339 = vmatmul.msk.bf16.gmra.mxu0 %vm580_vm3, %v442_v5  ;;  %v2515_v44 = vsub.s32 %v6705_v16, %v2514_v63  ;;  %v2551_v34 = vshrl.u32 %v6723_v12, 16  ;;  %5431 = vmatmul.msk.bf16.gmra.mxu3 %vm580_vm3, %v1222_v55  ;;  %v2553_v62 = vmul.u32 14564, %v2550_v53 }
 0x13f   :  { %5379 = vmatmul.msk.bf16.gmra.mxu1 %vm580_vm3, %v6671_v60  ;;  %v2541_v40 = vadd.s32 %v2540_v58, %v2531_v6  ;;  %v2554_v1 = vmul.u32 58254, %v2550_v53  ;;  %v6799_v23 = vadd.s32 184, %v5948_v45  ;;  %v6804_v32 = vadd.s32 192, %v5948_v45 }
 0x140   :  { %5745 = vst [vmem:[%s8686_s2 + $0x50] sm:$0xff] %v5606_v43   ;;  %5422 = vmatmul.msk.bf16.gmra.mxu2 %vm580_vm3, %v1204_v56  ;;  %vm4017_vm12 = vcmp.ne.s32.totalorder %v2515_v44, 0  ;;  %vm4089_vm13 = vcmp.lt.s32.totalorder %v2515_v44, 0  ;;  %v4233_v16 = vadd.s32 18, %v2515_v44  ;;  %v2555_v7 = vmul.u32 14564, %v2551_v34 }
 0x141   :  { %vm4161_vm14 = vmand %vm4089_vm13, %vm4017_vm12  ;;  %v2542_v60 = vshrl.u32 %v2541_v40, 4  ;;  %v2557_v0 = vshll.u32 %v2554_v1, 16  ;;  %v2556_v54 = vmul.u32 58254, %v2551_v34  ;;  %v2558_v5 = vshrl.u32 %v2554_v1, 16 }
 0x142   :  { %v4305_v6 = vsel %vm4161_vm14, %v4233_v16, %v2515_v44  ;;  %v2559_v22 = vshll.u32 %v2555_v7, 16  ;;  %v2560_v43 = vshrl.u32 %v2555_v7, 16  ;;  %v2579_v56 = vand.u32 65535, %v6799_v23 }
 0x143   :  { %v1421_v14 = vpop.f32.mrf.mxu2  ;;  %v759_v31 = vpop.f32.mrf.mxu0  ;;  %vm4377_vm15 = vcmp.ge.s32.totalorder %v4305_v6, 1  ;;  %vm4449_vm0 = vcmp.le.s32.totalorder %v4305_v6, 16  ;;  %v2543_v37 = vmul.u32 18, %v2542_v60  ;;  %vm2561_vm5 = vc.u32 %v2553_v62, %v2557_v0 }
 0x144   :  { %v6806_v35 = vadd.f32 %v1421_v14, %v1031_v59  ;;  %v1032_v63 = vpop.f32.mrf.mxu1  ;;  %vm4521_vm4 = vmand %vm4377_vm15, %vm4449_vm0  ;;  %v2563_v58 = vadd.s32 %v2557_v0, %v2553_v62  ;;  %v8738_v55 = vmov 0.0   ;;  %v2562_v59 = vsel %vm2561_vm5, 1, %v8696_v4 }
 0x145   :  { %v5459_v53 = vsel %vm4521_vm4, 1.0, %v8738_v55  ;;  %v2544_v44 = vsub.s32 %v6712_v52, %v2543_v37  ;;  %v2580_v34 = vshrl.u32 %v6799_v23, 16  ;;  %v2564_v16 = vadd.s32 %v2562_v59, %v2556_v54 }
 0x146   :  { %v4881_v40 = vmul.f32 %v5459_v53, %v6740_v46  ;;  %vm2565_vm6 = vc.u32 %v2563_v58, %v2559_v22  ;;  %v1033_v1 = vadd.f32 %v1032_v63, %v759_v31  ;;  %v2583_v0 = vmul.u32 58254, %v2579_v56 }
 0x147   :  { %vm4018_vm7 = vcmp.ne.s32.totalorder %v2544_v44, 0  ;;  %vm4090_vm8 = vcmp.lt.s32.totalorder %v2544_v44, 0  ;;  %v4234_v7 = vadd.s32 18, %v2544_v44  ;;  %v2566_v62 = vsel %vm2565_vm6, 1, %v8696_v4 }
 0x148   :  { %v4952_v60 = vadd.f32 %v6759_v38, %v4881_v40  ;;  %v5031_v14 = vmul.f32 %v4881_v40, %v6740_v46  ;;  %vm4162_vm9 = vmand %vm4090_vm8, %vm4018_vm7  ;;  %v2568_v52 = vadd.s32 %v2566_v62, %v2564_v16  ;;  %v2582_v8 = vmul.u32 14564, %v2579_v56  ;;  %v6821_v38 = vld [vmem:[%s8685_s0 + $0xa8] sm:$0xff]  ;;  %v6823_v46 = vpop.f32.mrf.mxu3 }
 0x149   :  { %v4306_v6 = vsel %vm4162_vm9, %v4234_v7, %v2544_v44  ;;  %v2584_v15 = vmul.u32 14564, %v2580_v34  ;;  %v2585_v53 = vmul.u32 58254, %v2580_v34  ;;  %v2586_v58 = vshll.u32 %v2583_v0, 16 }
 0x14a   :  { %v5102_v54 = vadd.f32 %v6773_v49, %v5031_v14  ;;  %vm4378_vm10 = vcmp.ge.s32.totalorder %v4306_v6, 1  ;;  %vm4450_vm11 = vcmp.le.s32.totalorder %v4306_v6, 16  ;;  %v2569_v22 = vadd.s32 %v2568_v52, %v2558_v5 }
 0x14b   :  { %v1423_v37 = vpop.f32.mrf.mxu2  ;;  %v762_v31 = vpop.f32.mrf.mxu0  ;;  %vm4522_vm12 = vmand %vm4378_vm10, %vm4450_vm11  ;;  %v2587_v56 = vshrl.u32 %v2583_v0, 16  ;;  %v2588_v44 = vshll.u32 %v2584_v15, 16  ;;  %v2589_v40 = vshrl.u32 %v2584_v15, 16  ;;  %vm2590_vm13 = vc.u32 %v2582_v8, %v2586_v58 }
 0x14c   :  { %v6825_v63 = vadd.f32 %v1423_v37, %v1033_v1  ;;  %v1035_v59 = vpop.f32.mrf.mxu1  ;;  %v5460_v49 = vsel %vm4522_vm12, 1.0, %v8738_v55  ;;  %v2570_v34 = vadd.s32 %v2569_v22, %v2560_v43  ;;  %v2592_v62 = vadd.s32 %v2586_v58, %v2582_v8 }
 0x14d   :  { %v1036_v5 = vadd.f32 %v1035_v59, %v762_v31  ;;  %v4882_v16 = vmul.f32 %v5460_v49, %v6762_v10  ;;  %v2591_v1 = vsel %vm2590_vm13, 1, %v8696_v4  ;;  %v443_v52 = vshrl.u32 %v6746_v57, 16 }
 0x14e   :  { %v5611_v7 = vpack.c.bf16 %v6825_v63, %v6806_v35  ;;  %v2571_v14 = vshrl.u32 %v2570_v34, 4  ;;  %v447_v0 = vshll.u32 %v6821_v38, 16  ;;  %v2593_v6 = vadd.s32 %v2591_v1, %v2585_v53 }
 0x14f   :  { %5380 = vmatmul.msk.bf16.gmra.mxu1 %vm580_vm3, %v6746_v57  ;;  %v6836_v43 = vadd.f32 %v4952_v60, %v4882_v16  ;;  %v5032_v15 = vmul.f32 %v4882_v16, %v6762_v10  ;;  %vm2594_vm14 = vc.u32 %v2592_v62, %v2588_v44  ;;  %v445_v22 = vor.u32 %v443_v52, %v6757_v9  ;;  %v6852_v10 = vld [vmem:[%s8685_s0 + $0xf0] sm:$0xff] }
 0x150   :  { %5746 = vst [vmem:[%s8686_s2 + $0x58] sm:$0xff] %v5611_v7   ;;  %v2572_v8 = vmul.u32 18, %v2571_v14  ;;  %v2595_v37 = vsel %vm2594_vm14, 1, %v8696_v4  ;;  %v6844_v31 = vrot.slane %v447_v0, 1  ;;  %v8695_v60 = vrot.slane %v6821_v38, 1  ;;  %v6876_v0 = vpop.f32.mrf.mxu3 }
 0x151   :  { %v6846_v58 = vadd.f32 %v5102_v54, %v5032_v15  ;;  %v2597_v59 = vadd.s32 %v2595_v37, %v2593_v6  ;;  %v8694_v53 = vrot.slane %v6852_v10, 1  ;;  %v6859_v54 = vadd.s32 200, %v5948_v45 }
 0x152   :  { %v2573_v49 = vsub.s32 %v6723_v12, %v2572_v8  ;;  %v450_v9 = vsel %vm278_vm1, %v445_v22, %v6844_v31  ;;  %v8739_v7 = vrot.slane %v6746_v57, 1  ;;  %v8740_v12 = vrot.slane %v6770_v21, 1 }
 0x153   :  { %v1426_v44 = vpop.f32.mrf.mxu2  ;;  %v764_v34 = vpop.f32.mrf.mxu0  ;;  %v2598_v16 = vadd.s32 %v2597_v59, %v2587_v56  ;;  %5340 = vmatmul.msk.bf16.gmra.mxu0 %vm580_vm3, %v450_v9  ;;  %v2608_v1 = vand.u32 65535, %v6804_v32  ;;  %v2609_v57 = vshrl.u32 %v6804_v32, 16 }
 0x154   :  { %v1206_v62 = vsel %vm1163_vm2, %v8739_v7, %v8695_v60  ;;  %v1224_v14 = vsel %vm1163_vm2, %v8740_v12, %v8694_v53  ;;  %v1037_v52 = vpop.f32.mrf.mxu1  ;;  %vm4019_vm15 = vcmp.ne.s32.totalorder %v2573_v49, 0  ;;  %vm4091_vm0 = vcmp.lt.s32.totalorder %v2573_v49, 0 }
 0x155   :  { %v4235_v56 = vadd.s32 18, %v2573_v49  ;;  %5423 = vmatmul.msk.bf16.gmra.mxu2 %vm580_vm3, %v1206_v62  ;;  %5432 = vmatmul.msk.bf16.gmra.mxu3 %vm580_vm3, %v1224_v14  ;;  %vm4163_vm4 = vmand %vm4091_vm0, %vm4019_vm15  ;;  %v2599_v15 = vadd.s32 %v2598_v16, %v2589_v40  ;;  %v6878_v6 = vadd.f32 %v1426_v44, %v1036_v5  ;;  %v2611_v21 = vmul.u32 14564, %v2608_v1 }
 0x156   :  { %v2612_v8 = vmul.u32 58254, %v2608_v1  ;;  %v2613_v22 = vmul.u32 14564, %v2609_v57  ;;  %v2614_v59 = vmul.u32 58254, %v2609_v57  ;;  %v1038_v9 = vadd.f32 %v1037_v52, %v764_v34 }
 0x157   :  { %v4307_v37 = vsel %vm4163_vm4, %v4235_v56, %v2573_v49  ;;  %v2600_v7 = vshrl.u32 %v2599_v15, 4  ;;  %v2637_v60 = vand.u32 65535, %v6859_v54  ;;  %v2638_v52 = vshrl.u32 %v6859_v54, 16 }
 0x158   :  { %vm4379_vm5 = vcmp.ge.s32.totalorder %v4307_v37, 1  ;;  %vm4451_vm6 = vcmp.le.s32.totalorder %v4307_v37, 16  ;;  %v2615_v62 = vshll.u32 %v2612_v8, 16  ;;  %v2616_v12 = vshrl.u32 %v2612_v8, 16 }
 0x159   :  { %vm4523_vm7 = vmand %vm4379_vm5, %vm4451_vm6  ;;  %v2617_v14 = vshll.u32 %v2613_v22, 16  ;;  %v2618_v53 = vshrl.u32 %v2613_v22, 16  ;;  %v2601_v5 = vmul.u32 18, %v2600_v7  ;;  %v2640_v15 = vmul.u32 14564, %v2637_v60 }
 0x15a   :  { %v5461_v40 = vsel %vm4523_vm7, 1.0, %v8738_v55  ;;  %vm2619_vm8 = vc.u32 %v2611_v21, %v2615_v62  ;;  %v2621_v44 = vadd.s32 %v2615_v62, %v2611_v21 }
 0x15b   :  { %v1428_v16 = vpop.f32.mrf.mxu2  ;;  %v4883_v49 = vmul.f32 %v5461_v40, %v6806_v35  ;;  %v2620_v34 = vsel %vm2619_vm8, 1, %v8696_v4  ;;  %v2602_v56 = vsub.s32 %v6799_v23, %v2601_v5  ;;  %v767_v8 = vpop.f32.mrf.mxu0 }
 0x15c   :  { %v6884_v1 = vadd.f32 %v1428_v16, %v1038_v9  ;;  %v2622_v57 = vadd.s32 %v2620_v34, %v2614_v59  ;;  %vm2623_vm9 = vc.u32 %v2621_v44, %v2617_v14  ;;  %v1040_v37 = vpop.f32.mrf.mxu1  ;;  %v2641_v59 = vmul.u32 58254, %v2637_v60  ;;  %v6904_v44 = vpop.f32.mrf.mxu3 }
 0x15d   :  { %v4954_v22 = vadd.f32 %v6836_v43, %v4883_v49  ;;  %v5033_v21 = vmul.f32 %v4883_v49, %v6806_v35  ;;  %v2624_v7 = vsel %vm2623_vm9, 1, %v8696_v4  ;;  %vm4020_vm10 = vcmp.ne.s32.totalorder %v2602_v56, 0  ;;  %v6900_v35 = vld [vmem:[%s8685_s0 + $0xb0] sm:$0xff] }
 0x15e   :  { %v5616_v62 = vpack.c.bf16 %v6884_v1, %v6878_v6  ;;  %vm4092_vm11 = vcmp.lt.s32.totalorder %v2602_v56, 0  ;;  %v4236_v9 = vadd.s32 18, %v2602_v56  ;;  %v2626_v40 = vadd.s32 %v2624_v7, %v2622_v57 }
 0x15f   :  { %v5104_v23 = vadd.f32 %v6846_v58, %v5033_v21  ;;  %vm4164_vm12 = vmand %vm4092_vm11, %vm4020_vm10  ;;  %v2642_v43 = vmul.u32 14564, %v2638_v52  ;;  %v2643_v14 = vmul.u32 58254, %v2638_v52  ;;  %5381 = vmatmul.msk.bf16.gmra.mxu1 %vm580_vm3, %v6821_v38  ;;  %v1041_v16 = vadd.f32 %v1040_v37, %v767_v8 }
 0x160   :  { %5747 = vst [vmem:[%s8686_s2 + $0x60] sm:$0xff] %v5616_v62   ;;  %v4308_v5 = vsel %vm4164_vm12, %v4236_v9, %v2602_v56  ;;  %v2627_v58 = vadd.s32 %v2626_v40, %v2616_v12  ;;  %v451_v49 = vshrl.u32 %v6821_v38, 16  ;;  %v2644_v60 = vshll.u32 %v2641_v59, 16 }
 0x161   :  { %vm4380_vm13 = vcmp.ge.s32.totalorder %v4308_v5, 1  ;;  %vm4452_vm14 = vcmp.le.s32.totalorder %v4308_v5, 16  ;;  %v2645_v34 = vshrl.u32 %v2641_v59, 16  ;;  %v2646_v57 = vshll.u32 %v2642_v43, 16 }
 0x162   :  { %vm4524_vm15 = vmand %vm4380_vm13, %vm4452_vm14  ;;  %v2628_v52 = vadd.s32 %v2627_v58, %v2618_v53  ;;  %v2647_v21 = vshrl.u32 %v2642_v43, 16  ;;  %v453_v7 = vor.u32 %v451_v49, %v6844_v31  ;;  %vm2648_vm0 = vc.u32 %v2640_v15, %v2644_v60  ;;  %v6918_v31 = vld [vmem:[%s8685_s0 + $0xf8] sm:$0xff] }
 0x163   :  { %v1431_v62 = vpop.f32.mrf.mxu2  ;;  %v5462_v4 = vsel %vm4524_vm15, 1.0, %v8738_v55  ;;  %v2650_v56 = vadd.s32 %v2644_v60, %v2640_v15  ;;  %v455_v12 = vshll.u32 %v6900_v35, 16  ;;  %v8741_v9 = vmov 0   ;;  %v769_v60 = vpop.f32.mrf.mxu0 }
 0x164   :  { %v4884_v8 = vmul.f32 %v5462_v4, %v6825_v63  ;;  %v2629_v37 = vshrl.u32 %v2628_v52, 4  ;;  %v2649_v40 = vsel %vm2648_vm0, 1, %v8741_v9  ;;  %v8698_v15 = vrot.slane %v6918_v31, 1  ;;  %v1042_v52 = vpop.f32.mrf.mxu1 }
 0x165   :  { %v2651_v5 = vadd.s32 %v2649_v40, %v2643_v14  ;;  %vm2652_vm4 = vc.u32 %v2650_v56, %v2646_v57  ;;  %v6913_v53 = vrot.slane %v455_v12, 1  ;;  %v8742_v57 = vrot.slane %v6900_v35, 1 }
 0x166   :  { %v4955_v43 = vadd.f32 %v4954_v22, %v4884_v8  ;;  %v5034_v58 = vmul.f32 %v4884_v8, %v6825_v63  ;;  %v2630_v4 = vmul.u32 18, %v2629_v37  ;;  %v2653_v49 = vsel %vm2652_vm4, 1, %v8741_v9 }
 0x167   :  { %v2655_v59 = vadd.s32 %v2653_v49, %v2651_v5  ;;  %v458_v14 = vsel %vm278_vm1, %v453_v7, %v6913_v53  ;;  %v8743_v56 = vrot.slane %v6821_v38, 1  ;;  %v8744_v22 = vrot.slane %v6852_v10, 1 }
 0x168   :  { %v5105_v8 = vadd.f32 %v5104_v23, %v5034_v58  ;;  %v2631_v37 = vsub.s32 %v6804_v32, %v2630_v4  ;;  %5341 = vmatmul.msk.bf16.gmra.mxu0 %vm580_vm3, %v458_v14  ;;  %v6939_v7 = vadd.s32 208, %v5948_v45  ;;  %v1043_v38 = vadd.f32 %v1042_v52, %v769_v60  ;;  %v6945_v23 = vpop.f32.mrf.mxu3 }
 0x169   :  { %v1208_v12 = vsel %vm1163_vm2, %v8743_v56, %v8742_v57  ;;  %v1226_v63 = vsel %vm1163_vm2, %v8744_v22, %v8698_v15  ;;  %v2656_v40 = vadd.s32 %v2655_v59, %v2645_v34  ;;  %v6943_v5 = vadd.s32 216, %v5948_v45 }
 0x16a   :  { %5424 = vmatmul.msk.bf16.gmra.mxu2 %vm580_vm3, %v1208_v12  ;;  %5433 = vmatmul.msk.bf16.gmra.mxu3 %vm580_vm3, %v1226_v63  ;;  %vm4021_vm5 = vcmp.ne.s32.totalorder %v2631_v37, 0  ;;  %vm4093_vm6 = vcmp.lt.s32.totalorder %v2631_v37, 0  ;;  %v4237_v10 = vadd.s32 18, %v2631_v37  ;;  %v2666_v32 = vand.u32 65535, %v6939_v7 }
 0x16b   :  { %v1433_v58 = vpop.f32.mrf.mxu2  ;;  %vm4165_vm7 = vmand %vm4093_vm6, %vm4021_vm5  ;;  %v2657_v4 = vadd.s32 %v2656_v40, %v2647_v21  ;;  %v6948_v49 = vadd.f32 %v1431_v62, %v1041_v16  ;;  %v2667_v34 = vshrl.u32 %v6939_v7, 16  ;;  %v2695_v57 = vand.u32 65535, %v6943_v5 }
 0x16c   :  { %v6951_v59 = vadd.f32 %v1433_v58, %v1043_v38  ;;  %v4309_v60 = vsel %vm4165_vm7, %v4237_v10, %v2631_v37  ;;  %v2669_v52 = vmul.u32 14564, %v2666_v32  ;;  %v2670_v14 = vmul.u32 58254, %v2666_v32  ;;  %v1045_v13 = vpop.f32.mrf.mxu1 }
 0x16d   :  { %vm4381_vm8 = vcmp.ge.s32.totalorder %v4309_v60, 1  ;;  %vm4453_vm9 = vcmp.le.s32.totalorder %v4309_v60, 16  ;;  %v2658_v56 = vshrl.u32 %v2657_v4, 4  ;;  %v2671_v12 = vmul.u32 14564, %v2667_v34 }
 0x16e   :  { %vm4525_vm10 = vmand %vm4381_vm8, %vm4453_vm9  ;;  %v2672_v22 = vmul.u32 58254, %v2667_v34  ;;  %v2673_v63 = vshll.u32 %v2670_v14, 16  ;;  %v2674_v15 = vshrl.u32 %v2670_v14, 16  ;;  %v5621_v16 = vpack.c.bf16 %v6951_v59, %v6948_v49 }
 0x16f   :  { %v5463_v21 = vsel %vm4525_vm10, 1.0, %v8738_v55  ;;  %v2659_v62 = vmul.u32 18, %v2658_v56  ;;  %v2675_v40 = vshll.u32 %v2671_v12, 16  ;;  %v2676_v37 = vshrl.u32 %v2671_v12, 16  ;;  %5382 = vmatmul.msk.bf16.gmra.mxu1 %vm580_vm3, %v6900_v35 }
 0x170   :  { %v4885_v38 = vmul.f32 %v5463_v21, %v6878_v6  ;;  %vm2677_vm11 = vc.u32 %v2669_v52, %v2673_v63  ;;  %v2679_v10 = vadd.s32 %v2673_v63, %v2669_v52  ;;  %5748 = vst [vmem:[%s8686_s2 + $0x68] sm:$0xff] %v5621_v16   ;;  %v2696_v32 = vshrl.u32 %v6943_v5, 16  ;;  %v772_v21 = vpop.f32.mrf.mxu0  ;;  %v6968_v26 = vpop.f32.mrf.mxu3 }
 0x171   :  { %v2660_v58 = vsub.s32 %v6859_v54, %v2659_v62  ;;  %v2678_v4 = vsel %vm2677_vm11, 1, %v8741_v9  ;;  %v2698_v34 = vmul.u32 14564, %v2695_v57  ;;  %v2699_v60 = vmul.u32 58254, %v2695_v57 }
 0x172   :  { %v4956_v14 = vadd.f32 %v4955_v43, %v4885_v38  ;;  %v5035_v56 = vmul.f32 %v4885_v38, %v6878_v6  ;;  %v2680_v12 = vadd.s32 %v2678_v4, %v2672_v22  ;;  %vm2681_vm12 = vc.u32 %v2679_v10, %v2675_v40  ;;  %v6973_v6 = vld [vmem:[%s8685_s0 + $0xb8] sm:$0xff] }
 0x173   :  { %vm4022_vm13 = vcmp.ne.s32.totalorder %v2660_v58, 0  ;;  %vm4094_vm14 = vcmp.lt.s32.totalorder %v2660_v58, 0  ;;  %v4238_v52 = vadd.s32 18, %v2660_v58  ;;  %v2682_v63 = vsel %vm2681_vm12, 1, %v8741_v9 }
 0x174   :  { %v5106_v16 = vadd.f32 %v5105_v8, %v5035_v56  ;;  %vm4166_vm15 = vmand %vm4094_vm14, %vm4022_vm13  ;;  %v2684_v54 = vadd.s32 %v2682_v63, %v2680_v12  ;;  %v2700_v62 = vmul.u32 14564, %v2696_v32  ;;  %v2701_v19 = vmul.u32 58254, %v2696_v32  ;;  %v1436_v8 = vpop.f32.mrf.mxu2 }
 0x175   :  { %v4310_v43 = vsel %vm4166_vm15, %v4238_v52, %v2660_v58  ;;  %v2702_v57 = vshll.u32 %v2699_v60, 16  ;;  %v2703_v22 = vshrl.u32 %v2699_v60, 16  ;;  %v1046_v40 = vadd.f32 %v1045_v13, %v772_v21 }
 0x176   :  { %vm4382_vm0 = vcmp.ge.s32.totalorder %v4310_v43, 1  ;;  %vm4454_vm4 = vcmp.le.s32.totalorder %v4310_v43, 16  ;;  %v2685_v38 = vadd.s32 %v2684_v54, %v2674_v15  ;;  %v2704_v10 = vshll.u32 %v2700_v62, 16 }
 0x177   :  { %vm4526_vm5 = vmand %vm4382_vm0, %vm4454_vm4  ;;  %v2705_v4 = vshrl.u32 %v2700_v62, 16  ;;  %vm2706_vm6 = vc.u32 %v2698_v34, %v2702_v57  ;;  %v2708_v56 = vadd.s32 %v2702_v57, %v2698_v34  ;;  %v459_v32 = vshrl.u32 %v6900_v35, 16  ;;  %v6991_v57 = vld [vmem:[%s8685_s0 + $0x100] sm:$0xff] }
 0x178   :  { %v5464_v12 = vsel %vm4526_vm5, 1.0, %v8738_v55  ;;  %v2686_v63 = vadd.s32 %v2685_v38, %v2676_v37  ;;  %v2707_v3 = vsel %vm2706_vm6, 1, %v8741_v9  ;;  %v463_v58 = vshll.u32 %v6973_v6, 16 }
 0x179   :  { %v4886_v13 = vmul.f32 %v5464_v12, %v6884_v1  ;;  %v2709_v60 = vadd.s32 %v2707_v3, %v2701_v19  ;;  %vm2710_vm7 = vc.u32 %v2708_v56, %v2704_v10  ;;  %v461_v15 = vor.u32 %v459_v32, %v6913_v53  ;;  %v774_v10 = vpop.f32.mrf.mxu0 }
 0x17a   :  { %v2687_v21 = vshrl.u32 %v2686_v63, 4  ;;  %v2711_v52 = vsel %vm2710_vm7, 1, %v8741_v9  ;;  %v6982_v54 = vrot.slane %v463_v58, 1  ;;  %v8700_v34 = vrot.slane %v6973_v6, 1 }
 0x17b   :  { %v6985_v62 = vadd.f32 %v4956_v14, %v4886_v13  ;;  %v5036_v37 = vmul.f32 %v4886_v13, %v6884_v1  ;;  %v2713_v43 = vadd.s32 %v2711_v52, %v2709_v60  ;;  %v8699_v3 = vrot.slane %v6991_v57, 1  ;;  %v1047_v1 = vpop.f32.mrf.mxu1  ;;  %v7014_v13 = vpop.f32.mrf.mxu3 }
 0x17c   :  { %v2688_v19 = vmul.u32 18, %v2687_v21  ;;  %v466_v53 = vsel %vm278_vm1, %v461_v15, %v6982_v54  ;;  %v8745_v38 = vrot.slane %v6900_v35, 1  ;;  %v8746_v12 = vrot.slane %v6918_v31, 1  ;;  %8747 = vst [vmem:[#allocation10_spill] sm:$0xff] %v7014_v13  ;;  %v1438_v52 = vpop.f32.mrf.mxu2 }
 0x17d   :  { %v7001_v56 = vadd.f32 %v5106_v16, %v5036_v37  ;;  %v2714_v32 = vadd.s32 %v2713_v43, %v2703_v22  ;;  %5342 = vmatmul.msk.bf16.gmra.mxu0 %vm580_vm3, %v466_v53  ;;  %v7011_v58 = vadd.s32 224, %v5948_v45  ;;  %v7017_v16 = vadd.f32 %v1436_v8, %v1046_v40 }
 0x17e   :  { %v1210_v14 = vsel %vm1163_vm2, %v8745_v38, %v8700_v34  ;;  %v1228_v63 = vsel %vm1163_vm2, %v8746_v12, %v8699_v3  ;;  %v2689_v35 = vsub.s32 %v6939_v7, %v2688_v19  ;;  %v1048_v21 = vadd.f32 %v1047_v1, %v774_v10 }
 0x17f   :  { %5425 = vmatmul.msk.bf16.gmra.mxu2 %vm580_vm3, %v1210_v14  ;;  %5434 = vmatmul.msk.bf16.gmra.mxu3 %vm580_vm3, %v1228_v63  ;;  %v2715_v22 = vadd.s32 %v2714_v32, %v2705_v4  ;;  %v2724_v60 = vand.u32 65535, %v7011_v58  ;;  %v2725_v15 = vshrl.u32 %v7011_v58, 16  ;;  %v7024_v7 = vadd.s32 232, %v5948_v45 }
 0x180   :  { %5383 = vmatmul.msk.bf16.gmra.mxu1 %vm580_vm3, %v6973_v6  ;;  %vm4023_vm8 = vcmp.ne.s32.totalorder %v2689_v35, 0  ;;  %vm4095_vm9 = vcmp.lt.s32.totalorder %v2689_v35, 0  ;;  %v4239_v31 = vadd.s32 18, %v2689_v35  ;;  %v7026_v53 = vadd.f32 %v1438_v52, %v1048_v21 }
 0x181   :  { %vm4167_vm10 = vmand %vm4095_vm9, %vm4023_vm8  ;;  %v2716_v37 = vshrl.u32 %v2715_v22, 4  ;;  %v2727_v40 = vmul.u32 14564, %v2724_v60  ;;  %v2728_v8 = vmul.u32 58254, %v2724_v60  ;;  %v2729_v4 = vmul.u32 14564, %v2725_v15 }
 0x182   :  { %v4311_v43 = vsel %vm4167_vm10, %v4239_v31, %v2689_v35  ;;  %v2730_v19 = vmul.u32 58254, %v2725_v15  ;;  %v7029_v38 = vadd.s32 240, %v5948_v45  ;;  %v5626_v12 = vpack.c.bf16 %v7026_v53, %v7017_v16 }
 0x183   :  { %vm4383_vm11 = vcmp.ge.s32.totalorder %v4311_v43, 1  ;;  %vm4455_vm12 = vcmp.le.s32.totalorder %v4311_v43, 16  ;;  %v2717_v14 = vmul.u32 18, %v2716_v37  ;;  %v2731_v10 = vshll.u32 %v2728_v8, 16  ;;  %v777_v37 = vpop.f32.mrf.mxu0 }
 0x184   :  { %vm4527_vm13 = vmand %vm4383_vm11, %vm4455_vm12  ;;  %v2732_v1 = vshrl.u32 %v2728_v8, 16  ;;  %v2733_v32 = vshll.u32 %v2729_v4, 16  ;;  %v2753_v63 = vand.u32 65535, %v7024_v7  ;;  %v2734_v21 = vshrl.u32 %v2729_v4, 16  ;;  %5749 = vst [vmem:[%s8686_s2 + $0x70] sm:$0xff] %v5626_v12   ;;  %v1050_v8 = vpop.f32.mrf.mxu1  ;;  %v7044_v4 = vpop.f32.mrf.mxu3 }
 0x185   :  { %v5465_v35 = vsel %vm4527_vm13, 1.0, %v8738_v55  ;;  %v2718_v22 = vsub.s32 %v6943_v5, %v2717_v14  ;;  %vm2735_vm14 = vc.u32 %v2727_v40, %v2731_v10  ;;  %v2737_v60 = vadd.s32 %v2731_v10, %v2727_v40  ;;  %8748 = vst [vmem:[#allocation11_spill] sm:$0xff] %v7044_v4  ;;  %v1441_v10 = vpop.f32.mrf.mxu2 }
 0x186   :  { %v4887_v15 = vmul.f32 %v5465_v35, %v6948_v49  ;;  %v2736_v31 = vsel %vm2735_vm14, 1, %v8741_v9  ;;  %v2754_v52 = vshrl.u32 %v7024_v7, 16  ;;  %v2757_v14 = vmul.u32 58254, %v2753_v63 }
 0x187   :  { %vm4024_vm15 = vcmp.ne.s32.totalorder %v2718_v22, 0  ;;  %vm4096_vm0 = vcmp.lt.s32.totalorder %v2718_v22, 0  ;;  %v4240_v43 = vadd.s32 18, %v2718_v22  ;;  %v2738_v3 = vadd.s32 %v2736_v31, %v2730_v19 }
 0x188   :  { %v4958_v5 = vadd.f32 %v6985_v62, %v4887_v15  ;;  %v5037_v40 = vmul.f32 %v4887_v15, %v6948_v49  ;;  %vm4168_vm4 = vmand %vm4096_vm0, %vm4024_vm15  ;;  %vm2739_vm5 = vc.u32 %v2737_v60, %v2733_v32  ;;  %v2756_v34 = vmul.u32 14564, %v2753_v63 }
 0x189   :  { %v4312_v35 = vsel %vm4168_vm4, %v4240_v43, %v2718_v22  ;;  %v2740_v12 = vsel %vm2739_vm5, 1, %v8741_v9  ;;  %v2758_v51 = vmul.u32 14564, %v2754_v52  ;;  %v2759_v19 = vmul.u32 58254, %v2754_v52 }
 0x18a   :  { %v5108_v62 = vadd.f32 %v7001_v56, %v5037_v40  ;;  %vm4384_vm6 = vcmp.ge.s32.totalorder %v4312_v35, 1  ;;  %vm4456_vm7 = vcmp.le.s32.totalorder %v4312_v35, 16  ;;  %v2742_v49 = vadd.s32 %v2740_v12, %v2738_v3 }
 0x18b   :  { %vm4528_vm8 = vmand %vm4384_vm6, %vm4456_vm7  ;;  %v2760_v32 = vshll.u32 %v2757_v14, 16  ;;  %v2761_v60 = vshrl.u32 %v2757_v14, 16  ;;  %v2762_v15 = vshll.u32 %v2758_v51, 16  ;;  %v1051_v63 = vadd.f32 %v1050_v8, %v777_v37 }
 0x18c   :  { %v5466_v22 = vsel %vm4528_vm8, 1.0, %v8738_v55  ;;  %v2743_v31 = vadd.s32 %v2742_v49, %v2732_v1  ;;  %v467_v43 = vshrl.u32 %v6973_v6, 16  ;;  %v471_v56 = vshll.u32 %v7050_v30, 16  ;;  %v1052_v49 = vpop.f32.mrf.mxu1 }
 0x18d   :  { %v4888_v36 = vmul.f32 %v5466_v22, %v6951_v59  ;;  %vm2764_vm9 = vc.u32 %v2756_v34, %v2760_v32  ;;  %v2766_v4 = vadd.s32 %v2760_v32, %v2756_v34  ;;  %v8702_v14 = vrot.slane %v7050_v30, 1  ;;  %v7082_v22 = vpop.f32.mrf.mxu3 }
 0x18e   :  { %v2744_v40 = vadd.s32 %v2743_v31, %v2734_v21  ;;  %v2765_v3 = vsel %vm2764_vm9, 1, %v8741_v9  ;;  %v469_v52 = vor.u32 %v467_v43, %v6982_v54  ;;  %v7066_v12 = vrot.slane %v471_v56, 1  ;;  %8750 = vst [vmem:[#allocation12_spill] sm:$0xff] %v7082_v22  ;;  %v1443_v31 = vpop.f32.mrf.mxu2 }
 0x18f   :  { %v7060_v35 = vadd.f32 %v4958_v5, %v4888_v36  ;;  %v5038_v1 = vmul.f32 %v4888_v36, %v6951_v59  ;;  %v2767_v37 = vadd.s32 %v2765_v3, %v2759_v19  ;;  %vm2768_vm10 = vc.u32 %v2766_v4, %v2762_v15  ;;  %v779_v5 = vpop.f32.mrf.mxu0  ;;  %v7079_v4 = vld [vmem:[%s8685_s0 + $0x108] sm:$0xff] }
 0x190   :  { %5384 = vmatmul.msk.bf16.gmra.mxu1 %vm580_vm3, %v7050_v30  ;;  %v2745_v8 = vshrl.u32 %v2744_v40, 4  ;;  %v2769_v34 = vsel %vm2768_vm10, 1, %v8741_v9  ;;  %v8749_v54 = vrot.slane %v6973_v6, 1  ;;  %v2763_v36 = vshrl.u32 %v2758_v51, 16 }
 0x191   :  { %v7073_v32 = vadd.f32 %v5108_v62, %v5038_v1  ;;  %v2771_v59 = vadd.s32 %v2769_v34, %v2767_v37  ;;  %v8701_v19 = vrot.slane %v7079_v4, 1  ;;  %v474_v6 = vsel %vm278_vm1, %v469_v52, %v7066_v12 }
 0x192   :  { %v1212_v21 = vsel %vm1163_vm2, %v8749_v54, %v8702_v14  ;;  %v2746_v15 = vmul.u32 18, %v2745_v8  ;;  %v2782_v62 = vand.u32 65535, %v7029_v38  ;;  %5343 = vmatmul.msk.bf16.gmra.mxu0 %vm580_vm3, %v474_v6  ;;  %v8751_v43 = vrot.slane %v6991_v57, 1 }
 0x193   :  { %5426 = vmatmul.msk.bf16.gmra.mxu2 %vm580_vm3, %v1212_v21  ;;  %v2772_v51 = vadd.s32 %v2771_v59, %v2761_v60  ;;  %v2783_v40 = vshrl.u32 %v7029_v38, 16  ;;  %v1053_v3 = vadd.f32 %v1052_v49, %v779_v5  ;;  %v7096_v52 = vadd.f32 %v1441_v10, %v1051_v63 }
 0x194   :  { %v1230_v56 = vsel %vm1163_vm2, %v8751_v43, %v8701_v19  ;;  %v2747_v1 = vsub.s32 %v7011_v58, %v2746_v15  ;;  %v2785_v37 = vmul.u32 14564, %v2782_v62  ;;  %v2786_v8 = vmul.u32 58254, %v2782_v62  ;;  %v7106_v62 = vld [vmem:[%s8685_s0 + $0xc8] sm:$0xff] }
 0x195   :  { %5435 = vmatmul.msk.bf16.gmra.mxu3 %vm580_vm3, %v1230_v56  ;;  %v2773_v60 = vadd.s32 %v2772_v51, %v2763_v36  ;;  %v2787_v34 = vmul.u32 14564, %v2783_v40  ;;  %v2788_v54 = vmul.u32 58254, %v2783_v40  ;;  %v7098_v21 = vadd.f32 %v1443_v31, %v1053_v3 }
 0x196   :  { %vm4025_vm11 = vcmp.ne.s32.totalorder %v2747_v1, 0  ;;  %vm4097_vm12 = vcmp.lt.s32.totalorder %v2747_v1, 0  ;;  %v4241_v57 = vadd.s32 18, %v2747_v1  ;;  %v2789_v59 = vshll.u32 %v2786_v8, 16  ;;  %v1446_v14 = vpop.f32.mrf.mxu2 }
 0x197   :  { %vm4169_vm13 = vmand %vm4097_vm12, %vm4025_vm11  ;;  %v2774_v6 = vshrl.u32 %v2773_v60, 4  ;;  %v2790_v5 = vshrl.u32 %v2786_v8, 16  ;;  %v2791_v49 = vshll.u32 %v2787_v34, 16  ;;  %v5631_v10 = vpack.c.bf16 %v7098_v21, %v7096_v52  ;;  %v7119_v8 = vpop.f32.mrf.mxu3 }
 0x198   :  { %v4313_v58 = vsel %vm4169_vm13, %v4241_v57, %v2747_v1  ;;  %vm2793_vm14 = vc.u32 %v2785_v37, %v2789_v59  ;;  %v2795_v15 = vadd.s32 %v2789_v59, %v2785_v37  ;;  %v2792_v31 = vshrl.u32 %v2787_v34, 16  ;;  %8752 = vst [vmem:[#allocation13_spill] sm:$0xff] %v7119_v8  ;;  %v782_v59 = vpop.f32.mrf.mxu0 }
 0x199   :  { %vm4385_vm15 = vcmp.ge.s32.totalorder %v4313_v58, 1  ;;  %vm4457_vm0 = vcmp.le.s32.totalorder %v4313_v58, 16  ;;  %v2775_v63 = vmul.u32 18, %v2774_v6  ;;  %v2794_v36 = vsel %vm2793_vm14, 1, %v8741_v9  ;;  %5750 = vst [vmem:[%s8686_s2 + $0x78] sm:$0xff] %v5631_v10   ;;  %v1055_v6 = vpop.f32.mrf.mxu1 }
 0x19a   :  { %vm4529_vm4 = vmand %vm4385_vm15, %vm4457_vm0  ;;  %v2796_v51 = vadd.s32 %v2794_v36, %v2788_v54  ;;  %vm2797_vm5 = vc.u32 %v2795_v15, %v2791_v49  ;;  %v7112_v43 = vadd.s32 248, %v5948_v45  ;;  %v475_v1 = vshrl.u32 %v7050_v30, 16 }
 0x19b   :  { %v5467_v56 = vsel %vm4529_vm4, 1.0, %v8738_v55  ;;  %v2776_v40 = vsub.s32 %v7024_v7, %v2775_v63  ;;  %v2798_v3 = vsel %vm2797_vm5, 1, %v8741_v9  ;;  %v479_v7 = vshll.u32 %v7106_v62, 16 }
 0x19c   :  { %v4889_v37 = vmul.f32 %v5467_v56, %v7017_v16  ;;  %v2800_v60 = vadd.s32 %v2798_v3, %v2796_v51  ;;  %v2811_v34 = vand.u32 65535, %v7112_v43  ;;  %v2812_v54 = vshrl.u32 %v7112_v43, 16 }
 0x19d   :  { %vm4026_vm6 = vcmp.ne.s32.totalorder %v2776_v40, 0  ;;  %vm4098_vm7 = vcmp.lt.s32.totalorder %v2776_v40, 0  ;;  %v4242_v57 = vadd.s32 18, %v2776_v40  ;;  %v1056_v10 = vadd.f32 %v1055_v6, %v782_v59 }
 0x19e   :  { %v4960_v49 = vadd.f32 %v7060_v35, %v4889_v37  ;;  %v5039_v58 = vmul.f32 %v4889_v37, %v7017_v16  ;;  %vm4170_vm8 = vmand %vm4098_vm7, %vm4026_vm6  ;;  %v2801_v15 = vadd.s32 %v2800_v60, %v2790_v5  ;;  %v2814_v36 = vmul.u32 14564, %v2811_v34 }
 0x19f   :  { %v4314_v63 = vsel %vm4170_vm8, %v4242_v57, %v2776_v40  ;;  %v2815_v51 = vmul.u32 58254, %v2811_v34  ;;  %v2816_v56 = vmul.u32 14564, %v2812_v54  ;;  %v2817_v35 = vmul.u32 58254, %v2812_v54 }
 0x1a0   :  { %5385 = vmatmul.msk.bf16.gmra.mxu1 %vm580_vm3, %v7106_v62  ;;  %v5110_v3 = vadd.f32 %v7073_v32, %v5039_v58  ;;  %vm4386_vm9 = vcmp.ge.s32.totalorder %v4314_v63, 1  ;;  %vm4458_vm10 = vcmp.le.s32.totalorder %v4314_v63, 16  ;;  %v2802_v19 = vadd.s32 %v2801_v15, %v2792_v31  ;;  %v7147_v15 = vpop.f32.mrf.mxu3 }
 0x1a1   :  { %vm4530_vm11 = vmand %vm4386_vm9, %vm4458_vm10  ;;  %v2818_v8 = vshll.u32 %v2815_v51, 16  ;;  %v2819_v16 = vshrl.u32 %v2815_v51, 16  ;;  %v2820_v37 = vshll.u32 %v2816_v56, 16  ;;  %v477_v60 = vor.u32 %v475_v1, %v7066_v12  ;;  %8753 = vst [vmem:[#allocation14_spill] sm:$0xff] %v7147_v15 }
 0x1a2   :  { %v5468_v5 = vsel %vm4530_vm11, 1.0, %v8738_v55  ;;  %v2803_v40 = vshrl.u32 %v2802_v19, 4  ;;  %v7131_v34 = vrot.slane %v479_v7, 1  ;;  %v8704_v59 = vrot.slane %v7106_v62, 1  ;;  %v7141_v19 = vld [vmem:[%s8685_s0 + $0x110] sm:$0xff] }
 0x1a3   :  { %v4890_v57 = vmul.f32 %v5468_v5, %v7026_v53  ;;  %vm2822_vm12 = vc.u32 %v2814_v36, %v2818_v8  ;;  %v2824_v32 = vadd.s32 %v2818_v8, %v2814_v36  ;;  %v8703_v12 = vrot.slane %v7141_v19, 1 }
 0x1a4   :  { %v2804_v31 = vmul.u32 18, %v2803_v40  ;;  %v2823_v6 = vsel %vm2822_vm12, 1, %v8741_v9  ;;  %v482_v54 = vsel %vm278_vm1, %v477_v60, %v7131_v34  ;;  %v8754_v36 = vrot.slane %v7050_v30, 1  ;;  %v784_v40 = vpop.f32.mrf.mxu0  ;;  %v1057_v30 = vpop.f32.mrf.mxu1 }
 0x1a5   :  { %v4961_v1 = vadd.f32 %v4960_v49, %v4890_v57  ;;  %v5040_v7 = vmul.f32 %v4890_v57, %v7026_v53  ;;  %v2825_v58 = vadd.s32 %v2823_v6, %v2817_v35  ;;  %vm2826_vm13 = vc.u32 %v2824_v32, %v2820_v37  ;;  %5344 = vmatmul.msk.bf16.gmra.mxu0 %vm580_vm3, %v482_v54  ;;  %v1448_v6 = vpop.f32.mrf.mxu2 }
 0x1a6   :  { %v2805_v8 = vsub.s32 %v7029_v38, %v2804_v31  ;;  %v2827_v63 = vsel %vm2826_vm13, 1, %v8741_v9  ;;  %v1214_v51 = vsel %vm1163_vm2, %v8754_v36, %v8704_v59  ;;  %v8755_v53 = vrot.slane %v7079_v4, 1 }
 0x1a7   :  { %v5111_v35 = vadd.f32 %v5110_v3, %v5040_v7  ;;  %v2821_v37 = vshrl.u32 %v2816_v56, 16  ;;  %v2829_v5 = vadd.s32 %v2827_v63, %v2825_v58  ;;  %5427 = vmatmul.msk.bf16.gmra.mxu2 %vm580_vm3, %v1214_v51  ;;  %v7163_v38 = vadd.s32 256, %v5948_v45 }
 0x1a8   :  { %v1232_v49 = vsel %vm1163_vm2, %v8755_v53, %v8703_v12  ;;  %vm4027_vm14 = vcmp.ne.s32.totalorder %v2805_v8, 0  ;;  %vm4099_vm15 = vcmp.lt.s32.totalorder %v2805_v8, 0  ;;  %v4243_v60 = vadd.s32 18, %v2805_v8 }
 0x1a9   :  { %5436 = vmatmul.msk.bf16.gmra.mxu3 %vm580_vm3, %v1232_v49  ;;  %vm4171_vm0 = vmand %vm4099_vm15, %vm4027_vm14  ;;  %v2830_v57 = vadd.s32 %v2829_v5, %v2819_v16  ;;  %v2840_v4 = vand.u32 65535, %v7163_v38  ;;  %v2841_v3 = vshrl.u32 %v7163_v38, 16  ;;  %v7167_v32 = vadd.f32 %v1446_v14, %v1056_v10  ;;  %v7182_v49 = vld [vmem:[%s8685_s0 + $0xd0] sm:$0xff] }
 0x1aa   :  { %v4315_v56 = vsel %vm4171_vm0, %v4243_v60, %v2805_v8  ;;  %v1058_v31 = vadd.f32 %v1057_v30, %v784_v40  ;;  %v7170_v54 = vadd.s32 264, %v5948_v45  ;;  %v7173_v58 = vadd.s32 272, %v5948_v45 }
 0x1ab   :  { %vm4387_vm4 = vcmp.ge.s32.totalorder %v4315_v56, 1  ;;  %vm4459_vm5 = vcmp.le.s32.totalorder %v4315_v56, 16  ;;  %v2831_v7 = vadd.s32 %v2830_v57, %v2821_v37  ;;  %v2843_v16 = vmul.u32 14564, %v2840_v4 }
 0x1ac   :  { %vm4531_vm6 = vmand %vm4387_vm4, %vm4459_vm5  ;;  %v2844_v63 = vmul.u32 58254, %v2840_v4  ;;  %v2845_v36 = vmul.u32 14564, %v2841_v3  ;;  %v2846_v51 = vmul.u32 58254, %v2841_v3  ;;  %v7176_v10 = vadd.f32 %v1448_v6, %v1058_v31  ;;  %v7191_v6 = vpop.f32.mrf.mxu3  ;;  %v787_v12 = vpop.f32.mrf.mxu0 }
 0x1ad   :  { %v5469_v8 = vsel %vm4531_vm6, 1.0, %v8738_v55  ;;  %v2832_v14 = vshrl.u32 %v2831_v7, 4  ;;  %v2869_v53 = vand.u32 65535, %v7170_v54  ;;  %v2870_v3 = vshrl.u32 %v7170_v54, 16  ;;  %8756 = vst [vmem:[#allocation15_spill] sm:$0xff] %v7191_v6  ;;  %v1060_v59 = vpop.f32.mrf.mxu1  ;;  %v1451_v13 = vpop.f32.mrf.mxu2 }
 0x1ae   :  { %v4891_v37 = vmul.f32 %v5469_v8, %v7096_v52  ;;  %v2847_v5 = vshll.u32 %v2844_v63, 16  ;;  %v2848_v40 = vshrl.u32 %v2844_v63, 16  ;;  %v2849_v30 = vshll.u32 %v2845_v36, 16 }
 0x1af   :  { %v2833_v60 = vmul.u32 18, %v2832_v14  ;;  %v2850_v57 = vshrl.u32 %v2845_v36, 16  ;;  %v5636_v4 = vpack.c.bf16 %v7176_v10, %v7167_v32  ;;  %v2872_v36 = vmul.u32 14564, %v2869_v53 }
 0x1b0   :  { %5386 = vmatmul.msk.bf16.gmra.mxu1 %vm580_vm3, %v7182_v49  ;;  %v4962_v56 = vadd.f32 %v4961_v1, %v4891_v37  ;;  %v5041_v31 = vmul.f32 %v4891_v37, %v7096_v52  ;;  %vm2851_vm7 = vc.u32 %v2843_v16, %v2847_v5  ;;  %v2853_v7 = vadd.s32 %v2847_v5, %v2843_v16 }
 0x1b1   :  { %v2834_v63 = vsub.s32 %v7112_v43, %v2833_v60  ;;  %v2852_v8 = vsel %vm2851_vm7, 1, %v8741_v9  ;;  %5751 = vst [vmem:[%s8686_s2 + $0x80] sm:$0xff] %v5636_v4   ;;  %v2873_v14 = vmul.u32 58254, %v2869_v53  ;;  %v2874_v52 = vmul.u32 14564, %v2870_v3 }
 0x1b2   :  { %v5112_v15 = vadd.f32 %v5111_v35, %v5041_v31  ;;  %v2854_v1 = vadd.s32 %v2852_v8, %v2846_v51  ;;  %vm2855_vm8 = vc.u32 %v2853_v7, %v2849_v30  ;;  %v2875_v5 = vmul.u32 58254, %v2870_v3 }
 0x1b3   :  { %vm4028_vm9 = vcmp.ne.s32.totalorder %v2834_v63, 0  ;;  %vm4100_vm10 = vcmp.lt.s32.totalorder %v2834_v63, 0  ;;  %v4244_v37 = vadd.s32 18, %v2834_v63  ;;  %v2856_v16 = vsel %vm2855_vm8, 1, %v8741_v9 }
 0x1b4   :  { %vm4172_vm11 = vmand %vm4100_vm10, %vm4028_vm9  ;;  %v2858_v43 = vadd.s32 %v2856_v16, %v2854_v1  ;;  %v2876_v60 = vshll.u32 %v2873_v14, 16  ;;  %v2877_v6 = vshrl.u32 %v2873_v14, 16  ;;  %v2878_v4 = vshll.u32 %v2874_v52, 16  ;;  %v7208_v1 = vpop.f32.mrf.mxu3 }
 0x1b5   :  { %v4316_v22 = vsel %vm4172_vm11, %v4244_v37, %v2834_v63  ;;  %v2879_v42 = vshrl.u32 %v2874_v52, 16  ;;  %v1061_v53 = vadd.f32 %v1060_v59, %v787_v12  ;;  %v483_v31 = vshrl.u32 %v7106_v62, 16  ;;  %v7219_v37 = vld [vmem:[%s8685_s0 + $0x118] sm:$0xff] }
 0x1b6   :  { %vm4388_vm12 = vcmp.ge.s32.totalorder %v4316_v22, 1  ;;  %vm4460_vm13 = vcmp.le.s32.totalorder %v4316_v22, 16  ;;  %v2859_v35 = vadd.s32 %v2858_v43, %v2848_v40  ;;  %vm2880_vm14 = vc.u32 %v2872_v36, %v2876_v60 }
 0x1b7   :  { %vm4532_vm15 = vmand %vm4388_vm12, %vm4460_vm13  ;;  %v2881_v51 = vsel %vm2880_vm14, 1, %v8741_v9  ;;  %v2882_v30 = vadd.s32 %v2876_v60, %v2872_v36  ;;  %v487_v7 = vshll.u32 %v7182_v49, 16  ;;  %v1215_v14 = vrot.slane %v7182_v49, 1 }
 0x1b8   :  { %v5470_v3 = vsel %vm4532_vm15, 1.0, %v8738_v55  ;;  %v2860_v8 = vadd.s32 %v2859_v35, %v2850_v57  ;;  %v2883_v63 = vadd.s32 %v2881_v51, %v2875_v5  ;;  %v485_v22 = vor.u32 %v483_v31, %v7131_v34 }
 0x1b9   :  { %v4892_v59 = vmul.f32 %v5470_v3, %v7098_v21  ;;  %vm2884_vm0 = vc.u32 %v2882_v30, %v2878_v4  ;;  %v7206_v12 = vrot.slane %v487_v7, 1  ;;  %v8757_v52 = vrot.slane %v7106_v62, 1  ;;  %v789_v4 = vpop.f32.mrf.mxu0  ;;  %v1062_v62 = vpop.f32.mrf.mxu1 }
 0x1ba   :  { %v2861_v40 = vshrl.u32 %v2860_v8, 4  ;;  %v2885_v36 = vsel %vm2884_vm0, 1, %v8741_v9  ;;  %v1233_v34 = vrot.slane %v7219_v37, 1  ;;  %v8758_v51 = vrot.slane %v7141_v19, 1 }
 0x1bb   :  { %v1216_v57 = vsel %vm1163_vm2, %v8757_v52, %v1215_v14  ;;  %v4963_v16 = vadd.f32 %v4962_v56, %v4892_v59  ;;  %v5042_v43 = vmul.f32 %v4892_v59, %v7098_v21  ;;  %v2887_v5 = vadd.s32 %v2885_v36, %v2883_v63  ;;  %v1453_v52 = vpop.f32.mrf.mxu2 }
 0x1bc   :  { %v490_v60 = vsel %vm278_vm1, %v485_v22, %v7206_v12  ;;  %5428 = vmatmul.msk.bf16.gmra.mxu2 %vm580_vm3, %v1216_v57  ;;  %v2862_v35 = vmul.u32 18, %v2861_v40  ;;  %v1234_v30 = vsel %vm1163_vm2, %v8758_v51, %v1233_v34  ;;  %v7233_v56 = vadd.s32 280, %v5948_v45 }
 0x1bd   :  { %5345 = vmatmul.msk.bf16.gmra.mxu0 %vm580_vm3, %v490_v60  ;;  %v5113_v21 = vadd.f32 %v5112_v15, %v5042_v43  ;;  %v2888_v31 = vadd.s32 %v2887_v5, %v2877_v6  ;;  %5437 = vmatmul.msk.bf16.gmra.mxu3 %vm580_vm3, %v1234_v30  ;;  %v2898_v7 = vand.u32 65535, %v7173_v58  ;;  %v2899_v3 = vshrl.u32 %v7173_v58, 16 }
 0x1be   :  { %v2863_v8 = vsub.s32 %v7163_v38, %v2862_v35  ;;  %v7239_v63 = vadd.f32 %v1451_v13, %v1061_v53  ;;  %v1063_v59 = vadd.f32 %v1062_v62, %v789_v4  ;;  %v2927_v6 = vand.u32 65535, %v7233_v56  ;;  %v7245_v62 = vpop.f32.mrf.mxu3 }
 0x1bf   :  { %v2889_v22 = vadd.s32 %v2888_v31, %v2879_v42  ;;  %v2901_v19 = vmul.u32 14564, %v2898_v7  ;;  %v2902_v40 = vmul.u32 58254, %v2898_v7  ;;  %v2903_v36 = vmul.u32 14564, %v2899_v3 }
 0x1c0   :  { %vm4029_vm4 = vcmp.ne.s32.totalorder %v2863_v8, 0  ;;  %vm4101_vm5 = vcmp.lt.s32.totalorder %v2863_v8, 0  ;;  %v4245_v15 = vadd.s32 18, %v2863_v8  ;;  %v2904_v43 = vmul.u32 58254, %v2899_v3 }
 0x1c1   :  { %vm4173_vm6 = vmand %vm4101_vm5, %vm4029_vm4  ;;  %v2890_v57 = vshrl.u32 %v2889_v22, 4  ;;  %v2905_v5 = vshll.u32 %v2902_v40, 16  ;;  %v2928_v60 = vshrl.u32 %v7233_v56, 16  ;;  %v2906_v13 = vshrl.u32 %v2902_v40, 16 }
 0x1c2   :  { %v4317_v38 = vsel %vm4173_vm6, %v4245_v15, %v2863_v8  ;;  %v2907_v53 = vshll.u32 %v2903_v36, 16  ;;  %v7243_v4 = vadd.f32 %v1453_v52, %v1063_v59  ;;  %v2908_v35 = vshrl.u32 %v2903_v36, 16 }
 0x1c3   :  { %vm4389_vm7 = vcmp.ge.s32.totalorder %v4317_v38, 1  ;;  %vm4461_vm8 = vcmp.le.s32.totalorder %v4317_v38, 16  ;;  %v2891_v42 = vmul.u32 18, %v2890_v57  ;;  %vm2909_vm9 = vc.u32 %v2901_v19, %v2905_v5 }
 0x1c4   :  { %vm4533_vm10 = vmand %vm4389_vm7, %vm4461_vm8  ;;  %v2910_v51 = vsel %vm2909_vm9, 1, %v8741_v9  ;;  %v2911_v30 = vadd.s32 %v2905_v5, %v2901_v19  ;;  %v5641_v31 = vpack.c.bf16 %v7243_v4, %v7239_v63  ;;  %v2931_v59 = vmul.u32 58254, %v2927_v6 }
 0x1c5   :  { %v5471_v7 = vsel %vm4533_vm10, 1.0, %v8738_v55  ;;  %v2892_v3 = vsub.s32 %v7170_v54, %v2891_v42  ;;  %v2912_v8 = vadd.s32 %v2910_v51, %v2904_v43  ;;  %v2930_v40 = vmul.u32 14564, %v2927_v6 }
 0x1c6   :  { %v4893_v22 = vmul.f32 %v5471_v7, %v7167_v32  ;;  %vm2913_vm11 = vc.u32 %v2911_v30, %v2907_v53  ;;  %5752 = vst [vmem:[%s8686_s2 + $0x88] sm:$0xff] %v5641_v31   ;;  %v2932_v36 = vmul.u32 14564, %v2928_v60  ;;  %v2934_v43 = vshll.u32 %v2931_v59, 16 }
 0x1c7   :  { %vm4030_vm12 = vcmp.ne.s32.totalorder %v2892_v3, 0  ;;  %vm4102_vm13 = vcmp.lt.s32.totalorder %v2892_v3, 0  ;;  %v4246_v19 = vadd.s32 18, %v2892_v3  ;;  %v2914_v52 = vsel %vm2913_vm11, 1, %v8741_v9 }
 0x1c8   :  { %v4964_v15 = vadd.f32 %v4963_v16, %v4893_v22  ;;  %v5043_v57 = vmul.f32 %v4893_v22, %v7167_v32  ;;  %vm4174_vm14 = vmand %vm4102_vm13, %vm4030_vm12  ;;  %v2916_v54 = vadd.s32 %v2914_v52, %v2912_v8  ;;  %v2933_v38 = vmul.u32 58254, %v2928_v60  ;;  %v7269_v22 = vpop.f32.mrf.mxu3 }
 0x1c9   :  { %v4318_v5 = vsel %vm4174_vm14, %v4246_v19, %v2892_v3  ;;  %v2936_v53 = vshll.u32 %v2932_v36, 16  ;;  %v2935_v6 = vshrl.u32 %v2931_v59, 16  ;;  %vm2938_vm5 = vc.u32 %v2930_v40, %v2934_v43 }
 0x1ca   :  { %v5114_v42 = vadd.f32 %v5113_v21, %v5043_v57  ;;  %vm4390_vm15 = vcmp.ge.s32.totalorder %v4318_v5, 1  ;;  %vm4462_vm0 = vcmp.le.s32.totalorder %v4318_v5, 16  ;;  %v2917_v51 = vadd.s32 %v2916_v54, %v2906_v13 }
 0x1cb   :  { %vm4534_vm4 = vmand %vm4390_vm15, %vm4462_vm0  ;;  %v2940_v30 = vadd.s32 %v2934_v43, %v2930_v40  ;;  %v491_v31 = vshrl.u32 %v7182_v49, 16  ;;  %v2939_v32 = vsel %vm2938_vm5, 1, %v8741_v9  ;;  %v8759_v8 = vrot.slane %v6689_v18, 1 }
 0x1cc   :  { %v5472_v16 = vsel %vm4534_vm4, 1.0, %v8738_v55  ;;  %v2918_v7 = vadd.s32 %v2917_v51, %v2908_v35  ;;  %v2941_v13 = vadd.s32 %v2939_v32, %v2933_v38  ;;  %v2937_v35 = vshrl.u32 %v2932_v36, 16 }
 0x1cd   :  { %v1218_v21 = vsel %vm1163_vm2, %v1215_v14, %v8759_v8  ;;  %v4894_v60 = vmul.f32 %v5472_v16, %v7176_v10  ;;  %vm2942_vm6 = vc.u32 %v2940_v30, %v2936_v53  ;;  %v493_v3 = vor.u32 %v491_v31, %v7206_v12 }
 0x1ce   :  { %5429 = vmatmul.msk.bf16.gmra.mxu2 %vm580_vm3, %v1218_v21  ;;  %v2919_v59 = vshrl.u32 %v2918_v7, 4  ;;  %v2943_v40 = vsel %vm2942_vm6, 1, %v8741_v9  ;;  %v1235_v18 = vrot.slane %v5997_v41, 1  ;;  %v7281_v36 = vadd.s32 288, %v5948_v45 }
 0x1cf   :  { %v4965_v19 = vadd.f32 %v4964_v15, %v4894_v60  ;;  %v5044_v49 = vmul.f32 %v4894_v60, %v7176_v10  ;;  %v2945_v14 = vadd.s32 %v2943_v40, %v2941_v13  ;;  %v498_v52 = vsel %vm278_vm1, %v493_v3, %v5863_v27  ;;  %v792_v10 = vpop.f32.mrf.mxu0  ;;  %v1065_v15 = vpop.f32.mrf.mxu1 }
 0x1d0   :  { %v2920_v57 = vmul.u32 18, %v2919_v59  ;;  %5346 = vmatmul.msk.bf16.gmra.mxu0 %vm580_vm3, %v498_v52  ;;  %v1236_v12 = vsel %vm1163_vm2, %v1233_v34, %v1235_v18  ;;  %v2956_v27 = vand.u32 65535, %v7281_v36  ;;  %v2957_v5 = vshrl.u32 %v7281_v36, 16  ;;  %v1456_v34 = vpop.f32.mrf.mxu2  ;;  %v1501_v32 = vpop.f32.mrf.mxu3 }
 0x1d1   :  { %v5115_v54 = vadd.f32 %v5114_v42, %v5044_v49  ;;  %v2946_v43 = vadd.s32 %v2945_v14, %v2935_v6  ;;  %5438 = vmatmul.msk.bf16.gmra.mxu3 %vm580_vm3, %v1236_v12  ;;  %v7288_v8 = vadd.s32 296, %v5948_v45  ;;  %v1066_v59 = vadd.f32 %v1065_v15, %v792_v10 }
 0x1d2   :  { %v2921_v41 = vsub.s32 %v7173_v58, %v2920_v57  ;;  %v2959_v51 = vmul.u32 14564, %v2956_v27  ;;  %v2960_v42 = vmul.u32 58254, %v2956_v27  ;;  %v2961_v6 = vmul.u32 14564, %v2957_v5 }
 0x1d3   :  { %v2947_v38 = vadd.s32 %v2946_v43, %v2937_v35  ;;  %v2962_v31 = vmul.u32 58254, %v2957_v5  ;;  %v2985_v10 = vand.u32 65535, %v7288_v8 }
 0x1d4   :  { %vm4031_vm1 = vcmp.ne.s32.totalorder %v2921_v41, 0  ;;  %vm4103_vm7 = vcmp.lt.s32.totalorder %v2921_v41, 0  ;;  %v4247_v37 = vadd.s32 18, %v2921_v41  ;;  %v2963_v16 = vshll.u32 %v2960_v42, 16 }
 0x1d5   :  { %vm4175_vm2 = vmand %vm4103_vm7, %vm4031_vm1  ;;  %v2948_v53 = vshrl.u32 %v2947_v38, 4  ;;  %v2965_v7 = vshll.u32 %v2961_v6, 16  ;;  %v2964_v52 = vshrl.u32 %v2960_v42, 16  ;;  %v2966_v43 = vshrl.u32 %v2961_v6, 16 }
 0x1d6   :  { %v4319_v30 = vsel %vm4175_vm2, %v4247_v37, %v2921_v41  ;;  %vm2967_vm10 = vc.u32 %v2959_v51, %v2963_v16  ;;  %v2969_v13 = vadd.s32 %v2963_v16, %v2959_v51  ;;  %v1582_v51 = vadd.f32 %v1456_v34, %v1066_v59 }
 0x1d7   :  { %vm4391_vm3 = vcmp.ge.s32.totalorder %v4319_v30, 1  ;;  %vm4463_vm8 = vcmp.le.s32.totalorder %v4319_v30, 16  ;;  %v2949_v58 = vmul.u32 18, %v2948_v53  ;;  %v2968_v35 = vsel %vm2967_vm10, 1, %v8741_v9  ;;  %v794_v57 = vpop.f32.mrf.mxu0  ;;  %v1067_v12 = vpop.f32.mrf.mxu1 }
 0x1d8   :  { %vm4535_vm9 = vmand %vm4391_vm3, %vm4463_vm8  ;;  %v2970_v18 = vadd.s32 %v2968_v35, %v2962_v31  ;;  %vm2971_vm14 = vc.u32 %v2969_v13, %v2965_v7  ;;  %v1458_v5 = vpop.f32.mrf.mxu2  ;;  %v2989_v6 = vmul.u32 58254, %v2985_v10  ;;  %v2988_v31 = vmul.u32 14564, %v2985_v10  ;;  %v1503_v16 = vpop.f32.mrf.mxu3 }
 0x1d9   :  { %v5473_v21 = vsel %vm4535_vm9, 1.0, %v8738_v55  ;;  %v2950_v60 = vsub.s32 %v7233_v56, %v2949_v58  ;;  %v2972_v41 = vsel %vm2971_vm14, 1, %v8741_v9  ;;  %v1113_v7 = vadd.f32 %v6726_v39, %v6176_v11 }
 0x1da   :  { %v4895_v3 = vmul.f32 %v5473_v21, %v7239_v63  ;;  %v2974_v27 = vadd.s32 %v2972_v41, %v2970_v18  ;;  %v2992_v59 = vshll.u32 %v2989_v6, 16 }
 0x1db   :  { %vm4032_vm11 = vcmp.ne.s32.totalorder %v2950_v60, 0  ;;  %vm4104_vm12 = vcmp.lt.s32.totalorder %v2950_v60, 0  ;;  %v4248_v40 = vadd.s32 18, %v2950_v60 }
 0x1dc   :  { %v4966_v49 = vadd.f32 %v4965_v19, %v4895_v3  ;;  %v5045_v14 = vmul.f32 %v4895_v3, %v7239_v63  ;;  %vm4176_vm13 = vmand %vm4104_vm12, %vm4032_vm11  ;;  %v1068_v19 = vadd.f32 %v1067_v12, %v794_v57  ;;  %v2986_v63 = vshrl.u32 %v7288_v8, 16 }
 0x1dd   :  { %v4320_v56 = vsel %vm4176_vm13, %v4248_v40, %v2950_v60  ;;  %v2975_v37 = vadd.s32 %v2974_v27, %v2964_v52  ;;  %vm2996_vm5 = vc.u32 %v2988_v31, %v2992_v59  ;;  %v2998_v11 = vadd.s32 %v2992_v59, %v2988_v31 }
 0x1de   :  { %v5116_v15 = vadd.f32 %v5115_v54, %v5045_v14  ;;  %vm4392_vm15 = vcmp.ge.s32.totalorder %v4320_v56, 1  ;;  %vm4464_vm0 = vcmp.le.s32.totalorder %v4320_v56, 16  ;;  %v7300_v42 = vadd.f32 %v1458_v5, %v1068_v19 }
 0x1df   :  { %vm4536_vm4 = vmand %vm4392_vm15, %vm4464_vm0  ;;  %v1111_v54 = vadd.f32 %v6676_v61, %v6154_v25  ;;  %v2976_v30 = vadd.s32 %v2975_v37, %v2966_v43  ;;  %v2990_v58 = vmul.u32 14564, %v2986_v63  ;;  %v2991_v34 = vmul.u32 58254, %v2986_v63  ;;  %v1070_v31 = vpop.f32.mrf.mxu1 }
 0x1e0   :  { %v5474_v38 = vsel %vm4536_vm4, 1.0, %v8738_v55  ;;  %v5646_v13 = vpack.c.bf16 %v7300_v42, %v1582_v51  ;;  %v7313_v25 = vadd.f32 %v1503_v16, %v1113_v7  ;;  %v2997_v39 = vsel %vm2996_vm5, 1, %v8741_v9 }
 0x1e1   :  { %v4896_v53 = vmul.f32 %v5474_v38, %v7243_v4  ;;  %v2977_v3 = vshrl.u32 %v2976_v30, 4  ;;  %v2994_v35 = vshll.u32 %v2990_v58, 16  ;;  %v7308_v18 = vadd.f32 %v1501_v32, %v1111_v54  ;;  %v797_v54 = vpop.f32.mrf.mxu0 }
 0x1e2   :  { %5753 = vst [vmem:[%s8686_s2 + $0x90] sm:$0xff] %v5646_v13   ;;  %v2993_v14 = vshrl.u32 %v2989_v6, 16  ;;  %v2999_v52 = vadd.s32 %v2997_v39, %v2991_v34  ;;  %v2995_v32 = vshrl.u32 %v2990_v58, 16  ;;  %v7325_v5 = vadd.s32 304, %v5948_v45  ;;  %v1506_v58 = vpop.f32.mrf.mxu3 }
 0x1e3   :  { %v4967_v21 = vadd.f32 %v4966_v49, %v4896_v53  ;;  %v5046_v60 = vmul.f32 %v4896_v53, %v7243_v4  ;;  %v2978_v61 = vmul.u32 18, %v2977_v3  ;;  %v5691_v4 = vpack.c.bf16 %v7313_v25, %v7308_v18  ;;  %v1461_v3 = vpop.f32.mrf.mxu2 }
 0x1e4   :  { %vm3000_vm6 = vc.u32 %v2998_v11, %v2994_v35  ;;  %v3014_v37 = vand.u32 65535, %v7325_v5  ;;  %v3015_v53 = vshrl.u32 %v7325_v5, 16 }
 0x1e5   :  { %v5117_v40 = vadd.f32 %v5116_v15, %v5046_v60  ;;  %v2979_v49 = vsub.s32 %v7281_v36, %v2978_v61  ;;  %v3001_v57 = vsel %vm3000_vm6, 1, %v8741_v9  ;;  %5762 = vst [vmem:[%s8686_s2 + $0xd8] sm:$0xff] %v5691_v4  }
 0x1e6   :  { %v3003_v56 = vadd.s32 %v3001_v57, %v2999_v52  ;;  %v3017_v16 = vmul.u32 14564, %v3014_v37  ;;  %v3018_v7 = vmul.u32 58254, %v3014_v37  ;;  %v3019_v60 = vmul.u32 14564, %v3015_v53 }
 0x1e7   :  { %vm4033_vm1 = vcmp.ne.s32.totalorder %v2979_v49, 0  ;;  %vm4105_vm7 = vcmp.lt.s32.totalorder %v2979_v49, 0  ;;  %v4249_v12 = vadd.s32 18, %v2979_v49 }
 0x1e8   :  { %vm4177_vm2 = vmand %vm4105_vm7, %vm4033_vm1  ;;  %v3004_v41 = vadd.s32 %v3003_v56, %v2993_v14  ;;  %v3023_v59 = vshll.u32 %v3019_v60, 16  ;;  %v3022_v39 = vshrl.u32 %v3018_v7, 16 }
 0x1e9   :  { %v4321_v43 = vsel %vm4177_vm2, %v4249_v12, %v2979_v49  ;;  %v799_v49 = vpop.f32.mrf.mxu0  ;;  %v1072_v12 = vpop.f32.mrf.mxu1 }
 0x1ea   :  { %vm4393_vm3 = vcmp.ge.s32.totalorder %v4321_v43, 1  ;;  %vm4465_vm8 = vcmp.le.s32.totalorder %v4321_v43, 16  ;;  %v3005_v36 = vadd.s32 %v3004_v41, %v2995_v32  ;;  %v3024_v32 = vshrl.u32 %v3019_v60, 16  ;;  %v1508_v56 = vpop.f32.mrf.mxu3 }
 0x1eb   :  { %vm4537_vm9 = vmand %vm4393_vm3, %vm4465_vm8  ;;  %v1118_v43 = vadd.f32 %v6801_v50, %v6239_v20  ;;  %v1071_v41 = vadd.f32 %v1070_v31, %v797_v54 }
 0x1ec   :  { %v5475_v10 = vsel %vm4537_vm9, 1.0, %v8738_v55  ;;  %v3006_v27 = vshrl.u32 %v3005_v36, 4  ;;  %v1116_v36 = vadd.f32 %v6749_v24, %v6214_v47 }
 0x1ed   :  { %v4897_v15 = vmul.f32 %v5475_v10, %v1582_v51 }
 0x1ee   :  { %v3007_v38 = vmul.u32 18, %v3006_v27  ;;  %v1463_v27 = vpop.f32.mrf.mxu2  ;;  %v7344_v37 = vadd.f32 %v1506_v58, %v1116_v36 }
 0x1ef   :  { %v4968_v19 = vadd.f32 %v4967_v21, %v4897_v15  ;;  %v5047_v63 = vmul.f32 %v4897_v15, %v1582_v51  ;;  %v3020_v51 = vmul.u32 58254, %v3015_v53  ;;  %v3021_v21 = vshll.u32 %v3018_v7, 16 }
 0x1f0   :  { %v3008_v30 = vsub.s32 %v7288_v8, %v3007_v38  ;;  %v7340_v38 = vadd.s32 312, %v5948_v45  ;;  %v1584_v53 = vadd.f32 %v1461_v3, %v1071_v41 }
 0x1f1   :  { %v5118_v6 = vadd.f32 %v5117_v40, %v5047_v63  ;;  %vm3025_vm15 = vc.u32 %v3017_v16, %v3021_v21  ;;  %v3027_v35 = vadd.s32 %v3021_v21, %v3017_v16  ;;  %v1073_v63 = vadd.f32 %v1072_v12, %v799_v49 }
 0x1f2   :  { %vm4034_vm10 = vcmp.ne.s32.totalorder %v3008_v30, 0  ;;  %vm4106_vm11 = vcmp.lt.s32.totalorder %v3008_v30, 0  ;;  %v4250_v13 = vadd.s32 18, %v3008_v30  ;;  %v3026_v8 = vsel %vm3025_vm15, 1, %v8741_v9 }
 0x1f3   :  { %vm4178_vm12 = vmand %vm4106_vm11, %vm4034_vm10  ;;  %v3028_v61 = vadd.s32 %v3026_v8, %v3020_v51  ;;  %vm3029_vm4 = vc.u32 %v3027_v35, %v3023_v59  ;;  %v3043_v20 = vand.u32 65535, %v7340_v38  ;;  %v3044_v50 = vshrl.u32 %v7340_v38, 16 }
 0x1f4   :  { %v4322_v34 = vsel %vm4178_vm12, %v4250_v13, %v3008_v30  ;;  %v3030_v4 = vsel %vm3029_vm4, 1, %v8741_v9  ;;  %v7346_v30 = vadd.f32 %v1463_v27, %v1073_v63  ;;  %v7354_v16 = vadd.s32 432, %v5948_v45 }
 0x1f5   :  { %vm4394_vm13 = vcmp.ge.s32.totalorder %v4322_v34, 1  ;;  %vm4466_vm14 = vcmp.le.s32.totalorder %v4322_v34, 16  ;;  %v3032_v57 = vadd.s32 %v3030_v4, %v3028_v61  ;;  %v3046_v54 = vmul.u32 14564, %v3043_v20 }
 0x1f6   :  { %vm4538_vm0 = vmand %vm4394_vm13, %vm4466_vm14  ;;  %v3047_v31 = vmul.u32 58254, %v3043_v20  ;;  %v3048_v7 = vmul.u32 14564, %v3044_v50  ;;  %v3049_v3 = vmul.u32 58254, %v3044_v50  ;;  %v3478_v34 = vand.u32 65535, %v7354_v16 }
 0x1f7   :  { %v5476_v40 = vsel %vm4538_vm0, 1.0, %v8738_v55  ;;  %v3033_v15 = vadd.s32 %v3032_v57, %v3022_v39  ;;  %v7376_v27 = vadd.s32 440, %v5948_v45 }
 0x1f8   :  { %v4898_v11 = vmul.f32 %v5476_v40, %v7300_v42  ;;  %v3050_v60 = vshll.u32 %v3047_v31, 16  ;;  %v3052_v51 = vshll.u32 %v3048_v7, 16  ;;  %v7367_v39 = vmul.u32 58254, %v3478_v34 }
 0x1fa   :  { %v4969_v14 = vadd.f32 %v4968_v19, %v4898_v11  ;;  %v5048_v52 = vmul.f32 %v4898_v11, %v7300_v42  ;;  %v7342_v19 = vadd.f32 %v1508_v56, %v1118_v43  ;;  %v3034_v42 = vadd.s32 %v3033_v15, %v3024_v32 }
 0x1fb   :  { %vm3054_vm5 = vc.u32 %v3046_v54, %v3050_v60  ;;  %v3056_v21 = vadd.s32 %v3050_v60, %v3046_v54  ;;  %v3479_v11 = vshrl.u32 %v7354_v16, 16  ;;  %v3481_v56 = vmul.u32 14564, %v3478_v34  ;;  %v1075_v54 = vpop.f32.mrf.mxu1 }
 0x1fc   :  { %v5119_v10 = vadd.f32 %v5118_v6, %v5048_v52  ;;  %v3035_v47 = vshrl.u32 %v3034_v42, 4  ;;  %v5696_v24 = vpack.c.bf16 %v7342_v19, %v7344_v37  ;;  %v5651_v6 = vpack.c.bf16 %v7346_v30, %v1584_v53 }
 0x1fd   :  { %v3055_v8 = vsel %vm3054_vm5, 1, %v8741_v9  ;;  %vm3058_vm2 = vc.u32 %v3056_v21, %v3052_v51  ;;  %v3053_v52 = vshrl.u32 %v3048_v7, 16  ;;  %v7370_v57 = vmul.u32 14564, %v3479_v11 }
 0x1fe   :  { %v3036_v58 = vmul.u32 18, %v3035_v47  ;;  %5763 = vst [vmem:[%s8686_s2 + $0xe0] sm:$0xff] %v5696_v24   ;;  %v3057_v40 = vadd.s32 %v3055_v8, %v3049_v3  ;;  %v3059_v61 = vsel %vm3058_vm2, 1, %v8741_v9  ;;  %v3485_v43 = vshll.u32 %v7367_v39, 16  ;;  %v1466_v3 = vpop.f32.mrf.mxu2 }
 0x1ff   :  { %5754 = vst [vmem:[%s8686_s2 + $0x98] sm:$0xff] %v5651_v6   ;;  %v7381_v42 = vadd.s32 320, %v5948_v45  ;;  %v3487_v20 = vshll.u32 %v7370_v57, 16  ;;  %v3484_v7 = vmul.u32 58254, %v3479_v11  ;;  %v3508_v21 = vshrl.u32 %v7376_v27, 16 }
 0x200   :  { %v3037_v13 = vsub.s32 %v7325_v5, %v3036_v58  ;;  %v3051_v5 = vshrl.u32 %v3047_v31, 16  ;;  %v3061_v4 = vadd.s32 %v3059_v61, %v3057_v40  ;;  %vm3489_vm10 = vc.u32 %v3481_v56, %v3485_v43 }
 0x201   :  { %v3491_v47 = vadd.s32 %v3485_v43, %v3481_v56  ;;  %v3072_v24 = vand.u32 65535, %v7381_v42  ;;  %v3507_v31 = vand.u32 65535, %v7376_v27  ;;  %v3490_v60 = vsel %vm3489_vm10, 1, %v8741_v9 }
 0x202   :  { %vm4035_vm6 = vcmp.ne.s32.totalorder %v3037_v13, 0  ;;  %vm4107_vm1 = vcmp.lt.s32.totalorder %v3037_v13, 0  ;;  %v4251_v59 = vadd.s32 18, %v3037_v13  ;;  %v3062_v12 = vadd.s32 %v3061_v4, %v3051_v5 }
 0x203   :  { %vm4179_vm7 = vmand %vm4107_vm1, %vm4035_vm6  ;;  %v3075_v58 = vmul.u32 14564, %v3072_v24  ;;  %vm3493_vm11 = vc.u32 %v3491_v47, %v3487_v20  ;;  %v7392_v40 = vadd.f32 %v6823_v46, %v6284_v17  ;;  %v7394_v61 = vmul.u32 58254, %v3507_v31 }
 0x204   :  { %v4323_v35 = vsel %vm4179_vm7, %v4251_v59, %v3037_v13  ;;  %v3063_v15 = vadd.s32 %v3062_v12, %v3053_v52  ;;  %v3492_v11 = vadd.s32 %v3490_v60, %v3484_v7  ;;  %v3494_v5 = vsel %vm3493_vm11, 1, %v8741_v9  ;;  %v1511_v52 = vpop.f32.mrf.mxu3 }
 0x205   :  { %vm4395_vm3 = vcmp.ge.s32.totalorder %v4323_v35, 1  ;;  %vm4467_vm8 = vcmp.le.s32.totalorder %v4323_v35, 16  ;;  %v7398_v56 = vmul.u32 14564, %v3508_v21  ;;  %v7401_v17 = vadd.s32 448, %v5948_v45 }
 0x206   :  { %vm4539_vm9 = vmand %vm4395_vm3, %vm4467_vm8  ;;  %v3064_v50 = vshrl.u32 %v3063_v15, 4  ;;  %v3514_v43 = vshll.u32 %v7394_v61, 16  ;;  %v7407_v20 = vadd.s32 328, %v5948_v45  ;;  %v3496_v7 = vadd.s32 %v3494_v5, %v3492_v11 }
 0x207   :  { %v5477_v49 = vsel %vm4539_vm9, 1.0, %v8738_v55  ;;  %v3513_v11 = vmul.u32 58254, %v3508_v21 }
 0x208   :  { %v4899_v32 = vmul.f32 %v5477_v49, %v1584_v53  ;;  %v3065_v6 = vmul.u32 18, %v3064_v50  ;;  %v1123_v50 = vadd.f32 %v6876_v0, %v6307_v28  ;;  %v1468_v0 = vpop.f32.mrf.mxu2 }
 0x20a   :  { %v7373_v41 = vadd.f32 %v4969_v14, %v4899_v32  ;;  %v5049_v36 = vmul.f32 %v4899_v32, %v1584_v53  ;;  %v3073_v14 = vshrl.u32 %v7381_v42, 16  ;;  %v802_v53 = vpop.f32.mrf.mxu0  ;;  %v3066_v13 = vsub.s32 %v7340_v38, %v3065_v6 }
 0x20b   :  { %v3510_v32 = vmul.u32 14564, %v3507_v31  ;;  %v1077_v31 = vpop.f32.mrf.mxu1  ;;  %v1076_v60 = vadd.f32 %v1075_v54, %v802_v53 }
 0x20c   :  { %v7378_v63 = vadd.f32 %v5119_v10, %v5049_v36  ;;  %v3076_v10 = vmul.u32 58254, %v3072_v24  ;;  %v3077_v51 = vmul.u32 14564, %v3073_v14  ;;  %v3078_v34 = vmul.u32 58254, %v3073_v14 }
 0x20d   :  { %vm4036_vm12 = vcmp.ne.s32.totalorder %v3066_v13, 0  ;;  %vm4108_vm13 = vcmp.lt.s32.totalorder %v3066_v13, 0  ;;  %v4252_v8 = vadd.s32 18, %v3066_v13  ;;  %vm3518_vm1 = vc.u32 %v3510_v32, %v3514_v43 }
 0x20e   :  { %v3079_v59 = vshll.u32 %v3076_v10, 16  ;;  %v3081_v35 = vshll.u32 %v3077_v51, 16  ;;  %vm4180_vm14 = vmand %vm4108_vm13, %vm4036_vm12  ;;  %v3080_v46 = vshrl.u32 %v3076_v10, 16  ;;  %v3082_v24 = vshrl.u32 %v3077_v51, 16 }
 0x20f   :  { %v4324_v4 = vsel %vm4180_vm14, %v4252_v8, %v3066_v13  ;;  %v3488_v10 = vshrl.u32 %v7370_v57, 16  ;;  %v3536_v13 = vand.u32 65535, %v7401_v17  ;;  %v3516_v51 = vshll.u32 %v7398_v56, 16 }
 0x210   :  { %vm3083_vm15 = vc.u32 %v3075_v58, %v3079_v59  ;;  %v3085_v38 = vadd.s32 %v3079_v59, %v3075_v58  ;;  %vm4396_vm0 = vcmp.ge.s32.totalorder %v4324_v4, 1  ;;  %vm4468_vm4 = vcmp.le.s32.totalorder %v4324_v4, 16 }
 0x211   :  { %v3084_v49 = vsel %vm3083_vm15, 1, %v8741_v9  ;;  %vm4540_vm5 = vmand %vm4396_vm0, %vm4468_vm4  ;;  %v3486_v58 = vshrl.u32 %v7367_v39, 16  ;;  %v3520_v8 = vadd.s32 %v3514_v43, %v3510_v32  ;;  %v3537_v39 = vshrl.u32 %v7401_v17, 16 }
 0x212   :  { %v3086_v12 = vadd.s32 %v3084_v49, %v3078_v34  ;;  %vm3087_vm6 = vc.u32 %v3085_v38, %v3081_v35  ;;  %v5478_v36 = vsel %vm4540_vm5, 1.0, %v8738_v55  ;;  %v804_v6 = vpop.f32.mrf.mxu0  ;;  %v3101_v38 = vand.u32 65535, %v7407_v20 }
 0x213   :  { %v3088_v15 = vsel %vm3087_vm6, 1, %v8741_v9  ;;  %v4900_v47 = vmul.f32 %v5478_v36, %v7346_v30  ;;  %v1078_v35 = vadd.f32 %v1077_v31, %v804_v6  ;;  %v7428_v4 = vmul.u32 58254, %v3536_v13  ;;  %v1513_v36 = vpop.f32.mrf.mxu3 }
 0x214   :  { %v3090_v14 = vadd.s32 %v3088_v15, %v3086_v12  ;;  %v3104_v12 = vmul.u32 14564, %v3101_v38  ;;  %v3519_v32 = vsel %vm3518_vm1, 1, %v8741_v9  ;;  %vm7431_vm7 = vc.u32 %v3520_v8, %v3516_v51 }
 0x215   :  { %v7416_v34 = vadd.f32 %v7373_v41, %v4900_v47  ;;  %v5050_v59 = vmul.f32 %v4900_v47, %v7346_v30  ;;  %v1586_v41 = vadd.f32 %v1466_v3, %v1076_v60  ;;  %v7425_v5 = vadd.f32 %v1468_v0, %v1078_v35 }
 0x216   :  { %v3091_v28 = vadd.s32 %v3090_v14, %v3080_v46  ;;  %v3102_v30 = vshrl.u32 %v7407_v20, 16  ;;  %v3105_v46 = vmul.u32 58254, %v3101_v38  ;;  %v3539_v3 = vmul.u32 14564, %v3536_v13 }
 0x217   :  { %v7423_v53 = vadd.f32 %v7378_v63, %v5050_v59  ;;  %v5656_v63 = vpack.c.bf16 %v7425_v5, %v1586_v41  ;;  %v7436_v15 = vmul.u32 14564, %v3537_v39  ;;  %v7439_v14 = vadd.f32 %v1511_v52, %v7392_v40 }
 0x218   :  { %v3092_v54 = vadd.s32 %v3091_v28, %v3082_v24  ;;  %v3106_v21 = vmul.u32 14564, %v3102_v30  ;;  %v3108_v24 = vshll.u32 %v3105_v46, 16  ;;  %v3107_v6 = vmul.u32 58254, %v3102_v30 }
 0x219   :  { %5755 = vst [vmem:[%s8686_s2 + $0xa0] sm:$0xff] %v5656_v63   ;;  %v7444_v60 = vadd.f32 %v1513_v36, %v1123_v50  ;;  %v3543_v59 = vshll.u32 %v7428_v4, 16  ;;  %v3497_v0 = vadd.s32 %v3496_v7, %v3486_v58  ;;  %v3521_v51 = vadd.s32 %v3519_v32, %v3513_v11 }
 0x21a   :  { %v3093_v49 = vshrl.u32 %v3092_v54, 4  ;;  %v3110_v31 = vshll.u32 %v3106_v21, 16  ;;  %vm3112_vm2 = vc.u32 %v3104_v12, %v3108_v24  ;;  %v3114_v13 = vadd.s32 %v3108_v24, %v3104_v12  ;;  %v807_v63 = vpop.f32.mrf.mxu0 }
 0x21b   :  { %v3113_v8 = vsel %vm3112_vm2, 1, %v8741_v9  ;;  %v5701_v40 = vpack.c.bf16 %v7444_v60, %v7439_v14  ;;  %v3523_v52 = vsel %vm7431_vm7, 1, %v8741_v9  ;;  %v3545_v35 = vshll.u32 %v7436_v15, 16 }
 0x21c   :  { %v3094_v47 = vmul.u32 18, %v3093_v49  ;;  %v3115_v38 = vadd.s32 %v3113_v8, %v3107_v6  ;;  %vm3116_vm10 = vc.u32 %v3114_v13, %v3110_v31  ;;  %vm7458_vm11 = vc.u32 %v3539_v3, %v3543_v59 }
 0x21d   :  { %5764 = vst [vmem:[%s8686_s2 + $0xe8] sm:$0xff] %v5701_v40   ;;  %v3549_v7 = vadd.s32 %v3543_v59, %v3539_v3  ;;  %v3117_v11 = vsel %vm3116_vm10, 1, %v8741_v9  ;;  %v3111_v30 = vshrl.u32 %v3106_v21, 16  ;;  %v7464_v12 = vadd.s32 336, %v5948_v45  ;;  %v1080_v3 = vpop.f32.mrf.mxu1 }
 0x21e   :  { %v3095_v28 = vsub.s32 %v7381_v42, %v3094_v47  ;;  %v3109_v42 = vshrl.u32 %v3105_v46, 16  ;;  %v3119_v49 = vadd.s32 %v3117_v11, %v3115_v38  ;;  %v3498_v46 = vadd.s32 %v3497_v0, %v3488_v10  ;;  %v1471_v10 = vpop.f32.mrf.mxu2 }
 0x21f   :  { %v3542_v36 = vmul.u32 58254, %v3537_v39  ;;  %v3515_v47 = vshrl.u32 %v7394_v61, 16  ;;  %v3525_v24 = vadd.s32 %v3523_v52, %v3521_v51  ;;  %v3548_v21 = vsel %vm7458_vm11, 1, %v8741_v9 }
 0x220   :  { %vm4037_vm3 = vcmp.ne.s32.totalorder %v3095_v28, 0  ;;  %vm4109_vm8 = vcmp.lt.s32.totalorder %v3095_v28, 0  ;;  %v4253_v50 = vadd.s32 18, %v3095_v28  ;;  %v3120_v43 = vadd.s32 %v3119_v49, %v3109_v42 }
 0x221   :  { %vm4181_vm9 = vmand %vm4109_vm8, %vm4037_vm3  ;;  %vm3551_vm15 = vc.u32 %v3549_v7, %v3545_v35  ;;  %v3130_v39 = vand.u32 65535, %v7464_v12  ;;  %v3517_v13 = vshrl.u32 %v7398_v56, 16  ;;  %v3550_v0 = vadd.s32 %v3548_v21, %v3542_v36 }
 0x222   :  { %v4325_v54 = vsel %vm4181_vm9, %v4253_v50, %v3095_v28  ;;  %v3121_v31 = vadd.s32 %v3120_v43, %v3111_v30  ;;  %v3499_v28 = vshrl.u32 %v3498_v46, 4  ;;  %v3526_v51 = vadd.s32 %v3525_v24, %v3515_v47  ;;  %v809_v30 = vpop.f32.mrf.mxu0 }
 0x223   :  { %vm4397_vm12 = vcmp.ge.s32.totalorder %v4325_v54, 1  ;;  %vm4469_vm13 = vcmp.le.s32.totalorder %v4325_v54, 16  ;;  %v3552_v8 = vsel %vm3551_vm15, 1, %v8741_v9  ;;  %v3131_v52 = vshrl.u32 %v7464_v12, 16 }
 0x224   :  { %vm4541_vm14 = vmand %vm4397_vm12, %vm4469_vm13  ;;  %v3122_v61 = vshrl.u32 %v3121_v31, 4  ;;  %v7493_v56 = vadd.f32 %v6968_v26, %v6398_v33  ;;  %v3133_v35 = vmul.u32 14564, %v3130_v39  ;;  %v3134_v42 = vmul.u32 58254, %v3130_v39 }
 0x225   :  { %v5479_v32 = vsel %vm4541_vm14, 1.0, %v8738_v55  ;;  %v3135_v38 = vmul.u32 14564, %v3131_v52  ;;  %v3544_v58 = vshrl.u32 %v7428_v4, 16  ;;  %v3554_v7 = vadd.s32 %v3552_v8, %v3550_v0  ;;  %v1082_v49 = vpop.f32.mrf.mxu1 }
 0x226   :  { %v4901_v6 = vmul.f32 %v5479_v32, %v1586_v41  ;;  %v3123_v50 = vmul.u32 18, %v3122_v61  ;;  %v3136_v11 = vmul.u32 58254, %v3131_v52  ;;  %v7501_v46 = vadd.s32 456, %v5948_v45  ;;  %v1473_v21 = vpop.f32.mrf.mxu2 }
 0x227   :  { %v3139_v26 = vshll.u32 %v3135_v38, 16  ;;  %v1081_v4 = vadd.f32 %v1080_v3, %v807_v63  ;;  %v3555_v36 = vadd.s32 %v3554_v7, %v3544_v58  ;;  %v1083_v43 = vadd.f32 %v1082_v49, %v809_v30  ;;  %v8765_v7 = vld [vmem:[#allocation2_spill] sm:$0xff] }
 0x228   :  { %v7474_v59 = vadd.f32 %v7416_v34, %v4901_v6  ;;  %v5051_v57 = vmul.f32 %v4901_v6, %v1586_v41  ;;  %v7485_v34 = vadd.f32 %v6904_v44, %v6350_v48  ;;  %v7489_v41 = vadd.f32 %v6945_v23, %v6364_v29  ;;  %v7498_v23 = vpop.f32.mrf.mxu3 }
 0x229   :  { %v3124_v54 = vsub.s32 %v7407_v20, %v3123_v50  ;;  %v3527_v48 = vadd.s32 %v3526_v51, %v3517_v13  ;;  %v3546_v44 = vshrl.u32 %v7436_v15, 16  ;;  %v3137_v29 = vshll.u32 %v3134_v42, 16 }
 0x22a   :  { %v7480_v40 = vadd.f32 %v7423_v53, %v5051_v57  ;;  %v3500_v53 = vmul.u32 18, %v3499_v28  ;;  %v7505_v47 = vadd.s32 464, %v5948_v45  ;;  %v3138_v31 = vshrl.u32 %v3134_v42, 16 }
 0x22b   :  { %vm4038_vm0 = vcmp.ne.s32.totalorder %v3124_v54, 0  ;;  %vm4110_vm4 = vcmp.lt.s32.totalorder %v3124_v54, 0  ;;  %v4254_v33 = vadd.s32 18, %v3124_v54  ;;  %vm3141_vm6 = vc.u32 %v3133_v35, %v3137_v29 }
 0x22c   :  { %vm4182_vm5 = vmand %vm4110_vm4, %vm4038_vm0  ;;  %v3143_v20 = vadd.s32 %v3137_v29, %v3133_v35  ;;  %v3142_v15 = vsel %vm3141_vm6, 1, %v8741_v9  ;;  %v7508_v6 = vsub.s32 %v7354_v16, %v3500_v53  ;;  %v7510_v63 = vadd.f32 %v1473_v21, %v1083_v43 }
 0x22d   :  { %v4326_v32 = vsel %vm4182_vm5, %v4254_v33, %v3124_v54  ;;  %v3144_v24 = vadd.s32 %v3142_v15, %v3136_v11  ;;  %v3565_v3 = vand.u32 65535, %v7501_v46  ;;  %v7514_v39 = vadd.f32 %v1471_v10, %v1081_v4  ;;  %v8766_v54 = vld [vmem:[#allocation11_spill] sm:$0xff]  ;;  %v8768_v11 = vld [vmem:[#allocation12_spill] sm:$0xff]  ;;  %v8770_v33 = vld [vmem:[#allocation13_spill] sm:$0xff] }
 0x22e   :  { %vm4398_vm1 = vcmp.ge.s32.totalorder %v4326_v32, 1  ;;  %vm4470_vm7 = vcmp.le.s32.totalorder %v4326_v32, 16  ;;  %vm3145_vm3 = vc.u32 %v3143_v20, %v3139_v26  ;;  %v3528_v13 = vshrl.u32 %v3527_v48, 4  ;;  %v8771_v20 = vld [vmem:[#allocation5_spill] sm:$0xff] }
 0x22f   :  { %vm4542_vm2 = vmand %vm4398_vm1, %vm4470_vm7  ;;  %v3146_v28 = vsel %vm3145_vm3, 1, %v8741_v9  ;;  %v3140_v61 = vshrl.u32 %v3135_v38, 16  ;;  %v7518_v16 = vadd.s32 %v3555_v36, %v3546_v44  ;;  %v3566_v8 = vshrl.u32 %v7501_v46, 16  ;;  %v8764_v38 = vld [vmem:[#allocation10_spill] sm:$0xff]  ;;  %v8767_v44 = vld [vmem:[#allocation3_spill] sm:$0xff] }
 0x230   :  { %v5480_v57 = vsel %vm4542_vm2, 1.0, %v8738_v55  ;;  %v3148_v51 = vadd.s32 %v3146_v28, %v3144_v24  ;;  %v3594_v52 = vand.u32 65535, %v7505_v47  ;;  %v5661_v50 = vpack.c.bf16 %v7510_v63, %v7514_v39  ;;  %v1518_v4 = vpop.f32.mrf.mxu3  ;;  %v8772_v36 = vld [vmem:[#allocation14_spill] sm:$0xff] }
 0x231   :  { %v4902_v0 = vmul.f32 %v5480_v57, %v7425_v5  ;;  %v7529_v53 = vadd.s32 344, %v5948_v45  ;;  %v7533_v58 = vadd.f32 %v8764_v38, %v6430_v2  ;;  %v7537_v48 = vadd.f32 %v8766_v54, %v8765_v7 }
 0x232   :  { %v3149_v42 = vadd.s32 %v3148_v51, %v3138_v31  ;;  %v7541_v29 = vadd.f32 %v8768_v11, %v8767_v44  ;;  %5756 = vst [vmem:[%s8686_s2 + $0xa8] sm:$0xff] %v5661_v50   ;;  %v3595_v2 = vshrl.u32 %v7505_v47, 16  ;;  %v7558_v32 = vadd.f32 %v8772_v36, %v8771_v20 }
 0x233   :  { %v7525_v35 = vadd.f32 %v7474_v59, %v4902_v0  ;;  %v5052_v10 = vmul.f32 %v4902_v0, %v7425_v5  ;;  %v7543_v59 = vmul.u32 58254, %v3565_v3  ;;  %v8769_v5 = vld [vmem:[#allocation4_spill] sm:$0xff]  ;;  %v7561_v15 = vadd.s32 18, %v7508_v6 }
 0x234   :  { %v7550_v26 = vadd.f32 %v8770_v33, %v8769_v5  ;;  %v3150_v49 = vadd.s32 %v3149_v42, %v3140_v61  ;;  %v7563_v43 = vmul.u32 18, %v3528_v13  ;;  %v7565_v24 = vmul.u32 58254, %v3594_v52 }
 0x235   :  { %v7554_v30 = vadd.f32 %v7480_v40, %v5052_v10  ;;  %v3557_v21 = vshrl.u32 %v7518_v16, 4  ;;  %v7568_v31 = vmul.u32 14564, %v3566_v8  ;;  %v3159_v40 = vand.u32 65535, %v7529_v53 }
 0x236   :  { %v3151_v57 = vshrl.u32 %v3150_v49, 4  ;;  %vm4051_vm8 = vcmp.ne.s32.totalorder %v7508_v6, 0  ;;  %vm4123_vm9 = vcmp.lt.s32.totalorder %v7508_v6, 0  ;;  %v3568_v28 = vmul.u32 14564, %v3565_v3 }
 0x237   :  { %v3572_v0 = vshll.u32 %v7543_v59, 16  ;;  %v3160_v61 = vshrl.u32 %v7529_v53, 16  ;;  %v7576_v13 = vadd.f32 %v1518_v4, %v7489_v41  ;;  %v3597_v51 = vmul.u32 14564, %v3594_v52  ;;  %vm4195_vm7 = vmand %vm4123_vm9, %vm4051_vm8  ;;  %v8780_v52 = vld [vmem:[#allocation15_spill] sm:$0xff] }
 0x238   :  { %v7578_v50 = vmul.u32 14564, %v3595_v2  ;;  %v3152_v16 = vmul.u32 18, %v3151_v57  ;;  %v7582_v10 = vadd.f32 %v7498_v23, %v7485_v34  ;;  %v3601_v42 = vshll.u32 %v7565_v24, 16 }
 0x239   :  { %8773 = vst [vmem:[#allocation10_spill] sm:$0xff] %v7576_v13  ;;  %v3162_v38 = vmul.u32 14564, %v3159_v40  ;;  %v3163_v7 = vmul.u32 58254, %v3159_v40  ;;  %v3164_v3 = vmul.u32 14564, %v3160_v61  ;;  %v3571_v54 = vmul.u32 58254, %v3566_v8 }
 0x23a   :  { %8774 = vst [vmem:[#allocation2_spill] sm:$0xff] %v7582_v10  ;;  %v3574_v44 = vshll.u32 %v7568_v31, 16  ;;  %v3153_v11 = vsub.s32 %v7464_v12, %v3152_v16  ;;  %v5706_v41 = vpack.c.bf16 %v7576_v13, %v7582_v10  ;;  %vm7589_vm10 = vc.u32 %v3568_v28, %v3572_v0 }
 0x23b   :  { %v3165_v5 = vmul.u32 58254, %v3160_v61  ;;  %v3166_v34 = vshll.u32 %v3163_v7, 16  ;;  %v3168_v23 = vshll.u32 %v3164_v3, 16  ;;  %v3578_v33 = vadd.s32 %v3572_v0, %v3568_v28 }
 0x23c   :  { %vm4039_vm11 = vcmp.ne.s32.totalorder %v3153_v11, 0  ;;  %vm4111_vm12 = vcmp.lt.s32.totalorder %v3153_v11, 0  ;;  %v4255_v49 = vadd.s32 18, %v3153_v11  ;;  %5765 = vst [vmem:[%s8686_s2 + $0xf0] sm:$0xff] %v5706_v41   ;;  %v3603_v12 = vshll.u32 %v7578_v50, 16  ;;  %v8779_v41 = vld [vmem:[#allocation6_spill] sm:$0xff] }
 0x23d   :  { %vm7597_vm13 = vc.u32 %v3597_v51, %v3601_v42  ;;  %vm4183_vm14 = vmand %vm4111_vm12, %vm4039_vm11  ;;  %vm3170_vm15 = vc.u32 %v3162_v38, %v3166_v34  ;;  %v3172_v4 = vadd.s32 %v3166_v34, %v3162_v38  ;;  %v3607_v20 = vadd.s32 %v3601_v42, %v3597_v51 }
 0x23e   :  { %v4327_v36 = vsel %vm4183_vm14, %v4255_v49, %v3153_v11  ;;  %v3167_v57 = vshrl.u32 %v3163_v7, 16  ;;  %v3171_v40 = vsel %vm3170_vm15, 1, %v8741_v9  ;;  %v3577_v0 = vsel %vm7589_vm10, 1, %v8741_v9  ;;  %v1085_v49 = vpop.f32.mrf.mxu1 }
 0x23f   :  { %vm4399_vm0 = vcmp.ge.s32.totalorder %v4327_v36, 1  ;;  %vm4471_vm4 = vcmp.le.s32.totalorder %v4327_v36, 16  ;;  %v3173_v28 = vadd.s32 %v3171_v40, %v3165_v5  ;;  %vm3174_vm5 = vc.u32 %v3172_v4, %v3168_v23  ;;  %v8782_v40 = vld [vmem:[#allocation7_spill] sm:$0xff] }
 0x240   :  { %vm3580_vm6 = vc.u32 %v3578_v33, %v3574_v44  ;;  %v3600_v61 = vmul.u32 58254, %v3595_v2  ;;  %vm4543_vm1 = vmand %vm4399_vm0, %vm4471_vm4  ;;  %v3175_v16 = vsel %vm3174_vm5, 1, %v8741_v9  ;;  %v3606_v51 = vsel %vm7597_vm13, 1, %v8741_v9  ;;  %v812_v33 = vpop.f32.mrf.mxu0 }
 0x241   :  { %v5481_v42 = vsel %vm4543_vm1, 1.0, %v8738_v55  ;;  %v3169_v38 = vshrl.u32 %v3164_v3, 16  ;;  %v3177_v7 = vadd.s32 %v3175_v16, %v3173_v28  ;;  %v3558_v11 = vmul.u32 18, %v3557_v21 }
 0x242   :  { %vm3609_vm2 = vc.u32 %v3607_v20, %v3603_v12  ;;  %v4903_v2 = vmul.f32 %v5481_v42, %v7514_v39  ;;  %v7616_v44 = vadd.s32 352, %v5948_v45  ;;  %v7620_v5 = vadd.f32 %v8780_v52, %v8779_v41 }
 0x243   :  { %v3579_v34 = vadd.s32 %v3577_v0, %v3571_v54  ;;  %v3581_v3 = vsel %vm3580_vm6, 1, %v8741_v9  ;;  %v3178_v23 = vadd.s32 %v3177_v7, %v3167_v57  ;;  %v3608_v8 = vadd.s32 %v3606_v51, %v3600_v61  ;;  %v1476_v0 = vpop.f32.mrf.mxu2 }
 0x244   :  { %8781 = vst [vmem:[#allocation11_spill] sm:$0xff] %v7620_v5  ;;  %v7624_v4 = vadd.s32 472, %v5948_v45  ;;  %v7627_v21 = vadd.f32 %v7525_v35, %v4903_v2  ;;  %v5053_v12 = vmul.f32 %v4903_v2, %v7514_v39  ;;  %v7632_v20 = vsel %vm4195_vm7, %v7561_v15, %v7508_v6  ;;  %v8784_v15 = vld [vmem:[#allocation8_spill] sm:$0xff] }
 0x245   :  { %v7636_v54 = vsub.s32 %v7376_v27, %v7563_v43  ;;  %v3610_v36 = vsel %vm3609_vm2, 1, %v8741_v9  ;;  %v3179_v57 = vadd.s32 %v3178_v23, %v3169_v38  ;;  %v7641_v28 = vadd.f32 %v7208_v1, %v8782_v40 }
 0x246   :  { %v7644_v35 = vsub.s32 %v7401_v17, %v3558_v11  ;;  %v7647_v39 = vadd.f32 %v7554_v30, %v5053_v12  ;;  %v3188_v6 = vand.u32 65535, %v7616_v44  ;;  %v7652_v27 = vadd.f32 %v7245_v62, %v8784_v15 }
 0x247   :  { %8783 = vst [vmem:[#allocation3_spill] sm:$0xff] %v7641_v28  ;;  %v3573_v43 = vshrl.u32 %v7543_v59, 16  ;;  %v3583_v61 = vadd.s32 %v3581_v3, %v3579_v34  ;;  %v3180_v16 = vshrl.u32 %v3179_v57, 4  ;;  %vm4411_vm3 = vcmp.ge.s32.totalorder %v7632_v20, 1  ;;  %v1087_v57 = vpop.f32.mrf.mxu1 }
 0x248   :  { %8785 = vst [vmem:[#allocation12_spill] sm:$0xff] %v7652_v27  ;;  %vm4483_vm8 = vcmp.le.s32.totalorder %v7632_v20, 16  ;;  %v3602_v1 = vshrl.u32 %v7565_v24, 16  ;;  %v3612_v17 = vadd.s32 %v3610_v36, %v3608_v8  ;;  %v3623_v30 = vand.u32 65535, %v7624_v4  ;;  %v814_v36 = vpop.f32.mrf.mxu0 }
 0x249   :  { %v3189_v51 = vshrl.u32 %v7616_v44, 16  ;;  %vm4052_vm9 = vcmp.ne.s32.totalorder %v7636_v54, 0  ;;  %vm4124_vm10 = vcmp.lt.s32.totalorder %v7636_v54, 0  ;;  %v7663_v62 = vadd.s32 18, %v7636_v54  ;;  %vm7690_vm7 = vmand %vm4411_vm3, %vm4483_vm8 }
 0x24a   :  { %v3575_v59 = vshrl.u32 %v7568_v31, 16  ;;  %v3181_v42 = vmul.u32 18, %v3180_v16  ;;  %vm4053_vm11 = vcmp.ne.s32.totalorder %v7644_v35, 0  ;;  %v3191_v38 = vmul.u32 14564, %v3188_v6  ;;  %v7674_v31 = vpop.f32.mrf.mxu3  ;;  %vm7703_vm2 = vmand %vm4124_vm10, %vm4052_vm9 }
 0x24b   :  { %v3192_v7 = vmul.u32 58254, %v3188_v6  ;;  %v7667_v24 = vmul.u32 14564, %v3189_v51  ;;  %vm4125_vm12 = vcmp.lt.s32.totalorder %v7644_v35, 0  ;;  %v3584_v11 = vadd.s32 %v3583_v61, %v3573_v43 }
 0x24c   :  { %v3604_v2 = vshrl.u32 %v7578_v50, 16  ;;  %v3182_v41 = vsub.s32 %v7529_v53, %v3181_v42  ;;  %v3613_v52 = vadd.s32 %v3612_v17, %v3602_v1  ;;  %v7672_v34 = vmul.u32 58254, %v3623_v30  ;;  %v1478_v17 = vpop.f32.mrf.mxu2  ;;  %vm7720_vm8 = vmand %vm4125_vm12, %vm4053_vm11 }
 0x24d   :  { %v3194_v3 = vmul.u32 58254, %v3189_v51  ;;  %v3195_v23 = vshll.u32 %v3192_v7, 16  ;;  %v3197_v12 = vshll.u32 %v7667_v24, 16  ;;  %v3624_v40 = vshrl.u32 %v7624_v4, 16 }
 0x24e   :  { %vm4040_vm13 = vcmp.ne.s32.totalorder %v3182_v41, 0  ;;  %vm4112_vm14 = vcmp.lt.s32.totalorder %v3182_v41, 0  ;;  %v4256_v8 = vadd.s32 18, %v3182_v41  ;;  %v1086_v50 = vadd.f32 %v1085_v49, %v812_v33 }
 0x24f   :  { %vm4184_vm15 = vmand %vm4112_vm14, %vm4040_vm13  ;;  %vm3199_vm0 = vc.u32 %v3191_v38, %v3195_v23  ;;  %v3201_v53 = vadd.s32 %v3195_v23, %v3191_v38  ;;  %v3626_v6 = vmul.u32 14564, %v3623_v30  ;;  %v1088_v61 = vadd.f32 %v1087_v57, %v814_v36 }
 0x250   :  { %v4328_v15 = vsel %vm4184_vm15, %v4256_v8, %v3182_v41  ;;  %v3200_v43 = vsel %vm3199_vm0, 1, %v8741_v9  ;;  %v3630_v16 = vshll.u32 %v7672_v34, 16  ;;  %v3585_v51 = vadd.s32 %v3584_v11, %v3575_v59 }
 0x251   :  { %vm4400_vm4 = vcmp.ge.s32.totalorder %v4328_v15, 1  ;;  %vm4472_vm5 = vcmp.le.s32.totalorder %v4328_v15, 16  ;;  %v3202_v1 = vadd.s32 %v3200_v43, %v3194_v3  ;;  %v3196_v42 = vshrl.u32 %v3192_v7, 16 }
 0x252   :  { %vm4544_vm6 = vmand %vm4400_vm4, %vm4472_vm5  ;;  %vm3203_vm1 = vc.u32 %v3201_v53, %v3197_v12  ;;  %v7680_v27 = vadd.f32 %v1478_v17, %v1088_v61  ;;  %v3614_v33 = vadd.s32 %v3613_v52, %v3604_v2  ;;  %v7683_v30 = vadd.f32 %v1476_v0, %v1086_v50  ;;  %v8794_v50 = vld [vmem:[#allocation9_spill] sm:$0xff] }
 0x253   :  { %v5482_v49 = vsel %vm4544_vm6, 1.0, %v8738_v55  ;;  %v3204_v38 = vsel %vm3203_vm1, 1, %v8741_v9  ;;  %v7695_v59 = vadd.s32 480, %v5948_v45  ;;  %v3198_v11 = vshrl.u32 %v7667_v24, 16 }
 0x254   :  { %v4904_v7 = vmul.f32 %v5482_v49, %v7510_v63  ;;  %v3206_v2 = vadd.s32 %v3204_v38, %v3202_v1  ;;  %v4269_v20 = vadd.s32 18, %v7644_v35  ;;  %v7708_v52 = vmul.u32 14564, %v3624_v40 }
 0x255   :  { %vm7710_vm3 = vc.u32 %v3626_v6, %v3630_v16  ;;  %v5666_v24 = vpack.c.bf16 %v7680_v27, %v7683_v30  ;;  %v7729_v57 = vadd.s32 360, %v5948_v45  ;;  %v7733_v53 = vadd.f32 %v7269_v22, %v8794_v50  ;;  %v1523_v22 = vpop.f32.mrf.mxu3 }
 0x256   :  { %v7725_v8 = vadd.f32 %v7627_v21, %v4904_v7  ;;  %v5054_v12 = vmul.f32 %v4904_v7, %v7510_v63  ;;  %v3207_v36 = vadd.s32 %v3206_v2, %v3196_v42  ;;  %v7738_v15 = vsel %vm7690_vm7, 1.0, %v8738_v55 }
 0x257   :  { %8795 = vst [vmem:[#allocation4_spill] sm:$0xff] %v7733_v53  ;;  %v3586_v43 = vshrl.u32 %v3585_v51, 4  ;;  %v3615_v61 = vshrl.u32 %v3614_v33, 4  ;;  %v3629_v63 = vmul.u32 58254, %v3624_v40  ;;  %v3652_v21 = vand.u32 65535, %v7695_v59 }
 0x258   :  { %5757 = vst [vmem:[%s8686_s2 + $0xb0] sm:$0xff] %v5666_v24   ;;  %v7745_v1 = vadd.f32 %v7647_v39, %v5054_v12  ;;  %v3208_v17 = vadd.s32 %v3207_v36, %v3198_v11  ;;  %v4340_v42 = vsel %vm7703_vm2, %v7663_v62, %v7636_v54  ;;  %v7754_v51 = vsel %vm7720_vm8, %v4269_v20, %v7644_v35 }
 0x259   :  { %v3632_v33 = vshll.u32 %v7708_v52, 16  ;;  %v3635_v40 = vsel %vm7710_vm3, 1, %v8741_v9  ;;  %v3636_v39 = vadd.s32 %v3630_v16, %v3626_v6  ;;  %v3653_v49 = vshrl.u32 %v7695_v59, 16 }
 0x25a   :  { %v3209_v38 = vshrl.u32 %v3208_v17, 4  ;;  %v3217_v41 = vand.u32 65535, %v7729_v57  ;;  %v3587_v7 = vmul.u32 18, %v3586_v43  ;;  %v3616_v11 = vmul.u32 18, %v3615_v61 }
 0x25b   :  { %v3218_v54 = vshrl.u32 %v7729_v57, 16  ;;  %v7764_v62 = vadd.f32 %v1523_v22, %v7533_v58  ;;  %vm4412_vm9 = vcmp.ge.s32.totalorder %v4340_v42, 1  ;;  %vm4484_vm10 = vcmp.le.s32.totalorder %v4340_v42, 16 }
 0x25c   :  { %v3637_v35 = vadd.s32 %v3635_v40, %v3629_v63  ;;  %v7766_v2 = vmul.u32 58254, %v3652_v21  ;;  %v3210_v0 = vmul.u32 18, %v3209_v38  ;;  %v7770_v6 = vadd.f32 %v7674_v31, %v7493_v56  ;;  %vm7809_vm7 = vmand %vm4412_vm9, %vm4484_vm10 }
 0x25d   :  { %8796 = vst [vmem:[#allocation13_spill] sm:$0xff] %v7764_v62  ;;  %v7773_v16 = vadd.s32 488, %v5948_v45  ;;  %v3220_v20 = vmul.u32 14564, %v3217_v41  ;;  %v3221_v3 = vmul.u32 58254, %v3217_v41  ;;  %v3222_v24 = vmul.u32 14564, %v3218_v54 }
 0x25e   :  { %8797 = vst [vmem:[#allocation5_spill] sm:$0xff] %v7770_v6  ;;  %vm3638_vm11 = vc.u32 %v3636_v39, %v3632_v33  ;;  %v7775_v23 = vmul.u32 14564, %v3653_v49  ;;  %v3211_v58 = vsub.s32 %v7616_v44, %v3210_v0  ;;  %v5711_v12 = vpack.c.bf16 %v7764_v62, %v7770_v6  ;;  %v7870_v6 = vpop.f32.mrf.mxu3 }
 0x25f   :  { %v3655_v36 = vmul.u32 14564, %v3652_v21  ;;  %v3223_v50 = vmul.u32 58254, %v3218_v54  ;;  %v3224_v43 = vshll.u32 %v3221_v3, 16  ;;  %v3226_v61 = vshll.u32 %v3222_v24, 16 }
 0x260   :  { %v3659_v56 = vshll.u32 %v7766_v2, 16  ;;  %vm4041_vm12 = vcmp.ne.s32.totalorder %v3211_v58, 0  ;;  %vm4113_vm13 = vcmp.lt.s32.totalorder %v3211_v58, 0  ;;  %v4257_v31 = vadd.s32 18, %v3211_v58  ;;  %5766 = vst [vmem:[%s8686_s2 + $0xf8] sm:$0xff] %v5711_v12  }
 0x261   :  { %v3639_v63 = vsel %vm3638_vm11, 1, %v8741_v9  ;;  %v3681_v44 = vand.u32 65535, %v7773_v16  ;;  %vm4185_vm14 = vmand %vm4113_vm13, %vm4041_vm12  ;;  %vm3228_vm15 = vc.u32 %v3220_v20, %v3224_v43  ;;  %v3230_v17 = vadd.s32 %v3224_v43, %v3220_v20 }
 0x262   :  { %v3661_v21 = vshll.u32 %v7775_v23, 16  ;;  %v4329_v22 = vsel %vm4185_vm14, %v4257_v31, %v3211_v58  ;;  %v3225_v33 = vshrl.u32 %v3221_v3, 16  ;;  %v3229_v40 = vsel %vm3228_vm15, 1, %v8741_v9 }
 0x263   :  { %vm4401_vm0 = vcmp.ge.s32.totalorder %v4329_v22, 1  ;;  %vm4473_vm4 = vcmp.le.s32.totalorder %v4329_v22, 16  ;;  %v3231_v39 = vadd.s32 %v3229_v40, %v3223_v50  ;;  %vm3232_vm5 = vc.u32 %v3230_v17, %v3226_v61  ;;  %v1090_v22 = vpop.f32.mrf.mxu1 }
 0x264   :  { %vm7788_vm6 = vc.u32 %v3655_v36, %v3659_v56  ;;  %v3665_v41 = vadd.s32 %v3659_v56, %v3655_v36  ;;  %v3682_v54 = vshrl.u32 %v7773_v16, 16  ;;  %vm4545_vm1 = vmand %vm4401_vm0, %vm4473_vm4  ;;  %v3233_v0 = vsel %vm3232_vm5, 1, %v8741_v9 }
 0x265   :  { %v7794_v20 = vmul.u32 58254, %v3681_v44  ;;  %v5483_v3 = vsel %vm4545_vm1, 1.0, %v8738_v55  ;;  %v3227_v58 = vshrl.u32 %v3222_v24, 16  ;;  %v3235_v12 = vadd.s32 %v3233_v0, %v3231_v39 }
 0x266   :  { %v7798_v43 = vsub.s32 %v7501_v46, %v3587_v7  ;;  %v7801_v50 = vsub.s32 %v7505_v47, %v3616_v11  ;;  %v4905_v61 = vmul.f32 %v5483_v3, %v7683_v30  ;;  %v7805_v36 = vadd.s32 368, %v5948_v45  ;;  %v817_v7 = vpop.f32.mrf.mxu0 }
 0x267   :  { %v3631_v24 = vshrl.u32 %v7672_v34, 16  ;;  %v3641_v31 = vadd.s32 %v3639_v63, %v3637_v35  ;;  %v3658_v17 = vmul.u32 58254, %v3653_v49  ;;  %v3236_v46 = vadd.s32 %v3235_v12, %v3225_v33  ;;  %v1481_v33 = vpop.f32.mrf.mxu2 }
 0x268   :  { %v3664_v47 = vsel %vm7788_vm6, 1, %v8741_v9  ;;  %vm7817_vm2 = vc.u32 %v3665_v41, %v3661_v21  ;;  %v7822_v42 = vadd.f32 %v7725_v8, %v4905_v61  ;;  %v5055_v40 = vmul.f32 %v4905_v61, %v7683_v30 }
 0x269   :  { %v3684_v39 = vmul.u32 14564, %v3681_v44  ;;  %v7825_v34 = vmul.u32 14564, %v3682_v54  ;;  %v3688_v49 = vshll.u32 %v7794_v20, 16  ;;  %v3237_v35 = vadd.s32 %v3236_v46, %v3227_v58 }
 0x26a   :  { %v7830_v63 = vmul.f32 %v7738_v15, %v7308_v18  ;;  %v7835_v21 = vsel %vm7809_vm7, 1.0, %v8738_v55  ;;  %v7838_v8 = vadd.f32 %v7745_v1, %v5055_v40  ;;  %v3246_v30 = vand.u32 65535, %v7805_v36 }
 0x26b   :  { %vm4413_vm3 = vcmp.ge.s32.totalorder %v7754_v51, 1  ;;  %vm4485_vm8 = vcmp.le.s32.totalorder %v7754_v51, 16  ;;  %v7844_v44 = vadd.s32 18, %v7798_v43  ;;  %v7847_v15 = vadd.s32 18, %v7801_v50 }
 0x26c   :  { %v3666_v38 = vadd.s32 %v3664_v47, %v3658_v17  ;;  %v3238_v41 = vshrl.u32 %v3237_v35, 4  ;;  %vm4054_vm9 = vcmp.ne.s32.totalorder %v7798_v43, 0  ;;  %vm4126_vm10 = vcmp.lt.s32.totalorder %v7798_v43, 0 }
 0x26d   :  { %v7852_v0 = vadd.s32 %v3641_v31, %v3631_v24  ;;  %v3668_v3 = vsel %vm7817_vm2, 1, %v8741_v9  ;;  %v3247_v58 = vshrl.u32 %v7805_v36, 16  ;;  %v3660_v12 = vshrl.u32 %v7766_v2, 16 }
 0x26e   :  { %v3690_v61 = vshll.u32 %v7825_v34, 16  ;;  %vm3692_vm11 = vc.u32 %v3684_v39, %v3688_v49  ;;  %v3239_v56 = vmul.u32 18, %v3238_v41  ;;  %vm4055_vm12 = vcmp.ne.s32.totalorder %v7801_v50, 0 }
 0x26f   :  { %vm4127_vm13 = vcmp.lt.s32.totalorder %v7801_v50, 0  ;;  %v3694_v17 = vadd.s32 %v3688_v49, %v3684_v39  ;;  %v3249_v46 = vmul.u32 14564, %v3246_v30  ;;  %v3250_v24 = vmul.u32 58254, %v3246_v30  ;;  %v819_v30 = vpop.f32.mrf.mxu0  ;;  %v1483_v28 = vpop.f32.mrf.mxu2 }
 0x270   :  { %v7862_v31 = vmul.u32 14564, %v3247_v58  ;;  %v3662_v47 = vshrl.u32 %v7775_v23, 16  ;;  %v3670_v11 = vadd.s32 %v3668_v3, %v3666_v38  ;;  %v3687_v40 = vmul.u32 58254, %v3682_v54  ;;  %v1092_v23 = vpop.f32.mrf.mxu1 }
 0x271   :  { %v3240_v35 = vsub.s32 %v7729_v57, %v3239_v56  ;;  %v3693_v2 = vsel %vm3692_vm11, 1, %v8741_v9  ;;  %v7868_v1 = vadd.s32 496, %v5948_v45  ;;  %v3252_v41 = vmul.u32 58254, %v3247_v58  ;;  %vm7882_vm11 = vmand %vm4413_vm3, %vm4485_vm8 }
 0x272   :  { %v3253_v62 = vshll.u32 %v3250_v24, 16  ;;  %v3255_v49 = vshll.u32 %v7862_v31, 16  ;;  %vm3696_vm0 = vc.u32 %v3694_v17, %v3690_v61  ;;  %v1091_v54 = vadd.f32 %v1090_v22, %v817_v7  ;;  %vm4199_vm3 = vmand %vm4127_vm13, %vm4055_vm12 }
 0x273   :  { %vm4042_vm14 = vcmp.ne.s32.totalorder %v3240_v35, 0  ;;  %vm4114_vm15 = vcmp.lt.s32.totalorder %v3240_v35, 0  ;;  %v4258_v39 = vadd.s32 18, %v3240_v35  ;;  %v3695_v38 = vadd.s32 %v3693_v2, %v3687_v40 }
 0x274   :  { %vm4186_vm4 = vmand %vm4114_vm15, %vm4042_vm14  ;;  %vm3257_vm5 = vc.u32 %v3249_v46, %v3253_v62  ;;  %v3259_v57 = vadd.s32 %v3253_v62, %v3249_v46  ;;  %v1093_v58 = vadd.f32 %v1092_v23, %v819_v30  ;;  %v3710_v53 = vand.u32 65535, %v7868_v1  ;;  %v1528_v23 = vpop.f32.mrf.mxu3 }
 0x275   :  { %v4330_v3 = vsel %vm4186_vm4, %v4258_v39, %v3240_v35  ;;  %v3258_v56 = vsel %vm3257_vm5, 1, %v8741_v9  ;;  %v3697_v13 = vsel %vm3696_vm0, 1, %v8741_v9  ;;  %v3254_v10 = vshrl.u32 %v3250_v24, 16  ;;  %vm7894_vm14 = vmand %vm4126_vm10, %vm4054_vm9 }
 0x276   :  { %vm4402_vm6 = vcmp.ge.s32.totalorder %v4330_v3, 1  ;;  %vm4474_vm1 = vcmp.le.s32.totalorder %v4330_v3, 16  ;;  %v3260_v5 = vadd.s32 %v3258_v56, %v3252_v41  ;;  %vm3261_vm2 = vc.u32 %v3259_v57, %v3255_v49 }
 0x277   :  { %vm4546_vm7 = vmand %vm4402_vm6, %vm4474_vm1  ;;  %v7876_v61 = vadd.f32 %v1483_v28, %v1093_v58  ;;  %v3671_v7 = vadd.s32 %v3670_v11, %v3660_v12  ;;  %v7887_v17 = vadd.f32 %v1481_v33, %v1091_v54  ;;  %v3262_v46 = vsel %vm3261_vm2, 1, %v8741_v9 }
 0x278   :  { %v5484_v22 = vsel %vm4546_vm7, 1.0, %v8738_v55  ;;  %v3689_v51 = vshrl.u32 %v7794_v20, 16  ;;  %v3256_v12 = vshrl.u32 %v7862_v31, 16  ;;  %v3264_v11 = vadd.s32 %v3262_v46, %v3260_v5 }
 0x279   :  { %v4906_v24 = vmul.f32 %v5484_v22, %v7680_v27  ;;  %v3699_v40 = vadd.s32 %v3697_v13, %v3695_v38  ;;  %v3711_v33 = vshrl.u32 %v7868_v1, 16  ;;  %v7902_v35 = vmul.u32 58254, %v3710_v53 }
 0x27a   :  { %v5671_v2 = vpack.c.bf16 %v7876_v61, %v7887_v17  ;;  %v3265_v31 = vadd.s32 %v3264_v11, %v3254_v10  ;;  %v7915_v13 = vadd.s32 376, %v5948_v45  ;;  %v7919_v5 = vmul.f32 %v7830_v63, %v7308_v18 }
 0x27b   :  { %v7911_v20 = vadd.f32 %v7822_v42, %v4906_v24  ;;  %v5056_v41 = vmul.f32 %v4906_v24, %v7680_v27  ;;  %v7923_v39 = vmul.f32 %v7835_v21, %v7313_v25  ;;  %v7928_v49 = vsel %vm7882_vm11, 1.0, %v8738_v55 }
 0x27c   :  { %v4342_v10 = vsel %vm7894_vm14, %v7844_v44, %v7798_v43  ;;  %5758 = vst [vmem:[%s8686_s2 + $0xb8] sm:$0xff] %v5671_v2   ;;  %v8808_v18 = vshrl.u32 %v7708_v52, 16  ;;  %v3672_v42 = vadd.s32 %v3671_v7, %v3662_v47  ;;  %v3266_v30 = vadd.s32 %v3265_v31, %v3256_v12 }
 0x27d   :  { %v7941_v21 = vadd.f32 %v7838_v8, %v5056_v41  ;;  %v7945_v54 = vsel %vm4199_vm3, %v7847_v15, %v7801_v50  ;;  %v3691_v43 = vshrl.u32 %v7825_v34, 16  ;;  %v3700_v44 = vadd.s32 %v3699_v40, %v3689_v51 }
 0x27e   :  { %v3643_v27 = vadd.s32 %v7852_v0, %v8808_v18  ;;  %v3713_v57 = vmul.u32 14564, %v3710_v53  ;;  %v7948_v38 = vmul.u32 14564, %v3711_v33  ;;  %v3717_v52 = vshll.u32 %v7902_v35, 16 }
 0x27f   :  { %v3267_v3 = vshrl.u32 %v3266_v30, 4  ;;  %v3275_v0 = vand.u32 65535, %v7915_v13  ;;  %vm4414_vm8 = vcmp.ge.s32.totalorder %v4342_v10, 1  ;;  %vm4486_vm9 = vcmp.le.s32.totalorder %v4342_v10, 16 }
 0x280   :  { %v3276_v8 = vshrl.u32 %v7915_v13, 16  ;;  %v7954_v47 = vadd.f32 %v1528_v23, %v7541_v29  ;;  %v3644_v50 = vshrl.u32 %v3643_v27, 4  ;;  %v3673_v15 = vshrl.u32 %v3672_v42, 4  ;;  %vm4558_vm6 = vmand %vm4414_vm8, %vm4486_vm9 }
 0x281   :  { %v3268_v56 = vmul.u32 18, %v3267_v3  ;;  %v7958_v53 = vadd.f32 %v7870_v6, %v7537_v48  ;;  %vm4415_vm10 = vcmp.ge.s32.totalorder %v7945_v54, 1  ;;  %vm4487_vm12 = vcmp.le.s32.totalorder %v7945_v54, 16 }
 0x282   :  { %8809 = vst [vmem:[#allocation14_spill] sm:$0xff] %v7954_v47  ;;  %v3701_v34 = vadd.s32 %v3700_v44, %v3691_v43  ;;  %v3278_v58 = vmul.u32 14564, %v3275_v0  ;;  %v3279_v62 = vmul.u32 58254, %v3275_v0  ;;  %v3280_v7 = vmul.u32 14564, %v3276_v8  ;;  %vm4559_vm3 = vmand %vm4415_vm10, %vm4487_vm12 }
 0x283   :  { %8810 = vst [vmem:[#allocation6_spill] sm:$0xff] %v7958_v53  ;;  %v3719_v22 = vshll.u32 %v7948_v38, 16  ;;  %vm7963_vm13 = vc.u32 %v3713_v57, %v3717_v52  ;;  %v3269_v46 = vsub.s32 %v7805_v36, %v3268_v56  ;;  %v5716_v48 = vpack.c.bf16 %v7954_v47, %v7958_v53 }
 0x284   :  { %v3723_v6 = vadd.s32 %v3717_v52, %v3713_v57  ;;  %v3281_v28 = vmul.u32 58254, %v3276_v8  ;;  %v3282_v51 = vshll.u32 %v3279_v62, 16  ;;  %v3284_v24 = vshll.u32 %v3280_v7, 16 }
 0x285   :  { %v7971_v12 = vadd.s32 504, %v5948_v45  ;;  %vm4043_vm15 = vcmp.ne.s32.totalorder %v3269_v46, 0  ;;  %vm4115_vm0 = vcmp.lt.s32.totalorder %v3269_v46, 0  ;;  %v4259_v11 = vadd.s32 18, %v3269_v46  ;;  %5767 = vst [vmem:[%s8686_s2 + $0x100] sm:$0xff] %v5716_v48  }
 0x286   :  { %v3702_v40 = vshrl.u32 %v3701_v34, 4  ;;  %v3716_v2 = vmul.u32 58254, %v3711_v33  ;;  %vm4187_vm4 = vmand %vm4115_vm0, %vm4043_vm15  ;;  %vm3286_vm5 = vc.u32 %v3278_v58, %v3282_v51  ;;  %v3288_v36 = vadd.s32 %v3282_v51, %v3278_v58 }
 0x287   :  { %v3722_v41 = vsel %vm7963_vm13, 1, %v8741_v9  ;;  %v4331_v31 = vsel %vm4187_vm4, %v4259_v11, %v3269_v46  ;;  %v3283_v18 = vshrl.u32 %v3279_v62, 16  ;;  %v3287_v27 = vsel %vm3286_vm5, 1, %v8741_v9  ;;  %v822_v62 = vpop.f32.mrf.mxu0 }
 0x288   :  { %vm4403_vm1 = vcmp.ge.s32.totalorder %v4331_v31, 1  ;;  %vm4475_vm7 = vcmp.le.s32.totalorder %v4331_v31, 16  ;;  %v3289_v42 = vadd.s32 %v3287_v27, %v3281_v28  ;;  %vm3290_vm2 = vc.u32 %v3288_v36, %v3284_v24 }
 0x289   :  { %v3645_v30 = vmul.u32 18, %v3644_v50  ;;  %vm3725_vm11 = vc.u32 %v3723_v6, %v3719_v22  ;;  %v3739_v33 = vand.u32 65535, %v7971_v12  ;;  %vm4547_vm14 = vmand %vm4403_vm1, %vm4475_vm7  ;;  %v3291_v23 = vsel %vm3290_vm2, 1, %v8741_v9 }
 0x28a   :  { %v3674_v43 = vmul.u32 18, %v3673_v15  ;;  %v5485_v44 = vsel %vm4547_vm14, 1.0, %v8738_v55  ;;  %v3285_v57 = vshrl.u32 %v3280_v7, 16  ;;  %v3293_v52 = vadd.s32 %v3291_v23, %v3289_v42  ;;  %v1095_v15 = vpop.f32.mrf.mxu1 }
 0x28b   :  { %v5496_v3 = vsel %vm4558_vm6, 1.0, %v8738_v55  ;;  %v3724_v10 = vadd.s32 %v3722_v41, %v3716_v2  ;;  %v4907_v0 = vmul.f32 %v5485_v44, %v7887_v17  ;;  %v7988_v8 = vadd.s32 384, %v5948_v45 }
 0x28c   :  { %v3703_v50 = vmul.u32 18, %v3702_v40  ;;  %v3726_v56 = vsel %vm3725_vm11, 1, %v8741_v9  ;;  %v3740_v34 = vshrl.u32 %v7971_v12, 16  ;;  %v3294_v58 = vadd.s32 %v3293_v52, %v3283_v18  ;;  %v8051_v52 = vpop.f32.mrf.mxu3 }
 0x28d   :  { %v7997_v7 = vsub.s32 %v7624_v4, %v3645_v30  ;;  %v7999_v22 = vmul.u32 58254, %v3739_v33  ;;  %v8002_v29 = vadd.f32 %v7911_v20, %v4907_v0  ;;  %v5057_v46 = vmul.f32 %v4907_v0, %v7887_v17  ;;  %v1486_v20 = vpop.f32.mrf.mxu2 }
 0x28e   :  { %v8007_v48 = vmul.f32 %v7928_v49, %v7344_v37  ;;  %v8010_v6 = vmul.f32 %v5496_v3, %v7342_v19  ;;  %v8013_v54 = vsub.s32 %v7695_v59, %v3674_v43  ;;  %v3295_v28 = vadd.s32 %v3294_v58, %v3285_v57 }
 0x28f   :  { %v3718_v4 = vshrl.u32 %v7902_v35, 16  ;;  %v3728_v51 = vadd.s32 %v3726_v56, %v3724_v10  ;;  %v8017_v24 = vadd.f32 %v7941_v21, %v5057_v46  ;;  %v3304_v17 = vand.u32 65535, %v7988_v8  ;;  %v824_v0 = vpop.f32.mrf.mxu0 }
 0x290   :  { %v8021_v11 = vsel %vm4559_vm3, 1.0, %v8738_v55  ;;  %v8024_v49 = vsub.s32 %v7773_v16, %v3703_v50  ;;  %v8026_v40 = vmul.u32 14564, %v3740_v34  ;;  %v3296_v59 = vshrl.u32 %v3295_v28, 4 }
 0x291   :  { %vm4056_vm8 = vcmp.ne.s32.totalorder %v7997_v7, 0  ;;  %vm4128_vm9 = vcmp.lt.s32.totalorder %v7997_v7, 0  ;;  %v8031_v35 = vadd.s32 18, %v7997_v7  ;;  %v3742_v21 = vmul.u32 14564, %v3739_v33 }
 0x292   :  { %v3746_v2 = vshll.u32 %v7999_v22, 16  ;;  %v3305_v36 = vshrl.u32 %v7988_v8, 16  ;;  %vm4057_vm10 = vcmp.ne.s32.totalorder %v8013_v54, 0  ;;  %vm4129_vm12 = vcmp.lt.s32.totalorder %v8013_v54, 0  ;;  %v1097_v50 = vpop.f32.mrf.mxu1 }
 0x293   :  { %v8038_v16 = vadd.s32 18, %v8013_v54  ;;  %v3720_v41 = vshrl.u32 %v7948_v38, 16  ;;  %v3297_v31 = vmul.u32 18, %v3296_v59  ;;  %v3729_v18 = vadd.s32 %v3728_v51, %v3718_v4 }
 0x294   :  { %v3307_v27 = vmul.u32 14564, %v3304_v17  ;;  %v3308_v42 = vmul.u32 58254, %v3304_v17  ;;  %v8041_v30 = vmul.u32 14564, %v3305_v36  ;;  %vm4058_vm13 = vcmp.ne.s32.totalorder %v8024_v49, 0 }
 0x295   :  { %vm4130_vm15 = vcmp.lt.s32.totalorder %v8024_v49, 0  ;;  %v3748_v33 = vshll.u32 %v8026_v40, 16  ;;  %v3298_v23 = vsub.s32 %v7915_v13, %v3297_v31  ;;  %vm8047_vm0 = vc.u32 %v3742_v21, %v3746_v2 }
 0x296   :  { %v3752_v44 = vadd.s32 %v3746_v2, %v3742_v21  ;;  %v3310_v38 = vmul.u32 58254, %v3305_v36  ;;  %v3311_v57 = vshll.u32 %v3308_v42, 16  ;;  %v3313_v10 = vshll.u32 %v8041_v30, 16  ;;  %v1488_v21 = vpop.f32.mrf.mxu2 }
 0x297   :  { %vm4044_vm4 = vcmp.ne.s32.totalorder %v3298_v23, 0  ;;  %vm4116_vm5 = vcmp.lt.s32.totalorder %v3298_v23, 0  ;;  %v4260_v3 = vadd.s32 18, %v3298_v23  ;;  %v3730_v56 = vadd.s32 %v3729_v18, %v3720_v41 }
 0x298   :  { %vm4188_vm6 = vmand %vm4116_vm5, %vm4044_vm4  ;;  %v1096_v58 = vadd.f32 %v1095_v15, %v822_v62  ;;  %vm3315_vm1 = vc.u32 %v3307_v27, %v3311_v57  ;;  %v3317_v13 = vadd.s32 %v3311_v57, %v3307_v27  ;;  %v3745_v46 = vmul.u32 58254, %v3740_v34 }
 0x299   :  { %v4332_v28 = vsel %vm4188_vm6, %v4260_v3, %v3298_v23  ;;  %v3316_v4 = vsel %vm3315_vm1, 1, %v8741_v9  ;;  %v1098_v51 = vadd.f32 %v1097_v50, %v824_v0  ;;  %v3751_v17 = vsel %vm8047_vm0, 1, %v8741_v9  ;;  %vm8072_vm0 = vmand %vm4128_vm9, %vm4056_vm8 }
 0x29a   :  { %vm4404_vm7 = vcmp.ge.s32.totalorder %v4332_v28, 1  ;;  %vm4476_vm2 = vcmp.le.s32.totalorder %v4332_v28, 16  ;;  %v3318_v59 = vadd.s32 %v3316_v4, %v3310_v38  ;;  %vm8058_vm11 = vc.u32 %v3752_v44, %v3748_v33  ;;  %vm4201_vm4 = vmand %vm4129_vm12, %vm4057_vm10 }
 0x29b   :  { %vm4548_vm14 = vmand %vm4404_vm7, %vm4476_vm2  ;;  %v3312_v62 = vshrl.u32 %v3308_v42, 16  ;;  %vm3319_vm3 = vc.u32 %v3317_v13, %v3313_v10  ;;  %v8062_v34 = vadd.f32 %v1488_v21, %v1098_v51  ;;  %v3731_v15 = vshrl.u32 %v3730_v56, 4 }
 0x29c   :  { %v5486_v36 = vsel %vm4548_vm14, 1.0, %v8738_v55  ;;  %v8065_v41 = vadd.f32 %v1486_v20, %v1096_v58  ;;  %v3320_v31 = vsel %vm3319_vm3, 1, %v8741_v9  ;;  %v8077_v27 = vadd.s32 512, %v5948_v45  ;;  %vm4202_vm8 = vmand %vm4130_vm15, %vm4058_vm13 }
 0x29d   :  { %v4908_v42 = vmul.f32 %v5486_v36, %v7876_v61  ;;  %v3314_v33 = vshrl.u32 %v8041_v30, 16  ;;  %v3322_v23 = vadd.s32 %v3320_v31, %v3318_v59  ;;  %v4274_v20 = vadd.s32 18, %v8024_v49 }
 0x29e   :  { %v3753_v43 = vadd.s32 %v3751_v17, %v3745_v46  ;;  %v3755_v44 = vsel %vm8058_vm11, 1, %v8741_v9  ;;  %v5676_v38 = vpack.c.bf16 %v8062_v34, %v8065_v41  ;;  %v8096_v10 = vadd.s32 392, %v5948_v45 }
 0x29f   :  { %v8092_v57 = vadd.f32 %v8002_v29, %v4908_v42  ;;  %v5058_v30 = vmul.f32 %v4908_v42, %v7876_v61  ;;  %v3323_v3 = vadd.s32 %v3322_v23, %v3312_v62  ;;  %v8100_v0 = vmul.f32 %v7923_v39, %v7313_v25 }
 0x2a0   :  { %v8104_v50 = vmul.f32 %v8007_v48, %v7344_v37  ;;  %v8110_v29 = vsel %vm8072_vm0, %v8031_v35, %v7997_v7  ;;  %v3732_v61 = vmul.u32 18, %v3731_v15  ;;  %5759 = vst [vmem:[%s8686_s2 + $0xc0] sm:$0xff] %v5676_v38   ;;  %v8121_v25 = vsel %vm4201_vm4, %v8038_v16, %v8013_v54  ;;  %v1533_v35 = vpop.f32.mrf.mxu3 }
 0x2a1   :  { %v3768_v37 = vand.u32 65535, %v8077_v27  ;;  %v8125_v56 = vadd.f32 %v8017_v24, %v5058_v30  ;;  %v3324_v7 = vadd.s32 %v3323_v3, %v3314_v33  ;;  %v8129_v58 = vmul.f32 %v8010_v6, %v7342_v19 }
 0x2a2   :  { %v8133_v13 = vmul.f32 %v8021_v11, %v7439_v14  ;;  %v3747_v46 = vshrl.u32 %v7999_v22, 16  ;;  %v3757_v28 = vadd.s32 %v3755_v44, %v3753_v43  ;;  %vm4416_vm9 = vcmp.ge.s32.totalorder %v8110_v29, 1 }
 0x2a3   :  { %8819 = vst [vmem:[#allocation15_spill] sm:$0xff] %v8129_v58  ;;  %vm4488_vm10 = vcmp.le.s32.totalorder %v8110_v29, 16  ;;  %v8139_v54 = vsel %vm4202_vm8, %v4274_v20, %v8024_v49  ;;  %v3325_v24 = vshrl.u32 %v3324_v7, 4  ;;  %v3333_v16 = vand.u32 65535, %v8096_v10 }
 0x2a4   :  { %vm4417_vm12 = vcmp.ge.s32.totalorder %v8121_v25, 1  ;;  %vm4489_vm13 = vcmp.le.s32.totalorder %v8121_v25, 16  ;;  %v8145_v19 = vsub.s32 %v7868_v1, %v3732_v61  ;;  %v3769_v22 = vshrl.u32 %v8077_v27, 16 }
 0x2a5   :  { %v3334_v11 = vshrl.u32 %v8096_v10, 16  ;;  %v8150_v4 = vadd.f32 %v1533_v35, %v7558_v32  ;;  %v3749_v49 = vshrl.u32 %v8026_v40, 16  ;;  %v8153_v51 = vmul.u32 58254, %v3768_v37 }
 0x2a6   :  { %v3326_v17 = vmul.u32 18, %v3325_v24  ;;  %v8157_v59 = vadd.f32 %v8051_v52, %v7550_v26  ;;  %v3758_v21 = vadd.s32 %v3757_v28, %v3747_v46  ;;  %v3336_v2 = vmul.u32 14564, %v3333_v16 }
 0x2a7   :  { %8820 = vst [vmem:[#allocation7_spill] sm:$0xff] %v8150_v4  ;;  %v3337_v1 = vmul.u32 58254, %v3333_v16  ;;  %v3338_v62 = vmul.u32 14564, %v3334_v11  ;;  %v3771_v15 = vmul.u32 14564, %v3768_v37  ;;  %v8160_v36 = vadd.s32 520, %v5948_v45 }
 0x2a8   :  { %8821 = vst [vmem:[#allocation8_spill] sm:$0xff] %v8157_v59  ;;  %v3327_v32 = vsub.s32 %v7988_v8, %v3326_v17  ;;  %v5721_v40 = vpack.c.bf16 %v8150_v4, %v8157_v59  ;;  %vm4490_vm5 = vcmp.le.s32.totalorder %v8139_v54, 16  ;;  %v8167_v31 = vmul.u32 14564, %v3769_v22 }
 0x2a9   :  { %v3339_v26 = vmul.u32 58254, %v3334_v11  ;;  %v3340_v52 = vshll.u32 %v3337_v1, 16  ;;  %v3342_v18 = vshll.u32 %v3338_v62, 16  ;;  %v3775_v42 = vshll.u32 %v8153_v51, 16 }
 0x2aa   :  { %vm4045_vm6 = vcmp.ne.s32.totalorder %v3327_v32, 0  ;;  %vm4117_vm1 = vcmp.lt.s32.totalorder %v3327_v32, 0  ;;  %v4261_v33 = vadd.s32 18, %v3327_v32  ;;  %5768 = vst [vmem:[%s8686_s2 + $0x108] sm:$0xff] %v5721_v40   ;;  %vm4059_vm7 = vcmp.ne.s32.totalorder %v8145_v19, 0 }
 0x2ab   :  { %vm4131_vm2 = vcmp.lt.s32.totalorder %v8145_v19, 0  ;;  %vm4189_vm11 = vmand %vm4117_vm1, %vm4045_vm6  ;;  %vm3344_vm14 = vc.u32 %v3336_v2, %v3340_v52  ;;  %v3346_v8 = vadd.s32 %v3340_v52, %v3336_v2  ;;  %v3797_v23 = vand.u32 65535, %v8160_v36 }
 0x2ac   :  { %v4333_v20 = vsel %vm4189_vm11, %v4261_v33, %v3327_v32  ;;  %v3341_v43 = vshrl.u32 %v3337_v1, 16  ;;  %v3345_v44 = vsel %vm3344_vm14, 1, %v8741_v9  ;;  %v3759_v30 = vadd.s32 %v3758_v21, %v3749_v49  ;;  %vm8183_vm6 = vmand %vm4416_vm9, %vm4488_vm10  ;;  %v827_v1 = vpop.f32.mrf.mxu0  ;;  %v1491_v33 = vpop.f32.mrf.mxu2 }
 0x2ad   :  { %vm4405_vm3 = vcmp.ge.s32.totalorder %v4333_v20, 1  ;;  %vm4477_vm0 = vcmp.le.s32.totalorder %v4333_v20, 16  ;;  %v3347_v38 = vadd.s32 %v3345_v44, %v3339_v26  ;;  %vm3348_vm4 = vc.u32 %v3346_v8, %v3342_v18  ;;  %vm8192_vm1 = vmand %vm4417_vm12, %vm4489_vm13 }
 0x2ae   :  { %v3777_v3 = vshll.u32 %v8167_v31, 16  ;;  %vm3779_vm8 = vc.u32 %v3771_v15, %v3775_v42  ;;  %vm4549_vm15 = vmand %vm4405_vm3, %vm4477_vm0  ;;  %v3349_v61 = vsel %vm3348_vm4, 1, %v8741_v9  ;;  %v3781_v7 = vadd.s32 %v3775_v42, %v3771_v15 }
 0x2af   :  { %v5487_v35 = vsel %vm4549_vm15, 1.0, %v8738_v55  ;;  %v3343_v46 = vshrl.u32 %v3338_v62, 16  ;;  %v3351_v28 = vadd.s32 %v3349_v61, %v3347_v38  ;;  %v4275_v16 = vadd.s32 18, %v8145_v19  ;;  %vm8205_vm9 = vmand %vm4131_vm2, %vm4059_vm7  ;;  %v1100_v62 = vpop.f32.mrf.mxu1 }
 0x2b0   :  { %v3774_v29 = vmul.u32 58254, %v3769_v22  ;;  %v4909_v11 = vmul.f32 %v5487_v35, %v8065_v41  ;;  %v8199_v49 = vadd.s32 400, %v5948_v45  ;;  %v3780_v25 = vsel %vm3779_vm8, 1, %v8741_v9 }
 0x2b1   :  { %v3798_v21 = vshrl.u32 %v8160_v36, 16  ;;  %v8211_v2 = vmul.u32 58254, %v3797_v23  ;;  %v3352_v22 = vadd.s32 %v3351_v28, %v3341_v43  ;;  %v8215_v15 = vmul.f32 %v8133_v13, %v7439_v14 }
 0x2b2   :  { %v5498_v32 = vsel %vm8183_vm6, 1.0, %v8738_v55  ;;  %v8221_v40 = vadd.f32 %v8092_v57, %v4909_v11  ;;  %v5059_v26 = vmul.f32 %v4909_v11, %v8065_v41  ;;  %v5499_v52 = vsel %vm8192_vm1, 1.0, %v8738_v55 }
 0x2b3   :  { %8828 = vst [vmem:[#allocation9_spill] sm:$0xff] %v8215_v15  ;;  %v3760_v18 = vshrl.u32 %v3759_v30, 4  ;;  %vm3783_vm10 = vc.u32 %v3781_v7, %v3777_v3  ;;  %v3353_v42 = vadd.s32 %v3352_v22, %v3343_v46  ;;  %vm8829_vm12 = vcmp.ge.s32.totalorder %v8139_v54, 1  ;;  %v8831_v30 = vld [vmem:[#allocation2_spill] sm:$0xff] }
 0x2b4   :  { %vm4562_vm13 = vmand %vm8829_vm12, %vm4490_vm5  ;;  %v8234_v14 = vsel %vm8205_vm9, %v4275_v16, %v8145_v19  ;;  %v3782_v57 = vadd.s32 %v3780_v25, %v3774_v29  ;;  %v8237_v41 = vadd.f32 %v8125_v56, %v5059_v26  ;;  %v3362_v8 = vand.u32 65535, %v8199_v49  ;;  %v8269_v26 = vpop.f32.mrf.mxu3  ;;  %v1493_v4 = vpop.f32.mrf.mxu2 }
 0x2b5   :  { %v3800_v20 = vmul.u32 14564, %v3797_v23  ;;  %v8240_v43 = vmul.u32 14564, %v3798_v21  ;;  %v3804_v44 = vshll.u32 %v8211_v2, 16  ;;  %v3354_v38 = vshrl.u32 %v3353_v42, 4 }
 0x2b6   :  { %v8244_v54 = vmul.f32 %v5498_v32, %v7444_v60  ;;  %v8247_v3 = vmul.f32 %v5499_v52, %v8831_v30  ;;  %v3784_v19 = vsel %vm3783_vm10, 1, %v8741_v9  ;;  %v3363_v56 = vshrl.u32 %v8199_v49, 16 }
 0x2b7   :  { %v8252_v61 = vsel %vm4562_vm13, 1.0, %v8738_v55  ;;  %v8254_v37 = vmul.u32 18, %v3760_v18  ;;  %v3776_v23 = vshrl.u32 %v8153_v51, 16  ;;  %v3355_v7 = vmul.u32 18, %v3354_v38  ;;  %v829_v18 = vpop.f32.mrf.mxu0  ;;  %v1102_v42 = vpop.f32.mrf.mxu1 }
 0x2b8   :  { %8830 = vst [vmem:[#allocation16_spill] sm:$0xff] %v8244_v54  ;;  %vm4419_vm15 = vcmp.ge.s32.totalorder %v8234_v14, 1  ;;  %vm4491_vm5 = vcmp.le.s32.totalorder %v8234_v14, 16  ;;  %v3778_v35 = vshrl.u32 %v8167_v31, 16  ;;  %v3365_v46 = vmul.u32 14564, %v3362_v8 }
 0x2b9   :  { %8832 = vst [vmem:[#allocation2_spill] sm:$0xff] %v8247_v3  ;;  %v3366_v28 = vmul.u32 58254, %v3362_v8  ;;  %v3367_v24 = vmul.u32 14564, %v3363_v56  ;;  %v3786_v16 = vadd.s32 %v3784_v19, %v3782_v57  ;;  %v3806_v29 = vshll.u32 %v8240_v43, 16  ;;  %vm4563_vm9 = vmand %vm4419_vm15, %vm4491_vm5 }
 0x2ba   :  { %vm8261_vm7 = vc.u32 %v3800_v20, %v3804_v44  ;;  %v3356_v17 = vsub.s32 %v8096_v10, %v3355_v7  ;;  %v3810_v51 = vadd.s32 %v3804_v44, %v3800_v20  ;;  %v8267_v25 = vadd.s32 528, %v5948_v45 }
 0x2bb   :  { %v3368_v22 = vmul.u32 58254, %v3363_v56  ;;  %v3369_v32 = vshll.u32 %v3366_v28, 16  ;;  %v3371_v52 = vshll.u32 %v3367_v24, 16  ;;  %v3803_v57 = vmul.u32 58254, %v3798_v21 }
 0x2bc   :  { %vm4046_vm2 = vcmp.ne.s32.totalorder %v3356_v17, 0  ;;  %vm4118_vm11 = vcmp.lt.s32.totalorder %v3356_v17, 0  ;;  %v4262_v31 = vadd.s32 18, %v3356_v17  ;;  %v1101_v8 = vadd.f32 %v1100_v62, %v827_v1 }
 0x2bd   :  { %vm4190_vm14 = vmand %vm4118_vm11, %vm4046_vm2  ;;  %vm3373_vm3 = vc.u32 %v3365_v46, %v3369_v32  ;;  %v3375_v38 = vadd.s32 %v3369_v32, %v3365_v46  ;;  %v3809_v10 = vsel %vm8261_vm7, 1, %v8741_v9  ;;  %v1103_v19 = vadd.f32 %v1102_v42, %v829_v18 }
 0x2be   :  { %v4334_v20 = vsel %vm4190_vm14, %v4262_v31, %v3356_v17  ;;  %v3374_v44 = vsel %vm3373_vm3, 1, %v8741_v9  ;;  %v3826_v56 = vand.u32 65535, %v8267_v25  ;;  %vm3812_vm8 = vc.u32 %v3810_v51, %v3806_v29 }
 0x2bf   :  { %vm4406_vm0 = vcmp.ge.s32.totalorder %v4334_v20, 1  ;;  %vm4478_vm4 = vcmp.le.s32.totalorder %v4334_v20, 16  ;;  %v3376_v7 = vadd.s32 %v3374_v44, %v3368_v22  ;;  %v3370_v21 = vshrl.u32 %v3366_v28, 16 }
 0x2c0   :  { %vm4550_vm6 = vmand %vm4406_vm0, %vm4478_vm4  ;;  %vm3377_vm1 = vc.u32 %v3375_v38, %v3371_v52  ;;  %v8276_v1 = vadd.f32 %v1493_v4, %v1103_v19  ;;  %v3787_v62 = vadd.s32 %v3786_v16, %v3776_v23  ;;  %v8279_v11 = vadd.f32 %v1491_v33, %v1101_v8 }
 0x2c1   :  { %v5488_v46 = vsel %vm4550_vm6, 1.0, %v8738_v55  ;;  %v3378_v17 = vsel %vm3377_vm1, 1, %v8741_v9  ;;  %v3811_v32 = vadd.s32 %v3809_v10, %v3803_v57  ;;  %v3372_v18 = vshrl.u32 %v3367_v24, 16  ;;  %v8837_v57 = vld [vmem:[#allocation10_spill] sm:$0xff]  ;;  %v1538_v10 = vpop.f32.mrf.mxu3 }
 0x2c2   :  { %v4910_v31 = vmul.f32 %v5488_v46, %v8062_v34  ;;  %v3380_v42 = vadd.s32 %v3378_v17, %v3376_v7  ;;  %v3813_v22 = vsel %vm3812_vm8, 1, %v8741_v9  ;;  %v3827_v29 = vshrl.u32 %v8267_v25, 16  ;;  %v8840_v46 = vld [vmem:[#allocation3_spill] sm:$0xff] }
 0x2c3   :  { %v8285_v28 = vmul.u32 58254, %v3826_v56  ;;  %v5681_v4 = vpack.c.bf16 %v8276_v1, %v8279_v11  ;;  %v8298_v16 = vadd.s32 408, %v5948_v45  ;;  %v8302_v51 = vmul.f32 %v8244_v54, %v7444_v60 }
 0x2c4   :  { %v8294_v33 = vadd.f32 %v8221_v40, %v4910_v31  ;;  %v5060_v23 = vmul.f32 %v4910_v31, %v8062_v34  ;;  %v3381_v24 = vadd.s32 %v3380_v42, %v3370_v21  ;;  %v8306_v52 = vmul.f32 %v8247_v3, %v8831_v30 }
 0x2c5   :  { %8835 = vst [vmem:[#allocation17_spill] sm:$0xff] %v8302_v51  ;;  %v8310_v14 = vmul.f32 %v8252_v61, %v8837_v57  ;;  %v3788_v40 = vadd.s32 %v3787_v62, %v3778_v35  ;;  %v3805_v34 = vshrl.u32 %v8211_v2, 16  ;;  %v3815_v8 = vadd.s32 %v3813_v22, %v3811_v32  ;;  %v8842_v32 = vld [vmem:[#allocation11_spill] sm:$0xff] }
 0x2c6   :  { %8836 = vst [vmem:[#allocation18_spill] sm:$0xff] %v8306_v52  ;;  %v8317_v38 = vadd.f32 %v8237_v41, %v5060_v23  ;;  %v3382_v60 = vadd.s32 %v3381_v24, %v3372_v18  ;;  %v8320_v30 = vsel %vm4563_vm9, 1.0, %v8738_v55  ;;  %v8324_v61 = vsub.s32 %v7971_v12, %v8254_v37 }
 0x2c7   :  { %8838 = vst [vmem:[#allocation19_spill] sm:$0xff] %v8310_v14  ;;  %v3829_v35 = vmul.u32 14564, %v3826_v56  ;;  %v8327_v20 = vadd.s32 536, %v5948_v45  ;;  %v8329_v44 = vmul.u32 14564, %v3827_v29  ;;  %v3833_v2 = vshll.u32 %v8285_v28, 16 }
 0x2c8   :  { %5760 = vst [vmem:[%s8686_s2 + $0xc8] sm:$0xff] %v5681_v4   ;;  %v3383_v19 = vshrl.u32 %v3382_v60, 4  ;;  %v3391_v41 = vand.u32 65535, %v8298_v16  ;;  %v3789_v7 = vshrl.u32 %v3788_v40, 4  ;;  %v3807_v21 = vshrl.u32 %v8240_v43, 16 }
 0x2c9   :  { %8839 = vst [vmem:[#allocation20_spill] sm:$0xff] %v8320_v30  ;;  %v3392_v62 = vshrl.u32 %v8298_v16, 16  ;;  %v8336_v17 = vadd.f32 %v1538_v10, %v8840_v46  ;;  %v3816_v12 = vadd.s32 %v3815_v8, %v3805_v34  ;;  %v3832_v37 = vmul.u32 58254, %v3827_v29 }
 0x2ca   :  { %v3384_v56 = vmul.u32 18, %v3383_v19  ;;  %v8340_v31 = vadd.f32 %v8269_v26, %v8842_v32  ;;  %v3855_v18 = vand.u32 65535, %v8327_v20  ;;  %v3394_v42 = vmul.u32 14564, %v3391_v41 }
 0x2cb   :  { %8841 = vst [vmem:[#allocation3_spill] sm:$0xff] %v8336_v17  ;;  %v3395_v22 = vmul.u32 58254, %v3391_v41  ;;  %v3396_v4 = vmul.u32 14564, %v3392_v62  ;;  %v3835_v23 = vshll.u32 %v8329_v44, 16  ;;  %vm3837_vm10 = vc.u32 %v3829_v35, %v3833_v2 }
 0x2cc   :  { %8843 = vst [vmem:[#allocation11_spill] sm:$0xff] %v8340_v31  ;;  %v3385_v43 = vsub.s32 %v8199_v49, %v3384_v56  ;;  %v5726_v24 = vpack.c.bf16 %v8336_v17, %v8340_v31  ;;  %v3839_v40 = vadd.s32 %v3833_v2, %v3829_v35  ;;  %v3397_v29 = vmul.u32 58254, %v3392_v62  ;;  %v1105_v31 = vpop.f32.mrf.mxu1  ;;  %v1496_v56 = vpop.f32.mrf.mxu2 }
 0x2cd   :  { %v3398_v34 = vshll.u32 %v3395_v22, 16  ;;  %v3400_v8 = vshll.u32 %v3396_v4, 16  ;;  %v3856_v26 = vshrl.u32 %v8327_v20, 16  ;;  %v3838_v10 = vsel %vm3837_vm10, 1, %v8741_v9 }
 0x2ce   :  { %vm4047_vm12 = vcmp.ne.s32.totalorder %v3385_v43, 0  ;;  %vm4119_vm13 = vcmp.lt.s32.totalorder %v3385_v43, 0  ;;  %v4263_v60 = vadd.s32 18, %v3385_v43  ;;  %5769 = vst [vmem:[%s8686_s2 + $0x110] sm:$0xff] %v5726_v24   ;;  %v8352_v19 = vmul.u32 58254, %v3855_v18 }
 0x2cf   :  { %vm4191_vm15 = vmand %vm4119_vm13, %vm4047_vm12  ;;  %vm3402_vm5 = vc.u32 %v3394_v42, %v3398_v34  ;;  %v3404_v49 = vadd.s32 %v3398_v34, %v3394_v42  ;;  %v8355_v2 = vadd.s32 544, %v5948_v45  ;;  %v3399_v41 = vshrl.u32 %v3395_v22, 16 }
 0x2d0   :  { %v4335_v35 = vsel %vm4191_vm15, %v4263_v60, %v3385_v43  ;;  %v3403_v62 = vsel %vm3402_vm5, 1, %v8741_v9  ;;  %vm8358_vm14 = vc.u32 %v3839_v40, %v3835_v23  ;;  %v3858_v32 = vmul.u32 14564, %v3855_v18 }
 0x2d1   :  { %vm4407_vm7 = vcmp.ge.s32.totalorder %v4335_v35, 1  ;;  %vm4479_vm2 = vcmp.le.s32.totalorder %v4335_v35, 16  ;;  %v3405_v46 = vadd.s32 %v3403_v62, %v3397_v29  ;;  %vm3406_vm11 = vc.u32 %v3404_v49, %v3400_v8  ;;  %v832_v62 = vpop.f32.mrf.mxu0 }
 0x2d2   :  { %v8362_v24 = vmul.u32 14564, %v3856_v26  ;;  %vm4551_vm3 = vmand %vm4407_vm7, %vm4479_vm2  ;;  %v3407_v42 = vsel %vm3406_vm11, 1, %v8741_v9  ;;  %v3862_v43 = vshll.u32 %v8352_v19, 16  ;;  %v3401_v34 = vshrl.u32 %v3396_v4, 16 }
 0x2d3   :  { %v5489_v22 = vsel %vm4551_vm3, 1.0, %v8738_v55  ;;  %v3409_v60 = vadd.s32 %v3407_v42, %v3405_v46  ;;  %v3790_v17 = vmul.u32 18, %v3789_v7  ;;  %v3884_v23 = vand.u32 65535, %v8355_v2 }
 0x2d4   :  { %v4911_v29 = vmul.f32 %v5489_v22, %v8279_v11  ;;  %v8370_v40 = vadd.s32 416, %v5948_v45  ;;  %v8373_v18 = vadd.s32 18, %v8324_v61  ;;  %v8375_v8 = vadd.s32 %v3816_v12, %v3807_v21  ;;  %v1498_v51 = vpop.f32.mrf.mxu2 }
 0x2d5   :  { %v3840_v49 = vadd.s32 %v3838_v10, %v3832_v37  ;;  %v3410_v35 = vadd.s32 %v3409_v60, %v3399_v41  ;;  %v3842_v7 = vsel %vm8358_vm14, 1, %v8741_v9  ;;  %v3864_v22 = vshll.u32 %v8362_v24, 16 }
 0x2d6   :  { %v8381_v4 = vadd.f32 %v8294_v33, %v4911_v29  ;;  %v5061_v46 = vmul.f32 %v4911_v29, %v8279_v11  ;;  %vm3866_vm0 = vc.u32 %v3858_v32, %v3862_v43  ;;  %v3868_v21 = vadd.s32 %v3862_v43, %v3858_v32 }
 0x2d7   :  { %v3411_v12 = vadd.s32 %v3410_v35, %v3401_v34  ;;  %v8387_v37 = vsub.s32 %v8077_v27, %v3790_v17  ;;  %v8392_v41 = vmul.u32 58254, %v3884_v23  ;;  %v3420_v33 = vand.u32 65535, %v8370_v40 }
 0x2d8   :  { %v8390_v10 = vadd.f32 %v8317_v38, %v5061_v46  ;;  %v3834_v11 = vshrl.u32 %v8285_v28, 16  ;;  %v3844_v60 = vadd.s32 %v3842_v7, %v3840_v49  ;;  %v3861_v29 = vmul.u32 58254, %v3856_v26 }
 0x2d9   :  { %v3412_v42 = vshrl.u32 %v3411_v12, 4  ;;  %v3867_v32 = vsel %vm3866_vm0, 1, %v8741_v9  ;;  %v8846_v27 = vshrl.u32 %v8355_v2, 16  ;;  %v3421_v38 = vshrl.u32 %v8370_v40, 16 }
 0x2da   :  { %vm3870_vm4 = vc.u32 %v3868_v21, %v3864_v22  ;;  %v3887_v34 = vmul.u32 14564, %v3884_v23  ;;  %v3891_v28 = vshll.u32 %v8392_v41, 16  ;;  %v3423_v49 = vmul.u32 14564, %v3420_v33  ;;  %v8411_v23 = vpop.f32.mrf.mxu3 }
 0x2db   :  { %v8400_v17 = vmul.u32 14564, %v8846_v27  ;;  %v3413_v35 = vmul.u32 18, %v3412_v42  ;;  %v3424_v26 = vmul.u32 58254, %v3420_v33  ;;  %v3425_v7 = vmul.u32 14564, %v3421_v38  ;;  %v834_v33 = vpop.f32.mrf.mxu0 }
 0x2dc   :  { %v3845_v46 = vadd.s32 %v3844_v60, %v3834_v11  ;;  %v3869_v12 = vadd.s32 %v3867_v32, %v3861_v29  ;;  %v8407_v47 = vadd.s32 552, %v5948_v45  ;;  %v3871_v27 = vsel %vm3870_vm4, 1, %v8741_v9  ;;  %v1107_v11 = vpop.f32.mrf.mxu1 }
 0x2dd   :  { %v3414_v59 = vsub.s32 %v8298_v16, %v3413_v35  ;;  %v3893_v53 = vshll.u32 %v8400_v17, 16  ;;  %v3426_v43 = vmul.u32 58254, %v3421_v38  ;;  %v3427_v22 = vshll.u32 %v3424_v26, 16 }
 0x2de   :  { %v3429_v21 = vshll.u32 %v3425_v7, 16  ;;  %vm8413_vm1 = vc.u32 %v3887_v34, %v3891_v28  ;;  %v1106_v16 = vadd.f32 %v1105_v31, %v832_v62  ;;  %v3913_v38 = vand.u32 65535, %v8407_v47 }
 0x2df   :  { %vm4048_vm8 = vcmp.ne.s32.totalorder %v3414_v59, 0  ;;  %vm4120_vm6 = vcmp.lt.s32.totalorder %v3414_v59, 0  ;;  %v4264_v42 = vadd.s32 18, %v3414_v59  ;;  %vm3431_vm10 = vc.u32 %v3423_v49, %v3427_v22 }
 0x2e0   :  { %vm4192_vm9 = vmand %vm4120_vm6, %vm4048_vm8  ;;  %v3433_v29 = vadd.s32 %v3427_v22, %v3423_v49  ;;  %v3432_v35 = vsel %vm3431_vm10, 1, %v8741_v9  ;;  %v1108_v52 = vadd.f32 %v1107_v11, %v834_v33  ;;  %v8420_v57 = vadd.s32 560, %v5948_v45 }
 0x2e1   :  { %v4336_v32 = vsel %vm4192_vm9, %v4264_v42, %v3414_v59  ;;  %v3434_v14 = vadd.s32 %v3432_v35, %v3426_v43  ;;  %v3897_v3 = vadd.s32 %v3891_v28, %v3887_v34  ;;  %v3428_v30 = vshrl.u32 %v3424_v26, 16 }
 0x2e2   :  { %vm4408_vm12 = vcmp.ge.s32.totalorder %v4336_v32, 1  ;;  %vm4480_vm13 = vcmp.le.s32.totalorder %v4336_v32, 16  ;;  %vm3435_vm5 = vc.u32 %v3433_v29, %v3429_v21  ;;  %v8422_v31 = vadd.f32 %v1498_v51, %v1108_v52  ;;  %v1543_v32 = vpop.f32.mrf.mxu3 }
 0x2e3   :  { %vm4552_vm15 = vmand %vm4408_vm12, %vm4480_vm13  ;;  %v3914_v62 = vshrl.u32 %v8407_v47, 16  ;;  %v8426_v49 = vadd.f32 %v1496_v56, %v1106_v16  ;;  %v3436_v22 = vsel %vm3435_vm5, 1, %v8741_v9  ;;  %v8430_v42 = vmul.u32 58254, %v3913_v38 }
 0x2e4   :  { %v5490_v59 = vsel %vm4552_vm15, 1.0, %v8738_v55  ;;  %v3430_v33 = vshrl.u32 %v3425_v7, 16  ;;  %v3438_v11 = vadd.s32 %v3436_v22, %v3434_v14  ;;  %v3863_v34 = vshrl.u32 %v8352_v19, 16 }
 0x2e5   :  { %v4912_v43 = vmul.f32 %v5490_v59, %v8276_v1  ;;  %v3873_v28 = vadd.s32 %v3871_v27, %v3869_v12  ;;  %v3942_v51 = vand.u32 65535, %v8420_v57  ;;  %v5686_v52 = vpack.c.bf16 %v8422_v31, %v8426_v49 }
 0x2e6   :  { %v3439_v21 = vadd.s32 %v3438_v11, %v3428_v30  ;;  %v8441_v16 = vadd.s32 424, %v5948_v45  ;;  %v8849_v7 = vshrl.u32 %v8355_v2, 16  ;;  %v3896_v19 = vsel %vm8413_vm1, 1, %v8741_v9 }
 0x2e7   :  { %v8437_v26 = vadd.f32 %v8381_v4, %v4912_v43  ;;  %v5062_v56 = vmul.f32 %v4912_v43, %v8276_v1  ;;  %vm8448_vm7 = vc.u32 %v3897_v3, %v3893_v53  ;;  %v3916_v27 = vmul.u32 14564, %v3913_v38  ;;  %5761 = vst [vmem:[%s8686_s2 + $0xd0] sm:$0xff] %v5686_v52  }
 0x2e8   :  { %v3890_v14 = vmul.u32 58254, %v8849_v7  ;;  %v8458_v30 = vmul.u32 14564, %v3914_v62  ;;  %v3920_v4 = vshll.u32 %v8430_v42, 16  ;;  %v3440_v29 = vadd.s32 %v3439_v21, %v3430_v33  ;;  %v8857_v21 = vld [vmem:[#allocation12_spill] sm:$0xff] }
 0x2e9   :  { %v8456_v1 = vadd.f32 %v8390_v10, %v5062_v56  ;;  %v8852_v60 = vshrl.u32 %v8375_v8, 4  ;;  %v8853_v3 = vshrl.u32 %v8329_v44, 16  ;;  %v3943_v59 = vshrl.u32 %v8420_v57, 16 }
 0x2ea   :  { %v8471_v10 = vadd.s32 %v3873_v28, %v3863_v34  ;;  %v3441_v22 = vshrl.u32 %v3440_v29, 4  ;;  %v8473_v43 = vmul.u32 58254, %v3942_v51  ;;  %v3449_v33 = vand.u32 65535, %v8441_v16 }
 0x2eb   :  { %v8463_v53 = vmul.u32 18, %v8852_v60  ;;  %v8467_v38 = vadd.s32 %v3845_v46, %v8853_v3  ;;  %v3898_v11 = vadd.s32 %v3896_v19, %v3890_v14  ;;  %v3900_v8 = vsel %vm8448_vm7, 1, %v8741_v9  ;;  %v8854_v46 = vld [vmem:[#allocation4_spill] sm:$0xff] }
 0x2ec   :  { %v3450_v44 = vshrl.u32 %v8441_v16, 16  ;;  %v8481_v52 = vadd.f32 %v1543_v32, %v8854_v46  ;;  %v3922_v56 = vshll.u32 %v8458_v30, 16  ;;  %vm8484_vm2 = vc.u32 %v3916_v27, %v3920_v4 }
 0x2ed   :  { %v3442_v28 = vmul.u32 18, %v3441_v22  ;;  %v8490_v7 = vadd.f32 %v8411_v23, %v8857_v21  ;;  %v8492_v14 = vmul.u32 14564, %v3943_v59  ;;  %v3452_v19 = vmul.u32 14564, %v3449_v33 }
 0x2ee   :  { %v3453_v12 = vmul.u32 58254, %v3449_v33  ;;  %v3454_v29 = vmul.u32 14564, %v3450_v44  ;;  %v3945_v32 = vmul.u32 14564, %v3942_v51  ;;  %v3949_v3 = vshll.u32 %v8473_v43, 16 }
 0x2ef   :  { %8858 = vst [vmem:[#allocation4_spill] sm:$0xff] %v8490_v7  ;;  %v3443_v60 = vsub.s32 %v8370_v40, %v3442_v28  ;;  %v5731_v46 = vpack.c.bf16 %v8481_v52, %v8490_v7  ;;  %v3926_v35 = vadd.s32 %v3920_v4, %v3916_v27  ;;  %v3455_v15 = vmul.u32 58254, %v3450_v44 }
 0x2f0   :  { %v3456_v22 = vshll.u32 %v3453_v12, 16  ;;  %v3458_v54 = vshll.u32 %v3454_v29, 16  ;;  %v3919_v58 = vmul.u32 58254, %v3914_v62  ;;  %v3925_v23 = vsel %vm8484_vm2, 1, %v8741_v9 }
 0x2f1   :  { %vm4049_vm11 = vcmp.ne.s32.totalorder %v3443_v60, 0  ;;  %vm4121_vm14 = vcmp.lt.s32.totalorder %v3443_v60, 0  ;;  %5770 = vst [vmem:[%s8686_s2 + $0x118] sm:$0xff] %v5731_v46   ;;  %v4265_v40 = vadd.s32 18, %v3443_v60  ;;  %v3951_v51 = vshll.u32 %v8492_v14, 16 }
 0x2f2   :  { %vm3460_vm3 = vc.u32 %v3452_v19, %v3456_v22  ;;  %v3462_v33 = vadd.s32 %v3456_v22, %v3452_v19  ;;  %vm4193_vm0 = vmand %vm4121_vm14, %vm4049_vm11  ;;  %vm3953_vm4 = vc.u32 %v3945_v32, %v3949_v3  ;;  %v3955_v27 = vadd.s32 %v3949_v3, %v3945_v32 }
 0x2f3   :  { %v3461_v62 = vsel %vm3460_vm3, 1, %v8741_v9  ;;  %v8507_v4 = vadd.s32 568, %v5948_v45  ;;  %vm8509_vm8 = vc.u32 %v3926_v35, %v3922_v56  ;;  %v3457_v34 = vshrl.u32 %v3453_v12, 16 }
 0x2f4   :  { %v3463_v28 = vadd.s32 %v3461_v62, %v3455_v15  ;;  %vm3464_vm6 = vc.u32 %v3462_v33, %v3458_v54  ;;  %v3948_v21 = vmul.u32 58254, %v3943_v59  ;;  %v4337_v32 = vsel %vm4193_vm0, %v4265_v40, %v3443_v60 }
 0x2f5   :  { %v3465_v46 = vsel %vm3464_vm6, 1, %v8741_v9  ;;  %v3971_v19 = vand.u32 65535, %v8507_v4  ;;  %v3972_v22 = vshrl.u32 %v8507_v4, 16  ;;  %v3954_v3 = vsel %vm3953_vm4, 1, %v8741_v9 }
 0x2f6   :  { %v3459_v7 = vshrl.u32 %v3454_v29, 16  ;;  %v3467_v45 = vadd.s32 %v3465_v46, %v3463_v28  ;;  %vm4060_vm1 = vcmp.ne.s32.totalorder %v8324_v61, 0  ;;  %vm4132_vm9 = vcmp.lt.s32.totalorder %v8324_v61, 0 }
 0x2f7   :  { %v3892_v35 = vshrl.u32 %v8392_v41, 16  ;;  %v3927_v15 = vadd.s32 %v3925_v23, %v3919_v58  ;;  %vm3957_vm10 = vc.u32 %v3955_v27, %v3951_v51  ;;  %v3975_v54 = vmul.u32 58254, %v3971_v19  ;;  %vm8545_vm14 = vmand %vm4132_vm9, %vm4060_vm1 }
 0x2f8   :  { %v3929_v59 = vsel %vm8509_vm8, 1, %v8741_v9  ;;  %v3468_v56 = vadd.s32 %v3467_v45, %v3457_v34  ;;  %v3974_v12 = vmul.u32 14564, %v3971_v19  ;;  %v3976_v60 = vmul.u32 14564, %v3972_v22 }
 0x2f9   :  { %v3902_v40 = vadd.s32 %v3900_v8, %v3898_v11  ;;  %vm4409_vm12 = vcmp.ge.s32.totalorder %v4337_v32, 1  ;;  %vm4481_vm13 = vcmp.le.s32.totalorder %v4337_v32, 16  ;;  %v3956_v29 = vadd.s32 %v3954_v3, %v3948_v21 }
 0x2fa   :  { %vm4061_vm15 = vcmp.ne.s32.totalorder %v8387_v37, 0  ;;  %vm4133_vm5 = vcmp.lt.s32.totalorder %v8387_v37, 0  ;;  %v3958_v41 = vsel %vm3957_vm10, 1, %v8741_v9  ;;  %v3469_v58 = vadd.s32 %v3468_v56, %v3459_v7  ;;  %vm4553_vm7 = vmand %vm4409_vm12, %vm4481_vm13 }
 0x2fb   :  { %v3977_v23 = vmul.u32 58254, %v3972_v22  ;;  %v3978_v51 = vshll.u32 %v3975_v54, 16  ;;  %v8861_v33 = vshrl.u32 %v8362_v24, 16  ;;  %v3921_v62 = vshrl.u32 %v8430_v42, 16  ;;  %vm4205_vm1 = vmand %vm4133_vm5, %vm4061_vm15 }
 0x2fc   :  { %v3931_v44 = vadd.s32 %v3929_v59, %v3927_v15  ;;  %v3980_v11 = vshll.u32 %v3976_v60, 16  ;;  %v3894_v8 = vshrl.u32 %v8400_v17, 16  ;;  %v3470_v34 = vshrl.u32 %v3469_v58, 4 }
 0x2fd   :  { %v3875_v27 = vadd.s32 %v8471_v10, %v8861_v33  ;;  %vm3982_vm2 = vc.u32 %v3974_v12, %v3978_v51  ;;  %v3984_v28 = vadd.s32 %v3978_v51, %v3974_v12  ;;  %v3903_v21 = vadd.s32 %v3902_v40, %v3892_v35 }
 0x2fe   :  { %v3950_v46 = vshrl.u32 %v8473_v43, 16  ;;  %v3960_v7 = vadd.s32 %v3958_v41, %v3956_v29  ;;  %v3983_v19 = vsel %vm3982_vm2, 1, %v8741_v9  ;;  %v3923_v24 = vshrl.u32 %v8458_v30, 16 }
 0x2ff   :  { %v3471_v22 = vmul.u32 18, %v3470_v34  ;;  %v3985_v10 = vadd.s32 %v3983_v19, %v3977_v23  ;;  %vm3986_vm11 = vc.u32 %v3984_v28, %v3980_v11  ;;  %v3932_v42 = vadd.s32 %v3931_v44, %v3921_v62 }
 0x300   :  { %v5491_v32 = vsel %vm4553_vm7, 1.0, %v8738_v55  ;;  %v3979_v3 = vshrl.u32 %v3975_v54, 16  ;;  %v3987_v17 = vsel %vm3986_vm11, 1, %v8741_v9  ;;  %v3820_v45 = vsub.s32 %v8160_v36, %v8463_v53 }
 0x301   :  { %v3847_v35 = vshrl.u32 %v8467_v38, 4  ;;  %v3472_v43 = vsub.s32 %v8441_v16, %v3471_v22  ;;  %v3989_v15 = vadd.s32 %v3987_v17, %v3985_v10  ;;  %v3904_v59 = vadd.s32 %v3903_v21, %v3894_v8 }
 0x302   :  { %v3952_v30 = vshrl.u32 %v8492_v14, 16  ;;  %v3961_v56 = vadd.s32 %v3960_v7, %v3950_v46  ;;  %v3981_v12 = vshrl.u32 %v3976_v60, 16  ;;  %v4913_v9 = vmul.f32 %v5491_v32, %v8426_v49 }
 0x303   :  { %vm4050_vm3 = vcmp.ne.s32.totalorder %v3472_v43, 0  ;;  %vm4122_vm0 = vcmp.lt.s32.totalorder %v3472_v43, 0  ;;  %v4266_v36 = vadd.s32 18, %v3472_v43  ;;  %v4277_v16 = vadd.s32 18, %v8387_v37 }
 0x304   :  { %v3876_v53 = vshrl.u32 %v3875_v27, 4  ;;  %v3933_v38 = vadd.s32 %v3932_v42, %v3923_v24  ;;  %vm4194_vm4 = vmand %vm4122_vm0, %vm4050_vm3  ;;  %v3990_v14 = vadd.s32 %v3989_v15, %v3979_v3  ;;  %vm4062_vm8 = vcmp.ne.s32.totalorder %v3820_v45, 0 }
 0x305   :  { %vm4134_vm6 = vcmp.lt.s32.totalorder %v3820_v45, 0  ;;  %v3848_v60 = vmul.u32 18, %v3847_v35  ;;  %v4338_v40 = vsel %vm4194_vm4, %v4266_v36, %v3472_v43  ;;  %v3905_v29 = vshrl.u32 %v3904_v59, 4  ;;  %v8872_v36 = vld [vmem:[#allocation9_spill] sm:$0xff] }
 0x306   :  { %vm4410_vm9 = vcmp.ge.s32.totalorder %v4338_v40, 1  ;;  %vm4482_vm10 = vcmp.le.s32.totalorder %v4338_v40, 16  ;;  %v3991_v41 = vadd.s32 %v3990_v14, %v3981_v12  ;;  %v8559_v58 = vsel %vm8545_vm14, %v8373_v18, %v8324_v61  ;;  %vm4206_vm13 = vmand %vm4134_vm6, %vm4062_vm8 }
 0x307   :  { %v4278_v23 = vadd.s32 18, %v3820_v45  ;;  %v5063_v51 = vmul.f32 %v4913_v9, %v8426_v49  ;;  %v3962_v33 = vadd.s32 %v3961_v56, %v3952_v30  ;;  %vm4554_vm12 = vmand %vm4410_vm9, %vm4482_vm10  ;;  %v3877_v27 = vmul.u32 18, %v3876_v53  ;;  %v8873_v53 = vld [vmem:[#allocation5_spill] sm:$0xff] }
 0x308   :  { %v3934_v62 = vshrl.u32 %v3933_v38, 4  ;;  %v5492_v44 = vsel %vm4554_vm12, 1.0, %v8738_v55  ;;  %v3992_v11 = vshrl.u32 %v3991_v41, 4  ;;  %v8564_v8 = vsel %vm4205_vm1, %v4277_v16, %v8387_v37  ;;  %v8874_v38 = vld [vmem:[#allocation20_spill] sm:$0xff]  ;;  %v8877_v41 = vld [vmem:[#allocation2_spill] sm:$0xff] }
 0x309   :  { %v3849_v34 = vsub.s32 %v8267_v25, %v3848_v60  ;;  %v4984_v61 = vadd.f32 %v8437_v26, %v4913_v9  ;;  %v4914_v18 = vmul.f32 %v5492_v44, %v8422_v31  ;;  %vm4420_vm15 = vcmp.ge.s32.totalorder %v8559_v58, 1 }
 0x30a   :  { %vm4492_vm5 = vcmp.le.s32.totalorder %v8559_v58, 16  ;;  %v3906_v49 = vmul.u32 18, %v3905_v29  ;;  %v3993_v28 = vmul.u32 18, %v3992_v11  ;;  %v5134_v21 = vadd.f32 %v8456_v1, %v5063_v51  ;;  %v8881_v11 = vld [vmem:[#allocation13_spill] sm:$0xff] }
 0x30b   :  { %v3963_v46 = vshrl.u32 %v3962_v33, 4  ;;  %v4985_v37 = vadd.f32 %v4984_v61, %v4914_v18  ;;  %v5064_v7 = vmul.f32 %v4914_v18, %v8422_v31  ;;  %vm4421_vm7 = vcmp.ge.s32.totalorder %v8564_v8, 1  ;;  %v8879_v33 = vld [vmem:[#allocation10_spill] sm:$0xff] }
 0x30c   :  { %v4350_v19 = vsel %vm4206_vm13, %v4278_v23, %v3820_v45  ;;  %v3878_v25 = vsub.s32 %v8327_v20, %v3877_v27  ;;  %v3935_v26 = vmul.u32 18, %v3934_v62  ;;  %v3994_v24 = vsub.s32 %v8507_v4, %v3993_v28  ;;  %v8878_v23 = vld [vmem:[#allocation17_spill] sm:$0xff]  ;;  %v8880_v27 = vld [vmem:[#allocation19_spill] sm:$0xff]  ;;  %v8882_v18 = vld [vmem:[#allocation18_spill] sm:$0xff] }
 0x30d   :  { %vm4063_vm2 = vcmp.ne.s32.totalorder %v3849_v34, 0  ;;  %vm4135_vm11 = vcmp.lt.s32.totalorder %v3849_v34, 0  ;;  %v4986_v22 = vadd.f32 %v4985_v37, %v7830_v63  ;;  %v5135_v10 = vadd.f32 %v5134_v21, %v5064_v7 }
 0x30e   :  { %v3907_v42 = vsub.s32 %v8355_v2, %v3906_v49  ;;  %vm4068_vm14 = vcmp.ne.s32.totalorder %v3994_v24, 0  ;;  %vm4140_vm3 = vcmp.lt.s32.totalorder %v3994_v24, 0  ;;  %v4284_v1 = vadd.s32 18, %v3994_v24  ;;  %vm8585_vm6 = vmand %vm4135_vm11, %vm4063_vm2 }
 0x30f   :  { %v4279_v32 = vadd.s32 18, %v3849_v34  ;;  %v3964_v31 = vmul.u32 18, %v3963_v46  ;;  %v4987_v3 = vadd.f32 %v4986_v22, %v7923_v39  ;;  %v5136_v17 = vadd.f32 %v5135_v10, %v7919_v5  ;;  %vm4212_vm0 = vmand %vm4140_vm3, %vm4068_vm14  ;;  %v8883_v46 = vld [vmem:[#allocation6_spill] sm:$0xff] }
 0x310   :  { %vm4064_vm4 = vcmp.ne.s32.totalorder %v3878_v25, 0  ;;  %vm4136_vm8 = vcmp.lt.s32.totalorder %v3878_v25, 0  ;;  %v3936_v20 = vsub.s32 %v8407_v47, %v3935_v26  ;;  %v4356_v4 = vsel %vm4212_vm0, %v4284_v1, %v3994_v24  ;;  %vm8605_vm11 = vmand %vm4420_vm15, %vm4492_vm5  ;;  %v8884_v22 = vld [vmem:[#allocation14_spill] sm:$0xff] }
 0x311   :  { %v4988_v2 = vadd.f32 %v4987_v3, %v8007_v48  ;;  %v5137_v45 = vadd.f32 %v5136_v17, %v8100_v0  ;;  %vm4428_vm1 = vcmp.ge.s32.totalorder %v4356_v4, 1  ;;  %vm4500_vm9 = vcmp.le.s32.totalorder %v4356_v4, 16  ;;  %vm4208_vm3 = vmand %vm4136_vm8, %vm4064_vm4  ;;  %v8885_v3 = vld [vmem:[#allocation8_spill] sm:$0xff] }
 0x312   :  { %vm4493_vm10 = vcmp.le.s32.totalorder %v8564_v8, 16  ;;  %v4280_v5 = vadd.s32 18, %v3878_v25  ;;  %vm4065_vm12 = vcmp.ne.s32.totalorder %v3907_v42, 0  ;;  %vm4137_vm13 = vcmp.lt.s32.totalorder %v3907_v42, 0  ;;  %vm4572_vm14 = vmand %vm4428_vm1, %vm4500_vm9 }
 0x313   :  { %v3965_v39 = vsub.s32 %v8420_v57, %v3964_v31  ;;  %v4989_v47 = vadd.f32 %v4988_v2, %v8010_v6  ;;  %v5138_v35 = vadd.f32 %v5137_v45, %v8104_v50  ;;  %v5510_v43 = vsel %vm4572_vm14, 1.0, %v8738_v55  ;;  %v8868_v50 = vld [vmem:[#allocation15_spill] sm:$0xff]  ;;  %vm8621_vm15 = vmand %vm4421_vm7, %vm4493_vm10 }
 0x314   :  { %vm4422_vm2 = vcmp.ge.s32.totalorder %v4350_v19, 1  ;;  %v4351_v48 = vsel %vm8585_vm6, %v4279_v32, %v3849_v34  ;;  %v4281_v0 = vadd.s32 18, %v3907_v42  ;;  %v8599_v15 = vmul.f32 %v5510_v43, %v8481_v52  ;;  %vm4209_vm6 = vmand %vm4137_vm13, %vm4065_vm12  ;;  %v8886_v45 = vld [vmem:[#allocation7_spill] sm:$0xff] }
 0x315   :  { %vm4066_vm0 = vcmp.ne.s32.totalorder %v3936_v20, 0  ;;  %vm4138_vm4 = vcmp.lt.s32.totalorder %v3936_v20, 0  ;;  %v4990_v6 = vadd.f32 %v4989_v47, %v8133_v13  ;;  %v5139_v59 = vadd.f32 %v5138_v35, %v8868_v50  ;;  %v8871_v13 = vld [vmem:[#allocation16_spill] sm:$0xff] }
 0x316   :  { %vm4494_vm8 = vcmp.le.s32.totalorder %v4350_v19, 16  ;;  %v4352_v30 = vsel %vm4208_vm3, %v4280_v5, %v3878_v25  ;;  %v4282_v56 = vadd.s32 18, %v3936_v20  ;;  %v8615_v12 = vmul.f32 %v8599_v15, %v8481_v52  ;;  %vm4210_vm7 = vmand %vm4138_vm4, %vm4066_vm0 }
 0x317   :  { %vm4067_vm5 = vcmp.ne.s32.totalorder %v3965_v39, 0  ;;  %vm4139_vm1 = vcmp.lt.s32.totalorder %v3965_v39, 0  ;;  %v4991_v9 = vadd.f32 %v4990_v6, %v8871_v13  ;;  %v5140_v16 = vadd.f32 %v5139_v59, %v8872_v36  ;;  %vm8636_vm10 = vmand %vm4422_vm2, %vm4494_vm8  ;;  %v8889_v36 = vld [vmem:[#allocation4_spill] sm:$0xff] }
 0x318   :  { %v4923_v14 = vmul.f32 %v8874_v38, %v8873_v53  ;;  %v5502_v52 = vsel %vm8605_vm11, 1.0, %v8738_v55  ;;  %vm4423_vm9 = vcmp.ge.s32.totalorder %v4351_v48, 1  ;;  %vm4495_vm12 = vcmp.le.s32.totalorder %v4351_v48, 16  ;;  %vm4211_vm3 = vmand %vm4139_vm1, %vm4067_vm5  ;;  %v8887_v48 = vld [vmem:[#allocation11_spill] sm:$0xff] }
 0x319   :  { %v4353_v40 = vsel %vm4209_vm6, %v4281_v0, %v3907_v42  ;;  %v4283_v29 = vadd.s32 18, %v3965_v39  ;;  %v4992_v58 = vadd.f32 %v4991_v9, %v8877_v41  ;;  %v5141_v51 = vadd.f32 %v5140_v16, %v8878_v23  ;;  %vm4567_vm2 = vmand %vm4423_vm9, %vm4495_vm12 }
 0x31a   :  { %v5072_v62 = vmul.f32 %v8880_v27, %v8879_v33  ;;  %v5503_v44 = vsel %vm8621_vm15, 1.0, %v8738_v55  ;;  %vm4424_vm13 = vcmp.ge.s32.totalorder %v4352_v30, 1  ;;  %vm4496_vm14 = vcmp.le.s32.totalorder %v4352_v30, 16  ;;  %v8888_v30 = vld [vmem:[#allocation3_spill] sm:$0xff] }
 0x31b   :  { %v4924_v8 = vmul.f32 %v5502_v52, %v8881_v11  ;;  %v4354_v34 = vsel %vm4210_vm7, %v4282_v56, %v3936_v20  ;;  %v4993_v61 = vadd.f32 %v4992_v58, %v8880_v27  ;;  %v5142_v49 = vadd.f32 %v5141_v51, %v8882_v18  ;;  %vm4568_vm4 = vmand %vm4424_vm13, %vm4496_vm14 }
 0x31c   :  { %v5073_v28 = vmul.f32 %v4923_v14, %v8873_v53  ;;  %v5504_v21 = vsel %vm8636_vm10, 1.0, %v8738_v55  ;;  %vm4425_vm11 = vcmp.ge.s32.totalorder %v4353_v40, 1  ;;  %vm4497_vm0 = vcmp.le.s32.totalorder %v4353_v40, 16 }
 0x31d   :  { %v4925_v37 = vmul.f32 %v5503_v44, %v8883_v46  ;;  %v4355_v7 = vsel %vm4211_vm3, %v4283_v29, %v3965_v39  ;;  %v5143_v19 = vadd.f32 %v5142_v49, %v5072_v62  ;;  %v4994_v25 = vadd.f32 %v4993_v61, %v4923_v14  ;;  %vm4569_vm15 = vmand %vm4425_vm11, %vm4497_vm0 }
 0x31e   :  { %v5505_v26 = vsel %vm4567_vm2, 1.0, %v8738_v55  ;;  %vm4426_vm8 = vcmp.ge.s32.totalorder %v4354_v34, 1  ;;  %vm4498_vm6 = vcmp.le.s32.totalorder %v4354_v34, 16  ;;  %v5074_v24 = vmul.f32 %v4924_v8, %v8881_v11 }
 0x31f   :  { %v4926_v10 = vmul.f32 %v5504_v21, %v8884_v22  ;;  %v4995_v42 = vadd.f32 %v4994_v25, %v4924_v8  ;;  %v5144_v1 = vadd.f32 %v5143_v19, %v5073_v28  ;;  %v5506_v32 = vsel %vm4568_vm4, 1.0, %v8738_v55  ;;  %vm4570_vm9 = vmand %vm4426_vm8, %vm4498_vm6 }
 0x320   :  { %vm4427_vm5 = vcmp.ge.s32.totalorder %v4355_v7, 1  ;;  %vm4499_vm1 = vcmp.le.s32.totalorder %v4355_v7, 16  ;;  %v5075_v31 = vmul.f32 %v4925_v37, %v8883_v46  ;;  %v4927_v17 = vmul.f32 %v5505_v26, %v8885_v3 }
 0x321   :  { %v4996_v20 = vadd.f32 %v4995_v42, %v4925_v37  ;;  %v5145_v4 = vadd.f32 %v5144_v1, %v5074_v24  ;;  %v5507_v63 = vsel %vm4569_vm15, 1.0, %v8738_v55  ;;  %v5076_v2 = vmul.f32 %v4926_v10, %v8884_v22  ;;  %vm4571_vm12 = vmand %vm4427_vm5, %vm4499_vm1 }
 0x322   :  { %v4928_v5 = vmul.f32 %v5506_v32, %v8886_v45  ;;  %v5508_v35 = vsel %vm4570_vm9, 1.0, %v8738_v55  ;;  %v5077_v43 = vmul.f32 %v4927_v17, %v8885_v3  ;;  %v4929_v0 = vmul.f32 %v5507_v63, %v8887_v48 }
 0x323   :  { %v4997_v39 = vadd.f32 %v4996_v20, %v4926_v10  ;;  %v5146_v47 = vadd.f32 %v5145_v4, %v5075_v31  ;;  %v5509_v50 = vsel %vm4571_vm12, 1.0, %v8738_v55  ;;  %v4930_v56 = vmul.f32 %v5508_v35, %v8888_v30 }
 0x324   :  { %v5078_v59 = vmul.f32 %v4928_v5, %v8886_v45  ;;  %v5079_v9 = vmul.f32 %v4929_v0, %v8887_v48  ;;  %v4931_v16 = vmul.f32 %v5509_v50, %v8889_v36 }
 0x325   :  { %v4998_v57 = vadd.f32 %v4997_v39, %v4927_v17  ;;  %v5147_v6 = vadd.f32 %v5146_v47, %v5076_v2  ;;  %v5080_v14 = vmul.f32 %v4930_v56, %v8888_v30 }
 0x326   :  { %v5081_v40 = vmul.f32 %v4931_v16, %v8889_v36 }
 0x327   :  { %v4999_v54 = vadd.f32 %v4998_v57, %v4928_v5  ;;  %v5148_v13 = vadd.f32 %v5147_v6, %v5077_v43 }
 0x329   :  { %v5000_v53 = vadd.f32 %v4999_v54, %v4929_v0  ;;  %v5149_v38 = vadd.f32 %v5148_v13, %v5078_v59 }
 0x32b   :  { %v5001_v52 = vadd.f32 %v5000_v53, %v4930_v56  ;;  %v5150_v60 = vadd.f32 %v5149_v38, %v5079_v9 }
 0x32d   :  { %v5002_v29 = vadd.f32 %v5001_v52, %v4931_v16  ;;  %v5151_v55 = vadd.f32 %v5150_v60, %v5080_v14 }
 0x32f   :  { %v5003_v41 = vadd.f32 %v5002_v29, %v8599_v15  ;;  %v5152_v58 = vadd.f32 %v5151_v55, %v5081_v40 }
 0x331   :  { %v5004_v23 = vrot.slane %v5003_v41, 4  ;;  %v5153_v51 = vadd.f32 %v5152_v58, %v8615_v12 }
 0x333   :  { %v5005_v33 = vadd.f32 %v5004_v23, %v5003_v41  ;;  %v5154_v27 = vrot.slane %v5153_v51, 4 }
 0x335   :  { %v5006_v62 = vrot.slane %v5005_v33, 2  ;;  %v5155_v44 = vadd.f32 %v5154_v27, %v5153_v51 }
 0x337   :  { %v5007_v11 = vadd.f32 %v5006_v62, %v5005_v33  ;;  %v5156_v8 = vrot.slane %v5155_v44, 2 }
 0x339   :  { %v5008_v34 = vrot.slane %v5007_v11, 1  ;;  %v5157_v61 = vadd.f32 %v5156_v8, %v5155_v44 }
 0x33b   :  { %v5009_v18 = vadd.f32 %v5008_v34, %v5007_v11  ;;  %v5158_v49 = vrot.slane %v5157_v61, 1 }
 0x33d   :  { %5010 = vst [vmem:[%s8687_s3] sm:$0x1] %v5009_v18  ;;  %v5159_v28 = vadd.f32 %v5158_v49, %v5157_v61 }
 0x33f   :  { %5160 = vst [vmem:[%s8688_s4] sm:$0x1] %v5159_v28 }

// kernel: up_forward.5
= control target key start
LH: loop header
LB: loop body
LE: loop exit
PB: predicated region body
PF: predicated region fallthrough
CT: control target
= control target key end

     0   :  { %s1137_s0 = inlined_call_operand.vmem [shape: bf16[576,128], index: 0, kind: input, shape index: {}]   ;;  %s1138_s1 = inlined_call_operand.vmem [shape: f32[1,128], index: 1, kind: input, shape index: {}]   ;;  %s1139_s2 = inlined_call_operand.vmem [shape: f32[1,128], index: 2, kind: input, shape index: {}]   ;;  %s1140_s3 = inlined_call_operand.vmem [shape: f32[576,128], index: 3, kind: output, shape index: {}]  }
   0x1   :  { %v459_v0 = vld [vmem:[%s1137_s0] sm:$0xff]   ;;  %v602_v5 = vld [vmem:[%s1137_s0 + $0x8] sm:$0xff]   ;;  %v603_v8 = vld [vmem:[%s1137_s0 + $0x10] sm:$0xff]  }
   0x2   :  { %v665_v1 = vld [vmem:[%s1138_s1] ss:$0 sm:$0xff]  ;;  %v460_v2 = vunpack.c.l.bf16 %v459_v0  ;;  %v461_v4 = vunpack.c.h.bf16 %v459_v0  ;;  %v464_v6 = vunpack.c.l.bf16 %v602_v5  ;;  %v465_v7 = vunpack.c.h.bf16 %v602_v5  ;;  %v604_v9 = vld [vmem:[%s1137_s0 + $0x18] sm:$0xff]   ;;  %v606_v31 = vld [vmem:[%s1137_s0 + $0x28] sm:$0xff]  }
   0x3   :  { %v670_v3 = vld [vmem:[%s1139_s2] ss:$0 sm:$0xff]  ;;  %v468_v12 = vunpack.c.l.bf16 %v603_v8  ;;  %v469_v13 = vunpack.c.h.bf16 %v603_v8  ;;  %v472_v16 = vunpack.c.l.bf16 %v604_v9  ;;  %v473_v17 = vunpack.c.h.bf16 %v604_v9  ;;  %v607_v36 = vld [vmem:[%s1137_s0 + $0x30] sm:$0xff]   ;;  %v608_v41 = vld [vmem:[%s1137_s0 + $0x38] sm:$0xff]  }
   0x4   :  { %v162_v10 = vmul.f32 %v665_v1, %v460_v2  ;;  %v163_v11 = vmul.f32 %v665_v1, %v461_v4  ;;  %v164_v14 = vmul.f32 %v665_v1, %v464_v6  ;;  %v165_v15 = vmul.f32 %v665_v1, %v465_v7  ;;  %v605_v26 = vld [vmem:[%s1137_s0 + $0x20] sm:$0xff]   ;;  %v610_v5 = vld [vmem:[%s1137_s0 + $0x48] sm:$0xff]  }
   0x5   :  { %v166_v20 = vmul.f32 %v665_v1, %v468_v12  ;;  %v167_v21 = vmul.f32 %v665_v1, %v469_v13  ;;  %v168_v24 = vmul.f32 %v665_v1, %v472_v16  ;;  %v169_v25 = vmul.f32 %v665_v1, %v473_v17  ;;  %v609_v62 = vld [vmem:[%s1137_s0 + $0x40] sm:$0xff]  }
   0x6   :  { %v238_v18 = vadd.f32 %v670_v3, %v162_v10  ;;  %v239_v19 = vadd.f32 %v670_v3, %v163_v11  ;;  %v240_v22 = vadd.f32 %v670_v3, %v164_v14  ;;  %v241_v23 = vadd.f32 %v670_v3, %v165_v15  ;;  %v611_v10 = vld [vmem:[%s1137_s0 + $0x50] sm:$0xff]   ;;  %v612_v15 = vld [vmem:[%s1137_s0 + $0x58] sm:$0xff]  }
   0x7   :  { %v242_v29 = vadd.f32 %v670_v3, %v166_v20  ;;  %v243_v30 = vadd.f32 %v670_v3, %v167_v21  ;;  %v244_v34 = vadd.f32 %v670_v3, %v168_v24  ;;  %v245_v35 = vadd.f32 %v670_v3, %v169_v25 }
   0x8   :  { %v310_v27 = vmax.f32 %v238_v18, 0.0  ;;  %v311_v28 = vmax.f32 %v239_v19, 0.0  ;;  %v312_v32 = vmax.f32 %v240_v22, 0.0  ;;  %v313_v33 = vmax.f32 %v241_v23, 0.0 }
   0x9   :  { %v314_v37 = vmax.f32 %v242_v29, 0.0  ;;  %v315_v38 = vmax.f32 %v243_v30, 0.0  ;;  %v476_v39 = vunpack.c.l.bf16 %v605_v26  ;;  %v477_v40 = vunpack.c.h.bf16 %v605_v26 }
   0xa   :  { %382 = vst [vmem:[%s1140_s3] sm:$0xff] %v310_v27  ;;  %v316_v42 = vmax.f32 %v244_v34, 0.0  ;;  %v317_v43 = vmax.f32 %v245_v35, 0.0  ;;  %v480_v44 = vunpack.c.l.bf16 %v606_v31  ;;  %v481_v45 = vunpack.c.h.bf16 %v606_v31 }
   0xb   :  { %383 = vst [vmem:[%s1140_s3 + $0x8] sm:$0xff] %v311_v28  ;;  %v170_v46 = vmul.f32 %v665_v1, %v476_v39  ;;  %v171_v47 = vmul.f32 %v665_v1, %v477_v40  ;;  %v484_v48 = vunpack.c.l.bf16 %v607_v36  ;;  %v485_v49 = vunpack.c.h.bf16 %v607_v36  ;;  %v613_v36 = vld [vmem:[%s1137_s0 + $0x60] sm:$0xff]  }
   0xc   :  { %384 = vst [vmem:[%s1140_s3 + $0x10] sm:$0xff] %v312_v32  ;;  %v172_v50 = vmul.f32 %v665_v1, %v480_v44  ;;  %v173_v51 = vmul.f32 %v665_v1, %v481_v45  ;;  %v488_v52 = vunpack.c.l.bf16 %v608_v41  ;;  %v489_v53 = vunpack.c.h.bf16 %v608_v41  ;;  %v614_v41 = vld [vmem:[%s1137_s0 + $0x68] sm:$0xff]  }
   0xd   :  { %385 = vst [vmem:[%s1140_s3 + $0x18] sm:$0xff] %v313_v33  ;;  %v246_v54 = vadd.f32 %v670_v3, %v170_v46  ;;  %v247_v55 = vadd.f32 %v670_v3, %v171_v47  ;;  %v174_v56 = vmul.f32 %v665_v1, %v484_v48  ;;  %v175_v57 = vmul.f32 %v665_v1, %v485_v49  ;;  %v615_v46 = vld [vmem:[%s1137_s0 + $0x70] sm:$0xff]  }
   0xe   :  { %386 = vst [vmem:[%s1140_s3 + $0x20] sm:$0xff] %v314_v37  ;;  %v248_v58 = vadd.f32 %v670_v3, %v172_v50  ;;  %v249_v59 = vadd.f32 %v670_v3, %v173_v51  ;;  %v176_v60 = vmul.f32 %v665_v1, %v488_v52  ;;  %v177_v61 = vmul.f32 %v665_v1, %v489_v53  ;;  %v616_v51 = vld [vmem:[%s1137_s0 + $0x78] sm:$0xff]  }
   0xf   :  { %387 = vst [vmem:[%s1140_s3 + $0x28] sm:$0xff] %v315_v38  ;;  %v318_v63 = vmax.f32 %v246_v54, 0.0  ;;  %v319_v0 = vmax.f32 %v247_v55, 0.0  ;;  %v250_v2 = vadd.f32 %v670_v3, %v174_v56  ;;  %v251_v4 = vadd.f32 %v670_v3, %v175_v57 }
  0x10   :  { %388 = vst [vmem:[%s1140_s3 + $0x30] sm:$0xff] %v316_v42  ;;  %v320_v6 = vmax.f32 %v248_v58, 0.0  ;;  %v321_v7 = vmax.f32 %v249_v59, 0.0  ;;  %v252_v8 = vadd.f32 %v670_v3, %v176_v60  ;;  %v253_v9 = vadd.f32 %v670_v3, %v177_v61 }
  0x11   :  { %389 = vst [vmem:[%s1140_s3 + $0x38] sm:$0xff] %v317_v43  ;;  %v322_v11 = vmax.f32 %v250_v2, 0.0  ;;  %v323_v12 = vmax.f32 %v251_v4, 0.0  ;;  %v492_v13 = vunpack.c.l.bf16 %v609_v62  ;;  %v493_v14 = vunpack.c.h.bf16 %v609_v62 }
  0x12   :  { %390 = vst [vmem:[%s1140_s3 + $0x40] sm:$0xff] %v318_v63  ;;  %v324_v16 = vmax.f32 %v252_v8, 0.0  ;;  %v325_v17 = vmax.f32 %v253_v9, 0.0  ;;  %v496_v18 = vunpack.c.l.bf16 %v610_v5  ;;  %v497_v19 = vunpack.c.h.bf16 %v610_v5 }
  0x13   :  { %391 = vst [vmem:[%s1140_s3 + $0x48] sm:$0xff] %v319_v0  ;;  %v178_v20 = vmul.f32 %v665_v1, %v492_v13  ;;  %v179_v21 = vmul.f32 %v665_v1, %v493_v14  ;;  %v500_v22 = vunpack.c.l.bf16 %v611_v10  ;;  %v501_v23 = vunpack.c.h.bf16 %v611_v10  ;;  %v617_v10 = vld [vmem:[%s1137_s0 + $0x80] sm:$0xff]  }
  0x14   :  { %392 = vst [vmem:[%s1140_s3 + $0x50] sm:$0xff] %v320_v6  ;;  %v180_v24 = vmul.f32 %v665_v1, %v496_v18  ;;  %v181_v25 = vmul.f32 %v665_v1, %v497_v19  ;;  %v504_v26 = vunpack.c.l.bf16 %v612_v15  ;;  %v505_v27 = vunpack.c.h.bf16 %v612_v15  ;;  %v618_v15 = vld [vmem:[%s1137_s0 + $0x88] sm:$0xff]  }
  0x15   :  { %393 = vst [vmem:[%s1140_s3 + $0x58] sm:$0xff] %v321_v7  ;;  %v254_v28 = vadd.f32 %v670_v3, %v178_v20  ;;  %v255_v29 = vadd.f32 %v670_v3, %v179_v21  ;;  %v182_v30 = vmul.f32 %v665_v1, %v500_v22  ;;  %v183_v31 = vmul.f32 %v665_v1, %v501_v23  ;;  %v619_v20 = vld [vmem:[%s1137_s0 + $0x90] sm:$0xff]  }
  0x16   :  { %394 = vst [vmem:[%s1140_s3 + $0x60] sm:$0xff] %v322_v11  ;;  %v256_v32 = vadd.f32 %v670_v3, %v180_v24  ;;  %v257_v33 = vadd.f32 %v670_v3, %v181_v25  ;;  %v184_v34 = vmul.f32 %v665_v1, %v504_v26  ;;  %v185_v35 = vmul.f32 %v665_v1, %v505_v27  ;;  %v620_v25 = vld [vmem:[%s1137_s0 + $0x98] sm:$0xff]  }
  0x17   :  { %395 = vst [vmem:[%s1140_s3 + $0x68] sm:$0xff] %v323_v12  ;;  %v326_v37 = vmax.f32 %v254_v28, 0.0  ;;  %v327_v38 = vmax.f32 %v255_v29, 0.0  ;;  %v258_v39 = vadd.f32 %v670_v3, %v182_v30  ;;  %v259_v40 = vadd.f32 %v670_v3, %v183_v31 }
  0x18   :  { %396 = vst [vmem:[%s1140_s3 + $0x70] sm:$0xff] %v324_v16  ;;  %v328_v42 = vmax.f32 %v256_v32, 0.0  ;;  %v329_v43 = vmax.f32 %v257_v33, 0.0  ;;  %v260_v44 = vadd.f32 %v670_v3, %v184_v34  ;;  %v261_v45 = vadd.f32 %v670_v3, %v185_v35 }
  0x19   :  { %397 = vst [vmem:[%s1140_s3 + $0x78] sm:$0xff] %v325_v17  ;;  %v330_v47 = vmax.f32 %v258_v39, 0.0  ;;  %v331_v48 = vmax.f32 %v259_v40, 0.0  ;;  %v508_v49 = vunpack.c.l.bf16 %v613_v36  ;;  %v509_v50 = vunpack.c.h.bf16 %v613_v36 }
  0x1a   :  { %398 = vst [vmem:[%s1140_s3 + $0x80] sm:$0xff] %v326_v37  ;;  %v332_v52 = vmax.f32 %v260_v44, 0.0  ;;  %v333_v53 = vmax.f32 %v261_v45, 0.0  ;;  %v512_v54 = vunpack.c.l.bf16 %v614_v41  ;;  %v513_v55 = vunpack.c.h.bf16 %v614_v41 }
  0x1b   :  { %399 = vst [vmem:[%s1140_s3 + $0x88] sm:$0xff] %v327_v38  ;;  %v186_v56 = vmul.f32 %v665_v1, %v508_v49  ;;  %v187_v57 = vmul.f32 %v665_v1, %v509_v50  ;;  %v516_v58 = vunpack.c.l.bf16 %v615_v46  ;;  %v517_v59 = vunpack.c.h.bf16 %v615_v46  ;;  %v621_v46 = vld [vmem:[%s1137_s0 + $0xa0] sm:$0xff]  }
  0x1c   :  { %400 = vst [vmem:[%s1140_s3 + $0x90] sm:$0xff] %v328_v42  ;;  %v188_v60 = vmul.f32 %v665_v1, %v512_v54  ;;  %v189_v61 = vmul.f32 %v665_v1, %v513_v55  ;;  %v520_v62 = vunpack.c.l.bf16 %v616_v51  ;;  %v521_v63 = vunpack.c.h.bf16 %v616_v51  ;;  %v622_v51 = vld [vmem:[%s1137_s0 + $0xa8] sm:$0xff]  }
  0x1d   :  { %401 = vst [vmem:[%s1140_s3 + $0x98] sm:$0xff] %v329_v43  ;;  %v262_v0 = vadd.f32 %v670_v3, %v186_v56  ;;  %v263_v2 = vadd.f32 %v670_v3, %v187_v57  ;;  %v190_v4 = vmul.f32 %v665_v1, %v516_v58  ;;  %v191_v5 = vmul.f32 %v665_v1, %v517_v59  ;;  %v623_v56 = vld [vmem:[%s1137_s0 + $0xb0] sm:$0xff]  }
  0x1e   :  { %402 = vst [vmem:[%s1140_s3 + $0xa0] sm:$0xff] %v330_v47  ;;  %v264_v6 = vadd.f32 %v670_v3, %v188_v60  ;;  %v265_v7 = vadd.f32 %v670_v3, %v189_v61  ;;  %v192_v8 = vmul.f32 %v665_v1, %v520_v62  ;;  %v193_v9 = vmul.f32 %v665_v1, %v521_v63  ;;  %v624_v61 = vld [vmem:[%s1137_s0 + $0xb8] sm:$0xff]  }
  0x1f   :  { %403 = vst [vmem:[%s1140_s3 + $0xa8] sm:$0xff] %v331_v48  ;;  %v334_v11 = vmax.f32 %v262_v0, 0.0  ;;  %v335_v12 = vmax.f32 %v263_v2, 0.0  ;;  %v266_v13 = vadd.f32 %v670_v3, %v190_v4  ;;  %v267_v14 = vadd.f32 %v670_v3, %v191_v5 }
  0x20   :  { %404 = vst [vmem:[%s1140_s3 + $0xb0] sm:$0xff] %v332_v52  ;;  %v336_v16 = vmax.f32 %v264_v6, 0.0  ;;  %v337_v17 = vmax.f32 %v265_v7, 0.0  ;;  %v268_v18 = vadd.f32 %v670_v3, %v192_v8  ;;  %v269_v19 = vadd.f32 %v670_v3, %v193_v9 }
  0x21   :  { %405 = vst [vmem:[%s1140_s3 + $0xb8] sm:$0xff] %v333_v53  ;;  %v338_v21 = vmax.f32 %v266_v13, 0.0  ;;  %v339_v22 = vmax.f32 %v267_v14, 0.0  ;;  %v524_v23 = vunpack.c.l.bf16 %v617_v10  ;;  %v525_v24 = vunpack.c.h.bf16 %v617_v10 }
  0x22   :  { %406 = vst [vmem:[%s1140_s3 + $0xc0] sm:$0xff] %v334_v11  ;;  %v340_v26 = vmax.f32 %v268_v18, 0.0  ;;  %v341_v27 = vmax.f32 %v269_v19, 0.0  ;;  %v528_v28 = vunpack.c.l.bf16 %v618_v15  ;;  %v529_v29 = vunpack.c.h.bf16 %v618_v15 }
  0x23   :  { %407 = vst [vmem:[%s1140_s3 + $0xc8] sm:$0xff] %v335_v12  ;;  %v194_v30 = vmul.f32 %v665_v1, %v524_v23  ;;  %v195_v31 = vmul.f32 %v665_v1, %v525_v24  ;;  %v532_v32 = vunpack.c.l.bf16 %v619_v20  ;;  %v533_v33 = vunpack.c.h.bf16 %v619_v20  ;;  %v625_v20 = vld [vmem:[%s1137_s0 + $0xc0] sm:$0xff]  }
  0x24   :  { %408 = vst [vmem:[%s1140_s3 + $0xd0] sm:$0xff] %v336_v16  ;;  %v196_v34 = vmul.f32 %v665_v1, %v528_v28  ;;  %v197_v35 = vmul.f32 %v665_v1, %v529_v29  ;;  %v536_v36 = vunpack.c.l.bf16 %v620_v25  ;;  %v537_v37 = vunpack.c.h.bf16 %v620_v25  ;;  %v626_v25 = vld [vmem:[%s1137_s0 + $0xc8] sm:$0xff]  }
  0x25   :  { %409 = vst [vmem:[%s1140_s3 + $0xd8] sm:$0xff] %v337_v17  ;;  %v270_v38 = vadd.f32 %v670_v3, %v194_v30  ;;  %v271_v39 = vadd.f32 %v670_v3, %v195_v31  ;;  %v198_v40 = vmul.f32 %v665_v1, %v532_v32  ;;  %v199_v41 = vmul.f32 %v665_v1, %v533_v33  ;;  %v627_v30 = vld [vmem:[%s1137_s0 + $0xd0] sm:$0xff]  }
  0x26   :  { %410 = vst [vmem:[%s1140_s3 + $0xe0] sm:$0xff] %v338_v21  ;;  %v272_v42 = vadd.f32 %v670_v3, %v196_v34  ;;  %v273_v43 = vadd.f32 %v670_v3, %v197_v35  ;;  %v200_v44 = vmul.f32 %v665_v1, %v536_v36  ;;  %v201_v45 = vmul.f32 %v665_v1, %v537_v37  ;;  %v628_v35 = vld [vmem:[%s1137_s0 + $0xd8] sm:$0xff]  }
  0x27   :  { %411 = vst [vmem:[%s1140_s3 + $0xe8] sm:$0xff] %v339_v22  ;;  %v342_v47 = vmax.f32 %v270_v38, 0.0  ;;  %v343_v48 = vmax.f32 %v271_v39, 0.0  ;;  %v274_v49 = vadd.f32 %v670_v3, %v198_v40  ;;  %v275_v50 = vadd.f32 %v670_v3, %v199_v41 }
  0x28   :  { %412 = vst [vmem:[%s1140_s3 + $0xf0] sm:$0xff] %v340_v26  ;;  %v344_v52 = vmax.f32 %v272_v42, 0.0  ;;  %v345_v53 = vmax.f32 %v273_v43, 0.0  ;;  %v276_v54 = vadd.f32 %v670_v3, %v200_v44  ;;  %v277_v55 = vadd.f32 %v670_v3, %v201_v45 }
  0x29   :  { %413 = vst [vmem:[%s1140_s3 + $0xf8] sm:$0xff] %v341_v27  ;;  %v346_v57 = vmax.f32 %v274_v49, 0.0  ;;  %v347_v58 = vmax.f32 %v275_v50, 0.0  ;;  %v540_v59 = vunpack.c.l.bf16 %v621_v46  ;;  %v541_v60 = vunpack.c.h.bf16 %v621_v46 }
  0x2a   :  { %414 = vst [vmem:[%s1140_s3 + $0x100] sm:$0xff] %v342_v47  ;;  %v348_v62 = vmax.f32 %v276_v54, 0.0  ;;  %v349_v63 = vmax.f32 %v277_v55, 0.0  ;;  %v544_v0 = vunpack.c.l.bf16 %v622_v51  ;;  %v545_v2 = vunpack.c.h.bf16 %v622_v51 }
  0x2b   :  { %415 = vst [vmem:[%s1140_s3 + $0x108] sm:$0xff] %v343_v48  ;;  %v202_v4 = vmul.f32 %v665_v1, %v540_v59  ;;  %v203_v5 = vmul.f32 %v665_v1, %v541_v60  ;;  %v548_v6 = vunpack.c.l.bf16 %v623_v56  ;;  %v549_v7 = vunpack.c.h.bf16 %v623_v56  ;;  %v629_v56 = vld [vmem:[%s1137_s0 + $0xe0] sm:$0xff]  }
  0x2c   :  { %416 = vst [vmem:[%s1140_s3 + $0x110] sm:$0xff] %v344_v52  ;;  %v204_v8 = vmul.f32 %v665_v1, %v544_v0  ;;  %v205_v9 = vmul.f32 %v665_v1, %v545_v2  ;;  %v552_v10 = vunpack.c.l.bf16 %v624_v61  ;;  %v553_v11 = vunpack.c.h.bf16 %v624_v61  ;;  %v630_v61 = vld [vmem:[%s1137_s0 + $0xe8] sm:$0xff]  }
  0x2d   :  { %417 = vst [vmem:[%s1140_s3 + $0x118] sm:$0xff] %v345_v53  ;;  %v278_v12 = vadd.f32 %v670_v3, %v202_v4  ;;  %v279_v13 = vadd.f32 %v670_v3, %v203_v5  ;;  %v206_v14 = vmul.f32 %v665_v1, %v548_v6  ;;  %v207_v15 = vmul.f32 %v665_v1, %v549_v7  ;;  %v631_v4 = vld [vmem:[%s1137_s0 + $0xf0] sm:$0xff]  }
  0x2e   :  { %418 = vst [vmem:[%s1140_s3 + $0x120] sm:$0xff] %v346_v57  ;;  %v280_v16 = vadd.f32 %v670_v3, %v204_v8  ;;  %v281_v17 = vadd.f32 %v670_v3, %v205_v9  ;;  %v208_v18 = vmul.f32 %v665_v1, %v552_v10  ;;  %v209_v19 = vmul.f32 %v665_v1, %v553_v11  ;;  %v632_v9 = vld [vmem:[%s1137_s0 + $0xf8] sm:$0xff]  }
  0x2f   :  { %419 = vst [vmem:[%s1140_s3 + $0x128] sm:$0xff] %v347_v58  ;;  %v350_v21 = vmax.f32 %v278_v12, 0.0  ;;  %v351_v22 = vmax.f32 %v279_v13, 0.0  ;;  %v282_v23 = vadd.f32 %v670_v3, %v206_v14  ;;  %v283_v24 = vadd.f32 %v670_v3, %v207_v15 }
  0x30   :  { %420 = vst [vmem:[%s1140_s3 + $0x130] sm:$0xff] %v348_v62  ;;  %v352_v26 = vmax.f32 %v280_v16, 0.0  ;;  %v353_v27 = vmax.f32 %v281_v17, 0.0  ;;  %v284_v28 = vadd.f32 %v670_v3, %v208_v18  ;;  %v285_v29 = vadd.f32 %v670_v3, %v209_v19 }
  0x31   :  { %421 = vst [vmem:[%s1140_s3 + $0x138] sm:$0xff] %v349_v63  ;;  %v354_v31 = vmax.f32 %v282_v23, 0.0  ;;  %v355_v32 = vmax.f32 %v283_v24, 0.0  ;;  %v556_v33 = vunpack.c.l.bf16 %v625_v20  ;;  %v557_v34 = vunpack.c.h.bf16 %v625_v20 }
  0x32   :  { %422 = vst [vmem:[%s1140_s3 + $0x140] sm:$0xff] %v350_v21  ;;  %v356_v36 = vmax.f32 %v284_v28, 0.0  ;;  %v357_v37 = vmax.f32 %v285_v29, 0.0  ;;  %v560_v38 = vunpack.c.l.bf16 %v626_v25  ;;  %v561_v39 = vunpack.c.h.bf16 %v626_v25 }
  0x33   :  { %423 = vst [vmem:[%s1140_s3 + $0x148] sm:$0xff] %v351_v22  ;;  %v210_v40 = vmul.f32 %v665_v1, %v556_v33  ;;  %v211_v41 = vmul.f32 %v665_v1, %v557_v34  ;;  %v564_v42 = vunpack.c.l.bf16 %v627_v30  ;;  %v565_v43 = vunpack.c.h.bf16 %v627_v30  ;;  %v633_v30 = vld [vmem:[%s1137_s0 + $0x100] sm:$0xff]  }
  0x34   :  { %424 = vst [vmem:[%s1140_s3 + $0x150] sm:$0xff] %v352_v26  ;;  %v212_v44 = vmul.f32 %v665_v1, %v560_v38  ;;  %v213_v45 = vmul.f32 %v665_v1, %v561_v39  ;;  %v568_v46 = vunpack.c.l.bf16 %v628_v35  ;;  %v569_v47 = vunpack.c.h.bf16 %v628_v35  ;;  %v634_v35 = vld [vmem:[%s1137_s0 + $0x108] sm:$0xff]  }
  0x35   :  { %425 = vst [vmem:[%s1140_s3 + $0x158] sm:$0xff] %v353_v27  ;;  %v286_v48 = vadd.f32 %v670_v3, %v210_v40  ;;  %v287_v49 = vadd.f32 %v670_v3, %v211_v41  ;;  %v214_v50 = vmul.f32 %v665_v1, %v564_v42  ;;  %v215_v51 = vmul.f32 %v665_v1, %v565_v43  ;;  %v635_v40 = vld [vmem:[%s1137_s0 + $0x110] sm:$0xff]  }
  0x36   :  { %426 = vst [vmem:[%s1140_s3 + $0x160] sm:$0xff] %v354_v31  ;;  %v288_v52 = vadd.f32 %v670_v3, %v212_v44  ;;  %v289_v53 = vadd.f32 %v670_v3, %v213_v45  ;;  %v216_v54 = vmul.f32 %v665_v1, %v568_v46  ;;  %v217_v55 = vmul.f32 %v665_v1, %v569_v47  ;;  %v636_v45 = vld [vmem:[%s1137_s0 + $0x118] sm:$0xff]  }
  0x37   :  { %427 = vst [vmem:[%s1140_s3 + $0x168] sm:$0xff] %v355_v32  ;;  %v358_v57 = vmax.f32 %v286_v48, 0.0  ;;  %v359_v58 = vmax.f32 %v287_v49, 0.0  ;;  %v290_v59 = vadd.f32 %v670_v3, %v214_v50  ;;  %v291_v60 = vadd.f32 %v670_v3, %v215_v51 }
  0x38   :  { %428 = vst [vmem:[%s1140_s3 + $0x170] sm:$0xff] %v356_v36  ;;  %v360_v62 = vmax.f32 %v288_v52, 0.0  ;;  %v361_v63 = vmax.f32 %v289_v53, 0.0  ;;  %v292_v0 = vadd.f32 %v670_v3, %v216_v54  ;;  %v293_v2 = vadd.f32 %v670_v3, %v217_v55 }
  0x39   :  { %429 = vst [vmem:[%s1140_s3 + $0x178] sm:$0xff] %v357_v37  ;;  %v362_v5 = vmax.f32 %v290_v59, 0.0  ;;  %v363_v6 = vmax.f32 %v291_v60, 0.0  ;;  %v572_v7 = vunpack.c.l.bf16 %v629_v56  ;;  %v573_v8 = vunpack.c.h.bf16 %v629_v56 }
  0x3a   :  { %430 = vst [vmem:[%s1140_s3 + $0x180] sm:$0xff] %v358_v57  ;;  %v364_v10 = vmax.f32 %v292_v0, 0.0  ;;  %v365_v11 = vmax.f32 %v293_v2, 0.0  ;;  %v576_v12 = vunpack.c.l.bf16 %v630_v61  ;;  %v577_v13 = vunpack.c.h.bf16 %v630_v61 }
  0x3b   :  { %431 = vst [vmem:[%s1140_s3 + $0x188] sm:$0xff] %v359_v58  ;;  %v218_v14 = vmul.f32 %v665_v1, %v572_v7  ;;  %v219_v15 = vmul.f32 %v665_v1, %v573_v8  ;;  %v580_v16 = vunpack.c.l.bf16 %v631_v4  ;;  %v581_v17 = vunpack.c.h.bf16 %v631_v4 }
  0x3c   :  { %432 = vst [vmem:[%s1140_s3 + $0x190] sm:$0xff] %v360_v62  ;;  %v220_v18 = vmul.f32 %v665_v1, %v576_v12  ;;  %v221_v19 = vmul.f32 %v665_v1, %v577_v13  ;;  %v584_v20 = vunpack.c.l.bf16 %v632_v9  ;;  %v585_v21 = vunpack.c.h.bf16 %v632_v9 }
  0x3d   :  { %433 = vst [vmem:[%s1140_s3 + $0x198] sm:$0xff] %v361_v63  ;;  %v294_v22 = vadd.f32 %v670_v3, %v218_v14  ;;  %v295_v23 = vadd.f32 %v670_v3, %v219_v15  ;;  %v222_v24 = vmul.f32 %v665_v1, %v580_v16  ;;  %v223_v25 = vmul.f32 %v665_v1, %v581_v17 }
  0x3e   :  { %434 = vst [vmem:[%s1140_s3 + $0x1a0] sm:$0xff] %v362_v5  ;;  %v296_v26 = vadd.f32 %v670_v3, %v220_v18  ;;  %v297_v27 = vadd.f32 %v670_v3, %v221_v19  ;;  %v224_v28 = vmul.f32 %v665_v1, %v584_v20  ;;  %v225_v29 = vmul.f32 %v665_v1, %v585_v21 }
  0x3f   :  { %435 = vst [vmem:[%s1140_s3 + $0x1a8] sm:$0xff] %v363_v6  ;;  %v366_v31 = vmax.f32 %v294_v22, 0.0  ;;  %v367_v32 = vmax.f32 %v295_v23, 0.0  ;;  %v298_v33 = vadd.f32 %v670_v3, %v222_v24  ;;  %v299_v34 = vadd.f32 %v670_v3, %v223_v25 }
  0x40   :  { %436 = vst [vmem:[%s1140_s3 + $0x1b0] sm:$0xff] %v364_v10  ;;  %v368_v36 = vmax.f32 %v296_v26, 0.0  ;;  %v369_v37 = vmax.f32 %v297_v27, 0.0  ;;  %v300_v38 = vadd.f32 %v670_v3, %v224_v28  ;;  %v301_v39 = vadd.f32 %v670_v3, %v225_v29 }
  0x41   :  { %437 = vst [vmem:[%s1140_s3 + $0x1b8] sm:$0xff] %v365_v11  ;;  %v370_v41 = vmax.f32 %v298_v33, 0.0  ;;  %v371_v42 = vmax.f32 %v299_v34, 0.0  ;;  %v588_v43 = vunpack.c.l.bf16 %v633_v30  ;;  %v589_v44 = vunpack.c.h.bf16 %v633_v30 }
  0x42   :  { %438 = vst [vmem:[%s1140_s3 + $0x1c0] sm:$0xff] %v366_v31  ;;  %v372_v46 = vmax.f32 %v300_v38, 0.0  ;;  %v373_v47 = vmax.f32 %v301_v39, 0.0  ;;  %v592_v48 = vunpack.c.l.bf16 %v634_v35  ;;  %v593_v49 = vunpack.c.h.bf16 %v634_v35 }
  0x43   :  { %439 = vst [vmem:[%s1140_s3 + $0x1c8] sm:$0xff] %v367_v32  ;;  %v226_v50 = vmul.f32 %v665_v1, %v588_v43  ;;  %v227_v51 = vmul.f32 %v665_v1, %v589_v44  ;;  %v596_v52 = vunpack.c.l.bf16 %v635_v40  ;;  %v597_v53 = vunpack.c.h.bf16 %v635_v40 }
  0x44   :  { %440 = vst [vmem:[%s1140_s3 + $0x1d0] sm:$0xff] %v368_v36  ;;  %v228_v54 = vmul.f32 %v665_v1, %v592_v48  ;;  %v229_v55 = vmul.f32 %v665_v1, %v593_v49  ;;  %v600_v56 = vunpack.c.l.bf16 %v636_v45  ;;  %v601_v57 = vunpack.c.h.bf16 %v636_v45 }
  0x45   :  { %441 = vst [vmem:[%s1140_s3 + $0x1d8] sm:$0xff] %v369_v37  ;;  %v302_v58 = vadd.f32 %v670_v3, %v226_v50  ;;  %v303_v59 = vadd.f32 %v670_v3, %v227_v51  ;;  %v230_v60 = vmul.f32 %v665_v1, %v596_v52  ;;  %v231_v61 = vmul.f32 %v665_v1, %v597_v53 }
  0x46   :  { %442 = vst [vmem:[%s1140_s3 + $0x1e0] sm:$0xff] %v370_v41  ;;  %v304_v62 = vadd.f32 %v670_v3, %v228_v54  ;;  %v305_v63 = vadd.f32 %v670_v3, %v229_v55  ;;  %v232_v0 = vmul.f32 %v665_v1, %v600_v56  ;;  %v233_v2 = vmul.f32 %v665_v1, %v601_v57 }
  0x47   :  { %443 = vst [vmem:[%s1140_s3 + $0x1e8] sm:$0xff] %v371_v42  ;;  %v374_v4 = vmax.f32 %v302_v58, 0.0  ;;  %v375_v5 = vmax.f32 %v303_v59, 0.0  ;;  %v306_v6 = vadd.f32 %v670_v3, %v230_v60  ;;  %v307_v7 = vadd.f32 %v670_v3, %v231_v61 }
  0x48   :  { %444 = vst [vmem:[%s1140_s3 + $0x1f0] sm:$0xff] %v372_v46  ;;  %v376_v8 = vmax.f32 %v304_v62, 0.0  ;;  %v377_v9 = vmax.f32 %v305_v63, 0.0  ;;  %v308_v10 = vadd.f32 %v670_v3, %v232_v0  ;;  %v309_v1 = vadd.f32 %v670_v3, %v233_v2 }
  0x49   :  { %445 = vst [vmem:[%s1140_s3 + $0x1f8] sm:$0xff] %v373_v47  ;;  %v378_v11 = vmax.f32 %v306_v6, 0.0  ;;  %v379_v12 = vmax.f32 %v307_v7, 0.0 }
  0x4a   :  { %446 = vst [vmem:[%s1140_s3 + $0x200] sm:$0xff] %v374_v4  ;;  %v380_v13 = vmax.f32 %v308_v10, 0.0  ;;  %v381_v3 = vmax.f32 %v309_v1, 0.0 }
  0x4b   :  { %447 = vst [vmem:[%s1140_s3 + $0x208] sm:$0xff] %v375_v5 }
  0x4c   :  { %448 = vst [vmem:[%s1140_s3 + $0x210] sm:$0xff] %v376_v8 }
  0x4d   :  { %449 = vst [vmem:[%s1140_s3 + $0x218] sm:$0xff] %v377_v9 }
  0x4e   :  { %450 = vst [vmem:[%s1140_s3 + $0x220] sm:$0xff] %v378_v11 }
  0x4f   :  { %451 = vst [vmem:[%s1140_s3 + $0x228] sm:$0xff] %v379_v12 }
  0x50   :  { %452 = vst [vmem:[%s1140_s3 + $0x230] sm:$0xff] %v380_v13 }
  0x51   :  { %453 = vst [vmem:[%s1140_s3 + $0x238] sm:$0xff] %v381_v3 }

// kernel: up_forward.4
= control target key start
LH: loop header
LB: loop body
LE: loop exit
PB: predicated region body
PF: predicated region fallthrough
CT: control target
= control target key end

     0   :  { %vm683_vm0 = vcmask 1045504   ;;  %vm574_vm1 = vcmask 97280   ;;  %vm1152_vm2 = vcmask 1046528   ;;  %vm276_vm3 = vsmask.f32 7424  ;;  %s8620_s1 = inlined_call_operand.vmem [shape: bf16[3,12,128], index: 1, kind: input, shape index: {}]   ;;  %s8621_s0 = inlined_call_operand.vmem [shape: bf16[1,584,12], index: 0, kind: input, shape index: {}]   ;;  %s8622_s2 = inlined_call_operand.vmem [shape: bf16[576,128], index: 2, kind: output, shape index: {0}]   ;;  %s8623_s3 = inlined_call_operand.vmem [shape: f32[1,1,128], index: 3, kind: output, shape index: {1}]   ;;  %s8624_s4 = inlined_call_operand.vmem [shape: f32[1,1,128], index: 4, kind: output, shape index: {2}]  }
   0x1   :  { %v5342_v0 = vld [vmem:[%s8620_s1] sm:$0xf]  ;;  %v5529_v1 = vld [vmem:[%s8620_s1] sm:$0x30]  ;;  %v5384_v2 = vld [vmem:[%s8620_s1 + $0x10] sm:$0xf] }
   0x2   :  { %v5343_v3 = vor.u32 %v5529_v1, %v5342_v0  ;;  %v5531_v4 = vld [vmem:[%s8620_s1 + $0x10] sm:$0x30]  ;;  %v5302_v5 = vld [vmem:[%s8620_s1 + $0x8] sm:$0xf]  ;;  %v5530_v6 = vld [vmem:[%s8620_s1 + $0x8] sm:$0x30] }
   0x3   :  { %v5385_v7 = vor.u32 %v5531_v4, %v5384_v2  ;;  %v5303_v8 = vor.u32 %v5530_v6, %v5302_v5  ;;  %v5533_v9 = vld [vmem:[%s8621_s0] sm:$0xff]   ;;  %v5494_v11 = vld [vmem:[%s8621_s0 + $0x8] sm:$0xff]  ;;  %v5837_v16 = vld [vmem:[%s8621_s0 + $0xd8] sm:$0xff] }
   0x4   :  { %v5716_v10 = vld [vmem:[%s8621_s0] sm:$0xf0]  ;;  %v954_v12 = vsel %vm683_vm0, %v5343_v3, 0  ;;  %v278_v13 = vshrl.u32 %v5533_v9, 16  ;;  %v280_v14 = vshll.u32 %v5533_v9, 16  ;;  %v1154_v20 = vrot.slane %v5494_v11, 1 }
   0x5   :  { %v5717_v15 = vld [vmem:[%s8621_s0] sm:$0xe]  ;;  %963 = vmatpush.bf16.msra.mxu1 %v954_v12  ;;  %v1340_v17 = vsel %vm683_vm0, %v5385_v7, 0  ;;  %v685_v18 = vsel %vm683_vm0, %v5303_v8, 0  ;;  %v285_v23 = vshll.u32 %v5494_v11, 16  ;;  %v493_v24 = vshll.u32 %v5837_v16, 16 }
   0x6   :  { %v5718_v19 = vor.u32 %v5717_v15, %v5716_v10  ;;  %v5521_v21 = vld [vmem:[%s8621_s0 + $0xe0] sm:$0xff]  ;;  %1349 = vmatpush.bf16.msra.mxu2 %v1340_v17  ;;  %694 = vmatpush.bf16.msra.mxu0 %v685_v18  ;;  %v282_v22 = vrot.slane %v280_v14, 1  ;;  %v497_v25 = vshrl.u32 %v5837_v16, 16  ;;  %v5495_v36 = vld [vmem:[%s8621_s0 + $0x10] sm:$0xff]  ;;  %v5522_v37 = vld [vmem:[%s8621_s0 + $0xe8] sm:$0xff]  ;;  %v289_v38 = vshrl.u32 %v5494_v11, 16 }
   0x7   :  { %5754 = vmatpush.bf16.msra.mxu3 %v685_v18  ;;  %v501_v27 = vshll.u32 %v5521_v21, 16  ;;  %v287_v29 = vrot.slane %v285_v23, 1  ;;  %v5847_v30 = vrot.slane %v493_v24, 1  ;;  %v293_v39 = vshll.u32 %v5495_v36, 16  ;;  %v5496_v50 = vld [vmem:[%s8621_s0 + $0x18] sm:$0xff]  ;;  %v5523_v51 = vld [vmem:[%s8621_s0 + $0xf0] sm:$0xff] }
   0x8   :  { %v1153_v26 = vrot.slane %v5718_v19, 1  ;;  %v283_v28 = vor.u32 %v282_v22, %v278_v13  ;;  %5344 = vmatmul.msk.bf16.vlgmr.msra.gmra.mxu1 %vm574_vm1, %v5533_v9  ;;  %v505_v40 = vshrl.u32 %v5521_v21, 16  ;;  %v509_v41 = vshll.u32 %v5522_v37, 16  ;;  %v5497_v0 = vld [vmem:[%s8621_s0 + $0x20] sm:$0xff]  ;;  %v5524_v1 = vld [vmem:[%s8621_s0 + $0xf8] sm:$0xff]  ;;  %v5498_v14 = vld [vmem:[%s8621_s0 + $0x28] sm:$0xff] }
   0x9   :  { %v503_v32 = vrot.slane %v501_v27, 1  ;;  %v499_v34 = vor.u32 %v497_v25, %v5847_v30  ;;  %v1156_v42 = vrot.slane %v5495_v36, 1  ;;  %v291_v43 = vor.u32 %v289_v38, %v287_v29  ;;  %v5525_v15 = vld [vmem:[%s8621_s0 + $0x100] sm:$0xff] }
   0xa   :  { %v1155_v31 = vsel %vm1152_vm2, %v1153_v26, %v1154_v20  ;;  %v288_v33 = vsel %vm276_vm3, %v283_v28, %v287_v29  ;;  %v295_v44 = vrot.slane %v293_v39, 1  ;;  %v511_v46 = vrot.slane %v509_v41, 1  ;;  %v5910_v29 = vld [vmem:[%s8621_s0 + $0x30] sm:$0xff] }
   0xb   :  { %5755 = vmatpush.bf16.msrb.mxu3 %v954_v12  ;;  %5386 = vmatmul.msk.bf16.vlgmr.msra.gmra.mxu2 %vm574_vm1, %v1155_v31  ;;  %v504_v35 = vsel %vm276_vm3, %v499_v34, %v503_v32  ;;  %v507_v45 = vor.u32 %v505_v40, %v503_v32  ;;  %v1157_v47 = vsel %vm1152_vm2, %v1154_v20, %v1156_v42  ;;  %v297_v52 = vshrl.u32 %v5495_v36, 16  ;;  %v5526_v31 = vld [vmem:[%s8621_s0 + $0x108] sm:$0xff] }
   0xc   :  { %5304 = vmatmul.msk.bf16.vlgmr.msra.gmra.mxu0 %vm574_vm1, %v288_v33  ;;  %5331 = vmatmul.msk.bf16.vlgmr.msra.gmra.mxu3 %vm574_vm1, %v504_v35  ;;  %v296_v48 = vsel %vm276_vm3, %v291_v43, %v295_v44  ;;  %v301_v53 = vshll.u32 %v5496_v50, 16  ;;  %v513_v54 = vshrl.u32 %v5522_v37, 16  ;;  %v517_v55 = vshll.u32 %v5523_v51, 16 }
   0xd   :  { %v512_v49 = vsel %vm276_vm3, %v507_v45, %v511_v46  ;;  %v1158_v56 = vrot.slane %v5496_v50, 1  ;;  %v299_v57 = vor.u32 %v297_v52, %v295_v44  ;;  %v305_v2 = vshrl.u32 %v5496_v50, 16  ;;  %v5924_v44 = vld [vmem:[%s8621_s0 + $0x38] sm:$0xff] }
   0xe   :  { %v303_v58 = vrot.slane %v301_v53, 1  ;;  %v515_v59 = vor.u32 %v513_v54, %v511_v46  ;;  %v519_v60 = vrot.slane %v517_v55, 1  ;;  %v309_v3 = vshll.u32 %v5497_v0, 16 }
   0xf   :  { %5756 = vmatpush.bf16.msra.mxu3 %v1340_v17  ;;  %v1159_v61 = vsel %vm1152_vm2, %v1156_v42, %v1158_v56  ;;  %v521_v4 = vshrl.u32 %v5523_v51, 16  ;;  %v525_v5 = vshll.u32 %v5524_v1, 16  ;;  %v1160_v6 = vrot.slane %v5497_v0, 1 }
  0x10   :  { %v304_v62 = vsel %vm276_vm3, %v299_v57, %v303_v58  ;;  %v520_v63 = vsel %vm276_vm3, %v515_v59, %v519_v60  ;;  %v307_v7 = vor.u32 %v305_v2, %v303_v58  ;;  %v311_v8 = vrot.slane %v309_v3, 1  ;;  %v5943_v59 = vld [vmem:[%s8621_s0 + $0x40] sm:$0xff] }
  0x11   :  { %v523_v9 = vor.u32 %v521_v4, %v519_v60  ;;  %v527_v10 = vrot.slane %v525_v5, 1  ;;  %v313_v17 = vshrl.u32 %v5497_v0, 16  ;;  %v317_v18 = vshll.u32 %v5498_v14, 16  ;;  %v5954_v4 = vld [vmem:[%s8621_s0 + $0x118] sm:$0xff] }
  0x12   :  { %v312_v12 = vsel %vm276_vm3, %v307_v7, %v311_v8  ;;  %v529_v19 = vshrl.u32 %v5524_v1, 16  ;;  %v533_v20 = vshll.u32 %v5525_v15, 16  ;;  %v1162_v21 = vrot.slane %v5498_v14, 1 }
  0x13   :  { %v528_v13 = vsel %vm276_vm3, %v523_v9, %v527_v10  ;;  %v315_v22 = vor.u32 %v313_v17, %v311_v8  ;;  %v319_v23 = vrot.slane %v317_v18, 1  ;;  %v321_v32 = vshrl.u32 %v5498_v14, 16 }
  0x14   :  { %v531_v24 = vor.u32 %v529_v19, %v527_v10  ;;  %v535_v25 = vrot.slane %v533_v20, 1  ;;  %v1163_v26 = vsel %vm1152_vm2, %v1160_v6, %v1162_v21  ;;  %v325_v33 = vshll.u32 %v5910_v29, 16 }
  0x15   :  { %v320_v27 = vsel %vm276_vm3, %v315_v22, %v319_v23  ;;  %v1747_v34 = vlaneseq  ;;  %v537_v35 = vshrl.u32 %v5525_v15, 16  ;;  %v1164_v37 = vrot.slane %v5910_v29, 1 }
  0x16   :  { %v536_v28 = vsel %vm276_vm3, %v531_v24, %v535_v25  ;;  %v323_v39 = vor.u32 %v321_v32, %v319_v23  ;;  %v327_v40 = vrot.slane %v325_v33, 1  ;;  %v333_v54 = vshll.u32 %v5924_v44, 16 }
  0x17   :  { %v5918_v38 = vshrl.u32 %v1747_v34, 7  ;;  %v539_v42 = vor.u32 %v537_v35, %v535_v25  ;;  %v1165_v45 = vsel %vm1152_vm2, %v1162_v21, %v1164_v37  ;;  %v545_v58 = vshrl.u32 %v5526_v31, 16 }
  0x18   :  { %5345 = vmatmul.msk.bf16.gmra.mxu1 %vm574_vm1, %v5494_v11  ;;  %v1161_v11 = vsel %vm1152_vm2, %v1158_v56, %v1160_v6  ;;  %v8629_v1 = vmov 0   ;;  %v335_v3 = vrot.slane %v333_v54, 1  ;;  %v337_v7 = vshrl.u32 %v5924_v44, 16 }
  0x19   :  { %v1897_v41 = vand.u32 65535, %v5918_v38  ;;  %v1898_v46 = vshrl.u32 %v5918_v38, 16  ;;  %v557_v21 = vshll.u32 %v5954_v4, 16  ;;  %v1168_v24 = vrot.slane %v5943_v59, 1 }
  0x1a   :  { %v339_v25 = vor.u32 %v337_v7, %v335_v3 }
  0x1b   :  { %5387 = vmatmul.msk.bf16.gmra.mxu2 %vm574_vm1, %v1157_v47  ;;  %v1901_v47 = vmul.u32 58254, %v1897_v41  ;;  %v1900_v51 = vmul.u32 14564, %v1897_v41  ;;  %v1902_v52 = vmul.u32 14564, %v1898_v46  ;;  %v1903_v56 = vmul.u32 58254, %v1898_v46  ;;  %v5973_v41 = vld [vmem:[%s8621_s0 + $0x48] sm:$0xff] }
  0x1c   :  { %5305 = vmatmul.msk.bf16.gmra.mxu0 %vm574_vm1, %v296_v48  ;;  %5332 = vmatmul.msk.bf16.gmra.mxu3 %vm574_vm1, %v512_v49  ;;  %v328_v48 = vsel %vm276_vm3, %v323_v39, %v327_v40  ;;  %v329_v49 = vshrl.u32 %v5910_v29, 16  ;;  %v5968_v39 = vadd.s32 16, %v5918_v38 }
  0x1d   :  { %v1904_v55 = vshll.u32 %v1901_v47, 16  ;;  %v1906_v57 = vshll.u32 %v1902_v52, 16  ;;  %v1905_v8 = vshrl.u32 %v1901_v47, 16  ;;  %v1907_v17 = vshrl.u32 %v1902_v52, 16 }
  0x1f   :  { %vm1908_vm4 = vc.u32 %v1900_v51, %v1904_v55  ;;  %v1910_v60 = vadd.s32 %v1904_v55, %v1900_v51  ;;  %v1955_v55 = vand.u32 65535, %v5968_v39 }
  0x20   :  { %v1909_v2 = vsel %vm1908_vm4, 1, %v8629_v1 }
  0x21   :  { %v1911_v5 = vadd.s32 %v1909_v2, %v1903_v56  ;;  %vm1912_vm5 = vc.u32 %v1910_v60, %v1906_v57  ;;  %v349_v57 = vshll.u32 %v5973_v41, 16  ;;  %v1170_v60 = vrot.slane %v5973_v41, 1 }
  0x22   :  { %v1913_v9 = vsel %vm1912_vm5, 1, %v8629_v1  ;;  %v1959_v7 = vmul.u32 58254, %v1955_v55 }
  0x28   :  { %5346 = vmatmul.msk.bf16.gmra.mxu1 %vm574_vm1, %v5495_v36  ;;  %v541_v36 = vshll.u32 %v5526_v31, 16 }
  0x2a   :  { %v543_v43 = vrot.slane %v541_v36, 1 }
  0x2b   :  { %5388 = vmatmul.msk.bf16.gmra.mxu2 %vm574_vm1, %v1159_v61  ;;  %v5946_v61 = vadd.s32 8, %v5918_v38 }
  0x2c   :  { %5306 = vmatmul.msk.bf16.gmra.mxu0 %vm574_vm1, %v304_v62  ;;  %5333 = vmatmul.msk.bf16.gmra.mxu3 %vm574_vm1, %v520_v63  ;;  %v544_v53 = vsel %vm276_vm3, %v539_v42, %v543_v43  ;;  %v1166_v62 = vrot.slane %v5924_v44, 1  ;;  %v331_v63 = vor.u32 %v329_v49, %v327_v40  ;;  %v559_v40 = vrot.slane %v557_v21, 1 }
  0x2d   :  { %v1926_v6 = vand.u32 65535, %v5946_v61  ;;  %v1927_v10 = vshrl.u32 %v5946_v61, 16 }
  0x2e   :  { %v336_v46 = vsel %vm276_vm3, %v331_v63, %v335_v3 }
  0x2f   :  { %v1929_v18 = vmul.u32 14564, %v1926_v6  ;;  %v1931_v19 = vmul.u32 14564, %v1927_v10 }
  0x38   :  { %5347 = vmatmul.msk.bf16.gmra.mxu1 %vm574_vm1, %v5496_v50  ;;  %v5527_v50 = vld [vmem:[%s8621_s0 + $0x110] sm:$0xff] }
  0x39   :  { %v553_v15 = vshrl.u32 %v5527_v50, 16 }
  0x3b   :  { %5389 = vmatmul.msk.bf16.gmra.mxu2 %vm574_vm1, %v1161_v11  ;;  %v547_v11 = vor.u32 %v545_v58, %v543_v43 }
  0x3c   :  { %5307 = vmatmul.msk.bf16.gmra.mxu0 %vm574_vm1, %v312_v12  ;;  %5334 = vmatmul.msk.bf16.gmra.mxu3 %vm574_vm1, %v528_v13  ;;  %v341_v12 = vshll.u32 %v5943_v59, 16  ;;  %v1915_v13 = vadd.s32 %v1913_v9, %v1911_v5 }
  0x3e   :  { %v1916_v22 = vadd.s32 %v1915_v13, %v1905_v8  ;;  %v343_v34 = vrot.slane %v341_v12, 1  ;;  %v6013_v12 = vsel %vm1152_vm2, %v1168_v24, %v1170_v60 }
  0x40   :  { %v1917_v32 = vadd.s32 %v1916_v22, %v1907_v17 }
  0x42   :  { %v1918_v42 = vshrl.u32 %v1917_v32, 4  ;;  %v1963_v32 = vshrl.u32 %v1959_v7, 16 }
  0x44   :  { %v1919_v52 = vmul.u32 18, %v1918_v42 }
  0x46   :  { %v1920_v58 = vsub.s32 %v5918_v38, %v1919_v52 }
  0x48   :  { %5348 = vmatmul.msk.bf16.gmra.mxu1 %vm574_vm1, %v5497_v0  ;;  %v549_v0 = vshll.u32 %v5527_v50, 16  ;;  %v5984_v50 = vsel %vm1152_vm2, %v1166_v62, %v1168_v24  ;;  %vm3982_vm8 = vcmp.ne.s32.totalorder %v1920_v58, 0  ;;  %vm4054_vm9 = vcmp.lt.s32.totalorder %v1920_v58, 0 }
  0x49   :  { %v4198_v3 = vadd.s32 18, %v1920_v58  ;;  %vm4126_vm10 = vmand %vm4054_vm9, %vm3982_vm8 }
  0x4a   :  { %v551_v20 = vrot.slane %v549_v0, 1  ;;  %v1956_v0 = vshrl.u32 %v5968_v39, 16 }
  0x4b   :  { %5390 = vmatmul.msk.bf16.gmra.mxu2 %vm574_vm1, %v1163_v26  ;;  %v89_v26 = vld [vmem:[%s8621_s0 + $0x120] sm:$0x1] }
  0x4c   :  { %5308 = vmatmul.msk.bf16.gmra.mxu0 %vm574_vm1, %v320_v27  ;;  %5335 = vmatmul.msk.bf16.gmra.mxu3 %vm574_vm1, %v536_v28  ;;  %v1932_v27 = vmul.u32 58254, %v1927_v10  ;;  %v1935_v28 = vshll.u32 %v1931_v19, 16  ;;  %v238_v31 = vunpack.c.l.b16 %v89_v26  ;;  %v555_v35 = vor.u32 %v553_v15, %v551_v20 }
  0x4d   :  { %v552_v49 = vsel %vm276_vm3, %v547_v11, %v551_v20  ;;  %v1960_v8 = vmul.u32 14564, %v1956_v0  ;;  %v6005_v10 = vrot.slane %v349_v57, 1  ;;  %v4270_v11 = vsel %vm4126_vm10, %v4198_v3, %v1920_v58 }
  0x4e   :  { %v5986_v51 = vpack.c.b16 %v238_v31, %v238_v31  ;;  %v5994_v56 = vsel %vm276_vm3, %v555_v35, %v559_v40  ;;  %v1962_v15 = vshll.u32 %v1959_v7, 16  ;;  %vm4342_vm11 = vcmp.ge.s32.totalorder %v4270_v11, 1 }
  0x4f   :  { %vm4414_vm12 = vcmp.le.s32.totalorder %v4270_v11, 16 }
  0x50   :  { %v565_v2 = vshll.u32 %v5986_v51, 16  ;;  %vm6020_vm15 = vmand %vm4342_vm11, %vm4414_vm12 }
  0x52   :  { %v567_v24 = vrot.slane %v565_v2, 1 }
  0x58   :  { %5349 = vmatmul.msk.bf16.gmra.mxu1 %vm574_vm1, %v5498_v14  ;;  %v1930_v14 = vmul.u32 58254, %v1926_v6  ;;  %v1958_v6 = vmul.u32 14564, %v1955_v55 }
  0x5a   :  { %v1933_v23 = vshll.u32 %v1930_v14, 16  ;;  %v1934_v47 = vshrl.u32 %v1930_v14, 16  ;;  %v1961_v14 = vmul.u32 58254, %v1956_v0  ;;  %vm1966_vm13 = vc.u32 %v1958_v6, %v1962_v15 }
  0x5b   :  { %5391 = vmatmul.msk.bf16.gmra.mxu2 %vm574_vm1, %v1165_v45  ;;  %v1167_v45 = vsel %vm1152_vm2, %v1164_v37, %v1166_v62  ;;  %v1936_v37 = vshrl.u32 %v1931_v19, 16  ;;  %v561_v62 = vshrl.u32 %v5954_v4, 16  ;;  %v6008_v4 = vadd.s32 24, %v5918_v38 }
  0x5c   :  { %5309 = vmatmul.msk.bf16.gmra.mxu0 %vm574_vm1, %v328_v48  ;;  %5336 = vmatmul.msk.bf16.gmra.mxu3 %vm574_vm1, %v544_v53  ;;  %vm1937_vm6 = vc.u32 %v1929_v18, %v1933_v23  ;;  %v1939_v33 = vadd.s32 %v1933_v23, %v1929_v18  ;;  %v5989_v53 = vsel %vm276_vm3, %v339_v25, %v343_v34  ;;  %v1964_v18 = vshll.u32 %v1960_v8, 16 }
  0x5d   :  { %v1938_v36 = vsel %vm1937_vm6, 1, %v8629_v1  ;;  %v563_v17 = vor.u32 %v561_v62, %v559_v40  ;;  %v1984_v19 = vand.u32 65535, %v6008_v4  ;;  %v1985_v20 = vshrl.u32 %v6008_v4, 16 }
  0x5e   :  { %v1940_v43 = vadd.s32 %v1938_v36, %v1932_v27  ;;  %vm1941_vm7 = vc.u32 %v1939_v33, %v1935_v28  ;;  %v1967_v22 = vsel %vm1966_vm13, 1, %v8629_v1  ;;  %v1968_v23 = vadd.s32 %v1962_v15, %v1958_v6  ;;  %v6027_v36 = vld [vmem:[%s8621_s0 + $0x50] sm:$0xff] }
  0x5f   :  { %v1942_v48 = vsel %vm1941_vm7, 1, %v8629_v1  ;;  %v1987_v25 = vmul.u32 14564, %v1984_v19  ;;  %v1988_v26 = vmul.u32 58254, %v1984_v19  ;;  %v1969_v28 = vadd.s32 %v1967_v22, %v1961_v14 }
  0x60   :  { %v1944_v54 = vadd.s32 %v1942_v48, %v1940_v43  ;;  %v1989_v31 = vmul.u32 14564, %v1985_v20  ;;  %vm1970_vm14 = vc.u32 %v1968_v23, %v1964_v18  ;;  %v1965_v40 = vshrl.u32 %v1960_v8, 16 }
  0x61   :  { %v1991_v33 = vshll.u32 %v1988_v26, 16  ;;  %v1990_v43 = vmul.u32 58254, %v1985_v20  ;;  %v6031_v48 = vadd.s32 32, %v5918_v38  ;;  %v6040_v52 = vsel %vm276_vm3, %v563_v17, %v567_v24 }
  0x62   :  { %v1945_v63 = vadd.s32 %v1944_v54, %v1934_v47  ;;  %v357_v57 = vshll.u32 %v6027_v36, 16  ;;  %v1992_v58 = vshrl.u32 %v1988_v26, 16  ;;  %v1172_v0 = vrot.slane %v6027_v36, 1 }
  0x63   :  { %vm1995_vm6 = vc.u32 %v1987_v25, %v1991_v33  ;;  %v1997_v47 = vadd.s32 %v1991_v33, %v1987_v25  ;;  %v2013_v2 = vand.u32 65535, %v6031_v48  ;;  %v2014_v3 = vshrl.u32 %v6031_v48, 16 }
  0x64   :  { %v1946_v5 = vadd.s32 %v1945_v63, %v1936_v37  ;;  %v8631_v37 = vmov 0.0   ;;  %v1994_v6 = vshrl.u32 %v1989_v31, 16  ;;  %v359_v14 = vrot.slane %v357_v57, 1 }
  0x65   :  { %v6045_v54 = vsel %vm6020_vm15, 1.0, %v8631_v37  ;;  %v2018_v11 = vmul.u32 14564, %v2014_v3  ;;  %v2019_v19 = vmul.u32 58254, %v2014_v3  ;;  %v361_v57 = vshrl.u32 %v6027_v36, 16 }
  0x66   :  { %v1947_v13 = vshrl.u32 %v1946_v5, 4 }
  0x68   :  { %5350 = vmatmul.msk.bf16.gmra.mxu1 %vm574_vm1, %v5910_v29  ;;  %v345_v29 = vshrl.u32 %v5943_v59, 16  ;;  %v1948_v21 = vmul.u32 18, %v1947_v13 }
  0x6a   :  { %v347_v9 = vor.u32 %v345_v29, %v343_v34  ;;  %v1949_v27 = vsub.s32 %v5946_v61, %v1948_v21  ;;  %v1971_v61 = vsel %vm1970_vm14, 1, %v8629_v1  ;;  %v353_v29 = vshrl.u32 %v5973_v41, 16 }
  0x6b   :  { %5392 = vmatmul.msk.bf16.gmra.mxu2 %vm574_vm1, %v1167_v45  ;;  %v1973_v42 = vadd.s32 %v1971_v61, %v1969_v28  ;;  %v2022_v21 = vshll.u32 %v2018_v11, 16 }
  0x6c   :  { %5310 = vmatmul.msk.bf16.gmra.mxu0 %vm574_vm1, %v336_v46  ;;  %5337 = vmatmul.msk.bf16.gmra.mxu3 %vm574_vm1, %v552_v49  ;;  %vm3983_vm0 = vcmp.ne.s32.totalorder %v1949_v27, 0  ;;  %vm4055_vm4 = vcmp.lt.s32.totalorder %v1949_v27, 0  ;;  %v4199_v35 = vadd.s32 18, %v1949_v27  ;;  %v1993_v46 = vshll.u32 %v1989_v31, 16 }
  0x6d   :  { %vm4127_vm5 = vmand %vm4055_vm4, %vm3983_vm0  ;;  %v6037_v49 = vsel %vm276_vm3, %v347_v9, %v6005_v10  ;;  %v1974_v55 = vadd.s32 %v1973_v42, %v1963_v32  ;;  %v2017_v9 = vmul.u32 58254, %v2013_v2  ;;  %v355_v13 = vor.u32 %v353_v29, %v6005_v10  ;;  %v6086_v42 = vld [vmem:[%s8621_s0 + $0x58] sm:$0xff] }
  0x6e   :  { %v4271_v45 = vsel %vm4127_vm5, %v4199_v35, %v1949_v27  ;;  %vm1999_vm9 = vc.u32 %v1997_v47, %v1993_v46  ;;  %v2023_v46 = vshrl.u32 %v2018_v11, 16 }
  0x6f   :  { %vm4343_vm7 = vcmp.ge.s32.totalorder %v4271_v45, 1  ;;  %vm4415_vm8 = vcmp.le.s32.totalorder %v4271_v45, 16  ;;  %v1975_v62 = vadd.s32 %v1974_v55, %v1965_v40  ;;  %v2000_v7 = vsel %vm1999_vm9, 1, %v8629_v1 }
  0x70   :  { %vm4487_vm10 = vmand %vm4343_vm7, %vm4415_vm8  ;;  %v2020_v20 = vshll.u32 %v2017_v9, 16  ;;  %v2021_v32 = vshrl.u32 %v2017_v9, 16  ;;  %v6089_v45 = vsel %vm276_vm3, %v355_v13, %v359_v14  ;;  %v363_v9 = vor.u32 %v361_v57, %v359_v14 }
  0x71   :  { %v1976_v5 = vshrl.u32 %v1975_v62, 4  ;;  %v6066_v22 = vsel %vm4487_vm10, 1.0, %v8631_v37 }
  0x73   :  { %v1977_v15 = vmul.u32 18, %v1976_v5 }
  0x75   :  { %v1978_v10 = vsub.s32 %v5968_v39, %v1977_v15 }
  0x77   :  { %vm3984_vm12 = vcmp.ne.s32.totalorder %v1978_v10, 0  ;;  %vm4056_vm13 = vcmp.lt.s32.totalorder %v1978_v10, 0  ;;  %v4200_v27 = vadd.s32 18, %v1978_v10 }
  0x78   :  { %5351 = vmatmul.msk.bf16.gmra.mxu1 %vm574_vm1, %v5924_v44  ;;  %v1996_v44 = vsel %vm1995_vm6, 1, %v8629_v1  ;;  %vm4128_vm14 = vmand %vm4056_vm13, %vm3984_vm12 }
  0x79   :  { %v1998_v63 = vadd.s32 %v1996_v44, %v1990_v43  ;;  %v6096_v44 = vadd.s32 48, %v5918_v38 }
  0x7b   :  { %5393 = vmatmul.msk.bf16.gmra.mxu2 %vm574_vm1, %v5984_v50  ;;  %v6059_v50 = vadd.s32 40, %v5918_v38  ;;  %v2002_v8 = vadd.s32 %v2000_v7, %v1998_v63  ;;  %v1174_v63 = vrot.slane %v6086_v42, 1  ;;  %v2071_v14 = vand.u32 65535, %v6096_v44 }
  0x7c   :  { %5311 = vmatmul.msk.bf16.gmra.mxu0 %vm574_vm1, %v5989_v53  ;;  %5338 = vmatmul.msk.bf16.gmra.mxu3 %vm574_vm1, %v5994_v56  ;;  %v2016_v53 = vmul.u32 14564, %v2013_v2  ;;  %v6073_v56 = vsel %vm1152_vm2, %v1170_v60, %v1172_v0  ;;  %v4272_v60 = vsel %vm4128_vm14, %v4200_v27, %v1978_v10  ;;  %v365_v2 = vshll.u32 %v6086_v42, 16 }
  0x7d   :  { %v2042_v17 = vand.u32 65535, %v6059_v50  ;;  %v2003_v18 = vadd.s32 %v2002_v8, %v1992_v58  ;;  %v2043_v23 = vshrl.u32 %v6059_v50, 16  ;;  %vm4344_vm0 = vcmp.ge.s32.totalorder %v4272_v60, 1 }
  0x7e   :  { %vm2024_vm11 = vc.u32 %v2016_v53, %v2020_v20  ;;  %v2026_v26 = vadd.s32 %v2020_v20, %v2016_v53  ;;  %vm4416_vm4 = vcmp.le.s32.totalorder %v4272_v60, 16 }
  0x7f   :  { %v2004_v25 = vadd.s32 %v2003_v18, %v1994_v6  ;;  %v6077_v24 = vmul.u32 58254, %v2042_v17  ;;  %v2025_v28 = vsel %vm2024_vm11, 1, %v8629_v1  ;;  %v2045_v34 = vmul.u32 14564, %v2042_v17  ;;  %vm4488_vm5 = vmand %vm4344_vm0, %vm4416_vm4 }
  0x80   :  { %v2027_v33 = vadd.s32 %v2025_v28, %v2019_v19  ;;  %vm2028_vm15 = vc.u32 %v2026_v26, %v2022_v21  ;;  %v6081_v35 = vmul.u32 14564, %v2043_v23  ;;  %v2048_v47 = vmul.u32 58254, %v2043_v23 }
  0x81   :  { %v2005_v31 = vshrl.u32 %v2004_v25, 4  ;;  %v2029_v39 = vsel %vm2028_vm15, 1, %v8629_v1  ;;  %v2049_v55 = vshll.u32 %v6077_v24, 16  ;;  %v6103_v5 = vsel %vm4488_vm5, 1.0, %v8631_v37 }
  0x82   :  { %v2031_v43 = vadd.s32 %v2029_v39, %v2027_v33  ;;  %v2051_v58 = vshll.u32 %v6081_v35, 16  ;;  %v2050_v8 = vshrl.u32 %v6077_v24, 16  ;;  %v2072_v19 = vshrl.u32 %v6096_v44, 16 }
  0x83   :  { %v2006_v40 = vmul.u32 18, %v2005_v31  ;;  %vm2053_vm6 = vc.u32 %v2045_v34, %v2049_v55  ;;  %v2055_v13 = vadd.s32 %v2049_v55, %v2045_v34  ;;  %v2052_v10 = vshrl.u32 %v6081_v35, 16 }
  0x84   :  { %v2032_v3 = vadd.s32 %v2031_v43, %v2021_v32  ;;  %v2054_v11 = vsel %vm2053_vm6, 1, %v8629_v1  ;;  %v6130_v26 = vmul.u32 58254, %v2071_v14  ;;  %v6132_v24 = vmul.u32 14564, %v2072_v19 }
  0x85   :  { %v965_v61 = vpop.f32.mrf.mxu1  ;;  %v2007_v29 = vsub.s32 %v6008_v4, %v2006_v40  ;;  %vm2057_vm13 = vc.u32 %v2055_v13, %v2051_v58  ;;  %v2077_v34 = vmul.u32 58254, %v2072_v19  ;;  %v369_v13 = vshrl.u32 %v6086_v42, 16 }
  0x86   :  { %v2033_v7 = vadd.s32 %v2032_v3, %v2023_v46  ;;  %v2058_v23 = vsel %vm2057_vm13, 1, %v8629_v1  ;;  %v2078_v35 = vshll.u32 %v6130_v26, 16  ;;  %v2079_v46 = vshrl.u32 %v6130_v26, 16  ;;  %v6157_v3 = vld [vmem:[%s8621_s0 + $0x60] sm:$0xff] }
  0x87   :  { %vm3985_vm7 = vcmp.ne.s32.totalorder %v2007_v29, 0  ;;  %vm4057_vm8 = vcmp.lt.s32.totalorder %v2007_v29, 0  ;;  %v4201_v4 = vadd.s32 18, %v2007_v29  ;;  %v1176_v19 = vrot.slane %v6157_v3, 1 }
  0x88   :  { %5352 = vmatmul.msk.bf16.gmra.mxu1 %vm574_vm1, %v5943_v59  ;;  %vm4129_vm9 = vmand %vm4057_vm8, %vm3985_vm7  ;;  %v6112_v59 = vsel %vm1152_vm2, %v1172_v0, %v1174_v63  ;;  %v2034_v15 = vshrl.u32 %v2033_v7, 4 }
  0x89   :  { %v696_v62 = vpop.f32.mrf.mxu0  ;;  %v4273_v53 = vsel %vm4129_vm9, %v4201_v4, %v2007_v29  ;;  %v2081_v4 = vshrl.u32 %v6132_v24, 16 }
  0x8a   :  { %v966_v6 = vadd.f32 %v965_v61, %v696_v62  ;;  %vm4345_vm10 = vcmp.ge.s32.totalorder %v4273_v53, 1  ;;  %vm4417_vm11 = vcmp.le.s32.totalorder %v4273_v53, 16  ;;  %v2035_v21 = vmul.u32 18, %v2034_v15 }
  0x8b   :  { %5394 = vmatmul.msk.bf16.gmra.mxu2 %vm574_vm1, %v6013_v12  ;;  %v6118_v12 = vrot.slane %v365_v2, 1  ;;  %vm6122_vm12 = vmand %vm4345_vm10, %vm4417_vm11  ;;  %v373_v15 = vshll.u32 %v6157_v3, 16 }
  0x8c   :  { %5312 = vmatmul.msk.bf16.gmra.mxu0 %vm574_vm1, %v6037_v49  ;;  %5339 = vmatmul.msk.bf16.gmra.mxu3 %vm574_vm1, %v6040_v52  ;;  %v2056_v49 = vadd.s32 %v2054_v11, %v2048_v47  ;;  %v2074_v52 = vmul.u32 14564, %v2071_v14  ;;  %v6140_v32 = vsel %vm6122_vm12, 1.0, %v8631_v37  ;;  %v2036_v60 = vsub.s32 %v6031_v48, %v2035_v21 }
  0x8d   :  { %v967_v17 = vpop.f32.mrf.mxu1  ;;  %v6144_v33 = vsel %vm276_vm3, %v363_v9, %v6118_v12  ;;  %v2080_v47 = vshll.u32 %v6132_v24, 16  ;;  %v6195_v24 = vrot.slane %v373_v15, 1 }
  0x8e   :  { %v1351_v0 = vpop.f32.mrf.mxu2  ;;  %v2060_v25 = vadd.s32 %v2058_v23, %v2056_v49  ;;  %vm3986_vm14 = vcmp.ne.s32.totalorder %v2036_v60, 0  ;;  %vm4058_vm15 = vcmp.lt.s32.totalorder %v2036_v60, 0  ;;  %v4202_v40 = vadd.s32 18, %v2036_v60 }
  0x8f   :  { %v1531_v20 = vadd.f32 %v1351_v0, %v966_v6  ;;  %v6135_v31 = vpop.f32.mrf.mxu3  ;;  %vm4130_vm0 = vmand %vm4058_vm15, %vm3986_vm14  ;;  %vm2082_vm4 = vc.u32 %v2074_v52, %v2078_v35  ;;  %v2084_v57 = vadd.s32 %v2078_v35, %v2074_v52  ;;  %v371_v52 = vor.u32 %v369_v13, %v6118_v12 }
  0x90   :  { %v2061_v39 = vadd.s32 %v2060_v25, %v2050_v8  ;;  %v4274_v48 = vsel %vm4130_vm0, %v4202_v40, %v2036_v60  ;;  %v2083_v29 = vsel %vm2082_vm4, 1, %v8629_v1 }
  0x91   :  { %v4846_v27 = vmul.f32 %v6045_v54, %v1531_v20  ;;  %v698_v28 = vpop.f32.mrf.mxu0  ;;  %v6149_v54 = vadd.s32 56, %v5918_v38  ;;  %vm4346_vm5 = vcmp.ge.s32.totalorder %v4274_v48, 1  ;;  %vm4418_vm6 = vcmp.le.s32.totalorder %v4274_v48, 16 }
  0x92   :  { %v968_v61 = vadd.f32 %v967_v17, %v698_v28  ;;  %v2062_v43 = vadd.s32 %v2061_v39, %v2052_v10  ;;  %vm6160_vm7 = vmand %vm4346_vm5, %vm4418_vm6  ;;  %v2085_v8 = vadd.s32 %v2083_v29, %v2077_v34  ;;  %vm6164_vm8 = vc.u32 %v2084_v57, %v2080_v47 }
  0x93   :  { %v4996_v55 = vmul.f32 %v4846_v27, %v1531_v20  ;;  %v2100_v9 = vand.u32 65535, %v6149_v54  ;;  %v2101_v0 = vshrl.u32 %v6149_v54, 16  ;;  %v6181_v23 = vsel %vm6160_vm7, 1.0, %v8631_v37 }
  0x94   :  { %v2063_v2 = vshrl.u32 %v2062_v43, 4 }
  0x95   :  { %v970_v62 = vpop.f32.mrf.mxu1  ;;  %v2103_v21 = vmul.u32 14564, %v2100_v9  ;;  %v2104_v26 = vmul.u32 58254, %v2100_v9  ;;  %v2105_v12 = vmul.u32 14564, %v2101_v0  ;;  %v2106_v34 = vmul.u32 58254, %v2101_v0 }
  0x96   :  { %v1353_v58 = vpop.f32.mrf.mxu2  ;;  %v2064_v11 = vmul.u32 18, %v2063_v2 }
  0x97   :  { %v1532_v6 = vadd.f32 %v1353_v58, %v968_v61  ;;  %v6173_v14 = vpop.f32.mrf.mxu3  ;;  %v2107_v35 = vshll.u32 %v2104_v26, 16  ;;  %v6207_v61 = vadd.s32 64, %v5918_v38  ;;  %v2109_v47 = vshll.u32 %v2105_v12, 16 }
  0x98   :  { %5353 = vmatmul.msk.bf16.gmra.mxu1 %vm574_vm1, %v5973_v41  ;;  %v2065_v25 = vsub.s32 %v6059_v50, %v2064_v11  ;;  %v2108_v58 = vshrl.u32 %v2104_v26, 16  ;;  %v2110_v2 = vshrl.u32 %v2105_v12, 16  ;;  %v377_v12 = vshrl.u32 %v6157_v3, 16 }
  0x99   :  { %v5539_v17 = vpack.c.bf16 %v1532_v6, %v1531_v20  ;;  %v4847_v18 = vmul.f32 %v6066_v22, %v1532_v6  ;;  %v701_v49 = vpop.f32.mrf.mxu0  ;;  %v2087_v22 = vsel %vm6164_vm8, 1, %v8629_v1  ;;  %vm2111_vm14 = vc.u32 %v2103_v21, %v2107_v35 }
  0x9a   :  { %v971_v10 = vadd.f32 %v970_v62, %v701_v49  ;;  %vm3987_vm9 = vcmp.ne.s32.totalorder %v2065_v25, 0  ;;  %vm4059_vm10 = vcmp.lt.s32.totalorder %v2065_v25, 0  ;;  %v4203_v50 = vadd.s32 18, %v2065_v25 }
  0x9b   :  { %5540 = vst [vmem:[%s8622_s2] sm:$0xff] %v5539_v17   ;;  %v4918_v41 = vadd.f32 %v4847_v18, %v4846_v27  ;;  %v4997_v20 = vmul.f32 %v4847_v18, %v1532_v6  ;;  %5395 = vmatmul.msk.bf16.gmra.mxu2 %vm574_vm1, %v6073_v56  ;;  %vm4131_vm11 = vmand %vm4059_vm10, %vm3987_vm9  ;;  %v6202_v27 = vsel %vm1152_vm2, %v1174_v63, %v1176_v19  ;;  %v2112_v62 = vsel %vm2111_vm14, 1, %v8629_v1 }
  0x9c   :  { %5313 = vmatmul.msk.bf16.gmra.mxu0 %vm574_vm1, %v6089_v45  ;;  %v2089_v56 = vadd.s32 %v2087_v22, %v2085_v8  ;;  %5371 = vmatmul.msk.bf16.vlgmr.msrb.gmra.mxu3 %vm574_vm1, %v5837_v16  ;;  %v4275_v39 = vsel %vm4131_vm11, %v4203_v50, %v2065_v25  ;;  %v6211_v63 = vsel %vm276_vm3, %v371_v52, %v6195_v24  ;;  %v2130_v13 = vshrl.u32 %v6207_v61, 16  ;;  %v6228_v25 = vld [vmem:[%s8621_s0 + $0x68] sm:$0xff] }
  0x9d   :  { %v5068_v28 = vadd.f32 %v4997_v20, %v4996_v55  ;;  %v972_v60 = vpop.f32.mrf.mxu1  ;;  %vm4347_vm12 = vcmp.ge.s32.totalorder %v4275_v39, 1  ;;  %vm4419_vm13 = vcmp.le.s32.totalorder %v4275_v39, 16  ;;  %v2113_v55 = vadd.s32 %v2107_v35, %v2103_v21 }
  0x9e   :  { %v1356_v45 = vpop.f32.mrf.mxu2  ;;  %v2090_v43 = vadd.s32 %v2089_v56, %v2079_v46  ;;  %vm4491_vm15 = vmand %vm4347_vm12, %vm4419_vm13  ;;  %v2114_v6 = vadd.s32 %v2112_v62, %v2106_v34  ;;  %v2129_v46 = vand.u32 65535, %v6207_v61  ;;  %v6230_v22 = vmul.u32 14564, %v2130_v13 }
  0x9f   :  { %v1533_v40 = vadd.f32 %v1356_v45, %v971_v10  ;;  %v6214_v29 = vpop.f32.mrf.mxu3  ;;  %vm2115_vm0 = vc.u32 %v2113_v55, %v2109_v47  ;;  %v6236_v20 = vadd.s32 80, %v5918_v38  ;;  %v2135_v50 = vmul.u32 58254, %v2130_v13 }
  0xa0   :  { %v2091_v57 = vadd.s32 %v2090_v43, %v2081_v4  ;;  %v2116_v9 = vsel %vm2115_vm0, 1, %v8629_v1  ;;  %v6223_v4 = vmul.u32 58254, %v2129_v46  ;;  %v2132_v18 = vmul.u32 14564, %v2129_v46 }
  0xa1   :  { %v4848_v16 = vmul.f32 %v6103_v5, %v1533_v40  ;;  %v703_v48 = vpop.f32.mrf.mxu0  ;;  %v6220_v5 = vsel %vm4491_vm15, 1.0, %v8631_v37  ;;  %v2118_v11 = vadd.s32 %v2116_v9, %v2114_v6  ;;  %v381_v45 = vshll.u32 %v6228_v25, 16 }
  0xa2   :  { %v2092_v53 = vshrl.u32 %v2091_v57, 4  ;;  %v973_v0 = vadd.f32 %v972_v60, %v703_v48  ;;  %v2137_v60 = vshrl.u32 %v6223_v4, 16  ;;  %v379_v48 = vor.u32 %v377_v12, %v6195_v24 }
  0xa3   :  { %v4919_v7 = vadd.f32 %v4918_v41, %v4848_v16  ;;  %v4998_v8 = vmul.f32 %v4848_v16, %v1533_v40  ;;  %v2119_v10 = vadd.s32 %v2118_v11, %v2108_v58  ;;  %v6233_v41 = vadd.s32 72, %v5918_v38 }
  0xa4   :  { %v2093_v17 = vmul.u32 18, %v2092_v53  ;;  %v1178_v16 = vrot.slane %v6228_v25, 1  ;;  %v2138_v62 = vshll.u32 %v6230_v22, 16  ;;  %v2139_v11 = vshrl.u32 %v6230_v22, 16 }
  0xa5   :  { %v5069_v15 = vadd.f32 %v5068_v28, %v4998_v8  ;;  %v975_v21 = vpop.f32.mrf.mxu1  ;;  %v2136_v28 = vshll.u32 %v6223_v4, 16  ;;  %v2120_v56 = vadd.s32 %v2119_v10, %v2110_v2  ;;  %v2158_v2 = vand.u32 65535, %v6233_v41 }
  0xa6   :  { %v1358_v49 = vpop.f32.mrf.mxu2  ;;  %v2094_v26 = vsub.s32 %v6096_v44, %v2093_v17  ;;  %v2159_v53 = vshrl.u32 %v6233_v41, 16  ;;  %v385_v4 = vshrl.u32 %v6228_v25, 16 }
  0xa7   :  { %v1534_v52 = vadd.f32 %v1358_v49, %v973_v0  ;;  %v6244_v43 = vpop.f32.mrf.mxu3  ;;  %v2121_v55 = vshrl.u32 %v2120_v56, 4  ;;  %vm2140_vm9 = vc.u32 %v2132_v18, %v2136_v28  ;;  %v2142_v8 = vadd.s32 %v2136_v28, %v2132_v18 }
  0xa8   :  { %5354 = vmatmul.msk.bf16.gmra.mxu1 %vm574_vm1, %v6027_v36  ;;  %vm3988_vm4 = vcmp.ne.s32.totalorder %v2094_v26, 0  ;;  %vm4060_vm5 = vcmp.lt.s32.totalorder %v2094_v26, 0  ;;  %v4204_v47 = vadd.s32 18, %v2094_v26  ;;  %v6255_v36 = vrot.slane %v381_v45, 1 }
  0xa9   :  { %v5544_v39 = vpack.c.bf16 %v1534_v52, %v1533_v40  ;;  %v4849_v34 = vmul.f32 %v6140_v32, %v1534_v52  ;;  %v706_v35 = vpop.f32.mrf.mxu0  ;;  %vm4132_vm6 = vmand %vm4060_vm5, %vm3988_vm4  ;;  %v2122_v58 = vmul.u32 18, %v2121_v55  ;;  %v2141_v13 = vsel %vm2140_vm9, 1, %v8629_v1 }
  0xaa   :  { %v976_v44 = vadd.f32 %v975_v21, %v706_v35  ;;  %v4276_v57 = vsel %vm4132_vm6, %v4204_v47, %v2094_v26  ;;  %v2143_v0 = vadd.s32 %v2141_v13, %v2135_v50  ;;  %vm2144_vm14 = vc.u32 %v2142_v8, %v2138_v62 }
  0xab   :  { %5719 = vst [vmem:[%s8622_s2 + $0x8] sm:$0xff] %v5544_v39   ;;  %v4920_v40 = vadd.f32 %v4919_v7, %v4849_v34  ;;  %v4999_v32 = vmul.f32 %v4849_v34, %v1534_v52  ;;  %5396 = vmatmul.msk.bf16.gmra.mxu2 %vm574_vm1, %v6112_v59  ;;  %vm4348_vm7 = vcmp.ge.s32.totalorder %v4276_v57, 1  ;;  %vm4420_vm8 = vcmp.le.s32.totalorder %v4276_v57, 16  ;;  %v6299_v57 = vld [vmem:[%s8621_s0 + $0x70] sm:$0xff] }
  0xac   :  { %5314 = vmatmul.msk.bf16.gmra.mxu0 %vm574_vm1, %v6144_v33  ;;  %v6266_v59 = vsel %vm1152_vm2, %v1176_v19, %v1178_v16  ;;  %v5759_v33 = vld [vmem:[%s8621_s0 + $0xe0] sm:$0xff]  ;;  %v2123_v7 = vsub.s32 %v6149_v54, %v2122_v58  ;;  %vm4492_vm10 = vmand %vm4348_vm7, %vm4420_vm8  ;;  %v6276_v19 = vsel %vm276_vm3, %v379_v48, %v6255_v36  ;;  %v2162_v49 = vmul.u32 58254, %v2158_v2 }
  0xad   :  { %v5070_v6 = vadd.f32 %v5069_v15, %v4999_v32  ;;  %5372 = vmatmul.msk.bf16.gmra.mxu3 %vm574_vm1, %v5759_v33  ;;  %v977_v46 = vpop.f32.mrf.mxu1  ;;  %v6283_v21 = vmul.u32 14564, %v2159_v53  ;;  %v6286_v10 = vsel %vm4492_vm10, 1.0, %v8631_v37  ;;  %v2145_v52 = vsel %vm2144_vm14, 1, %v8629_v1 }
  0xae   :  { %v1361_v24 = vpop.f32.mrf.mxu2  ;;  %vm3989_vm11 = vcmp.ne.s32.totalorder %v2123_v7, 0  ;;  %vm4061_vm12 = vcmp.lt.s32.totalorder %v2123_v7, 0  ;;  %v4205_v15 = vadd.s32 18, %v2123_v7  ;;  %v2161_v26 = vmul.u32 14564, %v2158_v2 }
  0xaf   :  { %v1535_v9 = vadd.f32 %v1361_v24, %v976_v44  ;;  %v6281_v18 = vpop.f32.mrf.mxu3  ;;  %vm4133_vm13 = vmand %vm4061_vm12, %vm3989_vm11  ;;  %v2164_v50 = vmul.u32 58254, %v2159_v53  ;;  %v2165_v12 = vshll.u32 %v2162_v49, 16  ;;  %v2167_v45 = vshll.u32 %v6283_v21, 16 }
  0xb0   :  { %v4277_v22 = vsel %vm4133_vm13, %v4205_v15, %v2123_v7  ;;  %v2166_v35 = vshrl.u32 %v2162_v49, 16  ;;  %v2187_v44 = vand.u32 65535, %v6236_v20  ;;  %v2188_v2 = vshrl.u32 %v6236_v20, 16 }
  0xb1   :  { %v4850_v54 = vmul.f32 %v6181_v23, %v1535_v9  ;;  %v708_v17 = vpop.f32.mrf.mxu0  ;;  %vm4349_vm15 = vcmp.ge.s32.totalorder %v4277_v22, 1  ;;  %vm4421_vm0 = vcmp.le.s32.totalorder %v4277_v22, 16  ;;  %v2147_v23 = vadd.s32 %v2145_v52, %v2143_v0 }
  0xb2   :  { %vm4493_vm4 = vmand %vm4349_vm15, %vm4421_vm0  ;;  %v978_v34 = vadd.f32 %v977_v46, %v708_v17  ;;  %vm2169_vm5 = vc.u32 %v2161_v26, %v2165_v12  ;;  %v2171_v48 = vadd.s32 %v2165_v12, %v2161_v26  ;;  %v1180_v13 = vrot.slane %v6299_v57, 1 }
  0xb3   :  { %v4921_v28 = vadd.f32 %v4920_v40, %v4850_v54  ;;  %v5000_v56 = vmul.f32 %v4850_v54, %v1535_v9  ;;  %v6292_v32 = vsel %vm4493_vm4, 1.0, %v8631_v37  ;;  %v2148_v40 = vadd.s32 %v2147_v23, %v2137_v60 }
  0xb4   :  { %v2170_v62 = vsel %vm2169_vm5, 1, %v8629_v1  ;;  %vm2173_vm6 = vc.u32 %v2171_v48, %v2167_v45  ;;  %v2190_v54 = vmul.u32 14564, %v2187_v44  ;;  %v6323_v52 = vmul.u32 14564, %v2188_v2 }
  0xb5   :  { %v5071_v39 = vadd.f32 %v5070_v6, %v5000_v56  ;;  %v980_v55 = vpop.f32.mrf.mxu1  ;;  %v6303_v6 = vmul.u32 58254, %v2187_v44  ;;  %v2149_v33 = vadd.s32 %v2148_v40, %v2139_v11  ;;  %v2172_v24 = vadd.s32 %v2170_v62, %v2164_v50 }
  0xb6   :  { %v1363_v47 = vpop.f32.mrf.mxu2  ;;  %v2174_v53 = vsel %vm2173_vm6, 1, %v8629_v1  ;;  %v2168_v11 = vshrl.u32 %v6283_v21, 16  ;;  %v387_v21 = vor.u32 %v385_v4, %v6255_v36 }
  0xb7   :  { %v1536_v58 = vadd.f32 %v1363_v47, %v978_v34  ;;  %v6307_v8 = vpop.f32.mrf.mxu3  ;;  %v2150_v15 = vshrl.u32 %v2149_v33, 4  ;;  %v2176_v0 = vadd.s32 %v2174_v53, %v2172_v24  ;;  %v2194_v56 = vshll.u32 %v6303_v6, 16 }
  0xb8   :  { %5355 = vmatmul.msk.bf16.gmra.mxu1 %vm574_vm1, %v6086_v42  ;;  %v389_v42 = vshll.u32 %v6299_v57, 16  ;;  %v2195_v34 = vshrl.u32 %v6303_v6, 16  ;;  %v2197_v6 = vshrl.u32 %v6323_v52, 16 }
  0xb9   :  { %v5549_v60 = vpack.c.bf16 %v1536_v58, %v1535_v9  ;;  %v4851_v46 = vmul.f32 %v6220_v5, %v1536_v58  ;;  %v711_v7 = vpop.f32.mrf.mxu0  ;;  %v2151_v49 = vmul.u32 18, %v2150_v15  ;;  %v2177_v22 = vadd.s32 %v2176_v0, %v2166_v35 }
  0xba   :  { %v981_v17 = vadd.f32 %v980_v55, %v711_v7  ;;  %v6338_v45 = vrot.slane %v389_v42, 1  ;;  %vm2198_vm7 = vc.u32 %v2190_v54, %v2194_v56  ;;  %v2200_v35 = vadd.s32 %v2194_v56, %v2190_v54 }
  0xbb   :  { %5720 = vst [vmem:[%s8622_s2 + $0x10] sm:$0xff] %v5549_v60   ;;  %v4922_v5 = vadd.f32 %v4921_v28, %v4851_v46  ;;  %v5001_v9 = vmul.f32 %v4851_v46, %v1536_v58  ;;  %5397 = vmatmul.msk.bf16.gmra.mxu2 %vm574_vm1, %v6202_v27  ;;  %v6330_v28 = vsel %vm1152_vm2, %v1178_v16, %v1180_v13  ;;  %v2193_v27 = vmul.u32 58254, %v2188_v2 }
  0xbc   :  { %5315 = vmatmul.msk.bf16.gmra.mxu0 %vm574_vm1, %v6211_v63  ;;  %v5760_v63 = vld [vmem:[%s8621_s0 + $0xe8] sm:$0xff]  ;;  %v2152_v50 = vsub.s32 %v6207_v61, %v2151_v49  ;;  %v2178_v12 = vadd.s32 %v2177_v22, %v2168_v11  ;;  %v2199_v61 = vsel %vm2198_vm7, 1, %v8629_v1  ;;  %v6347_v58 = vadd.s32 88, %v5918_v38 }
  0xbd   :  { %v5072_v26 = vadd.f32 %v5071_v39, %v5001_v9  ;;  %5373 = vmatmul.msk.bf16.gmra.mxu3 %vm574_vm1, %v5760_v63  ;;  %v982_v23 = vpop.f32.mrf.mxu1  ;;  %v2196_v39 = vshll.u32 %v6323_v52, 16  ;;  %v2201_v33 = vadd.s32 %v2199_v61, %v2193_v27  ;;  %v6356_v11 = vsel %vm276_vm3, %v387_v21, %v6338_v45 }
  0xbe   :  { %v1366_v36 = vpop.f32.mrf.mxu2  ;;  %vm3990_vm8 = vcmp.ne.s32.totalorder %v2152_v50, 0  ;;  %vm4062_vm9 = vcmp.lt.s32.totalorder %v2152_v50, 0  ;;  %v4206_v44 = vadd.s32 18, %v2152_v50  ;;  %v2179_v47 = vshrl.u32 %v2178_v12, 4 }
  0xbf   :  { %v1537_v16 = vadd.f32 %v1366_v36, %v981_v17  ;;  %v6343_v48 = vpop.f32.mrf.mxu3  ;;  %vm4134_vm10 = vmand %vm4062_vm9, %vm3990_vm8  ;;  %vm2202_vm11 = vc.u32 %v2200_v35, %v2196_v39  ;;  %v2216_v46 = vand.u32 65535, %v6347_v58  ;;  %v2217_v7 = vshrl.u32 %v6347_v58, 16  ;;  %v6362_v17 = vld [vmem:[%s8621_s0 + $0x78] sm:$0xff] }
  0xc0   :  { %v4278_v62 = vsel %vm4134_vm10, %v4206_v44, %v2152_v50  ;;  %v2180_v2 = vmul.u32 18, %v2179_v47  ;;  %v2203_v60 = vsel %vm2202_vm11, 1, %v8629_v1  ;;  %v6369_v56 = vadd.s32 96, %v5918_v38 }
  0xc1   :  { %v4852_v55 = vmul.f32 %v6286_v10, %v1537_v16  ;;  %v713_v40 = vpop.f32.mrf.mxu0  ;;  %vm4350_vm12 = vcmp.ge.s32.totalorder %v4278_v62, 1  ;;  %vm4422_vm13 = vcmp.le.s32.totalorder %v4278_v62, 16  ;;  %v2205_v0 = vadd.s32 %v2203_v60, %v2201_v33 }
  0xc2   :  { %vm4494_vm14 = vmand %vm4350_vm12, %vm4422_vm13  ;;  %v2181_v10 = vsub.s32 %v6233_v41, %v2180_v2  ;;  %v983_v15 = vadd.f32 %v982_v23, %v713_v40  ;;  %v6364_v22 = vmul.u32 58254, %v2216_v46  ;;  %v6366_v21 = vmul.u32 14564, %v2217_v7 }
  0xc3   :  { %v4923_v24 = vadd.f32 %v4922_v5, %v4852_v55  ;;  %v5002_v4 = vmul.f32 %v4852_v55, %v1537_v16  ;;  %v5430_v9 = vsel %vm4494_vm14, 1.0, %v8631_v37  ;;  %v2206_v49 = vadd.s32 %v2205_v0, %v2195_v34 }
  0xc4   :  { %vm3991_vm15 = vcmp.ne.s32.totalorder %v2181_v10, 0  ;;  %vm4063_vm0 = vcmp.lt.s32.totalorder %v2181_v10, 0  ;;  %v4207_v41 = vadd.s32 18, %v2181_v10  ;;  %v2222_v27 = vmul.u32 58254, %v2217_v7 }
  0xc5   :  { %v5073_v53 = vadd.f32 %v5072_v26, %v5002_v4  ;;  %v985_v5 = vpop.f32.mrf.mxu1  ;;  %vm4135_vm4 = vmand %vm4063_vm0, %vm3991_vm15  ;;  %v2219_v26 = vmul.u32 14564, %v2216_v46  ;;  %v2207_v39 = vadd.s32 %v2206_v49, %v2197_v6  ;;  %v2223_v34 = vshll.u32 %v6364_v22, 16 }
  0xc6   :  { %v1368_v54 = vpop.f32.mrf.mxu2  ;;  %v4279_v52 = vsel %vm4135_vm4, %v4207_v41, %v2181_v10  ;;  %v393_v35 = vshrl.u32 %v6299_v57, 16  ;;  %v2225_v47 = vshll.u32 %v6366_v21, 16  ;;  %v2224_v40 = vshrl.u32 %v6364_v22, 16 }
  0xc7   :  { %v1538_v42 = vadd.f32 %v1368_v54, %v983_v15  ;;  %v6372_v50 = vpop.f32.mrf.mxu3  ;;  %vm4351_vm5 = vcmp.ge.s32.totalorder %v4279_v52, 1  ;;  %vm4423_vm6 = vcmp.le.s32.totalorder %v4279_v52, 16  ;;  %v2208_v55 = vshrl.u32 %v2207_v39, 4 }
  0xc8   :  { %5356 = vmatmul.msk.bf16.gmra.mxu1 %vm574_vm1, %v6157_v3  ;;  %vm6376_vm7 = vmand %vm4351_vm5, %vm4423_vm6  ;;  %vm2227_vm8 = vc.u32 %v2219_v26, %v2223_v34  ;;  %v2229_v61 = vadd.s32 %v2223_v34, %v2219_v26  ;;  %v1182_v33 = vrot.slane %v6362_v17, 1  ;;  %v2226_v10 = vshrl.u32 %v6366_v21, 16 }
  0xc9   :  { %v5554_v63 = vpack.c.bf16 %v1538_v42, %v1537_v16  ;;  %v4853_v36 = vmul.f32 %v6292_v32, %v1538_v42  ;;  %v716_v23 = vpop.f32.mrf.mxu0  ;;  %v397_v16 = vshll.u32 %v6362_v17, 16  ;;  %v5431_v2 = vsel %vm6376_vm7, 1.0, %v8631_v37 }
  0xca   :  { %v986_v3 = vadd.f32 %v985_v5, %v716_v23  ;;  %v2228_v6 = vsel %vm2227_vm8, 1, %v8629_v1  ;;  %v2209_v4 = vmul.u32 18, %v2208_v55  ;;  %vm2231_vm9 = vc.u32 %v2229_v61, %v2225_v47 }
  0xcb   :  { %5721 = vst [vmem:[%s8622_s2 + $0x18] sm:$0xff] %v5554_v63   ;;  %v4924_v32 = vadd.f32 %v4923_v24, %v4853_v36  ;;  %v5003_v44 = vmul.f32 %v4853_v36, %v1538_v42  ;;  %5398 = vmatmul.msk.bf16.gmra.mxu2 %vm574_vm1, %v6266_v59  ;;  %v5761_v59 = vld [vmem:[%s8621_s0 + $0xf0] sm:$0xff]  ;;  %v2230_v60 = vadd.s32 %v2228_v6, %v2222_v27  ;;  %v2232_v7 = vsel %vm2231_vm9, 1, %v8629_v1 }
  0xcc   :  { %5316 = vmatmul.msk.bf16.gmra.mxu0 %vm574_vm1, %v6276_v19  ;;  %v2245_v15 = vand.u32 65535, %v6369_v56  ;;  %v2210_v0 = vsub.s32 %v6236_v20, %v2209_v4  ;;  %v6408_v5 = vrot.slane %v397_v16, 1  ;;  %v2246_v41 = vshrl.u32 %v6369_v56, 16 }
  0xcd   :  { %v5074_v62 = vadd.f32 %v5073_v53, %v5003_v44  ;;  %5374 = vmatmul.msk.bf16.gmra.mxu3 %vm574_vm1, %v5761_v59  ;;  %v987_v24 = vpop.f32.mrf.mxu1  ;;  %v6404_v53 = vor.u32 %v393_v35, %v6338_v45  ;;  %v2234_v54 = vadd.s32 %v2232_v7, %v2230_v60  ;;  %v6418_v45 = vsel %vm1152_vm2, %v1180_v13, %v1182_v33 }
  0xce   :  { %v1371_v19 = vpop.f32.mrf.mxu2  ;;  %v2248_v21 = vmul.u32 14564, %v2245_v15  ;;  %v2249_v52 = vmul.u32 58254, %v2245_v15  ;;  %vm3992_vm10 = vcmp.ne.s32.totalorder %v2210_v0, 0  ;;  %vm4064_vm11 = vcmp.lt.s32.totalorder %v2210_v0, 0 }
  0xcf   :  { %v1539_v46 = vadd.f32 %v1371_v19, %v986_v3  ;;  %v6411_v22 = vpop.f32.mrf.mxu3  ;;  %v4208_v20 = vadd.s32 18, %v2210_v0  ;;  %v6421_v26 = vadd.s32 104, %v5918_v38  ;;  %vm4136_vm12 = vmand %vm4064_vm11, %vm3992_vm10  ;;  %v2235_v63 = vadd.s32 %v2234_v54, %v2224_v40 }
  0xd0   :  { %v2250_v36 = vmul.u32 14564, %v2246_v41  ;;  %v2251_v39 = vmul.u32 58254, %v2246_v41  ;;  %v2252_v34 = vshll.u32 %v2249_v52, 16  ;;  %v2253_v16 = vshrl.u32 %v2249_v52, 16 }
  0xd1   :  { %v4854_v42 = vmul.f32 %v5430_v9, %v1539_v46  ;;  %v718_v49 = vpop.f32.mrf.mxu0  ;;  %v4280_v12 = vsel %vm4136_vm12, %v4208_v20, %v2210_v0  ;;  %v2236_v13 = vadd.s32 %v2235_v63, %v2226_v10  ;;  %v2274_v19 = vand.u32 65535, %v6421_v26 }
  0xd2   :  { %v988_v23 = vadd.f32 %v987_v24, %v718_v49  ;;  %vm4352_vm13 = vcmp.ge.s32.totalorder %v4280_v12, 1  ;;  %vm4424_vm14 = vcmp.le.s32.totalorder %v4280_v12, 16  ;;  %v2254_v47 = vshll.u32 %v2250_v36, 16 }
  0xd3   :  { %v4925_v27 = vadd.f32 %v4924_v32, %v4854_v42  ;;  %v5004_v9 = vmul.f32 %v4854_v42, %v1539_v46  ;;  %vm2256_vm15 = vc.u32 %v2248_v21, %v2252_v34  ;;  %v2258_v55 = vadd.s32 %v2252_v34, %v2248_v21  ;;  %vm6438_vm4 = vmand %vm4352_vm13, %vm4424_vm14 }
  0xd4   :  { %v2237_v32 = vshrl.u32 %v2236_v13, 4  ;;  %v2255_v6 = vshrl.u32 %v2250_v36, 16  ;;  %v2257_v40 = vsel %vm2256_vm15, 1, %v8629_v1  ;;  %v2277_v41 = vmul.u32 14564, %v2274_v19 }
  0xd5   :  { %v5075_v35 = vadd.f32 %v5074_v62, %v5004_v9  ;;  %v990_v3 = vpop.f32.mrf.mxu1  ;;  %v2259_v59 = vadd.s32 %v2257_v40, %v2251_v39  ;;  %vm2260_vm0 = vc.u32 %v2258_v55, %v2254_v47  ;;  %v2275_v62 = vshrl.u32 %v6421_v26, 16 }
  0xd6   :  { %v1373_v44 = vpop.f32.mrf.mxu2  ;;  %v2238_v7 = vmul.u32 18, %v2237_v32  ;;  %v2261_v15 = vsel %vm2260_vm0, 1, %v8629_v1  ;;  %v2278_v42 = vmul.u32 58254, %v2274_v19  ;;  %v6448_v52 = vsel %vm276_vm3, %v6404_v53, %v6408_v5 }
  0xd7   :  { %v1540_v61 = vadd.f32 %v1373_v44, %v988_v23  ;;  %v6426_v60 = vpop.f32.mrf.mxu3  ;;  %v2263_v54 = vadd.s32 %v2261_v15, %v2259_v59  ;;  %v2279_v21 = vmul.u32 14564, %v2275_v62  ;;  %v5432_v36 = vsel %vm6438_vm4, 1.0, %v8631_v37 }
  0xd8   :  { %5357 = vmatmul.msk.bf16.gmra.mxu1 %vm574_vm1, %v6228_v25  ;;  %v2282_v32 = vshrl.u32 %v2278_v42, 16  ;;  %v6482_v25 = vadd.s32 120, %v5918_v38 }
  0xd9   :  { %v5559_v24 = vpack.c.bf16 %v1540_v61, %v1539_v46  ;;  %v4855_v4 = vmul.f32 %v5431_v2, %v1540_v61  ;;  %v721_v10 = vpop.f32.mrf.mxu0  ;;  %v2239_v2 = vsub.s32 %v6347_v58, %v2238_v7  ;;  %v2264_v20 = vadd.s32 %v2263_v54, %v2253_v16  ;;  %v6453_v58 = vld [vmem:[%s8621_s0 + $0x80] sm:$0xff] }
  0xda   :  { %v991_v0 = vadd.f32 %v990_v3, %v721_v10  ;;  %v2283_v39 = vshll.u32 %v2279_v21, 16  ;;  %v2284_v59 = vshrl.u32 %v2279_v21, 16  ;;  %v405_v54 = vshll.u32 %v6453_v58, 16 }
  0xdb   :  { %5722 = vst [vmem:[%s8622_s2 + $0x20] sm:$0xff] %v5559_v24   ;;  %v4926_v49 = vadd.f32 %v4925_v27, %v4855_v4  ;;  %v5005_v46 = vmul.f32 %v4855_v4, %v1540_v61  ;;  %5399 = vmatmul.msk.bf16.gmra.mxu2 %vm574_vm1, %v6330_v28  ;;  %v2280_v27 = vmul.u32 58254, %v2275_v62  ;;  %v2281_v28 = vshll.u32 %v2278_v42, 16 }
  0xdc   :  { %5317 = vmatmul.msk.bf16.gmra.mxu0 %vm574_vm1, %v6356_v11  ;;  %vm3993_vm5 = vcmp.ne.s32.totalorder %v2239_v2, 0  ;;  %vm4065_vm6 = vcmp.lt.s32.totalorder %v2239_v2, 0  ;;  %v4209_v63 = vadd.s32 18, %v2239_v2  ;;  %v5762_v11 = vld [vmem:[%s8621_s0 + $0xf8] sm:$0xff]  ;;  %v2265_v12 = vadd.s32 %v2264_v20, %v2255_v6 }
  0xdd   :  { %v5076_v9 = vadd.f32 %v5075_v35, %v5005_v46  ;;  %5375 = vmatmul.msk.bf16.gmra.mxu3 %vm574_vm1, %v5762_v11  ;;  %v992_v23 = vpop.f32.mrf.mxu1  ;;  %vm4137_vm7 = vmand %vm4065_vm6, %vm3993_vm5  ;;  %vm2285_vm8 = vc.u32 %v2277_v41, %v2281_v28  ;;  %v2287_v16 = vadd.s32 %v2281_v28, %v2277_v41  ;;  %v1184_v6 = vrot.slane %v6453_v58, 1 }
  0xde   :  { %v1376_v53 = vpop.f32.mrf.mxu2  ;;  %v4281_v35 = vsel %vm4137_vm7, %v4209_v63, %v2239_v2  ;;  %v2286_v13 = vsel %vm2285_vm8, 1, %v8629_v1  ;;  %v2266_v44 = vshrl.u32 %v2265_v12, 4  ;;  %v401_v62 = vshrl.u32 %v6362_v17, 16 }
  0xdf   :  { %v1541_v34 = vadd.f32 %v1376_v53, %v991_v0  ;;  %vm4353_vm9 = vcmp.ge.s32.totalorder %v4281_v35, 1  ;;  %vm4425_vm10 = vcmp.le.s32.totalorder %v4281_v35, 16  ;;  %v2288_v3 = vadd.s32 %v2286_v13, %v2280_v27  ;;  %v6463_v61 = vpop.f32.mrf.mxu3 }
  0xe0   :  { %vm4497_vm11 = vmand %vm4353_vm9, %vm4425_vm10  ;;  %vm2289_vm12 = vc.u32 %v2287_v16, %v2283_v39  ;;  %v2267_v40 = vmul.u32 18, %v2266_v44  ;;  %v6472_v41 = vadd.s32 112, %v5918_v38  ;;  %v6485_v20 = vor.u32 %v401_v62, %v6408_v5 }
  0xe1   :  { %v4856_v47 = vmul.f32 %v5432_v36, %v1541_v34  ;;  %v723_v55 = vpop.f32.mrf.mxu0  ;;  %v2290_v19 = vsel %vm2289_vm12, 1, %v8629_v1  ;;  %v5433_v15 = vsel %vm4497_vm11, 1.0, %v8631_v37  ;;  %v6489_v11 = vrot.slane %v405_v54, 1 }
  0xe2   :  { %v993_v10 = vadd.f32 %v992_v23, %v723_v55  ;;  %v2292_v7 = vadd.s32 %v2290_v19, %v2288_v3  ;;  %v2268_v0 = vsub.s32 %v6369_v56, %v2267_v40  ;;  %v2304_v63 = vshrl.u32 %v6472_v41, 16 }
  0xe3   :  { %v4927_v24 = vadd.f32 %v4926_v49, %v4856_v47  ;;  %v5006_v4 = vmul.f32 %v4856_v47, %v1541_v34  ;;  %v6479_v49 = vsel %vm1152_vm2, %v1182_v33, %v1184_v6  ;;  %v2332_v53 = vand.u32 65535, %v6482_v25 }
  0xe4   :  { %v2293_v46 = vadd.s32 %v2292_v7, %v2282_v32  ;;  %vm3994_vm13 = vcmp.ne.s32.totalorder %v2268_v0, 0  ;;  %vm4066_vm14 = vcmp.lt.s32.totalorder %v2268_v0, 0  ;;  %v4210_v56 = vadd.s32 18, %v2268_v0 }
  0xe5   :  { %v5077_v42 = vadd.f32 %v5076_v9, %v5006_v4  ;;  %v995_v21 = vpop.f32.mrf.mxu1  ;;  %vm4138_vm15 = vmand %vm4066_vm14, %vm3994_vm13  ;;  %v2303_v9 = vand.u32 65535, %v6472_v41  ;;  %v6493_v36 = vadd.s32 128, %v5918_v38  ;;  %v2333_v44 = vshrl.u32 %v6482_v25, 16 }
  0xe6   :  { %v1378_v2 = vpop.f32.mrf.mxu2  ;;  %v2294_v28 = vadd.s32 %v2293_v46, %v2284_v59  ;;  %v4282_v33 = vsel %vm4138_vm15, %v4210_v56, %v2268_v0  ;;  %v2308_v55 = vmul.u32 14564, %v2304_v63  ;;  %v2309_v40 = vmul.u32 58254, %v2304_v63 }
  0xe7   :  { %v1542_v27 = vadd.f32 %v1378_v2, %v993_v10  ;;  %v6495_v5 = vpop.f32.mrf.mxu3  ;;  %vm4354_vm0 = vcmp.ge.s32.totalorder %v4282_v33, 1  ;;  %vm4426_vm4 = vcmp.le.s32.totalorder %v4282_v33, 16  ;;  %v2306_v13 = vmul.u32 14564, %v2303_v9  ;;  %v6521_v33 = vld [vmem:[%s8621_s0 + $0x88] sm:$0xff] }
  0xe8   :  { %8677 = vst [vmem:[#allocation2_spill] sm:$0xff] %v6495_v5  ;;  %5358 = vmatmul.msk.bf16.gmra.mxu1 %vm574_vm1, %v6299_v57  ;;  %vm4498_vm5 = vmand %vm4354_vm0, %vm4426_vm4  ;;  %v2295_v35 = vshrl.u32 %v2294_v28, 4  ;;  %v2307_v16 = vmul.u32 58254, %v2303_v9  ;;  %v2312_v4 = vshll.u32 %v2308_v55, 16  ;;  %v2313_v10 = vshrl.u32 %v2308_v55, 16 }
  0xe9   :  { %v5564_v23 = vpack.c.bf16 %v1542_v27, %v1541_v34  ;;  %v4857_v12 = vmul.f32 %v5433_v15, %v1542_v27  ;;  %v726_v39 = vpop.f32.mrf.mxu0  ;;  %v5434_v57 = vsel %vm4498_vm5, 1.0, %v8631_v37  ;;  %v2336_v0 = vmul.u32 58254, %v2332_v53 }
  0xea   :  { %v996_v47 = vadd.f32 %v995_v21, %v726_v39  ;;  %v2296_v32 = vmul.u32 18, %v2295_v35  ;;  %v2310_v59 = vshll.u32 %v2307_v16, 16  ;;  %v2311_v62 = vshrl.u32 %v2307_v16, 16 }
  0xeb   :  { %5723 = vst [vmem:[%s8622_s2 + $0x28] sm:$0xff] %v5564_v23   ;;  %v4928_v34 = vadd.f32 %v4927_v24, %v4857_v12  ;;  %v5007_v3 = vmul.f32 %v4857_v12, %v1542_v27  ;;  %5400 = vmatmul.msk.bf16.gmra.mxu2 %vm574_vm1, %v6418_v45  ;;  %v5763_v24 = vld [vmem:[%s8621_s0 + $0x100] sm:$0xff]  ;;  %v6514_v2 = vmul.u32 14564, %v2333_v44  ;;  %v2339_v63 = vshll.u32 %v2336_v0, 16 }
  0xec   :  { %5318 = vmatmul.msk.bf16.gmra.mxu0 %vm574_vm1, %v6448_v52  ;;  %v2297_v15 = vsub.s32 %v6421_v26, %v2296_v32  ;;  %vm2314_vm6 = vc.u32 %v2306_v13, %v2310_v59  ;;  %v2316_v52 = vadd.s32 %v2310_v59, %v2306_v13  ;;  %v2338_v26 = vmul.u32 58254, %v2333_v44 }
  0xed   :  { %v5078_v19 = vadd.f32 %v5077_v42, %v5007_v3  ;;  %5376 = vmatmul.msk.bf16.gmra.mxu3 %vm574_vm1, %v5763_v24  ;;  %v997_v7 = vpop.f32.mrf.mxu1  ;;  %v2315_v46 = vsel %vm2314_vm6, 1, %v8629_v1  ;;  %v2335_v42 = vmul.u32 14564, %v2332_v53  ;;  %v2340_v12 = vshrl.u32 %v2336_v0, 16 }
  0xee   :  { %v1381_v45 = vpop.f32.mrf.mxu2  ;;  %vm3995_vm7 = vcmp.ne.s32.totalorder %v2297_v15, 0  ;;  %vm4067_vm8 = vcmp.lt.s32.totalorder %v2297_v15, 0  ;;  %v4211_v21 = vadd.s32 18, %v2297_v15  ;;  %v2317_v56 = vadd.s32 %v2315_v46, %v2309_v40 }
  0xef   :  { %v1543_v54 = vadd.f32 %v1381_v45, %v996_v47  ;;  %v6516_v9 = vpop.f32.mrf.mxu3  ;;  %vm4139_vm9 = vmand %vm4067_vm8, %vm3995_vm7  ;;  %vm2318_vm10 = vc.u32 %v2316_v52, %v2312_v4  ;;  %v2341_v39 = vshll.u32 %v6514_v2, 16  ;;  %vm2343_vm14 = vc.u32 %v2335_v42, %v2339_v63 }
  0xf0   :  { %8678 = vst [vmem:[#allocation3_spill] sm:$0xff] %v6516_v9  ;;  %v4283_v53 = vsel %vm4139_vm9, %v4211_v21, %v2297_v15  ;;  %v2319_v23 = vsel %vm2318_vm10, 1, %v8629_v1  ;;  %v2345_v44 = vadd.s32 %v2339_v63, %v2335_v42  ;;  %v1186_v32 = vrot.slane %v6521_v33, 1 }
  0xf1   :  { %v4858_v27 = vmul.f32 %v5434_v57, %v1543_v54  ;;  %v728_v28 = vpop.f32.mrf.mxu0  ;;  %vm4355_vm11 = vcmp.ge.s32.totalorder %v4283_v53, 1  ;;  %vm4427_vm12 = vcmp.le.s32.totalorder %v4283_v53, 16  ;;  %v2321_v3 = vadd.s32 %v2319_v23, %v2317_v56 }
  0xf2   :  { %v998_v16 = vadd.f32 %v997_v7, %v728_v28  ;;  %vm4499_vm13 = vmand %vm4355_vm11, %vm4427_vm12  ;;  %v2344_v57 = vsel %vm2343_vm14, 1, %v8629_v1  ;;  %vm2347_vm15 = vc.u32 %v2345_v44, %v2341_v39  ;;  %v408_v7 = vsel %vm276_vm3, %v6485_v20, %v6489_v11 }
  0xf3   :  { %v4929_v35 = vadd.f32 %v4928_v34, %v4858_v27  ;;  %v5008_v13 = vmul.f32 %v4858_v27, %v1543_v54  ;;  %v5435_v55 = vsel %vm4499_vm13, 1.0, %v8631_v37  ;;  %v2322_v4 = vadd.s32 %v2321_v3, %v2311_v62 }
  0xf4   :  { %v2346_v24 = vadd.s32 %v2344_v57, %v2338_v26  ;;  %v409_v34 = vshrl.u32 %v6453_v58, 16  ;;  %v413_v15 = vshll.u32 %v6521_v33, 16  ;;  %v2342_v0 = vshrl.u32 %v6514_v2, 16 }
  0xf5   :  { %v5079_v47 = vadd.f32 %v5078_v19, %v5008_v13  ;;  %v1000_v59 = vpop.f32.mrf.mxu1  ;;  %v2348_v19 = vsel %vm2347_vm15, 1, %v8629_v1  ;;  %v2323_v52 = vadd.s32 %v2322_v4, %v2313_v10  ;;  %v2361_v42 = vand.u32 65535, %v6493_v36 }
  0xf6   :  { %v1383_v40 = vpop.f32.mrf.mxu2  ;;  %v2350_v46 = vadd.s32 %v2348_v19, %v2346_v24  ;;  %v6545_v20 = vsel %vm1152_vm2, %v1184_v6, %v1186_v32  ;;  %v2362_v10 = vshrl.u32 %v6493_v36, 16  ;;  %v6551_v26 = vrot.slane %v413_v15, 1 }
  0xf7   :  { %v1544_v45 = vadd.f32 %v1383_v40, %v998_v16  ;;  %v6536_v27 = vpop.f32.mrf.mxu3  ;;  %v2324_v2 = vshrl.u32 %v2323_v52, 4  ;;  %v2364_v6 = vmul.u32 14564, %v2361_v42  ;;  %v2365_v53 = vmul.u32 58254, %v2361_v42 }
  0xf8   :  { %8679 = vst [vmem:[#allocation4_spill] sm:$0xff] %v6536_v27  ;;  %5359 = vmatmul.msk.bf16.gmra.mxu1 %vm574_vm1, %v6362_v17  ;;  %v2351_v28 = vadd.s32 %v2350_v46, %v2340_v12  ;;  %v2366_v39 = vmul.u32 14564, %v2362_v10  ;;  %v2367_v16 = vmul.u32 58254, %v2362_v10  ;;  %v6564_v44 = vadd.s32 136, %v5918_v38 }
  0xf9   :  { %v5569_v62 = vpack.c.bf16 %v1544_v45, %v1543_v54  ;;  %v4859_v21 = vmul.f32 %v5435_v55, %v1544_v45  ;;  %v731_v56 = vpop.f32.mrf.mxu0  ;;  %v6549_v54 = vor.u32 %v409_v34, %v6489_v11  ;;  %v2325_v12 = vmul.u32 18, %v2324_v2 }
  0xfa   :  { %v1001_v23 = vadd.f32 %v1000_v59, %v731_v56  ;;  %v2352_v11 = vadd.s32 %v2351_v28, %v2342_v0  ;;  %v2368_v3 = vshll.u32 %v2365_v53, 16  ;;  %v2369_v59 = vshrl.u32 %v2365_v53, 16 }
  0xfb   :  { %5724 = vst [vmem:[%s8622_s2 + $0x30] sm:$0xff] %v5569_v62   ;;  %v6556_v17 = vadd.f32 %v4929_v35, %v4859_v21  ;;  %v5009_v63 = vmul.f32 %v4859_v21, %v1544_v45  ;;  %5401 = vmatmul.msk.bf16.gmra.mxu2 %vm574_vm1, %v6479_v49  ;;  %v5764_v35 = vld [vmem:[%s8621_s0 + $0x108] sm:$0xff]  ;;  %v2326_v55 = vsub.s32 %v6472_v41, %v2325_v12  ;;  %v2370_v4 = vshll.u32 %v2366_v39, 16 }
  0xfc   :  { %5319 = vmatmul.msk.bf16.gmra.mxu0 %vm574_vm1, %v408_v7  ;;  %v2353_v40 = vshrl.u32 %v2352_v11, 4  ;;  %vm2372_vm0 = vc.u32 %v2364_v6, %v2368_v3  ;;  %v2374_v24 = vadd.s32 %v2368_v3, %v2364_v6  ;;  %v2390_v34 = vand.u32 65535, %v6564_v44 }
  0xfd   :  { %v6561_v13 = vadd.f32 %v5079_v47, %v5009_v63  ;;  %5377 = vmatmul.msk.bf16.gmra.mxu3 %vm574_vm1, %v5764_v35  ;;  %v1002_v57 = vpop.f32.mrf.mxu1  ;;  %v2371_v47 = vshrl.u32 %v2366_v39, 16  ;;  %vm3996_vm4 = vcmp.ne.s32.totalorder %v2326_v55, 0  ;;  %vm4068_vm5 = vcmp.lt.s32.totalorder %v2326_v55, 0 }
  0xfe   :  { %v1386_v49 = vpop.f32.mrf.mxu2  ;;  %v4212_v45 = vadd.s32 18, %v2326_v55  ;;  %v2354_v7 = vmul.u32 18, %v2353_v40  ;;  %vm4140_vm6 = vmand %vm4068_vm5, %vm3996_vm4  ;;  %v2373_v41 = vsel %vm2372_vm0, 1, %v8629_v1  ;;  %vm2376_vm7 = vc.u32 %v2374_v24, %v2370_v4 }
  0xff   :  { %v1545_v19 = vadd.f32 %v1386_v49, %v1001_v23  ;;  %v6572_v52 = vpop.f32.mrf.mxu3  ;;  %v2391_v0 = vshrl.u32 %v6564_v44, 16  ;;  %v2375_v62 = vadd.s32 %v2373_v41, %v2367_v16  ;;  %v2393_v21 = vmul.u32 14564, %v2390_v34 }
 0x100   :  { %8680 = vst [vmem:[#allocation5_spill] sm:$0xff] %v6572_v52  ;;  %v4284_v46 = vsel %vm4140_vm6, %v4212_v45, %v2326_v55  ;;  %v2355_v42 = vsub.s32 %v6482_v25, %v2354_v7  ;;  %v2377_v56 = vsel %vm2376_vm7, 1, %v8629_v1  ;;  %v6578_v10 = vmul.u32 58254, %v2390_v34 }
 0x101   :  { %v733_v15 = vpop.f32.mrf.mxu0  ;;  %vm4356_vm8 = vcmp.ge.s32.totalorder %v4284_v46, 1  ;;  %vm4428_vm9 = vcmp.le.s32.totalorder %v4284_v46, 16  ;;  %v2379_v28 = vadd.s32 %v2377_v56, %v2375_v62  ;;  %v6581_v53 = vmul.u32 14564, %v2391_v0 }
 0x102   :  { %vm4500_vm10 = vmand %vm4356_vm8, %vm4428_vm9  ;;  %vm3997_vm11 = vcmp.ne.s32.totalorder %v2355_v42, 0  ;;  %vm4069_vm12 = vcmp.lt.s32.totalorder %v2355_v42, 0  ;;  %v4213_v2 = vadd.s32 18, %v2355_v42  ;;  %v1003_v6 = vadd.f32 %v1002_v57, %v733_v15 }
 0x103   :  { %v5436_v63 = vsel %vm4500_vm10, 1.0, %v8631_v37  ;;  %vm4141_vm13 = vmand %vm4069_vm12, %vm3997_vm11  ;;  %v2397_v25 = vshll.u32 %v6578_v10, 16  ;;  %v416_v16 = vsel %vm276_vm3, %v6549_v54, %v6551_v26  ;;  %v2380_v3 = vadd.s32 %v2379_v28, %v2369_v59  ;;  %v6597_v59 = vld [vmem:[%s8621_s0 + $0x90] sm:$0xff] }
 0x104   :  { %v4860_v23 = vmul.f32 %v5436_v63, %v1545_v19  ;;  %v4285_v11 = vsel %vm4141_vm13, %v4213_v2, %v2355_v42  ;;  %v2399_v49 = vshll.u32 %v6581_v53, 16  ;;  %v2396_v4 = vmul.u32 58254, %v2391_v0  ;;  %v5765_v28 = vld [vmem:[%s8621_s0 + $0x110] sm:$0xff] }
 0x105   :  { %v1005_v39 = vpop.f32.mrf.mxu1  ;;  %vm4357_vm14 = vcmp.ge.s32.totalorder %v4285_v11, 1  ;;  %vm4429_vm15 = vcmp.le.s32.totalorder %v4285_v11, 16  ;;  %v2381_v40 = vadd.s32 %v2380_v3, %v2371_v47  ;;  %vm2401_vm4 = vc.u32 %v2393_v21, %v2397_v25 }
 0x106   :  { %v1388_v12 = vpop.f32.mrf.mxu2  ;;  %v4931_v55 = vadd.f32 %v6556_v17, %v4860_v23  ;;  %v5010_v57 = vmul.f32 %v4860_v23, %v1545_v19  ;;  %vm4501_vm0 = vmand %vm4357_vm14, %vm4429_vm15  ;;  %v2403_v54 = vadd.s32 %v2397_v25, %v2393_v21  ;;  %v2402_v41 = vsel %vm2401_vm4, 1, %v8629_v1 }
 0x107   :  { %v1546_v35 = vadd.f32 %v1388_v12, %v1003_v6  ;;  %v5437_v34 = vsel %vm4501_vm0, 1.0, %v8631_v37  ;;  %v6590_v7 = vpop.f32.mrf.mxu3  ;;  %v2382_v15 = vshrl.u32 %v2381_v40, 4  ;;  %v417_v0 = vshrl.u32 %v6521_v33, 16 }
 0x108   :  { %8681 = vst [vmem:[#allocation6_spill] sm:$0xff] %v6590_v7  ;;  %5360 = vmatmul.msk.bf16.gmra.mxu1 %vm574_vm1, %v6453_v58  ;;  %v5081_v17 = vadd.f32 %v6561_v13, %v5010_v57  ;;  %v2400_v58 = vshrl.u32 %v6581_v53, 16  ;;  %vm2405_vm5 = vc.u32 %v2403_v54, %v2399_v49  ;;  %v2404_v62 = vadd.s32 %v2402_v41, %v2396_v4 }
 0x109   :  { %v5574_v24 = vpack.c.bf16 %v1546_v35, %v1545_v19  ;;  %v736_v45 = vpop.f32.mrf.mxu0  ;;  %v4861_v47 = vmul.f32 %v5437_v34, %v1546_v35  ;;  %v2398_v19 = vshrl.u32 %v6578_v10, 16  ;;  %v2383_v42 = vmul.u32 18, %v2382_v15 }
 0x10a   :  { %v1006_v21 = vadd.f32 %v1005_v39, %v736_v45  ;;  %v2406_v56 = vsel %vm2405_vm5, 1, %v8629_v1  ;;  %v1188_v10 = vrot.slane %v6597_v59, 1  ;;  %v6619_v23 = vadd.s32 144, %v5918_v38 }
 0x10b   :  { %5725 = vst [vmem:[%s8622_s2 + $0x38] sm:$0xff] %v5574_v24   ;;  %5402 = vmatmul.msk.bf16.gmra.mxu2 %vm574_vm1, %v6545_v20  ;;  %v4932_v46 = vadd.f32 %v4931_v55, %v4861_v47  ;;  %v5011_v13 = vmul.f32 %v4861_v47, %v1546_v35  ;;  %v421_v20 = vshll.u32 %v6597_v59, 16  ;;  %v2384_v6 = vsub.s32 %v6493_v36, %v2383_v42 }
 0x10c   :  { %5320 = vmatmul.msk.bf16.gmra.mxu0 %vm574_vm1, %v416_v16  ;;  %v2408_v25 = vadd.s32 %v2406_v56, %v2404_v62  ;;  %v419_v12 = vor.u32 %v417_v0, %v6551_v26  ;;  %v6625_v39 = vadd.s32 152, %v5918_v38  ;;  %v1189_v26 = vsel %vm1152_vm2, %v1186_v32, %v1188_v10 }
 0x10d   :  { %v5082_v2 = vadd.f32 %v5081_v17, %v5011_v13  ;;  %5378 = vmatmul.msk.bf16.gmra.mxu3 %vm574_vm1, %v5765_v28  ;;  %v1007_v53 = vpop.f32.mrf.mxu1  ;;  %v6622_v11 = vrot.slane %v421_v20, 1  ;;  %vm3998_vm6 = vcmp.ne.s32.totalorder %v2384_v6, 0  ;;  %vm4070_vm7 = vcmp.lt.s32.totalorder %v2384_v6, 0 }
 0x10e   :  { %v1391_v63 = vpop.f32.mrf.mxu2  ;;  %v4214_v16 = vadd.s32 18, %v2384_v6  ;;  %v2409_v3 = vadd.s32 %v2408_v25, %v2398_v19  ;;  %vm4142_vm8 = vmand %vm4070_vm7, %vm3998_vm6  ;;  %v2419_v55 = vand.u32 65535, %v6619_v23  ;;  %v2420_v57 = vshrl.u32 %v6619_v23, 16 }
 0x10f   :  { %v1547_v35 = vadd.f32 %v1391_v63, %v1006_v21  ;;  %v6627_v36 = vpop.f32.mrf.mxu3  ;;  %v2448_v24 = vand.u32 65535, %v6625_v39  ;;  %v2449_v34 = vshrl.u32 %v6625_v39, 16  ;;  %v424_v32 = vsel %vm276_vm3, %v419_v12, %v6622_v11 }
 0x110   :  { %8682 = vst [vmem:[#allocation7_spill] sm:$0xff] %v6627_v36  ;;  %v4286_v40 = vsel %vm4142_vm8, %v4214_v16, %v2384_v6  ;;  %v2410_v4 = vadd.s32 %v2409_v3, %v2400_v58  ;;  %v2422_v45 = vmul.u32 14564, %v2419_v55  ;;  %v2423_v54 = vmul.u32 58254, %v2419_v55 }
 0x111   :  { %v738_v49 = vpop.f32.mrf.mxu0  ;;  %vm4358_vm9 = vcmp.ge.s32.totalorder %v4286_v40, 1  ;;  %vm4430_vm10 = vcmp.le.s32.totalorder %v4286_v40, 16  ;;  %v2424_v15 = vmul.u32 14564, %v2420_v57  ;;  %v2425_v41 = vmul.u32 58254, %v2420_v57 }
 0x112   :  { %vm4502_vm11 = vmand %vm4358_vm9, %vm4430_vm10  ;;  %v1008_v17 = vadd.f32 %v1007_v53, %v738_v49  ;;  %v2411_v47 = vshrl.u32 %v2410_v4, 4  ;;  %v2426_v0 = vshll.u32 %v2423_v54, 16  ;;  %v2451_v58 = vmul.u32 14564, %v2448_v24 }
 0x113   :  { %v5438_v19 = vsel %vm4502_vm11, 1.0, %v8631_v37  ;;  %v2428_v56 = vshll.u32 %v2424_v15, 16  ;;  %v6641_v20 = vmul.u32 58254, %v2448_v24  ;;  %v6643_v6 = vmul.u32 14564, %v2449_v34 }
 0x114   :  { %v4862_v13 = vmul.f32 %v5438_v19, %v1547_v35  ;;  %v2412_v62 = vmul.u32 18, %v2411_v47  ;;  %vm2430_vm12 = vc.u32 %v2422_v45, %v2426_v0  ;;  %v2432_v63 = vadd.s32 %v2426_v0, %v2422_v45  ;;  %v5766_v19 = vld [vmem:[%s8621_s0 + $0x118] sm:$0xff] }
 0x115   :  { %v1010_v21 = vpop.f32.mrf.mxu1  ;;  %v2431_v16 = vsel %vm2430_vm12, 1, %v8629_v1  ;;  %v2427_v57 = vshrl.u32 %v2423_v54, 16 }
 0x116   :  { %v1393_v42 = vpop.f32.mrf.mxu2  ;;  %v4933_v53 = vadd.f32 %v4932_v46, %v4862_v13  ;;  %v5012_v25 = vmul.f32 %v4862_v13, %v1547_v35  ;;  %v2413_v12 = vsub.s32 %v6564_v44, %v2412_v62  ;;  %v2433_v40 = vadd.s32 %v2431_v16, %v2425_v41 }
 0x117   :  { %v1548_v28 = vadd.f32 %v1393_v42, %v1008_v17  ;;  %v6647_v55 = vpop.f32.mrf.mxu3  ;;  %vm2434_vm13 = vc.u32 %v2432_v63, %v2428_v56  ;;  %v2454_v46 = vmul.u32 58254, %v2449_v34  ;;  %v2457_v17 = vshll.u32 %v6643_v6, 16 }
 0x118   :  { %8683 = vst [vmem:[#allocation8_spill] sm:$0xff] %v6647_v55  ;;  %5361 = vmatmul.msk.bf16.gmra.mxu1 %vm574_vm1, %v6521_v33  ;;  %v5083_v4 = vadd.f32 %v5082_v2, %v5012_v25  ;;  %vm3999_vm14 = vcmp.ne.s32.totalorder %v2413_v12, 0  ;;  %vm4071_vm15 = vcmp.lt.s32.totalorder %v2413_v12, 0  ;;  %v4215_v24 = vadd.s32 18, %v2413_v12 }
 0x119   :  { %v5579_v3 = vpack.c.bf16 %v1548_v28, %v1547_v35  ;;  %v741_v49 = vpop.f32.mrf.mxu0  ;;  %vm4143_vm0 = vmand %vm4071_vm15, %vm3999_vm14  ;;  %v2435_v44 = vsel %vm2434_vm13, 1, %v8629_v1  ;;  %v2455_v35 = vshll.u32 %v6641_v20, 16  ;;  %v6658_v33 = vadd.s32 160, %v5918_v38 }
 0x11a   :  { %v4287_v45 = vsel %vm4143_vm0, %v4215_v24, %v2413_v12  ;;  %v2429_v2 = vshrl.u32 %v2424_v15, 16  ;;  %v2437_v54 = vadd.s32 %v2435_v44, %v2433_v40  ;;  %v1011_v34 = vadd.f32 %v1010_v21, %v741_v49 }
 0x11b   :  { %5726 = vst [vmem:[%s8622_s2 + $0x40] sm:$0xff] %v5579_v3   ;;  %5403 = vmatmul.msk.bf16.gmra.mxu2 %vm574_vm1, %v1189_v26  ;;  %vm4359_vm4 = vcmp.ge.s32.totalorder %v4287_v45, 1  ;;  %vm4431_vm5 = vcmp.le.s32.totalorder %v4287_v45, 16  ;;  %vm2459_vm6 = vc.u32 %v2451_v58, %v2455_v35  ;;  %v2461_v47 = vadd.s32 %v2455_v35, %v2451_v58  ;;  %v6665_v26 = vld [vmem:[%s8621_s0 + $0x98] sm:$0xff] }
 0x11c   :  { %5321 = vmatmul.msk.bf16.gmra.mxu0 %vm574_vm1, %v424_v32  ;;  %vm4503_vm7 = vmand %vm4359_vm4, %vm4431_vm5  ;;  %v2438_v15 = vadd.s32 %v2437_v54, %v2427_v57  ;;  %v2460_v0 = vsel %vm2459_vm6, 1, %v8629_v1  ;;  %v425_v58 = vshrl.u32 %v6597_v59, 16  ;;  %v2456_v42 = vshrl.u32 %v6641_v20, 16 }
 0x11d   :  { %5379 = vmatmul.msk.bf16.gmra.mxu3 %vm574_vm1, %v5766_v19  ;;  %v1012_v41 = vpop.f32.mrf.mxu1  ;;  %v5439_v13 = vsel %vm4503_vm7, 1.0, %v8631_v37  ;;  %v2462_v62 = vadd.s32 %v2460_v0, %v2454_v46  ;;  %vm2463_vm8 = vc.u32 %v2461_v47, %v2457_v17  ;;  %v2458_v63 = vshrl.u32 %v6643_v6, 16 }
 0x11e   :  { %v1396_v32 = vpop.f32.mrf.mxu2  ;;  %v4863_v21 = vmul.f32 %v5439_v13, %v1548_v28  ;;  %v2439_v56 = vadd.s32 %v2438_v15, %v2429_v2  ;;  %v2464_v25 = vsel %vm2463_vm8, 1, %v8629_v1  ;;  %v1190_v3 = vrot.slane %v6665_v26, 1 }
 0x11f   :  { %v2466_v16 = vadd.s32 %v2464_v25, %v2462_v62  ;;  %v429_v49 = vshll.u32 %v6665_v26, 16  ;;  %v2477_v57 = vand.u32 65535, %v6658_v33  ;;  %v427_v44 = vor.u32 %v425_v58, %v6622_v11  ;;  %v6685_v35 = vpop.f32.mrf.mxu3 }
 0x120   :  { %v6680_v40 = vadd.f32 %v4933_v53, %v4863_v21  ;;  %v5013_v24 = vmul.f32 %v4863_v21, %v1548_v28  ;;  %v2440_v20 = vshrl.u32 %v2439_v56, 4  ;;  %v6683_v46 = vadd.f32 %v1396_v32, %v1011_v34 }
 0x121   :  { %v743_v12 = vpop.f32.mrf.mxu0  ;;  %v2467_v6 = vadd.s32 %v2466_v16, %v2456_v42  ;;  %v6687_v45 = vrot.slane %v429_v49, 1  ;;  %v2478_v2 = vshrl.u32 %v6658_v33, 16  ;;  %v2480_v47 = vmul.u32 14564, %v2477_v57 }
 0x122   :  { %v6690_v54 = vadd.f32 %v5083_v4, %v5013_v24  ;;  %v2441_v17 = vmul.u32 18, %v2440_v20  ;;  %v6692_v19 = vmul.u32 58254, %v2477_v57  ;;  %v1013_v53 = vadd.f32 %v1012_v41, %v743_v12  ;;  %v6722_v20 = vld [vmem:[%s8621_s0 + $0xd8] sm:$0xff] }
 0x123   :  { %v2468_v28 = vadd.s32 %v2467_v6, %v2458_v63  ;;  %v1191_v11 = vsel %vm1152_vm2, %v1188_v10, %v1190_v3  ;;  %v6699_v34 = vmul.u32 14564, %v2478_v2  ;;  %v432_v4 = vsel %vm276_vm3, %v427_v44, %v6687_v45 }
 0x124   :  { %v2442_v32 = vsub.s32 %v6619_v23, %v2441_v17  ;;  %v2483_v58 = vmul.u32 58254, %v2478_v2  ;;  %v2484_v13 = vshll.u32 %v6692_v19, 16  ;;  %v2485_v62 = vshrl.u32 %v6692_v19, 16  ;;  %v6712_v23 = vld [vmem:[%s8621_s0 + $0xa0] sm:$0xff] }
 0x125   :  { %v1015_v0 = vpop.f32.mrf.mxu1  ;;  %v2469_v42 = vshrl.u32 %v2468_v28, 4  ;;  %v2486_v21 = vshll.u32 %v6699_v34, 16  ;;  %v8625_v44 = vrot.slane %v6722_v20, 1  ;;  %v6735_v2 = vld [vmem:[%s8621_s0 + $0xe0] sm:$0xff] }
 0x126   :  { %v1398_v15 = vpop.f32.mrf.mxu2  ;;  %vm4000_vm9 = vcmp.ne.s32.totalorder %v2442_v32, 0  ;;  %vm4072_vm10 = vcmp.lt.s32.totalorder %v2442_v32, 0  ;;  %v4216_v10 = vadd.s32 18, %v2442_v32  ;;  %vm2488_vm11 = vc.u32 %v2480_v47, %v2484_v13 }
 0x127   :  { %v6705_v41 = vadd.f32 %v1398_v15, %v1013_v53  ;;  %vm4144_vm12 = vmand %vm4072_vm10, %vm4000_vm9  ;;  %v2470_v63 = vmul.u32 18, %v2469_v42  ;;  %v2489_v12 = vsel %vm2488_vm11, 1, %v8629_v1  ;;  %v2490_v16 = vadd.s32 %v2484_v13, %v2480_v47  ;;  %v6743_v28 = vpop.f32.mrf.mxu3 }
 0x128   :  { %5362 = vmatmul.msk.bf16.gmra.mxu1 %vm574_vm1, %v6597_v59  ;;  %v4288_v49 = vsel %vm4144_vm12, %v4216_v10, %v2442_v32  ;;  %v2491_v24 = vadd.s32 %v2489_v12, %v2483_v58  ;;  %v1208_v17 = vrot.slane %v6735_v2, 1  ;;  %v6739_v47 = vadd.s32 168, %v5918_v38 }
 0x129   :  { %v5584_v56 = vpack.c.bf16 %v6705_v41, %v6683_v46  ;;  %v746_v25 = vpop.f32.mrf.mxu0  ;;  %vm4360_vm13 = vcmp.ge.s32.totalorder %v4288_v49, 1  ;;  %vm4432_vm14 = vcmp.le.s32.totalorder %v4288_v49, 16  ;;  %v2471_v59 = vsub.s32 %v6625_v39, %v2470_v63 }
 0x12a   :  { %v1016_v57 = vadd.f32 %v1015_v0, %v746_v25  ;;  %vm2492_vm15 = vc.u32 %v2490_v16, %v2486_v21  ;;  %vm4504_vm0 = vmand %vm4360_vm13, %vm4432_vm14  ;;  %v8627_v39 = vrot.slane %v6712_v23, 1  ;;  %v1209_v0 = vsel %vm1152_vm2, %v8625_v44, %v1208_v17 }
 0x12b   :  { %5727 = vst [vmem:[%s8622_s2 + $0x48] sm:$0xff] %v5584_v56   ;;  %5404 = vmatmul.msk.bf16.gmra.mxu2 %vm574_vm1, %v1191_v11  ;;  %v2493_v6 = vsel %vm2492_vm15, 1, %v8629_v1  ;;  %v5440_v19 = vsel %vm4504_vm0, 1.0, %v8631_v37  ;;  %vm4001_vm4 = vcmp.ne.s32.totalorder %v2471_v59, 0  ;;  %vm4073_vm5 = vcmp.lt.s32.totalorder %v2471_v59, 0 }
 0x12c   :  { %5322 = vmatmul.msk.bf16.gmra.mxu0 %vm574_vm1, %v432_v4  ;;  %v4217_v53 = vadd.s32 18, %v2471_v59  ;;  %v4864_v11 = vmul.f32 %v5440_v19, %v6683_v46  ;;  %vm4145_vm6 = vmand %vm4073_vm5, %vm4001_vm4  ;;  %v2495_v15 = vadd.s32 %v2493_v6, %v2491_v24  ;;  %v2506_v58 = vand.u32 65535, %v6739_v47 }
 0x12d   :  { %v1017_v4 = vpop.f32.mrf.mxu1  ;;  %v2487_v42 = vshrl.u32 %v6699_v34, 16  ;;  %5413 = vmatmul.msk.bf16.vlgmr.msra.gmra.mxu3 %vm574_vm1, %v1209_v0  ;;  %v2507_v21 = vshrl.u32 %v6739_v47, 16 }
 0x12e   :  { %v1401_v32 = vpop.f32.mrf.mxu2  ;;  %v4289_v13 = vsel %vm4145_vm6, %v4217_v53, %v2471_v59  ;;  %v4935_v10 = vadd.f32 %v6680_v40, %v4864_v11  ;;  %v5014_v56 = vmul.f32 %v4864_v11, %v6683_v46  ;;  %v2496_v63 = vadd.s32 %v2495_v15, %v2485_v62 }
 0x12f   :  { %vm4361_vm7 = vcmp.ge.s32.totalorder %v4289_v13, 1  ;;  %vm4433_vm8 = vcmp.le.s32.totalorder %v4289_v13, 16  ;;  %v2509_v12 = vmul.u32 14564, %v2506_v58  ;;  %v2510_v16 = vmul.u32 58254, %v2506_v58 }
 0x130   :  { %vm4505_vm9 = vmand %vm4361_vm7, %vm4433_vm8  ;;  %v2511_v49 = vmul.u32 14564, %v2507_v21  ;;  %v5085_v24 = vadd.f32 %v6690_v54, %v5014_v56  ;;  %v6759_v59 = vadd.f32 %v1401_v32, %v1016_v57  ;;  %v1193_v40 = vsel %vm1152_vm2, %v1190_v3, %v8627_v39 }
 0x131   :  { %v748_v25 = vpop.f32.mrf.mxu0  ;;  %v5441_v34 = vsel %vm4505_vm9, 1.0, %v8631_v37  ;;  %v2497_v6 = vadd.s32 %v2496_v63, %v2487_v42  ;;  %v2512_v62 = vmul.u32 58254, %v2507_v21  ;;  %v2513_v19 = vshll.u32 %v2510_v16, 16 }
 0x132   :  { %v4865_v46 = vmul.f32 %v5441_v34, %v6705_v41  ;;  %v1018_v53 = vadd.f32 %v1017_v4, %v748_v25  ;;  %v2514_v11 = vshrl.u32 %v2510_v16, 16  ;;  %v2515_v15 = vshll.u32 %v2511_v49, 16  ;;  %v6778_v16 = vpop.f32.mrf.mxu3 }
 0x133   :  { %v433_v54 = vshrl.u32 %v6665_v26, 16  ;;  %v2498_v32 = vshrl.u32 %v2497_v6, 4  ;;  %vm2517_vm10 = vc.u32 %v2509_v12, %v2513_v19  ;;  %v2519_v3 = vadd.s32 %v2513_v19, %v2509_v12 }
 0x134   :  { %v6768_v0 = vadd.f32 %v4935_v10, %v4865_v46  ;;  %v5015_v57 = vmul.f32 %v4865_v46, %v6705_v41  ;;  %v2518_v13 = vsel %vm2517_vm10, 1, %v8629_v1  ;;  %v437_v21 = vshll.u32 %v6712_v23, 16 }
 0x135   :  { %v1020_v56 = vpop.f32.mrf.mxu1  ;;  %v435_v42 = vor.u32 %v433_v54, %v6687_v45  ;;  %v2499_v63 = vmul.u32 18, %v2498_v32  ;;  %v2520_v10 = vadd.s32 %v2518_v13, %v2512_v62  ;;  %vm2521_vm11 = vc.u32 %v2519_v3, %v2515_v15  ;;  %v6788_v45 = vld [vmem:[%s8621_s0 + $0xe8] sm:$0xff] }
 0x136   :  { %v1403_v58 = vpop.f32.mrf.mxu2  ;;  %v6774_v4 = vadd.f32 %v5085_v24, %v5015_v57  ;;  %v6780_v41 = vrot.slane %v437_v21, 1  ;;  %v6783_v34 = vadd.s32 176, %v5918_v38  ;;  %v8626_v12 = vrot.slane %v6788_v45, 1 }
 0x137   :  { %v6776_v25 = vadd.f32 %v1403_v58, %v1018_v53  ;;  %v2500_v24 = vsub.s32 %v6658_v33, %v2499_v63  ;;  %v2522_v6 = vsel %vm2521_vm11, 1, %v8629_v1  ;;  %v2516_v19 = vshrl.u32 %v2511_v49, 16 }
 0x138   :  { %5363 = vmatmul.msk.bf16.gmra.mxu1 %vm574_vm1, %v6665_v26  ;;  %v2524_v53 = vadd.s32 %v2522_v6, %v2520_v10  ;;  %v440_v15 = vsel %vm276_vm3, %v435_v42, %v6780_v41  ;;  %v6800_v54 = vadd.s32 184, %v5918_v38  ;;  %v2535_v57 = vand.u32 65535, %v6783_v34 }
 0x139   :  { %v5589_v46 = vpack.c.bf16 %v6776_v25, %v6759_v59  ;;  %v751_v62 = vpop.f32.mrf.mxu0  ;;  %vm4002_vm12 = vcmp.ne.s32.totalorder %v2500_v24, 0  ;;  %vm4074_vm13 = vcmp.lt.s32.totalorder %v2500_v24, 0  ;;  %v4218_v33 = vadd.s32 18, %v2500_v24 }
 0x13a   :  { %vm4146_vm14 = vmand %vm4074_vm13, %vm4002_vm12  ;;  %v2525_v26 = vadd.s32 %v2524_v53, %v2514_v11  ;;  %v1021_v49 = vadd.f32 %v1020_v56, %v751_v62  ;;  %v2536_v32 = vshrl.u32 %v6783_v34, 16  ;;  %v1211_v58 = vsel %vm1152_vm2, %v1208_v17, %v8626_v12 }
 0x13b   :  { %5728 = vst [vmem:[%s8622_s2 + $0x50] sm:$0xff] %v5589_v46   ;;  %5405 = vmatmul.msk.bf16.gmra.mxu2 %vm574_vm1, %v1193_v40  ;;  %v4290_v13 = vsel %vm4146_vm14, %v4218_v33, %v2500_v24  ;;  %v2538_v3 = vmul.u32 14564, %v2535_v57  ;;  %v2539_v42 = vmul.u32 58254, %v2535_v57  ;;  %v2564_v46 = vand.u32 65535, %v6800_v54 }
 0x13c   :  { %5323 = vmatmul.msk.bf16.gmra.mxu0 %vm574_vm1, %v440_v15  ;;  %vm4362_vm15 = vcmp.ge.s32.totalorder %v4290_v13, 1  ;;  %vm4434_vm0 = vcmp.le.s32.totalorder %v4290_v13, 16  ;;  %v2526_v40 = vadd.s32 %v2525_v26, %v2516_v19  ;;  %v2540_v63 = vmul.u32 14564, %v2536_v32  ;;  %v6821_v26 = vpop.f32.mrf.mxu3 }
 0x13d   :  { %v1022_v11 = vpop.f32.mrf.mxu1  ;;  %vm4506_vm4 = vmand %vm4362_vm15, %vm4434_vm0  ;;  %v2541_v56 = vmul.u32 58254, %v2536_v32  ;;  %v2542_v10 = vshll.u32 %v2539_v42, 16  ;;  %5414 = vmatmul.msk.bf16.gmra.mxu3 %vm574_vm1, %v1211_v58  ;;  %v2565_v2 = vshrl.u32 %v6800_v54, 16  ;;  %v2543_v53 = vshrl.u32 %v2539_v42, 16  ;;  %v6829_v42 = vld [vmem:[%s8621_s0 + $0xa8] sm:$0xff] }
 0x13e   :  { %v1406_v21 = vpop.f32.mrf.mxu2  ;;  %v5442_v17 = vsel %vm4506_vm4, 1.0, %v8631_v37  ;;  %v2527_v24 = vshrl.u32 %v2526_v40, 4  ;;  %v2544_v62 = vshll.u32 %v2540_v63, 16  ;;  %v2545_v32 = vshrl.u32 %v2540_v63, 16 }
 0x13f   :  { %v6818_v6 = vadd.f32 %v1406_v21, %v1021_v49  ;;  %v4866_v19 = vmul.f32 %v5442_v17, %v6759_v59  ;;  %vm2546_vm5 = vc.u32 %v2538_v3, %v2542_v10  ;;  %v2548_v15 = vadd.s32 %v2542_v10, %v2538_v3 }
 0x140   :  { %v2528_v57 = vmul.u32 18, %v2527_v24  ;;  %v2547_v58 = vsel %vm2546_vm5, 1, %v8629_v1  ;;  %v2567_v13 = vmul.u32 14564, %v2564_v46  ;;  %v2568_v10 = vmul.u32 58254, %v2564_v46 }
 0x141   :  { %v753_v33 = vpop.f32.mrf.mxu0  ;;  %v4937_v44 = vadd.f32 %v6768_v0, %v4866_v19  ;;  %v5016_v40 = vmul.f32 %v4866_v19, %v6759_v59  ;;  %v2549_v49 = vadd.s32 %v2547_v58, %v2541_v56  ;;  %vm2550_vm6 = vc.u32 %v2548_v15, %v2544_v62 }
 0x142   :  { %v2529_v3 = vsub.s32 %v6739_v47, %v2528_v57  ;;  %v2551_v21 = vsel %vm2550_vm6, 1, %v8629_v1  ;;  %v6833_v63 = vmul.u32 14564, %v2565_v2  ;;  %v1023_v0 = vadd.f32 %v1022_v11, %v753_v33 }
 0x143   :  { %v5087_v17 = vadd.f32 %v6774_v4, %v5016_v40  ;;  %v2553_v24 = vadd.s32 %v2551_v21, %v2549_v49  ;;  %v2570_v12 = vmul.u32 58254, %v2565_v2  ;;  %v2571_v62 = vshll.u32 %v2568_v10, 16 }
 0x144   :  { %vm4003_vm7 = vcmp.ne.s32.totalorder %v2529_v3, 0  ;;  %vm4075_vm8 = vcmp.lt.s32.totalorder %v2529_v3, 0  ;;  %v4219_v59 = vadd.s32 18, %v2529_v3  ;;  %v2573_v47 = vshll.u32 %v6833_v63, 16 }
 0x145   :  { %v1025_v19 = vpop.f32.mrf.mxu1  ;;  %vm4147_vm9 = vmand %vm4075_vm8, %vm4003_vm7  ;;  %v2554_v15 = vadd.s32 %v2553_v24, %v2543_v53  ;;  %v1194_v46 = vrot.slane %v6829_v42, 1  ;;  %v2572_v39 = vshrl.u32 %v2568_v10, 16  ;;  %vm2575_vm10 = vc.u32 %v2567_v13, %v2571_v62  ;;  %v6852_v24 = vpop.f32.mrf.mxu3 }
 0x146   :  { %v1408_v56 = vpop.f32.mrf.mxu2  ;;  %v4291_v57 = vsel %vm4147_vm9, %v4219_v59, %v2529_v3  ;;  %v2577_v4 = vadd.s32 %v2571_v62, %v2567_v13  ;;  %v2574_v53 = vshrl.u32 %v6833_v63, 16  ;;  %v2576_v40 = vsel %vm2575_vm10, 1, %v8629_v1 }
 0x147   :  { %v6836_v58 = vadd.f32 %v1408_v56, %v1023_v0  ;;  %vm4363_vm11 = vcmp.ge.s32.totalorder %v4291_v57, 1  ;;  %vm4435_vm12 = vcmp.le.s32.totalorder %v4291_v57, 16  ;;  %v2555_v11 = vadd.s32 %v2554_v15, %v2545_v32  ;;  %v6868_v15 = vld [vmem:[%s8621_s0 + $0xf0] sm:$0xff] }
 0x148   :  { %5364 = vmatmul.msk.bf16.gmra.mxu1 %vm574_vm1, %v6712_v23  ;;  %vm4507_vm13 = vmand %vm4363_vm11, %vm4435_vm12  ;;  %vm2579_vm14 = vc.u32 %v2577_v4, %v2573_v47  ;;  %v2578_v32 = vadd.s32 %v2576_v40, %v2570_v12  ;;  %v8684_v63 = vrot.slane %v6712_v23, 1  ;;  %v441_v59 = vshrl.u32 %v6712_v23, 16 }
 0x149   :  { %v5594_v2 = vpack.c.bf16 %v6836_v58, %v6818_v6  ;;  %v756_v33 = vpop.f32.mrf.mxu0  ;;  %v5443_v3 = vsel %vm4507_vm13, 1.0, %v8631_v37  ;;  %v2556_v13 = vshrl.u32 %v2555_v11, 4  ;;  %v2580_v21 = vsel %vm2579_vm14, 1, %v8629_v1 }
 0x14a   :  { %v1026_v49 = vadd.f32 %v1025_v19, %v756_v33  ;;  %v4867_v10 = vmul.f32 %v5443_v3, %v6776_v25  ;;  %v1195_v0 = vsel %vm1152_vm2, %v8684_v63, %v1194_v46  ;;  %v445_v56 = vshll.u32 %v6829_v42, 16 }
 0x14b   :  { %5729 = vst [vmem:[%s8622_s2 + $0x58] sm:$0xff] %v5594_v2   ;;  %v2557_v62 = vmul.u32 18, %v2556_v13  ;;  %v2582_v19 = vadd.s32 %v2580_v21, %v2578_v32  ;;  %5406 = vmatmul.msk.bf16.gmra.mxu2 %vm574_vm1, %v1195_v0  ;;  %v6863_v12 = vadd.s32 192, %v5918_v38  ;;  %v8628_v47 = vrot.slane %v6868_v15, 1 }
 0x14c   :  { %v4938_v57 = vadd.f32 %v4937_v44, %v4867_v10  ;;  %v5017_v4 = vmul.f32 %v4867_v10, %v6776_v25  ;;  %v443_v23 = vor.u32 %v441_v59, %v6780_v41  ;;  %v6873_v11 = vrot.slane %v445_v56, 1 }
 0x14d   :  { %v2558_v33 = vsub.s32 %v6783_v34, %v2557_v62  ;;  %v2583_v40 = vadd.s32 %v2582_v19, %v2572_v39  ;;  %v2593_v3 = vand.u32 65535, %v6863_v12  ;;  %v1027_v13 = vpop.f32.mrf.mxu1  ;;  %v2594_v63 = vshrl.u32 %v6863_v12, 16 }
 0x14e   :  { %v1411_v2 = vpop.f32.mrf.mxu2  ;;  %v5088_v32 = vadd.f32 %v5087_v17, %v5017_v4  ;;  %v448_v21 = vsel %vm276_vm3, %v443_v23, %v6873_v11  ;;  %v8685_v44 = vrot.slane %v6788_v45, 1  ;;  %v6892_v45 = vld [vmem:[%s8621_s0 + $0xb0] sm:$0xff] }
 0x14f   :  { %vm4004_vm15 = vcmp.ne.s32.totalorder %v2558_v33, 0  ;;  %vm4076_vm0 = vcmp.lt.s32.totalorder %v2558_v33, 0  ;;  %v4220_v41 = vadd.s32 18, %v2558_v33  ;;  %v2584_v34 = vadd.s32 %v2583_v40, %v2574_v53  ;;  %5324 = vmatmul.msk.bf16.gmra.mxu0 %vm574_vm1, %v448_v21 }
 0x150   :  { %v1213_v25 = vsel %vm1152_vm2, %v8685_v44, %v8628_v47  ;;  %vm4148_vm4 = vmand %vm4076_vm0, %vm4004_vm15  ;;  %v6887_v17 = vadd.f32 %v1411_v2, %v1026_v49  ;;  %v2596_v10 = vmul.u32 14564, %v2593_v3  ;;  %v2597_v0 = vmul.u32 58254, %v2593_v3  ;;  %v6898_v44 = vpop.f32.mrf.mxu3 }
 0x151   :  { %5415 = vmatmul.msk.bf16.gmra.mxu3 %vm574_vm1, %v1213_v25  ;;  %v758_v39 = vpop.f32.mrf.mxu0  ;;  %v2598_v59 = vmul.u32 14564, %v2594_v63  ;;  %v4292_v56 = vsel %vm4148_vm4, %v4220_v41, %v2558_v33  ;;  %v2585_v62 = vshrl.u32 %v2584_v34, 4  ;;  %v2599_v19 = vmul.u32 58254, %v2594_v63 }
 0x152   :  { %v1028_v53 = vadd.f32 %v1027_v13, %v758_v39  ;;  %vm4364_vm5 = vcmp.ge.s32.totalorder %v4292_v56, 1  ;;  %vm4436_vm6 = vcmp.le.s32.totalorder %v4292_v56, 16  ;;  %v2600_v4 = vshll.u32 %v2597_v0, 16 }
 0x153   :  { %v2601_v23 = vshrl.u32 %v2597_v0, 16  ;;  %vm4508_vm7 = vmand %vm4364_vm5, %vm4436_vm6  ;;  %v2586_v40 = vmul.u32 18, %v2585_v62  ;;  %v2602_v49 = vshll.u32 %v2598_v59, 16  ;;  %v2603_v2 = vshrl.u32 %v2598_v59, 16 }
 0x154   :  { %v6895_v3 = vadd.s32 200, %v5918_v38  ;;  %v5444_v21 = vsel %vm4508_vm7, 1.0, %v8631_v37  ;;  %vm2604_vm8 = vc.u32 %v2596_v10, %v2600_v4  ;;  %v2606_v33 = vadd.s32 %v2600_v4, %v2596_v10 }
 0x155   :  { %v8633_v13 = vrot.slane %v6892_v45, 1  ;;  %v4868_v63 = vmul.f32 %v5444_v21, %v6818_v6  ;;  %v2587_v41 = vsub.s32 %v6800_v54, %v2586_v40  ;;  %v2605_v34 = vsel %vm2604_vm8, 1, %v8629_v1  ;;  %v1030_v4 = vpop.f32.mrf.mxu1 }
 0x156   :  { %v1413_v25 = vpop.f32.mrf.mxu2  ;;  %v2607_v0 = vadd.s32 %v2605_v34, %v2599_v19  ;;  %vm2608_vm9 = vc.u32 %v2606_v33, %v2602_v49  ;;  %v2622_v59 = vand.u32 65535, %v6895_v3  ;;  %v2623_v56 = vshrl.u32 %v6895_v3, 16 }
 0x157   :  { %v6904_v39 = vadd.f32 %v1413_v25, %v1028_v53  ;;  %v4939_v62 = vadd.f32 %v4938_v57, %v4868_v63  ;;  %v5018_v10 = vmul.f32 %v4868_v63, %v6818_v6  ;;  %vm4005_vm10 = vcmp.ne.s32.totalorder %v2587_v41, 0 }
 0x158   :  { %vm4077_vm11 = vcmp.lt.s32.totalorder %v2587_v41, 0  ;;  %5365 = vmatmul.msk.bf16.gmra.mxu1 %vm574_vm1, %v6829_v42  ;;  %v4221_v54 = vadd.s32 18, %v2587_v41  ;;  %v2609_v53 = vsel %vm2608_vm9, 1, %v8629_v1  ;;  %v2625_v40 = vmul.u32 14564, %v2622_v59 }
 0x159   :  { %v761_v47 = vpop.f32.mrf.mxu0  ;;  %vm4149_vm12 = vmand %vm4077_vm11, %vm4005_vm10  ;;  %v5599_v19 = vpack.c.bf16 %v6904_v39, %v6887_v17  ;;  %v5089_v49 = vadd.f32 %v5088_v32, %v5018_v10  ;;  %v2611_v21 = vadd.s32 %v2609_v53, %v2607_v0  ;;  %v2626_v57 = vmul.u32 58254, %v2622_v59 }
 0x15a   :  { %v2627_v33 = vmul.u32 14564, %v2623_v56  ;;  %v4293_v6 = vsel %vm4149_vm12, %v4221_v54, %v2587_v41  ;;  %v2628_v25 = vmul.u32 58254, %v2623_v56  ;;  %v1197_v32 = vsel %vm1152_vm2, %v1194_v46, %v8633_v13  ;;  %v6925_v56 = vpop.f32.mrf.mxu3 }
 0x15b   :  { %5730 = vst [vmem:[%s8622_s2 + $0x60] sm:$0xff] %v5599_v19   ;;  %vm4365_vm13 = vcmp.ge.s32.totalorder %v4293_v6, 1  ;;  %vm4437_vm14 = vcmp.le.s32.totalorder %v4293_v6, 16  ;;  %v2612_v63 = vadd.s32 %v2611_v21, %v2601_v23  ;;  %v2629_v34 = vshll.u32 %v2626_v57, 16  ;;  %5407 = vmatmul.msk.bf16.gmra.mxu2 %vm574_vm1, %v1197_v32 }
 0x15c   :  { %vm4509_vm15 = vmand %vm4365_vm13, %vm4437_vm14  ;;  %v2630_v1 = vshrl.u32 %v2626_v57, 16  ;;  %v2631_v37 = vshll.u32 %v2627_v33, 16  ;;  %v8686_v41 = vmov 0.0   ;;  %v8687_v53 = vmov 0  }
 0x15d   :  { %v5445_v59 = vsel %vm4509_vm15, 1.0, %v8686_v41  ;;  %v2613_v10 = vadd.s32 %v2612_v63, %v2603_v2  ;;  %vm2633_vm0 = vc.u32 %v2625_v40, %v2629_v34  ;;  %v2635_v54 = vadd.s32 %v2629_v34, %v2625_v40  ;;  %v1032_v36 = vpop.f32.mrf.mxu1 }
 0x15e   :  { %v1416_v0 = vpop.f32.mrf.mxu2  ;;  %v4869_v23 = vmul.f32 %v5445_v59, %v6836_v58  ;;  %v2634_v19 = vsel %vm2633_vm0, 1, %v8687_v53  ;;  %v449_v21 = vshrl.u32 %v6829_v42, 16  ;;  %v453_v57 = vshll.u32 %v6892_v45, 16 }
 0x15f   :  { %v2614_v6 = vshrl.u32 %v2613_v10, 4  ;;  %v2632_v46 = vshrl.u32 %v2627_v33, 16  ;;  %v2636_v13 = vadd.s32 %v2634_v19, %v2628_v25  ;;  %vm2637_vm4 = vc.u32 %v2635_v54, %v2631_v37 }
 0x160   :  { %v6930_v55 = vadd.f32 %v4939_v62, %v4869_v23  ;;  %v5019_v2 = vmul.f32 %v4869_v23, %v6836_v58  ;;  %v2638_v40 = vsel %vm2637_vm4, 1, %v8687_v53  ;;  %v451_v63 = vor.u32 %v449_v21, %v6873_v11  ;;  %v6945_v58 = vld [vmem:[%s8621_s0 + $0xf8] sm:$0xff] }
 0x161   :  { %v2615_v34 = vmul.u32 18, %v2614_v6  ;;  %v2640_v32 = vadd.s32 %v2638_v40, %v2636_v13  ;;  %v6935_v59 = vrot.slane %v453_v57, 1  ;;  %v6938_v42 = vadd.s32 208, %v5918_v38  ;;  %v763_v10 = vpop.f32.mrf.mxu0 }
 0x162   :  { %v6940_v33 = vadd.f32 %v5089_v49, %v5019_v2  ;;  %v1031_v37 = vadd.f32 %v1030_v4, %v761_v47  ;;  %v8634_v62 = vrot.slane %v6945_v58, 1  ;;  %v8688_v47 = vrot.slane %v6868_v15, 1 }
 0x163   :  { %v2616_v11 = vsub.s32 %v6863_v12, %v2615_v34  ;;  %v2641_v13 = vadd.s32 %v2640_v32, %v2630_v1  ;;  %v456_v25 = vsel %vm276_vm3, %v451_v63, %v6935_v59  ;;  %v2651_v54 = vand.u32 65535, %v6938_v42 }
 0x164   :  { %5325 = vmatmul.msk.bf16.gmra.mxu0 %vm574_vm1, %v456_v25  ;;  %v2652_v49 = vshrl.u32 %v6938_v42, 16  ;;  %v1215_v4 = vsel %vm1152_vm2, %v8688_v47, %v8634_v62  ;;  %v1033_v23 = vadd.f32 %v1032_v36, %v763_v10  ;;  %v6960_v19 = vadd.s32 216, %v5918_v38 }
 0x165   :  { %vm4006_vm5 = vcmp.ne.s32.totalorder %v2616_v11, 0  ;;  %vm4078_vm6 = vcmp.lt.s32.totalorder %v2616_v11, 0  ;;  %v4222_v1 = vadd.s32 18, %v2616_v11  ;;  %v2642_v12 = vadd.s32 %v2641_v13, %v2632_v46  ;;  %5416 = vmatmul.msk.bf16.gmra.mxu3 %vm574_vm1, %v1215_v4  ;;  %v6969_v46 = vpop.f32.mrf.mxu3 }
 0x166   :  { %v1418_v21 = vpop.f32.mrf.mxu2  ;;  %vm4150_vm7 = vmand %vm4078_vm6, %vm4006_vm5  ;;  %v6963_v57 = vadd.f32 %v1416_v0, %v1031_v37  ;;  %v2654_v6 = vmul.u32 14564, %v2651_v54  ;;  %v2655_v2 = vmul.u32 58254, %v2651_v54  ;;  %v2656_v40 = vmul.u32 14564, %v2652_v49 }
 0x167   :  { %v4294_v15 = vsel %vm4150_vm7, %v4222_v1, %v2616_v11  ;;  %v2643_v63 = vshrl.u32 %v2642_v12, 4  ;;  %v2657_v34 = vmul.u32 58254, %v2652_v49  ;;  %v6965_v36 = vadd.f32 %v1418_v21, %v1033_v23  ;;  %v1035_v12 = vpop.f32.mrf.mxu1 }
 0x168   :  { %5366 = vmatmul.msk.bf16.gmra.mxu1 %vm574_vm1, %v6892_v45  ;;  %vm4366_vm8 = vcmp.ge.s32.totalorder %v4294_v15, 1  ;;  %vm4438_vm9 = vcmp.le.s32.totalorder %v4294_v15, 16  ;;  %v2658_v32 = vshll.u32 %v2655_v2, 16  ;;  %v2680_v10 = vand.u32 65535, %v6960_v19 }
 0x169   :  { %vm4510_vm10 = vmand %vm4366_vm8, %vm4438_vm9  ;;  %v2644_v0 = vmul.u32 18, %v2643_v63  ;;  %v2659_v37 = vshrl.u32 %v2655_v2, 16  ;;  %v2660_v13 = vshll.u32 %v2656_v40, 16  ;;  %v5604_v11 = vpack.c.bf16 %v6965_v36, %v6963_v57  ;;  %v766_v21 = vpop.f32.mrf.mxu0 }
 0x16a   :  { %v5446_v25 = vsel %vm4510_vm10, 1.0, %v8686_v41  ;;  %vm2662_vm11 = vc.u32 %v2654_v6, %v2658_v32  ;;  %v2664_v54 = vadd.s32 %v2658_v32, %v2654_v6  ;;  %v2681_v49 = vshrl.u32 %v6960_v19, 16 }
 0x16b   :  { %v4870_v47 = vmul.f32 %v5446_v25, %v6887_v17  ;;  %v2645_v4 = vsub.s32 %v6895_v3, %v2644_v0  ;;  %v2663_v23 = vsel %vm2662_vm11, 1, %v8687_v53  ;;  %5731 = vst [vmem:[%s8622_s2 + $0x68] sm:$0xff] %v5604_v11   ;;  %v2683_v1 = vmul.u32 14564, %v2680_v10 }
 0x16c   :  { %v2665_v2 = vadd.s32 %v2663_v23, %v2657_v34  ;;  %vm2666_vm12 = vc.u32 %v2664_v54, %v2660_v13  ;;  %v2684_v15 = vmul.u32 58254, %v2680_v10  ;;  %v2685_v63 = vmul.u32 14564, %v2681_v49  ;;  %v6989_v10 = vld [vmem:[%s8621_s0 + $0xb8] sm:$0xff] }
 0x16d   :  { %v4941_v6 = vadd.f32 %v6930_v55, %v4870_v47  ;;  %v5020_v32 = vmul.f32 %v4870_v47, %v6887_v17  ;;  %vm4007_vm13 = vcmp.ne.s32.totalorder %v2645_v4, 0  ;;  %vm4079_vm14 = vcmp.lt.s32.totalorder %v2645_v4, 0 }
 0x16e   :  { %vm4151_vm15 = vmand %vm4079_vm14, %vm4007_vm13  ;;  %v4223_v3 = vadd.s32 18, %v2645_v4  ;;  %v2667_v0 = vsel %vm2666_vm12, 1, %v8687_v53  ;;  %v2686_v25 = vmul.u32 58254, %v2681_v49  ;;  %v2687_v62 = vshll.u32 %v2684_v15, 16  ;;  %v1421_v55 = vpop.f32.mrf.mxu2 }
 0x16f   :  { %v5091_v11 = vadd.f32 %v6940_v33, %v5020_v32  ;;  %v2661_v7 = vshrl.u32 %v2656_v40, 16  ;;  %v2669_v52 = vadd.s32 %v2667_v0, %v2665_v2  ;;  %v2689_v34 = vshll.u32 %v2685_v63, 16  ;;  %v6995_v40 = vpop.f32.mrf.mxu3 }
 0x170   :  { %v4295_v17 = vsel %vm4151_vm15, %v4223_v3, %v2645_v4  ;;  %vm2691_vm0 = vc.u32 %v2683_v1, %v2687_v62  ;;  %v2693_v13 = vadd.s32 %v2687_v62, %v2683_v1  ;;  %v6992_v54 = vadd.s32 224, %v5918_v38 }
 0x171   :  { %vm4367_vm4 = vcmp.ge.s32.totalorder %v4295_v17, 1  ;;  %vm4439_vm5 = vcmp.le.s32.totalorder %v4295_v17, 16  ;;  %v2670_v49 = vadd.s32 %v2669_v52, %v2659_v37  ;;  %v2692_v33 = vsel %vm2691_vm0, 1, %v8687_v53 }
 0x172   :  { %vm4511_vm6 = vmand %vm4367_vm4, %vm4439_vm5  ;;  %v2688_v47 = vshrl.u32 %v2684_v15, 16  ;;  %v2690_v23 = vshrl.u32 %v2685_v63, 16  ;;  %v2694_v2 = vadd.s32 %v2692_v33, %v2686_v25  ;;  %vm2695_vm7 = vc.u32 %v2693_v13, %v2689_v34  ;;  %v1037_v25 = vpop.f32.mrf.mxu1  ;;  %v768_v34 = vpop.f32.mrf.mxu0 }
 0x173   :  { %v5447_v32 = vsel %vm4511_vm6, 1.0, %v8686_v41  ;;  %v2671_v4 = vadd.s32 %v2670_v49, %v2661_v7  ;;  %v2696_v62 = vsel %vm2695_vm7, 1, %v8687_v53  ;;  %v8636_v1 = vrot.slane %v6989_v10, 1 }
 0x174   :  { %v4871_v3 = vmul.f32 %v5447_v32, %v6904_v39  ;;  %v2698_v0 = vadd.s32 %v2696_v62, %v2694_v2  ;;  %v457_v52 = vshrl.u32 %v6892_v45, 16  ;;  %v461_v37 = vshll.u32 %v6989_v10, 16 }
 0x175   :  { %v2672_v17 = vshrl.u32 %v2671_v4, 4  ;;  %v1036_v27 = vadd.f32 %v1035_v12, %v766_v21  ;;  %v8689_v15 = vrot.slane %v6892_v45, 1  ;;  %v2709_v7 = vand.u32 65535, %v6992_v54 }
 0x176   :  { %v7009_v13 = vadd.f32 %v4941_v6, %v4871_v3  ;;  %v5021_v49 = vmul.f32 %v4871_v3, %v6904_v39  ;;  %v2699_v33 = vadd.s32 %v2698_v0, %v2688_v47  ;;  %v459_v2 = vor.u32 %v457_v52, %v6935_v59  ;;  %v7024_v39 = vld [vmem:[%s8621_s0 + $0x100] sm:$0xff]  ;;  %v1423_v52 = vpop.f32.mrf.mxu2 }
 0x177   :  { %v1199_v63 = vsel %vm1152_vm2, %v8689_v15, %v8636_v1  ;;  %v2673_v12 = vmul.u32 18, %v2672_v17  ;;  %v7014_v21 = vrot.slane %v461_v37, 1  ;;  %v2710_v45 = vshrl.u32 %v6992_v54, 16 }
 0x178   :  { %5408 = vmatmul.msk.bf16.gmra.mxu2 %vm574_vm1, %v1199_v63  ;;  %v2712_v32 = vmul.u32 14564, %v2709_v7  ;;  %5367 = vmatmul.msk.bf16.gmra.mxu1 %vm574_vm1, %v6989_v10  ;;  %v7019_v4 = vadd.f32 %v5091_v11, %v5021_v49  ;;  %v2700_v6 = vadd.s32 %v2699_v33, %v2690_v23  ;;  %v2713_v62 = vmul.u32 58254, %v2709_v7  ;;  %v7040_v49 = vpop.f32.mrf.mxu3 }
 0x179   :  { %v8635_v59 = vrot.slane %v7024_v39, 1  ;;  %v2674_v47 = vsub.s32 %v6938_v42, %v2673_v12  ;;  %v464_v3 = vsel %vm276_vm3, %v459_v2, %v7014_v21  ;;  %v7030_v0 = vmul.u32 14564, %v2710_v45 }
 0x17a   :  { %v2701_v37 = vshrl.u32 %v2700_v6, 4  ;;  %5326 = vmatmul.msk.bf16.gmra.mxu0 %vm574_vm1, %v464_v3  ;;  %v2715_v11 = vmul.u32 58254, %v2710_v45  ;;  %v2716_v23 = vshll.u32 %v2713_v62, 16  ;;  %v8690_v17 = vrot.slane %v6945_v58, 1 }
 0x17b   :  { %vm4008_vm8 = vcmp.ne.s32.totalorder %v2674_v47, 0  ;;  %vm4080_vm9 = vcmp.lt.s32.totalorder %v2674_v47, 0  ;;  %v4224_v42 = vadd.s32 18, %v2674_v47  ;;  %v2718_v63 = vshll.u32 %v7030_v0, 16 }
 0x17c   :  { %v1217_v15 = vsel %vm1152_vm2, %v8690_v17, %v8635_v59  ;;  %vm4152_vm10 = vmand %vm4080_vm9, %vm4008_vm8  ;;  %v2702_v7 = vmul.u32 18, %v2701_v37  ;;  %v7042_v33 = vadd.f32 %v1421_v55, %v1036_v27  ;;  %vm2720_vm11 = vc.u32 %v2712_v32, %v2716_v23  ;;  %v7049_v37 = vld [vmem:[%s8621_s0 + $0xc0] sm:$0xff] }
 0x17d   :  { %5417 = vmatmul.msk.bf16.gmra.mxu3 %vm574_vm1, %v1217_v15  ;;  %v2722_v2 = vadd.s32 %v2716_v23, %v2712_v32  ;;  %v4296_v12 = vsel %vm4152_vm10, %v4224_v42, %v2674_v47  ;;  %v2717_v45 = vshrl.u32 %v2713_v62, 16  ;;  %v2721_v58 = vsel %vm2720_vm11, 1, %v8687_v53 }
 0x17e   :  { %v1038_v6 = vadd.f32 %v1037_v25, %v768_v34  ;;  %vm4368_vm12 = vcmp.ge.s32.totalorder %v4296_v12, 1  ;;  %vm4440_vm13 = vcmp.le.s32.totalorder %v4296_v12, 16  ;;  %v2703_v3 = vsub.s32 %v6960_v19, %v2702_v7  ;;  %v1040_v25 = vpop.f32.mrf.mxu1  ;;  %v771_v34 = vpop.f32.mrf.mxu0 }
 0x17f   :  { %v2723_v17 = vadd.s32 %v2721_v58, %v2715_v11  ;;  %vm4512_vm14 = vmand %vm4368_vm12, %vm4440_vm13  ;;  %v2719_v27 = vshrl.u32 %v7030_v0, 16  ;;  %vm2724_vm15 = vc.u32 %v2722_v2, %v2718_v63  ;;  %v7055_v32 = vadd.s32 232, %v5918_v38  ;;  %v1426_v12 = vpop.f32.mrf.mxu2 }
 0x180   :  { %v7052_v55 = vadd.f32 %v1423_v52, %v1038_v6  ;;  %v5448_v62 = vsel %vm4512_vm14, 1.0, %v8686_v41  ;;  %vm4009_vm0 = vcmp.ne.s32.totalorder %v2703_v3, 0  ;;  %vm4081_vm4 = vcmp.lt.s32.totalorder %v2703_v3, 0 }
 0x181   :  { %v4225_v19 = vadd.s32 18, %v2703_v3  ;;  %v4872_v47 = vmul.f32 %v5448_v62, %v6963_v57  ;;  %vm4153_vm5 = vmand %vm4081_vm4, %vm4009_vm0  ;;  %v2725_v11 = vsel %vm2724_vm15, 1, %v8687_v53  ;;  %v2738_v52 = vand.u32 65535, %v7055_v32 }
 0x182   :  { %v5609_v0 = vpack.c.bf16 %v7052_v55, %v7042_v33  ;;  %v2727_v15 = vadd.s32 %v2725_v11, %v2723_v17  ;;  %v2739_v42 = vshrl.u32 %v7055_v32, 16  ;;  %v8637_v63 = vrot.slane %v7049_v37, 1 }
 0x183   :  { %v4297_v23 = vsel %vm4153_vm5, %v4225_v19, %v2703_v3  ;;  %v4943_v7 = vadd.f32 %v7009_v13, %v4872_v47  ;;  %v5022_v2 = vmul.f32 %v4872_v47, %v6963_v57  ;;  %v2741_v6 = vmul.u32 14564, %v2738_v52  ;;  %v7073_v47 = vpop.f32.mrf.mxu3 }
 0x184   :  { %vm4369_vm6 = vcmp.ge.s32.totalorder %v4297_v23, 1  ;;  %vm4441_vm7 = vcmp.le.s32.totalorder %v4297_v23, 16  ;;  %5732 = vst [vmem:[%s8622_s2 + $0x70] sm:$0xff] %v5609_v0   ;;  %v2728_v58 = vadd.s32 %v2727_v15, %v2717_v45  ;;  %v2742_v3 = vmul.u32 58254, %v2738_v52 }
 0x185   :  { %vm4513_vm8 = vmand %vm4369_vm6, %vm4441_vm7  ;;  %v2743_v17 = vmul.u32 14564, %v2739_v42  ;;  %v5093_v62 = vadd.f32 %v7019_v4, %v5022_v2  ;;  %v2744_v11 = vmul.u32 58254, %v2739_v42  ;;  %v1041_v59 = vadd.f32 %v1040_v25, %v771_v34 }
 0x186   :  { %v5449_v19 = vsel %vm4513_vm8, 1.0, %v8686_v41  ;;  %v2729_v57 = vadd.s32 %v2728_v58, %v2719_v27  ;;  %v2745_v23 = vshll.u32 %v2742_v3, 16  ;;  %v2746_v1 = vshrl.u32 %v2742_v3, 16  ;;  %v1042_v3 = vpop.f32.mrf.mxu1 }
 0x187   :  { %v4873_v13 = vmul.f32 %v5449_v19, %v6965_v36  ;;  %v2747_v0 = vshll.u32 %v2743_v17, 16  ;;  %v8691_v45 = vrot.slane %v6989_v10, 1  ;;  %v465_v4 = vshrl.u32 %v6989_v10, 16  ;;  %v773_v10 = vpop.f32.mrf.mxu0 }
 0x188   :  { %5368 = vmatmul.msk.bf16.gmra.mxu1 %vm574_vm1, %v7049_v37  ;;  %v2730_v42 = vshrl.u32 %v2729_v57, 4  ;;  %vm2749_vm9 = vc.u32 %v2741_v6, %v2745_v23  ;;  %v2751_v34 = vadd.s32 %v2745_v23, %v2741_v6  ;;  %v469_v58 = vshll.u32 %v7049_v37, 16  ;;  %v7100_v6 = vld [vmem:[%s8621_s0 + $0x108] sm:$0xff] }
 0x189   :  { %v1201_v52 = vsel %vm1152_vm2, %v8691_v45, %v8637_v63  ;;  %v7083_v15 = vadd.f32 %v4943_v7, %v4873_v13  ;;  %v5023_v27 = vmul.f32 %v4873_v13, %v6965_v36  ;;  %v2750_v25 = vsel %vm2749_vm9, 1, %v8687_v53 }
 0x18a   :  { %5409 = vmatmul.msk.bf16.gmra.mxu2 %vm574_vm1, %v1201_v52  ;;  %v467_v2 = vor.u32 %v465_v4, %v7014_v21  ;;  %v2731_v45 = vmul.u32 18, %v2730_v42  ;;  %v2748_v7 = vshrl.u32 %v2743_v17, 16  ;;  %v2752_v63 = vadd.s32 %v2750_v25, %v2744_v11 }
 0x18b   :  { %v7090_v19 = vadd.f32 %v5093_v62, %v5023_v27  ;;  %vm2753_vm10 = vc.u32 %v2751_v34, %v2747_v0  ;;  %v7092_v36 = vrot.slane %v469_v58, 1  ;;  %v7095_v13 = vadd.s32 240, %v5918_v38  ;;  %v1428_v27 = vpop.f32.mrf.mxu2  ;;  %v7118_v58 = vpop.f32.mrf.mxu3 }
 0x18c   :  { %v8638_v21 = vrot.slane %v7100_v6, 1  ;;  %v2732_v57 = vsub.s32 %v6992_v54, %v2731_v45  ;;  %v2754_v62 = vsel %vm2753_vm10, 1, %v8687_v53  ;;  %v7105_v23 = vadd.f32 %v1426_v12, %v1041_v59  ;;  %8693 = vst [vmem:[#allocation9_spill] sm:$0xff] %v7118_v58 }
 0x18d   :  { %v1043_v17 = vadd.f32 %v1042_v3, %v773_v10  ;;  %v2756_v11 = vadd.s32 %v2754_v62, %v2752_v63  ;;  %v472_v0 = vsel %vm276_vm3, %v467_v2, %v7092_v36  ;;  %v2767_v52 = vand.u32 65535, %v7095_v13 }
 0x18e   :  { %v2768_v4 = vshrl.u32 %v7095_v13, 16  ;;  %vm4010_vm11 = vcmp.ne.s32.totalorder %v2732_v57, 0  ;;  %vm4082_vm12 = vcmp.lt.s32.totalorder %v2732_v57, 0  ;;  %v4226_v42 = vadd.s32 18, %v2732_v57  ;;  %5327 = vmatmul.msk.bf16.gmra.mxu0 %vm574_vm1, %v472_v0 }
 0x18f   :  { %v8692_v54 = vrot.slane %v7024_v39, 1  ;;  %vm4154_vm13 = vmand %vm4082_vm12, %vm4010_vm11  ;;  %v2757_v63 = vadd.s32 %v2756_v11, %v2746_v1  ;;  %v2770_v12 = vmul.u32 14564, %v2767_v52  ;;  %v2771_v25 = vmul.u32 58254, %v2767_v52 }
 0x190   :  { %v2772_v34 = vmul.u32 14564, %v2768_v4  ;;  %v4298_v2 = vsel %vm4154_vm13, %v4226_v42, %v2732_v57  ;;  %v2773_v3 = vmul.u32 58254, %v2768_v4  ;;  %v7120_v10 = vadd.f32 %v1428_v27, %v1043_v17  ;;  %v1045_v4 = vpop.f32.mrf.mxu1 }
 0x191   :  { %v1219_v59 = vsel %vm1152_vm2, %v8692_v54, %v8638_v21  ;;  %v7123_v45 = vadd.s32 248, %v5918_v38  ;;  %vm4370_vm14 = vcmp.ge.s32.totalorder %v4298_v2, 1  ;;  %vm4442_vm15 = vcmp.le.s32.totalorder %v4298_v2, 16  ;;  %v776_v54 = vpop.f32.mrf.mxu0 }
 0x192   :  { %5418 = vmatmul.msk.bf16.gmra.mxu3 %vm574_vm1, %v1219_v59  ;;  %v2758_v39 = vadd.s32 %v2757_v63, %v2748_v7  ;;  %v2774_v62 = vshll.u32 %v2771_v25, 16  ;;  %vm4514_vm0 = vmand %vm4370_vm14, %vm4442_vm15  ;;  %v2776_v1 = vshll.u32 %v2772_v34, 16  ;;  %v5614_v11 = vpack.c.bf16 %v7120_v10, %v7105_v23  ;;  %v7138_v59 = vld [vmem:[%s8621_s0 + $0xc8] sm:$0xff] }
 0x193   :  { %v5450_v0 = vsel %vm4514_vm0, 1.0, %v8686_v41  ;;  %v2796_v7 = vand.u32 65535, %v7123_v45  ;;  %v2797_v42 = vshrl.u32 %v7123_v45, 16 }
 0x194   :  { %v2759_v57 = vshrl.u32 %v2758_v39, 4  ;;  %vm2778_vm4 = vc.u32 %v2770_v12, %v2774_v62  ;;  %v2780_v52 = vadd.s32 %v2774_v62, %v2770_v12  ;;  %v4874_v17 = vmul.f32 %v5450_v0, %v7042_v33  ;;  %5733 = vst [vmem:[%s8622_s2 + $0x78] sm:$0xff] %v5614_v11  }
 0x195   :  { %v2779_v27 = vsel %vm2778_vm4, 1, %v8687_v53  ;;  %v2775_v12 = vshrl.u32 %v2771_v25, 16  ;;  %v2777_v0 = vshrl.u32 %v2772_v34, 16  ;;  %v2800_v58 = vmul.u32 58254, %v2796_v7 }
 0x196   :  { %v2760_v63 = vmul.u32 18, %v2759_v57  ;;  %v2781_v2 = vadd.s32 %v2779_v27, %v2773_v3  ;;  %vm2782_vm5 = vc.u32 %v2780_v52, %v2776_v1  ;;  %v4945_v39 = vadd.f32 %v7083_v15, %v4874_v17  ;;  %v7150_v57 = vpop.f32.mrf.mxu2 }
 0x197   :  { %v5024_v62 = vmul.f32 %v4874_v17, %v7042_v33  ;;  %v2783_v11 = vsel %vm2782_vm5, 1, %v8687_v53  ;;  %v7144_v5 = vmul.u32 14564, %v2797_v42  ;;  %v2799_v3 = vmul.u32 14564, %v2796_v7 }
 0x198   :  { %v2761_v21 = vsub.s32 %v7055_v32, %v2760_v63  ;;  %v2785_v9 = vadd.s32 %v2783_v11, %v2781_v2  ;;  %5369 = vmatmul.msk.bf16.gmra.mxu1 %vm574_vm1, %v7138_v59  ;;  %v2802_v1 = vmul.u32 58254, %v2797_v42  ;;  %v1202_v15 = vrot.slane %v7138_v59, 1  ;;  %v7152_v32 = vpop.f32.mrf.mxu3 }
 0x199   :  { %v5095_v25 = vadd.f32 %v7090_v19, %v5024_v62  ;;  %8694 = vst [vmem:[#allocation10_spill] sm:$0xff] %v7152_v32  ;;  %v2803_v52 = vshll.u32 %v2800_v58, 16  ;;  %v2804_v17 = vshrl.u32 %v2800_v58, 16  ;;  %v2805_v27 = vshll.u32 %v7144_v5, 16 }
 0x19a   :  { %vm4011_vm6 = vcmp.ne.s32.totalorder %v2761_v21, 0  ;;  %vm4083_vm7 = vcmp.lt.s32.totalorder %v2761_v21, 0  ;;  %v4227_v33 = vadd.s32 18, %v2761_v21  ;;  %v2786_v34 = vadd.s32 %v2785_v9, %v2775_v12  ;;  %v1047_v12 = vpop.f32.mrf.mxu1 }
 0x19b   :  { %vm4155_vm8 = vmand %vm4083_vm7, %vm4011_vm6  ;;  %v1046_v63 = vadd.f32 %v1045_v4, %v776_v54  ;;  %v8695_v7 = vrot.slane %v7049_v37, 1  ;;  %v473_v62 = vshrl.u32 %v7049_v37, 16  ;;  %vm2807_vm11 = vc.u32 %v2799_v3, %v2803_v52 }
 0x19c   :  { %v4299_v2 = vsel %vm4155_vm8, %v4227_v33, %v2761_v21  ;;  %v2787_v19 = vadd.s32 %v2786_v34, %v2777_v0  ;;  %v2809_v9 = vadd.s32 %v2803_v52, %v2799_v3  ;;  %v2808_v4 = vsel %vm2807_vm11, 1, %v8687_v53  ;;  %v778_v33 = vpop.f32.mrf.mxu0 }
 0x19d   :  { %v1203_v42 = vsel %vm1152_vm2, %v8695_v7, %v1202_v15  ;;  %vm4371_vm9 = vcmp.ge.s32.totalorder %v4299_v2, 1  ;;  %vm4443_vm10 = vcmp.le.s32.totalorder %v4299_v2, 16  ;;  %v475_v21 = vor.u32 %v473_v62, %v7092_v36  ;;  %v7177_v7 = vld [vmem:[%s8621_s0 + $0x110] sm:$0xff] }
 0x19e   :  { %5410 = vmatmul.msk.bf16.gmra.mxu2 %vm574_vm1, %v1203_v42  ;;  %vm4515_vm12 = vmand %vm4371_vm9, %vm4443_vm10  ;;  %v2788_v58 = vshrl.u32 %v2787_v19, 4  ;;  %v477_v54 = vshll.u32 %v7138_v59, 16  ;;  %v2806_v11 = vshrl.u32 %v7144_v5, 16  ;;  %v2810_v37 = vadd.s32 %v2808_v4, %v2802_v1 }
 0x19f   :  { %v5451_v0 = vsel %vm4515_vm12, 1.0, %v8686_v41  ;;  %vm2811_vm13 = vc.u32 %v2809_v9, %v2805_v27  ;;  %v7172_v36 = vadd.s32 256, %v5918_v38  ;;  %v8639_v5 = vrot.slane %v7177_v7, 1 }
 0x1a0   :  { %v4875_v3 = vmul.f32 %v5451_v0, %v7052_v55  ;;  %v2789_v34 = vmul.u32 18, %v2788_v58  ;;  %v2812_v52 = vsel %vm2811_vm13, 1, %v8687_v53  ;;  %v7169_v2 = vrot.slane %v477_v54, 1 }
 0x1a1   :  { %v2814_v19 = vadd.s32 %v2812_v52, %v2810_v37  ;;  %v1048_v1 = vadd.f32 %v1047_v12, %v778_v33  ;;  %v2825_v4 = vand.u32 65535, %v7172_v36  ;;  %v2826_v54 = vshrl.u32 %v7172_v36, 16  ;;  %v1433_v12 = vpop.f32.mrf.mxu2 }
 0x1a2   :  { %v4946_v27 = vadd.f32 %v4945_v39, %v4875_v3  ;;  %v5025_v42 = vmul.f32 %v4875_v3, %v7052_v55  ;;  %v2790_v62 = vsub.s32 %v7095_v13, %v2789_v34  ;;  %v480_v9 = vsel %vm276_vm3, %v475_v21, %v7169_v2  ;;  %v7193_v21 = vpop.f32.mrf.mxu3 }
 0x1a3   :  { %v2815_v58 = vadd.s32 %v2814_v19, %v2804_v17  ;;  %5328 = vmatmul.msk.bf16.gmra.mxu0 %vm574_vm1, %v480_v9  ;;  %v8696_v0 = vrot.slane %v7100_v6, 1  ;;  %8697 = vst [vmem:[#allocation11_spill] sm:$0xff] %v7193_v21  ;;  %v2828_v37 = vmul.u32 14564, %v2825_v4  ;;  %v2829_v33 = vmul.u32 58254, %v2825_v4 }
 0x1a4   :  { %v5096_v55 = vadd.f32 %v5095_v25, %v5025_v42  ;;  %vm4012_vm14 = vcmp.ne.s32.totalorder %v2790_v62, 0  ;;  %vm4084_vm15 = vcmp.lt.s32.totalorder %v2790_v62, 0  ;;  %v4228_v13 = vadd.s32 18, %v2790_v62  ;;  %v7203_v25 = vld [vmem:[%s8621_s0 + $0xd0] sm:$0xff] }
 0x1a5   :  { %v1221_v39 = vsel %vm1152_vm2, %v8696_v0, %v8639_v5  ;;  %vm4156_vm0 = vmand %vm4084_vm15, %vm4012_vm14  ;;  %v2816_v17 = vadd.s32 %v2815_v58, %v2806_v11  ;;  %v2830_v3 = vmul.u32 14564, %v2826_v54  ;;  %v7196_v52 = vadd.f32 %v7150_v57, %v1046_v63 }
 0x1a6   :  { %5419 = vmatmul.msk.bf16.gmra.mxu3 %vm574_vm1, %v1221_v39  ;;  %v4300_v34 = vsel %vm4156_vm0, %v4228_v13, %v2790_v62  ;;  %v2831_v6 = vmul.u32 58254, %v2826_v54  ;;  %v7198_v19 = vadd.f32 %v1433_v12, %v1048_v1  ;;  %v2832_v42 = vshll.u32 %v2829_v33, 16 }
 0x1a7   :  { %vm4372_vm4 = vcmp.ge.s32.totalorder %v4300_v34, 1  ;;  %vm4444_vm5 = vcmp.le.s32.totalorder %v4300_v34, 16  ;;  %v2817_v11 = vshrl.u32 %v2816_v17, 4  ;;  %v2833_v9 = vshrl.u32 %v2829_v33, 16 }
 0x1a8   :  { %vm4516_vm6 = vmand %vm4372_vm4, %vm4444_vm5  ;;  %v2834_v58 = vshll.u32 %v2830_v3, 16  ;;  %v5619_v62 = vpack.c.bf16 %v7198_v19, %v7196_v52  ;;  %5370 = vmatmul.msk.bf16.gmra.mxu1 %vm574_vm1, %v7203_v25  ;;  %vm2836_vm7 = vc.u32 %v2828_v37, %v2832_v42  ;;  %v2838_v1 = vadd.s32 %v2832_v42, %v2828_v37  ;;  %v781_v42 = vpop.f32.mrf.mxu0 }
 0x1a9   :  { %v5452_v57 = vsel %vm4516_vm6, 1.0, %v8686_v41  ;;  %v2818_v63 = vmul.u32 18, %v2817_v11  ;;  %v2835_v54 = vshrl.u32 %v2830_v3, 16  ;;  %v2837_v0 = vsel %vm2836_vm7, 1, %v8687_v53  ;;  %v1050_v11 = vpop.f32.mrf.mxu1 }
 0x1aa   :  { %v4876_v4 = vmul.f32 %v5452_v57, %v7105_v23  ;;  %5734 = vst [vmem:[%s8622_s2 + $0x80] sm:$0xff] %v5619_v62   ;;  %v7216_v39 = vadd.s32 264, %v5918_v38  ;;  %v2839_v13 = vadd.s32 %v2837_v0, %v2831_v6  ;;  %vm2840_vm8 = vc.u32 %v2838_v1, %v2834_v58  ;;  %v1436_v58 = vpop.f32.mrf.mxu2  ;;  %v7224_v1 = vpop.f32.mrf.mxu3 }
 0x1ab   :  { %v2819_v12 = vsub.s32 %v7123_v45, %v2818_v63  ;;  %v8640_v17 = vrot.slane %v7203_v25, 1  ;;  %v2841_v3 = vsel %vm2840_vm8, 1, %v8687_v53  ;;  %8698 = vst [vmem:[#allocation12_spill] sm:$0xff] %v7224_v1 }
 0x1ac   :  { %v4947_v33 = vadd.f32 %v4946_v27, %v4876_v4  ;;  %v5026_v37 = vmul.f32 %v4876_v4, %v7105_v23  ;;  %v2854_v34 = vand.u32 65535, %v7216_v39  ;;  %v2843_v57 = vadd.s32 %v2841_v3, %v2839_v13 }
 0x1ad   :  { %vm4013_vm9 = vcmp.ne.s32.totalorder %v2819_v12, 0  ;;  %vm4085_vm10 = vcmp.lt.s32.totalorder %v2819_v12, 0  ;;  %v4229_v62 = vadd.s32 18, %v2819_v12  ;;  %v2855_v45 = vshrl.u32 %v7216_v39, 16 }
 0x1ae   :  { %v5097_v5 = vadd.f32 %v5096_v55, %v5026_v37  ;;  %vm4157_vm11 = vmand %vm4085_vm10, %vm4013_vm9  ;;  %v2858_v6 = vmul.u32 58254, %v2854_v34  ;;  %v2844_v27 = vadd.s32 %v2843_v57, %v2833_v9  ;;  %v2857_v23 = vmul.u32 14564, %v2854_v34 }
 0x1af   :  { %v4301_v63 = vsel %vm4157_vm11, %v4229_v62, %v2819_v12  ;;  %v1205_v4 = vsel %vm1152_vm2, %v1202_v15, %v8640_v17  ;;  %v2859_v0 = vmul.u32 14564, %v2855_v45  ;;  %v1051_v55 = vadd.f32 %v1050_v11, %v781_v42 }
 0x1b0   :  { %vm4373_vm12 = vcmp.ge.s32.totalorder %v4301_v63, 1  ;;  %vm4445_vm13 = vcmp.le.s32.totalorder %v4301_v63, 16  ;;  %5411 = vmatmul.msk.bf16.gmra.mxu2 %vm574_vm1, %v1205_v4  ;;  %v2845_v13 = vadd.s32 %v2844_v27, %v2835_v54  ;;  %v2860_v37 = vmul.u32 58254, %v2855_v45 }
 0x1b1   :  { %vm4517_vm14 = vmand %vm4373_vm12, %vm4445_vm13  ;;  %v2861_v12 = vshll.u32 %v2858_v6, 16  ;;  %v481_v9 = vshrl.u32 %v7138_v59, 16  ;;  %v2862_v34 = vshrl.u32 %v2858_v6, 16  ;;  %v2863_v62 = vshll.u32 %v2859_v0, 16 }
 0x1b2   :  { %v5453_v3 = vsel %vm4517_vm14, 1.0, %v8686_v41  ;;  %v485_v57 = vshll.u32 %v7203_v25, 16  ;;  %v2846_v17 = vshrl.u32 %v2845_v13, 4  ;;  %v2864_v11 = vshrl.u32 %v2859_v0, 16  ;;  %v1052_v0 = vpop.f32.mrf.mxu1 }
 0x1b3   :  { %v4877_v15 = vmul.f32 %v5453_v3, %v7120_v10  ;;  %vm2865_vm15 = vc.u32 %v2857_v23, %v2861_v12  ;;  %v2867_v63 = vadd.s32 %v2861_v12, %v2857_v23  ;;  %v483_v54 = vor.u32 %v481_v9, %v7169_v2  ;;  %v7249_v23 = vld [vmem:[%s8621_s0 + $0x118] sm:$0xff] }
 0x1b4   :  { %v2866_v42 = vsel %vm2865_vm15, 1, %v8687_v53  ;;  %v7238_v45 = vrot.slane %v485_v57, 1  ;;  %v2847_v4 = vmul.u32 18, %v2846_v17  ;;  %v7244_v13 = vadd.s32 272, %v5918_v38 }
 0x1b5   :  { %v4948_v27 = vadd.f32 %v4947_v33, %v4877_v15  ;;  %v5027_v59 = vmul.f32 %v4877_v15, %v7120_v10  ;;  %v2868_v6 = vadd.s32 %v2866_v42, %v2860_v37  ;;  %vm2869_vm0 = vc.u32 %v2867_v63, %v2863_v62  ;;  %v783_v33 = vpop.f32.mrf.mxu0  ;;  %v7264_v63 = vpop.f32.mrf.mxu3 }
 0x1b6   :  { %v488_v1 = vsel %vm276_vm3, %v483_v54, %v7238_v45  ;;  %v8641_v2 = vrot.slane %v7249_v23, 1  ;;  %v2848_v10 = vsub.s32 %v7172_v36, %v2847_v4  ;;  %v2870_v17 = vsel %vm2869_vm0, 1, %v8687_v53  ;;  %8700 = vst [vmem:[#allocation13_spill] sm:$0xff] %v7264_v63 }
 0x1b7   :  { %v5098_v12 = vadd.f32 %v5097_v5, %v5027_v59  ;;  %5329 = vmatmul.msk.bf16.gmra.mxu0 %vm574_vm1, %v488_v1  ;;  %v7255_v37 = vadd.f32 %v1436_v58, %v1051_v55  ;;  %v2872_v9 = vadd.s32 %v2870_v17, %v2868_v6  ;;  %v2883_v3 = vand.u32 65535, %v7244_v13  ;;  %v1438_v5 = vpop.f32.mrf.mxu2 }
 0x1b8   :  { %v2884_v62 = vshrl.u32 %v7244_v13, 16  ;;  %v8699_v57 = vrot.slane %v7177_v7, 1  ;;  %vm4014_vm4 = vcmp.ne.s32.totalorder %v2848_v10, 0  ;;  %vm4086_vm5 = vcmp.lt.s32.totalorder %v2848_v10, 0 }
 0x1b9   :  { %v4230_v36 = vadd.s32 18, %v2848_v10  ;;  %v1053_v58 = vadd.f32 %v1052_v0, %v783_v33  ;;  %vm4158_vm6 = vmand %vm4086_vm5, %vm4014_vm4  ;;  %v2873_v1 = vadd.s32 %v2872_v9, %v2862_v34  ;;  %v2886_v55 = vmul.u32 14564, %v2883_v3 }
 0x1ba   :  { %v1223_v15 = vsel %vm1152_vm2, %v8699_v57, %v8641_v2  ;;  %v2887_v42 = vmul.u32 58254, %v2883_v3  ;;  %v2888_v54 = vmul.u32 14564, %v2884_v62  ;;  %v2889_v4 = vmul.u32 58254, %v2884_v62 }
 0x1bb   :  { %5420 = vmatmul.msk.bf16.gmra.mxu3 %vm574_vm1, %v1223_v15  ;;  %v4302_v59 = vsel %vm4158_vm6, %v4230_v36, %v2848_v10  ;;  %v7267_v6 = vadd.f32 %v1438_v5, %v1053_v58  ;;  %v7270_v7 = vadd.s32 280, %v5918_v38  ;;  %v2874_v17 = vadd.s32 %v2873_v1, %v2864_v11 }
 0x1bc   :  { %vm4374_vm7 = vcmp.ge.s32.totalorder %v4302_v59, 1  ;;  %vm4446_vm8 = vcmp.le.s32.totalorder %v4302_v59, 16  ;;  %v2890_v57 = vshll.u32 %v2887_v42, 16  ;;  %v2892_v2 = vshll.u32 %v2888_v54, 16 }
 0x1bd   :  { %vm4518_vm9 = vmand %vm4374_vm7, %vm4446_vm8  ;;  %v5624_v0 = vpack.c.bf16 %v7267_v6, %v7255_v37  ;;  %v2875_v33 = vshrl.u32 %v2874_v17, 4  ;;  %v2912_v11 = vand.u32 65535, %v7270_v7  ;;  %v2913_v62 = vshrl.u32 %v7270_v7, 16  ;;  %v7285_v21 = vpop.f32.mrf.mxu3 }
 0x1be   :  { %v5454_v34 = vsel %vm4518_vm9, 1.0, %v8686_v41  ;;  %vm2894_vm10 = vc.u32 %v2886_v55, %v2890_v57  ;;  %v2896_v10 = vadd.s32 %v2890_v57, %v2886_v55  ;;  %v2891_v5 = vshrl.u32 %v2887_v42, 16 }
 0x1bf   :  { %v4878_v9 = vmul.f32 %v5454_v34, %v7196_v52  ;;  %v2895_v3 = vsel %vm2894_vm10, 1, %v8687_v53  ;;  %5735 = vst [vmem:[%s8622_s2 + $0x88] sm:$0xff] %v5624_v0   ;;  %v2876_v15 = vmul.u32 18, %v2875_v33  ;;  %v2893_v55 = vshrl.u32 %v2888_v54, 16 }
 0x1c0   :  { %v2897_v36 = vadd.s32 %v2895_v3, %v2889_v4  ;;  %vm2898_vm11 = vc.u32 %v2896_v10, %v2892_v2  ;;  %v2916_v34 = vmul.u32 58254, %v2912_v11  ;;  %v2917_v63 = vmul.u32 14564, %v2913_v62 }
 0x1c1   :  { %v4949_v58 = vadd.f32 %v4948_v27, %v4878_v9  ;;  %v5028_v1 = vmul.f32 %v4878_v9, %v7196_v52  ;;  %v2899_v59 = vsel %vm2898_vm11, 1, %v8687_v53  ;;  %v2877_v17 = vsub.s32 %v7216_v39, %v2876_v15 }
 0x1c2   :  { %v2901_v57 = vadd.s32 %v2899_v59, %v2897_v36  ;;  %v2915_v32 = vmul.u32 14564, %v2912_v11  ;;  %v8701_v33 = vrot.slane %v6722_v20, 1  ;;  %v8702_v42 = vrot.slane %v7203_v25, 1  ;;  %v1055_v11 = vpop.f32.mrf.mxu1  ;;  %v786_v20 = vpop.f32.mrf.mxu0 }
 0x1c3   :  { %v5099_v0 = vadd.f32 %v5098_v12, %v5028_v1  ;;  %vm4015_vm12 = vcmp.ne.s32.totalorder %v2877_v17, 0  ;;  %vm4087_vm13 = vcmp.lt.s32.totalorder %v2877_v17, 0  ;;  %v4231_v52 = vadd.s32 18, %v2877_v17 }
 0x1c4   :  { %v1207_v27 = vsel %vm1152_vm2, %v8702_v42, %v8701_v33  ;;  %v2902_v2 = vadd.s32 %v2901_v57, %v2891_v5  ;;  %vm4159_vm14 = vmand %vm4087_vm13, %vm4015_vm12  ;;  %v2918_v39 = vmul.u32 58254, %v2913_v62  ;;  %v2919_v54 = vshll.u32 %v2916_v34, 16 }
 0x1c5   :  { %5412 = vmatmul.msk.bf16.gmra.mxu2 %vm574_vm1, %v1207_v27  ;;  %v2920_v4 = vshrl.u32 %v2916_v34, 16  ;;  %v2921_v12 = vshll.u32 %v2917_v63, 16  ;;  %v4303_v10 = vsel %vm4159_vm14, %v4231_v52, %v2877_v17  ;;  %v2922_v3 = vshrl.u32 %v2917_v63, 16  ;;  %v1441_v17 = vpop.f32.mrf.mxu2 }
 0x1c6   :  { %v2903_v9 = vadd.s32 %v2902_v2, %v2893_v55  ;;  %v489_v15 = vshrl.u32 %v7203_v25, 16  ;;  %vm4375_vm15 = vcmp.ge.s32.totalorder %v4303_v10, 1  ;;  %vm4447_vm0 = vcmp.le.s32.totalorder %v4303_v10, 16 }
 0x1c7   :  { %vm2923_vm4 = vc.u32 %v2915_v32, %v2919_v54  ;;  %v2925_v36 = vadd.s32 %v2919_v54, %v2915_v32  ;;  %vm4519_vm5 = vmand %vm4375_vm15, %vm4447_vm0  ;;  %v7297_v59 = vadd.s32 288, %v5918_v38  ;;  %v1224_v25 = vrot.slane %v5986_v51, 1 }
 0x1c8   :  { %v2904_v5 = vshrl.u32 %v2903_v9, 4  ;;  %v2924_v1 = vsel %vm2923_vm4, 1, %v8687_v53  ;;  %v491_v62 = vor.u32 %v489_v15, %v7238_v45  ;;  %v5455_v55 = vsel %vm4519_vm5, 1.0, %v8686_v41 }
 0x1c9   :  { %v2926_v63 = vadd.s32 %v2924_v1, %v2918_v39  ;;  %vm2927_vm6 = vc.u32 %v2925_v36, %v2921_v12  ;;  %v4879_v57 = vmul.f32 %v5455_v55, %v7198_v19  ;;  %v2941_v45 = vand.u32 65535, %v7297_v59 }
 0x1ca   :  { %v2905_v34 = vmul.u32 18, %v2904_v5  ;;  %v2928_v32 = vsel %vm2927_vm6, 1, %v8687_v53  ;;  %v496_v33 = vsel %vm276_vm3, %v491_v62, %v5847_v30  ;;  %v2942_v27 = vshrl.u32 %v7297_v59, 16  ;;  %v7314_v30 = vpop.f32.mrf.mxu3  ;;  %v1057_v55 = vpop.f32.mrf.mxu1 }
 0x1cb   :  { %v2930_v42 = vadd.s32 %v2928_v32, %v2926_v63  ;;  %5330 = vmatmul.msk.bf16.gmra.mxu0 %vm574_vm1, %v496_v33  ;;  %v8703_v52 = vrot.slane %v7249_v23, 1  ;;  %v4950_v51 = vadd.f32 %v4949_v58, %v4879_v57  ;;  %v5029_v39 = vmul.f32 %v4879_v57, %v7198_v19 }
 0x1cc   :  { %v2906_v54 = vsub.s32 %v7244_v13, %v2905_v34  ;;  %v2944_v10 = vmul.u32 14564, %v2941_v45  ;;  %v2945_v9 = vmul.u32 58254, %v2941_v45  ;;  %v2946_v15 = vmul.u32 14564, %v2942_v27  ;;  %v788_v13 = vpop.f32.mrf.mxu0 }
 0x1cd   :  { %v1225_v2 = vsel %vm1152_vm2, %v8703_v52, %v1224_v25  ;;  %v2931_v12 = vadd.s32 %v2930_v42, %v2920_v4  ;;  %v5100_v36 = vadd.f32 %v5099_v0, %v5029_v39  ;;  %v2947_v1 = vmul.u32 58254, %v2942_v27  ;;  %v1443_v33 = vpop.f32.mrf.mxu2 }
 0x1ce   :  { %5421 = vmatmul.msk.bf16.gmra.mxu3 %vm574_vm1, %v1225_v2  ;;  %vm4016_vm3 = vcmp.ne.s32.totalorder %v2906_v54, 0  ;;  %vm4088_vm7 = vcmp.lt.s32.totalorder %v2906_v54, 0  ;;  %v4232_v5 = vadd.s32 18, %v2906_v54  ;;  %v2948_v58 = vshll.u32 %v2945_v9, 16 }
 0x1cf   :  { %vm4160_vm8 = vmand %vm4088_vm7, %vm4016_vm3  ;;  %v2932_v23 = vadd.s32 %v2931_v12, %v2922_v3  ;;  %v2950_v19 = vshll.u32 %v2946_v15, 16  ;;  %v1056_v63 = vadd.f32 %v1055_v11, %v786_v20  ;;  %v1058_v3 = vadd.f32 %v1057_v55, %v788_v13 }
 0x1d0   :  { %v4304_v62 = vsel %vm4160_vm8, %v4232_v5, %v2906_v54  ;;  %vm2952_vm9 = vc.u32 %v2944_v10, %v2948_v58  ;;  %v2954_v0 = vadd.s32 %v2948_v58, %v2944_v10  ;;  %v2949_v45 = vshrl.u32 %v2945_v9, 16 }
 0x1d1   :  { %vm4376_vm2 = vcmp.ge.s32.totalorder %v4304_v62, 1  ;;  %vm4448_vm1 = vcmp.le.s32.totalorder %v4304_v62, 16  ;;  %v2933_v4 = vshrl.u32 %v2932_v23, 4  ;;  %v2953_v25 = vsel %vm2952_vm9, 1, %v8687_v53 }
 0x1d2   :  { %vm4520_vm10 = vmand %vm4376_vm2, %vm4448_vm1  ;;  %v2955_v32 = vadd.s32 %v2953_v25, %v2947_v1  ;;  %vm2956_vm11 = vc.u32 %v2954_v0, %v2950_v19  ;;  %v7321_v2 = vadd.f32 %v1443_v33, %v1058_v3  ;;  %v7324_v11 = vadd.s32 296, %v5918_v38  ;;  %v1486_v9 = vpop.f32.mrf.mxu3 }
 0x1d3   :  { %v5456_v57 = vsel %vm4520_vm10, 1.0, %v8686_v41  ;;  %v2934_v34 = vmul.u32 18, %v2933_v4  ;;  %v2957_v52 = vsel %vm2956_vm11, 1, %v8687_v53  ;;  %v2951_v54 = vshrl.u32 %v2946_v15, 16 }
 0x1d4   :  { %v4880_v42 = vmul.f32 %v5456_v57, %v7255_v37  ;;  %v2959_v12 = vadd.s32 %v2957_v52, %v2955_v32  ;;  %v1567_v5 = vadd.f32 %v1441_v17, %v1056_v63  ;;  %v2970_v62 = vand.u32 65535, %v7324_v11 }
 0x1d5   :  { %v2935_v27 = vsub.s32 %v7270_v7, %v2934_v34  ;;  %v1101_v34 = vadd.f32 %v6685_v35, %v6135_v31  ;;  %v1103_v33 = vadd.f32 %v6743_v28, %v6173_v14 }
 0x1d6   :  { %v4951_v20 = vadd.f32 %v4950_v51, %v4880_v42  ;;  %v5030_v39 = vmul.f32 %v4880_v42, %v7255_v37  ;;  %v2960_v7 = vadd.s32 %v2959_v12, %v2949_v45  ;;  %v5629_v58 = vpack.c.bf16 %v7321_v2, %v1567_v5 }
 0x1d7   :  { %vm4017_vm12 = vcmp.ne.s32.totalorder %v2935_v27, 0  ;;  %vm4089_vm13 = vcmp.lt.s32.totalorder %v2935_v27, 0  ;;  %v4233_v10 = vadd.s32 18, %v2935_v27  ;;  %v2971_v37 = vshrl.u32 %v7324_v11, 16 }
 0x1d8   :  { %v5101_v23 = vadd.f32 %v5100_v36, %v5030_v39  ;;  %vm4161_vm14 = vmand %vm4089_vm13, %vm4017_vm12  ;;  %v2961_v51 = vadd.s32 %v2960_v7, %v2951_v54  ;;  %5736 = vst [vmem:[%s8622_s2 + $0x90] sm:$0xff] %v5629_v58   ;;  %v2973_v19 = vmul.u32 14564, %v2970_v62  ;;  %v2974_v55 = vmul.u32 58254, %v2970_v62  ;;  %v791_v58 = vpop.f32.mrf.mxu0 }
 0x1d9   :  { %v4305_v1 = vsel %vm4161_vm14, %v4233_v10, %v2935_v27  ;;  %v2975_v4 = vmul.u32 14564, %v2971_v37  ;;  %v2976_v0 = vmul.u32 58254, %v2971_v37  ;;  %v7342_v35 = vadd.f32 %v1486_v9, %v1101_v34 }
 0x1da   :  { %vm4377_vm15 = vcmp.ge.s32.totalorder %v4305_v1, 1  ;;  %vm4449_vm0 = vcmp.le.s32.totalorder %v4305_v1, 16  ;;  %v2962_v15 = vshrl.u32 %v2961_v51, 4  ;;  %v2977_v57 = vshll.u32 %v2974_v55, 16  ;;  %v1488_v27 = vpop.f32.mrf.mxu3  ;;  %v1060_v1 = vpop.f32.mrf.mxu1 }
 0x1db   :  { %vm4521_vm4 = vmand %vm4377_vm15, %vm4449_vm0  ;;  %v2979_v3 = vshll.u32 %v2975_v4, 16  ;;  %v7345_v54 = vadd.f32 %v1488_v27, %v1103_v33  ;;  %v2980_v14 = vshrl.u32 %v2975_v4, 16  ;;  %v7354_v62 = vadd.s32 304, %v5918_v38 }
 0x1dc   :  { %v5457_v17 = vsel %vm4521_vm4, 1.0, %v8686_v41  ;;  %v2963_v13 = vmul.u32 18, %v2962_v15  ;;  %vm2981_vm5 = vc.u32 %v2973_v19, %v2977_v57  ;;  %v2983_v45 = vadd.s32 %v2977_v57, %v2973_v19 }
 0x1dd   :  { %v4881_v36 = vmul.f32 %v5457_v17, %v7267_v6  ;;  %v5674_v12 = vpack.c.bf16 %v7345_v54, %v7342_v35  ;;  %v2999_v19 = vand.u32 65535, %v7354_v62 }
 0x1de   :  { %v2964_v32 = vsub.s32 %v7297_v59, %v2963_v13  ;;  %vm2985_vm8 = vc.u32 %v2983_v45, %v2979_v3  ;;  %v3000_v13 = vshrl.u32 %v7354_v62, 16  ;;  %v1061_v45 = vadd.f32 %v1060_v1, %v791_v58 }
 0x1df   :  { %v4952_v63 = vadd.f32 %v4951_v20, %v4881_v36  ;;  %v5031_v25 = vmul.f32 %v4881_v36, %v7267_v6  ;;  %v2982_v6 = vsel %vm2981_vm5, 1, %v8687_v53  ;;  %v2978_v20 = vshrl.u32 %v2974_v55, 16  ;;  %5745 = vst [vmem:[%s8622_s2 + $0xd8] sm:$0xff] %v5674_v12   ;;  %v1446_v36 = vpop.f32.mrf.mxu2 }
 0x1e0   :  { %vm4018_vm6 = vcmp.ne.s32.totalorder %v2964_v32, 0  ;;  %vm4090_vm3 = vcmp.lt.s32.totalorder %v2964_v32, 0  ;;  %v4234_v52 = vadd.s32 18, %v2964_v32  ;;  %v2984_v39 = vadd.s32 %v2982_v6, %v2976_v0 }
 0x1e1   :  { %v5102_v42 = vadd.f32 %v5101_v23, %v5031_v25  ;;  %vm4162_vm7 = vmand %vm4090_vm3, %vm4018_vm6  ;;  %v2986_v59 = vsel %vm2985_vm8, 1, %v8687_v53  ;;  %v3003_v25 = vmul.u32 58254, %v2999_v19  ;;  %v3002_v0 = vmul.u32 14564, %v2999_v19 }
 0x1e2   :  { %v4306_v31 = vsel %vm4162_vm7, %v4234_v52, %v2964_v32  ;;  %v2988_v28 = vadd.s32 %v2986_v59, %v2984_v39  ;;  %v3004_v57 = vmul.u32 14564, %v3000_v13  ;;  %v3005_v32 = vmul.u32 58254, %v3000_v13  ;;  %v1062_v33 = vpop.f32.mrf.mxu1  ;;  %v1491_v58 = vpop.f32.mrf.mxu3 }
 0x1e3   :  { %vm4378_vm2 = vcmp.ge.s32.totalorder %v4306_v31, 1  ;;  %vm4450_vm1 = vcmp.le.s32.totalorder %v4306_v31, 16  ;;  %v3007_v59 = vshrl.u32 %v3003_v25, 16 }
 0x1e4   :  { %vm4522_vm9 = vmand %vm4378_vm2, %vm4450_vm1  ;;  %v2989_v23 = vadd.s32 %v2988_v28, %v2978_v20  ;;  %v3008_v3 = vshll.u32 %v3004_v57, 16 }
 0x1e5   :  { %v5458_v10 = vsel %vm4522_vm9, 1.0, %v8686_v41 }
 0x1e6   :  { %v4882_v7 = vmul.f32 %v5458_v10, %v1567_v5  ;;  %v2990_v9 = vadd.s32 %v2989_v23, %v2980_v14  ;;  %v7362_v14 = vadd.f32 %v1446_v36, %v1061_v45  ;;  %v7368_v10 = vadd.s32 312, %v5918_v38 }
 0x1e7   :  { %v1448_v39 = vpop.f32.mrf.mxu2 }
 0x1e8   :  { %v4953_v51 = vadd.f32 %v4952_v63, %v4882_v7  ;;  %v5032_v37 = vmul.f32 %v4882_v7, %v1567_v5  ;;  %v2991_v17 = vshrl.u32 %v2990_v9, 4  ;;  %v3006_v63 = vshll.u32 %v3003_v25, 16 }
 0x1e9   :  { %v3009_v9 = vshrl.u32 %v3004_v57, 16  ;;  %v3029_v13 = vshrl.u32 %v7368_v10, 16 }
 0x1ea   :  { %v5103_v15 = vadd.f32 %v5102_v42, %v5032_v37  ;;  %v2992_v55 = vmul.u32 18, %v2991_v17  ;;  %v793_v42 = vpop.f32.mrf.mxu0  ;;  %vm3010_vm15 = vc.u32 %v3002_v0, %v3006_v63  ;;  %v3012_v27 = vadd.s32 %v3006_v63, %v3002_v0 }
 0x1eb   :  { %v1063_v20 = vadd.f32 %v1062_v33, %v793_v42  ;;  %v7374_v37 = vadd.s32 432, %v5918_v38  ;;  %v3033_v57 = vmul.u32 14564, %v3029_v13  ;;  %v3034_v63 = vmul.u32 58254, %v3029_v13 }
 0x1ec   :  { %v2993_v4 = vsub.s32 %v7324_v11, %v2992_v55  ;;  %v3011_v11 = vsel %vm3010_vm15, 1, %v8687_v53  ;;  %vm3014_vm4 = vc.u32 %v3012_v27, %v3008_v3  ;;  %v3028_v55 = vand.u32 65535, %v7368_v10 }
 0x1ed   :  { %v3013_v6 = vadd.s32 %v3011_v11, %v3005_v32  ;;  %v3015_v28 = vsel %vm3014_vm4, 1, %v8687_v53  ;;  %v7365_v12 = vadd.f32 %v1448_v39, %v1063_v20  ;;  %v3464_v25 = vshrl.u32 %v7374_v37, 16  ;;  %v1493_v11 = vpop.f32.mrf.mxu3 }
 0x1ee   :  { %vm4019_vm10 = vcmp.ne.s32.totalorder %v2993_v4, 0  ;;  %vm4091_vm11 = vcmp.lt.s32.totalorder %v2993_v4, 0  ;;  %v4235_v34 = vadd.s32 18, %v2993_v4  ;;  %v3032_v0 = vmul.u32 58254, %v3028_v55 }
 0x1ef   :  { %vm4163_vm12 = vmand %vm4091_vm11, %vm4019_vm10  ;;  %v3017_v1 = vadd.s32 %v3015_v28, %v3013_v6  ;;  %v5634_v19 = vpack.c.bf16 %v7365_v12, %v7362_v14  ;;  %v1106_v32 = vadd.f32 %v6778_v16, %v6214_v29  ;;  %v1108_v3 = vadd.f32 %v6821_v26, %v6244_v43 }
 0x1f0   :  { %v4307_v5 = vsel %vm4163_vm12, %v4235_v34, %v2993_v4  ;;  %v3037_v45 = vshll.u32 %v3033_v57, 16  ;;  %v3036_v16 = vshrl.u32 %v3032_v0, 16  ;;  %v3038_v28 = vshrl.u32 %v3033_v57, 16 }
 0x1f1   :  { %vm4379_vm13 = vcmp.ge.s32.totalorder %v4307_v5, 1  ;;  %vm4451_vm14 = vcmp.le.s32.totalorder %v4307_v5, 16  ;;  %v3018_v36 = vadd.s32 %v3017_v1, %v3007_v59  ;;  %5737 = vst [vmem:[%s8622_s2 + $0x98] sm:$0xff] %v5634_v19   ;;  %v3035_v5 = vshll.u32 %v3032_v0, 16 }
 0x1f2   :  { %vm4523_vm0 = vmand %vm4379_vm13, %vm4451_vm14  ;;  %v7397_v43 = vadd.f32 %v1493_v11, %v1108_v3  ;;  %v7407_v19 = vadd.s32 320, %v5918_v38  ;;  %v7415_v0 = vadd.s32 440, %v5918_v38  ;;  %v1451_v11 = vpop.f32.mrf.mxu2 }
 0x1f3   :  { %v5459_v52 = vsel %vm4523_vm0, 1.0, %v8686_v41 }
 0x1f4   :  { %v4883_v31 = vmul.f32 %v5459_v52, %v7321_v2  ;;  %v7394_v52 = vmul.u32 14564, %v3464_v25  ;;  %v3058_v3 = vshrl.u32 %v7407_v19, 16 }
 0x1f6   :  { %v7370_v23 = vadd.f32 %v4953_v51, %v4883_v31  ;;  %v5033_v7 = vmul.f32 %v4883_v31, %v7321_v2  ;;  %v3019_v51 = vadd.s32 %v3018_v36, %v3009_v9  ;;  %v3463_v2 = vand.u32 65535, %v7374_v37 }
 0x1f7   :  { %v7400_v31 = vadd.f32 %v1491_v58, %v1106_v32 }
 0x1f8   :  { %v7376_v17 = vadd.f32 %v5103_v15, %v5033_v7  ;;  %v3020_v4 = vshrl.u32 %v3019_v51, 4  ;;  %v3031_v15 = vmul.u32 14564, %v3028_v55  ;;  %v7391_v33 = vmul.u32 58254, %v3463_v2 }
 0x1f9   :  { %v3466_v27 = vmul.u32 14564, %v3463_v2  ;;  %v5679_v9 = vpack.c.bf16 %v7397_v43, %v7400_v31  ;;  %v3472_v55 = vshll.u32 %v7394_v52, 16  ;;  %v1065_v2 = vpop.f32.mrf.mxu1 }
 0x1fa   :  { %v3021_v34 = vmul.u32 18, %v3020_v4  ;;  %vm3039_vm5 = vc.u32 %v3031_v15, %v3035_v5  ;;  %v3041_v6 = vadd.s32 %v3035_v5, %v3031_v15  ;;  %v3470_v26 = vshll.u32 %v7391_v33, 16  ;;  %v796_v4 = vpop.f32.mrf.mxu0 }
 0x1fb   :  { %v3040_v29 = vsel %vm3039_vm5, 1, %v8687_v53  ;;  %5746 = vst [vmem:[%s8622_s2 + $0xe0] sm:$0xff] %v5679_v9   ;;  %v3469_v15 = vmul.u32 58254, %v3464_v25  ;;  %v3057_v5 = vand.u32 65535, %v7407_v19 }
 0x1fc   :  { %v3022_v42 = vsub.s32 %v7354_v62, %v3021_v34  ;;  %v3042_v39 = vadd.s32 %v3040_v29, %v3034_v63  ;;  %vm3043_vm8 = vc.u32 %v3041_v6, %v3037_v45  ;;  %vm3474_vm10 = vc.u32 %v3466_v27, %v3470_v26 }
 0x1fd   :  { %v3044_v59 = vsel %vm3043_vm8, 1, %v8687_v53  ;;  %v3476_v58 = vadd.s32 %v3470_v26, %v3466_v27  ;;  %v3475_v32 = vsel %vm3474_vm10, 1, %v8687_v53  ;;  %v3492_v27 = vand.u32 65535, %v7415_v0 }
 0x1fe   :  { %vm4020_vm6 = vcmp.ne.s32.totalorder %v3022_v42, 0  ;;  %vm4092_vm3 = vcmp.lt.s32.totalorder %v3022_v42, 0  ;;  %v4236_v20 = vadd.s32 18, %v3022_v42  ;;  %v3046_v7 = vadd.s32 %v3044_v59, %v3042_v39 }
 0x1ff   :  { %vm4164_vm7 = vmand %vm4092_vm3, %vm4020_vm6  ;;  %vm3478_vm11 = vc.u32 %v3476_v58, %v3472_v55  ;;  %v3477_v25 = vadd.s32 %v3475_v32, %v3469_v15  ;;  %v3471_v29 = vshrl.u32 %v7391_v33, 16  ;;  %v3060_v39 = vmul.u32 14564, %v3057_v5 }
 0x200   :  { %v4308_v62 = vsel %vm4164_vm7, %v4236_v20, %v3022_v42  ;;  %v3047_v36 = vadd.s32 %v3046_v7, %v3036_v16  ;;  %v3479_v6 = vsel %vm3478_vm11, 1, %v8687_v53  ;;  %v3062_v20 = vmul.u32 14564, %v3058_v3 }
 0x201   :  { %vm4380_vm2 = vcmp.ge.s32.totalorder %v4308_v62, 1  ;;  %vm4452_vm1 = vcmp.le.s32.totalorder %v4308_v62, 16  ;;  %v3473_v16 = vshrl.u32 %v7394_v52, 16  ;;  %v3493_v26 = vshrl.u32 %v7415_v0, 16 }
 0x202   :  { %vm4524_vm9 = vmand %vm4380_vm2, %vm4452_vm1  ;;  %v3048_v51 = vadd.s32 %v3047_v36, %v3038_v28  ;;  %v3481_v62 = vadd.s32 %v3479_v6, %v3477_v25  ;;  %v7429_v59 = vmul.u32 58254, %v3492_v27  ;;  %v3063_v28 = vmul.u32 58254, %v3058_v3  ;;  %v1067_v36 = vpop.f32.mrf.mxu1  ;;  %v798_v52 = vpop.f32.mrf.mxu0 }
 0x203   :  { %v5460_v1 = vsel %vm4524_vm9, 1.0, %v8686_v41  ;;  %v3495_v9 = vmul.u32 14564, %v3492_v27  ;;  %v3066_v33 = vshll.u32 %v3062_v20, 16  ;;  %v1066_v55 = vadd.f32 %v1065_v2, %v796_v4 }
 0x204   :  { %v4884_v13 = vmul.f32 %v5460_v1, %v7362_v14  ;;  %v3049_v63 = vshrl.u32 %v3048_v51, 4  ;;  %v7434_v58 = vmul.u32 14564, %v3493_v26  ;;  %v7438_v15 = vadd.s32 328, %v5918_v38 }
 0x205   :  { %v7444_v25 = vadd.f32 %v1451_v11, %v1066_v55  ;;  %v3067_v27 = vshrl.u32 %v3062_v20, 16 }
 0x206   :  { %v4955_v57 = vadd.f32 %v7370_v23, %v4884_v13  ;;  %v5034_v34 = vmul.f32 %v4884_v13, %v7362_v14  ;;  %v3050_v45 = vmul.u32 18, %v3049_v63  ;;  %v3061_v14 = vmul.u32 58254, %v3057_v5 }
 0x207   :  { %v1068_v5 = vadd.f32 %v1067_v36, %v798_v52  ;;  %v3482_v36 = vadd.s32 %v3481_v62, %v3471_v29 }
 0x208   :  { %v5105_v42 = vadd.f32 %v7376_v17, %v5034_v34  ;;  %v3051_v23 = vsub.s32 %v7368_v10, %v3050_v45  ;;  %v3064_v7 = vshll.u32 %v3061_v14, 16  ;;  %v7432_v10 = vadd.s32 448, %v5918_v38  ;;  %v1453_v45 = vpop.f32.mrf.mxu2 }
 0x209   :  { %v3499_v34 = vshll.u32 %v7429_v59, 16  ;;  %v3065_v4 = vshrl.u32 %v3061_v14, 16  ;;  %v3501_v14 = vshll.u32 %v7434_v58, 16  ;;  %v3483_v62 = vadd.s32 %v3482_v36, %v3473_v16 }
 0x20a   :  { %vm4021_vm12 = vcmp.ne.s32.totalorder %v3051_v23, 0  ;;  %vm4093_vm13 = vcmp.lt.s32.totalorder %v3051_v23, 0  ;;  %v4237_v17 = vadd.s32 18, %v3051_v23  ;;  %vm3068_vm4 = vc.u32 %v3060_v39, %v3064_v7 }
 0x20b   :  { %vm4165_vm14 = vmand %vm4093_vm13, %vm4021_vm12  ;;  %v3069_v13 = vsel %vm3068_vm4, 1, %v8687_v53  ;;  %v3070_v51 = vadd.s32 %v3064_v7, %v3060_v39  ;;  %v3521_v3 = vand.u32 65535, %v7432_v10  ;;  %v1496_v7 = vpop.f32.mrf.mxu3  ;;  %vm3503_vm3 = vc.u32 %v3495_v9, %v3499_v34 }
 0x20c   :  { %v4309_v1 = vsel %vm4165_vm14, %v4237_v17, %v3051_v23  ;;  %v3071_v63 = vadd.s32 %v3069_v13, %v3063_v28  ;;  %v7447_v23 = vadd.f32 %v1453_v45, %v1068_v5  ;;  %v3522_v55 = vshrl.u32 %v7432_v10, 16 }
 0x20d   :  { %vm4381_vm15 = vcmp.ge.s32.totalorder %v4309_v1, 1  ;;  %vm4453_vm0 = vcmp.le.s32.totalorder %v4309_v1, 16  ;;  %vm3072_vm6 = vc.u32 %v3070_v51, %v3066_v33  ;;  %v3086_v1 = vand.u32 65535, %v7438_v15 }
 0x20e   :  { %vm4525_vm5 = vmand %vm4381_vm15, %vm4453_vm0  ;;  %v3073_v6 = vsel %vm3072_vm6, 1, %v8687_v53  ;;  %v3505_v33 = vadd.s32 %v3499_v34, %v3495_v9  ;;  %v5639_v52 = vpack.c.bf16 %v7447_v23, %v7444_v25  ;;  %v3498_v9 = vmul.u32 58254, %v3493_v26 }
 0x20f   :  { %v5461_v32 = vsel %vm4525_vm5, 1.0, %v8686_v41  ;;  %v3075_v28 = vadd.s32 %v3073_v6, %v3071_v63  ;;  %v3090_v29 = vmul.u32 58254, %v3086_v1  ;;  %v3089_v34 = vmul.u32 14564, %v3086_v1 }
 0x210   :  { %v4885_v2 = vmul.f32 %v5461_v32, %v7365_v12  ;;  %5738 = vst [vmem:[%s8622_s2 + $0xa0] sm:$0xff] %v5639_v52   ;;  %vm3507_vm7 = vc.u32 %v3505_v33, %v3501_v14  ;;  %v3524_v63 = vmul.u32 14564, %v3521_v3  ;;  %v7466_v5 = vmul.u32 14564, %v3522_v55 }
 0x211   :  { %v3076_v20 = vadd.s32 %v3075_v28, %v3065_v4  ;;  %v3093_v4 = vshll.u32 %v3090_v29, 16  ;;  %v1111_v45 = vadd.f32 %v6852_v24, %v6281_v18  ;;  %v1113_v16 = vadd.f32 %v6898_v44, %v6307_v8 }
 0x212   :  { %v7449_v39 = vadd.f32 %v4955_v57, %v4885_v2  ;;  %v5035_v17 = vmul.f32 %v4885_v2, %v7365_v12  ;;  %v3087_v57 = vshrl.u32 %v7438_v15, 16  ;;  %v7460_v12 = vmul.u32 58254, %v3521_v3 }
 0x213   :  { %v3077_v13 = vadd.s32 %v3076_v20, %v3067_v27  ;;  %v3484_v26 = vshrl.u32 %v3483_v62, 4  ;;  %v3508_v1 = vsel %vm3507_vm7, 1, %v8687_v53  ;;  %vm3097_vm8 = vc.u32 %v3089_v34, %v3093_v4  ;;  %v1498_v36 = vpop.f32.mrf.mxu3 }
 0x214   :  { %v7454_v11 = vadd.f32 %v5105_v42, %v5035_v17  ;;  %v3504_v42 = vsel %vm3503_vm3, 1, %v8687_v53  ;;  %v3091_v32 = vmul.u32 14564, %v3087_v57  ;;  %v3528_v2 = vshll.u32 %v7460_v12, 16 }
 0x215   :  { %v3078_v51 = vshrl.u32 %v3077_v13, 4  ;;  %v3092_v6 = vmul.u32 58254, %v3087_v57  ;;  %v3506_v28 = vadd.s32 %v3504_v42, %v3498_v9  ;;  %v3530_v14 = vshll.u32 %v7466_v5, 16 }
 0x216   :  { %v3095_v17 = vshll.u32 %v3091_v32, 16  ;;  %vm7476_vm2 = vc.u32 %v3524_v63, %v3528_v2  ;;  %v3098_v18 = vsel %vm3097_vm8, 1, %v8687_v53  ;;  %v3099_v24 = vadd.s32 %v3093_v4, %v3089_v34 }
 0x217   :  { %v3079_v27 = vmul.u32 18, %v3078_v51  ;;  %v7481_v44 = vadd.f32 %v1496_v7, %v1111_v45  ;;  %v3094_v20 = vshrl.u32 %v3090_v29, 16  ;;  %v3100_v52 = vadd.s32 %v3098_v18, %v3092_v6  ;;  %v801_v6 = vpop.f32.mrf.mxu0 }
 0x218   :  { %vm3101_vm11 = vc.u32 %v3099_v24, %v3095_v17  ;;  %v3534_v57 = vadd.s32 %v3528_v2, %v3524_v63  ;;  %v3096_v62 = vshrl.u32 %v3091_v32, 16  ;;  %v3500_v7 = vshrl.u32 %v7429_v59, 16 }
 0x219   :  { %v3080_v3 = vsub.s32 %v7407_v19, %v3079_v27  ;;  %v7483_v19 = vadd.f32 %v1498_v36, %v1113_v16  ;;  %v3102_v9 = vsel %vm3101_vm11, 1, %v8687_v53  ;;  %v3510_v34 = vadd.s32 %v3508_v1, %v3506_v28  ;;  %v1070_v16 = vpop.f32.mrf.mxu1 }
 0x21a   :  { %v3104_v42 = vadd.s32 %v3102_v9, %v3100_v52  ;;  %v3527_v29 = vmul.u32 58254, %v3522_v55  ;;  %v7494_v32 = vadd.s32 336, %v5918_v38  ;;  %v3485_v63 = vmul.u32 18, %v3484_v26 }
 0x21b   :  { %vm4022_vm1 = vcmp.ne.s32.totalorder %v3080_v3, 0  ;;  %vm4094_vm9 = vcmp.lt.s32.totalorder %v3080_v3, 0  ;;  %v4238_v8 = vadd.s32 18, %v3080_v3  ;;  %v5684_v51 = vpack.c.bf16 %v7483_v19, %v7481_v44 }
 0x21c   :  { %vm4166_vm10 = vmand %vm4094_vm9, %vm4022_vm1  ;;  %v3105_v45 = vadd.s32 %v3104_v42, %v3094_v20  ;;  %v3533_v2 = vsel %vm7476_vm2, 1, %v8687_v53  ;;  %v7500_v59 = vadd.s32 456, %v5918_v38  ;;  %vm3536_vm15 = vc.u32 %v3534_v57, %v3530_v14 }
 0x21d   :  { %v4310_v13 = vsel %vm4166_vm10, %v4238_v8, %v3080_v3  ;;  %5747 = vst [vmem:[%s8622_s2 + $0xe8] sm:$0xff] %v5684_v51   ;;  %v3502_v17 = vshrl.u32 %v7434_v58, 16  ;;  %v3511_v28 = vadd.s32 %v3510_v34, %v3500_v7  ;;  %v3535_v3 = vadd.s32 %v3533_v2, %v3527_v29  ;;  %v1456_v58 = vpop.f32.mrf.mxu2 }
 0x21e   :  { %vm4382_vm12 = vcmp.ge.s32.totalorder %v4310_v13, 1  ;;  %vm4454_vm13 = vcmp.le.s32.totalorder %v4310_v13, 16  ;;  %v3106_v27 = vadd.s32 %v3105_v45, %v3096_v62  ;;  %v3115_v33 = vand.u32 65535, %v7494_v32 }
 0x21f   :  { %vm4526_vm14 = vmand %vm4382_vm12, %vm4454_vm13  ;;  %v7510_v18 = vsub.s32 %v7374_v37, %v3485_v63  ;;  %v3537_v14 = vsel %vm3536_vm15, 1, %v8687_v53  ;;  %v3550_v24 = vand.u32 65535, %v7500_v59  ;;  %v3116_v20 = vshrl.u32 %v7494_v32, 16  ;;  %v803_v2 = vpop.f32.mrf.mxu0 }
 0x220   :  { %v5462_v4 = vsel %vm4526_vm14, 1.0, %v8686_v41  ;;  %v3107_v36 = vshrl.u32 %v3106_v27, 4  ;;  %v7524_v52 = vadd.f32 %v6969_v46, %v6372_v50  ;;  %v7528_v37 = vadd.f32 %v6995_v40, %v6411_v22 }
 0x221   :  { %v4886_v55 = vmul.f32 %v5462_v4, %v7444_v25  ;;  %v3512_v57 = vadd.s32 %v3511_v28, %v3502_v17  ;;  %v3529_v13 = vshrl.u32 %v7460_v12, 16  ;;  %v3539_v62 = vadd.s32 %v3537_v14, %v3535_v3  ;;  %v1072_v63 = vpop.f32.mrf.mxu1 }
 0x222   :  { %vm4036_vm0 = vcmp.ne.s32.totalorder %v7510_v18, 0  ;;  %vm4108_vm4 = vcmp.lt.s32.totalorder %v7510_v18, 0  ;;  %v7538_v50 = vadd.s32 18, %v7510_v18  ;;  %v3551_v22 = vshrl.u32 %v7500_v59, 16 }
 0x223   :  { %v7505_v1 = vadd.f32 %v7449_v39, %v4886_v55  ;;  %v5036_v26 = vmul.f32 %v4886_v55, %v7444_v25  ;;  %v7519_v39 = vadd.f32 %v6925_v56, %v6343_v48  ;;  %v3108_v25 = vmul.u32 18, %v3107_v36  ;;  %vm4180_vm11 = vmand %vm4108_vm4, %vm4036_vm0 }
 0x224   :  { %v3119_v56 = vmul.u32 58254, %v3115_v33  ;;  %v7541_v46 = vmul.u32 58254, %v3550_v24  ;;  %v3120_v40 = vmul.u32 14564, %v3116_v20  ;;  %v3118_v12 = vmul.u32 14564, %v3115_v33 }
 0x225   :  { %v7515_v8 = vadd.f32 %v7454_v11, %v5036_v26  ;;  %v7531_v11 = vadd.s32 464, %v5918_v38  ;;  %v3109_v48 = vsub.s32 %v7438_v15, %v3108_v25  ;;  %v3513_v42 = vshrl.u32 %v3512_v57, 4  ;;  %v1458_v14 = vpop.f32.mrf.mxu2 }
 0x226   :  { %v3531_v15 = vshrl.u32 %v7466_v5, 16  ;;  %v3122_v7 = vshll.u32 %v3119_v56, 16  ;;  %v3540_v34 = vadd.s32 %v3539_v62, %v3529_v13  ;;  %v3121_v4 = vmul.u32 58254, %v3116_v20 }
 0x227   :  { %vm4023_vm5 = vcmp.ne.s32.totalorder %v3109_v48, 0  ;;  %vm4095_vm6 = vcmp.lt.s32.totalorder %v3109_v48, 0  ;;  %v4239_v9 = vadd.s32 18, %v3109_v48  ;;  %v3579_v51 = vand.u32 65535, %v7531_v11 }
 0x228   :  { %vm4167_vm3 = vmand %vm4095_vm6, %vm4023_vm5  ;;  %v3124_v45 = vshll.u32 %v3120_v40, 16  ;;  %v3553_v55 = vmul.u32 14564, %v3550_v24  ;;  %v1071_v27 = vadd.f32 %v1070_v16, %v801_v6  ;;  %v7545_v17 = vmul.u32 14564, %v3551_v22 }
 0x229   :  { %v4311_v29 = vsel %vm4167_vm3, %v4239_v9, %v3109_v48  ;;  %v3557_v28 = vshll.u32 %v7541_v46, 16  ;;  %vm3126_vm1 = vc.u32 %v3118_v12, %v3122_v7  ;;  %v3128_v5 = vadd.s32 %v3122_v7, %v3118_v12 }
 0x22a   :  { %vm4383_vm7 = vcmp.ge.s32.totalorder %v4311_v29, 1  ;;  %vm4455_vm8 = vcmp.le.s32.totalorder %v4311_v29, 16  ;;  %v7548_v26 = vmul.u32 58254, %v3579_v51  ;;  %v3127_v36 = vsel %vm3126_vm1, 1, %v8687_v53 }
 0x22b   :  { %vm4527_vm2 = vmand %vm4383_vm7, %vm4455_vm8  ;;  %v1073_v33 = vadd.f32 %v1072_v63, %v803_v2  ;;  %v3123_v25 = vshrl.u32 %v3119_v56, 16  ;;  %v3129_v20 = vadd.s32 %v3127_v36, %v3121_v4  ;;  %vm3130_vm9 = vc.u32 %v3128_v5, %v3124_v45  ;;  %v1501_v4 = vpop.f32.mrf.mxu3  ;;  %v8709_v36 = vld [vmem:[#allocation9_spill] sm:$0xff] }
 0x22c   :  { %v5463_v3 = vsel %vm4527_vm2, 1.0, %v8686_v41  ;;  %v7553_v16 = vadd.f32 %v1456_v58, %v1071_v27  ;;  %v3131_v6 = vsel %vm3130_vm9, 1, %v8687_v53  ;;  %v7559_v13 = vadd.s32 344, %v5918_v38 }
 0x22d   :  { %v4887_v24 = vmul.f32 %v5463_v3, %v7447_v23  ;;  %v7556_v57 = vadd.f32 %v1458_v14, %v1073_v33  ;;  %v3125_v9 = vshrl.u32 %v3120_v40, 16  ;;  %v3133_v12 = vadd.s32 %v3131_v6, %v3129_v20  ;;  %v8708_v3 = vld [vmem:[#allocation2_spill] sm:$0xff] }
 0x22e   :  { %v3514_v7 = vmul.u32 18, %v3513_v42  ;;  %v3559_v56 = vshll.u32 %v7545_v17, 16  ;;  %vm7566_vm10 = vc.u32 %v3553_v55, %v3557_v28  ;;  %v3563_v29 = vadd.s32 %v3557_v28, %v3553_v55 }
 0x22f   :  { %v7562_v62 = vadd.f32 %v7505_v1, %v4887_v24  ;;  %v5037_v48 = vmul.f32 %v4887_v24, %v7447_v23  ;;  %v3580_v1 = vshrl.u32 %v7531_v11, 16  ;;  %v3134_v40 = vadd.s32 %v3133_v12, %v3123_v25 }
 0x230   :  { %v5644_v42 = vpack.c.bf16 %v7556_v57, %v7553_v16  ;;  %v7582_v45 = vadd.f32 %v7040_v49, %v6426_v60  ;;  %v7586_v63 = vadd.f32 %v7073_v47, %v6463_v61  ;;  %v3541_v2 = vadd.s32 %v3540_v34, %v3531_v15 }
 0x231   :  { %v7576_v23 = vadd.f32 %v7515_v8, %v5037_v48  ;;  %v3144_v55 = vand.u32 65535, %v7559_v13  ;;  %v3556_v27 = vmul.u32 58254, %v3551_v22  ;;  %v3582_v28 = vmul.u32 14564, %v3579_v51 }
 0x232   :  { %v3586_v8 = vshll.u32 %v7548_v26, 16  ;;  %v3135_v5 = vadd.s32 %v3134_v40, %v3125_v9  ;;  %5739 = vst [vmem:[%s8622_s2 + $0xa8] sm:$0xff] %v5644_v42   ;;  %v7595_v60 = vadd.f32 %v8709_v36, %v8708_v3  ;;  %v7599_v61 = vsel %vm4180_vm11, %v7538_v50, %v7510_v18 }
 0x233   :  { %v3562_v49 = vsel %vm7566_vm10, 1, %v8687_v53  ;;  %v3145_v47 = vshrl.u32 %v7559_v13, 16  ;;  %v7606_v22 = vsub.s32 %v7415_v0, %v3514_v7  ;;  %vm3565_vm12 = vc.u32 %v3563_v29, %v3559_v56  ;;  %v1503_v40 = vpop.f32.mrf.mxu3 }
 0x234   :  { %v7608_v15 = vmul.u32 14564, %v3580_v1  ;;  %v3136_v51 = vshrl.u32 %v3135_v5, 4  ;;  %v3542_v34 = vshrl.u32 %v3541_v2, 4  ;;  %v3558_v33 = vshrl.u32 %v7541_v46, 16 }
 0x235   :  { %v3147_v14 = vmul.u32 14564, %v3144_v55  ;;  %v3148_v24 = vmul.u32 58254, %v3144_v55  ;;  %v3564_v18 = vadd.s32 %v3562_v49, %v3556_v27  ;;  %vm3590_vm13 = vc.u32 %v3582_v28, %v3586_v8 }
 0x236   :  { %v3137_v50 = vmul.u32 18, %v3136_v51  ;;  %v3149_v25 = vmul.u32 14564, %v3145_v47  ;;  %vm4396_vm14 = vcmp.ge.s32.totalorder %v7599_v61, 1  ;;  %vm4468_vm15 = vcmp.le.s32.totalorder %v7599_v61, 16 }
 0x237   :  { %v3566_v0 = vsel %vm3565_vm12, 1, %v8687_v53  ;;  %v7615_v20 = vadd.s32 472, %v5918_v38  ;;  %v3150_v6 = vmul.u32 58254, %v3145_v47  ;;  %v3151_v48 = vshll.u32 %v3148_v24, 16  ;;  %vm7651_vm11 = vmand %vm4396_vm14, %vm4468_vm15 }
 0x238   :  { %vm4037_vm0 = vcmp.ne.s32.totalorder %v7606_v22, 0  ;;  %v3585_v46 = vmul.u32 58254, %v3580_v1  ;;  %v3588_v9 = vshll.u32 %v7608_v15, 16  ;;  %v3138_v12 = vsub.s32 %v7494_v32, %v3137_v50 }
 0x239   :  { %v3153_v7 = vshll.u32 %v3149_v25, 16  ;;  %v3591_v56 = vsel %vm3590_vm13, 1, %v8687_v53  ;;  %v3592_v58 = vadd.s32 %v3586_v8, %v3582_v28  ;;  %vm3155_vm4 = vc.u32 %v3147_v14, %v3151_v48 }
 0x23a   :  { %v3157_v29 = vadd.s32 %v3151_v48, %v3147_v14  ;;  %vm4024_vm5 = vcmp.ne.s32.totalorder %v3138_v12, 0  ;;  %vm4096_vm6 = vcmp.lt.s32.totalorder %v3138_v12, 0  ;;  %v4240_v42 = vadd.s32 18, %v3138_v12  ;;  %v806_v48 = vpop.f32.mrf.mxu0 }
 0x23b   :  { %v3156_v2 = vsel %vm3155_vm4, 1, %v8687_v53  ;;  %v3608_v55 = vand.u32 65535, %v7615_v20  ;;  %vm4168_vm3 = vmand %vm4096_vm6, %vm4024_vm5  ;;  %v3152_v1 = vshrl.u32 %v3148_v24, 16  ;;  %v7624_v32 = vadd.f32 %v1501_v4, %v7519_v39 }
 0x23c   :  { %v3158_v27 = vadd.s32 %v3156_v2, %v3150_v6  ;;  %vm3159_vm7 = vc.u32 %v3157_v29, %v3153_v7  ;;  %v4312_v5 = vsel %vm4168_vm3, %v4240_v42, %v3138_v12  ;;  %v7628_v8 = vadd.f32 %v1503_v40, %v7524_v52  ;;  %v1075_v6 = vpop.f32.mrf.mxu1  ;;  %v1461_v2 = vpop.f32.mrf.mxu2 }
 0x23d   :  { %v3160_v28 = vsel %vm3159_vm7, 1, %v8687_v53  ;;  %vm4384_vm8 = vcmp.ge.s32.totalorder %v4312_v5, 1  ;;  %vm4456_vm2 = vcmp.le.s32.totalorder %v4312_v5, 16  ;;  %v3154_v3 = vshrl.u32 %v3149_v25, 16 }
 0x23e   :  { %v3162_v36 = vadd.s32 %v3160_v28, %v3158_v27  ;;  %v3568_v49 = vadd.s32 %v3566_v0, %v3564_v18  ;;  %vm3594_vm1 = vc.u32 %v3592_v58, %v3588_v9  ;;  %v3609_v47 = vshrl.u32 %v7615_v20, 16  ;;  %vm4528_vm9 = vmand %vm4384_vm8, %vm4456_vm2  ;;  %v8713_v27 = vld [vmem:[#allocation10_spill] sm:$0xff]  ;;  %v8714_v28 = vld [vmem:[#allocation4_spill] sm:$0xff] }
 0x23f   :  { %v5689_v51 = vpack.c.bf16 %v7628_v8, %v7624_v32  ;;  %v3543_v14 = vmul.u32 18, %v3542_v34  ;;  %v7633_v39 = vmul.u32 58254, %v3608_v55  ;;  %v5464_v4 = vsel %vm4528_vm9, 1.0, %v8686_v41 }
 0x240   :  { %v3163_v24 = vadd.s32 %v3162_v36, %v3152_v1  ;;  %vm4109_vm10 = vcmp.lt.s32.totalorder %v7606_v22, 0  ;;  %v4253_v52 = vadd.s32 18, %v7606_v22  ;;  %v3593_v50 = vadd.s32 %v3591_v56, %v3585_v46  ;;  %v8712_v1 = vld [vmem:[#allocation3_spill] sm:$0xff] }
 0x241   :  { %v4888_v18 = vmul.f32 %v5464_v4, %v7553_v16  ;;  %5748 = vst [vmem:[%s8622_s2 + $0xf0] sm:$0xff] %v5689_v51   ;;  %v3560_v25 = vshrl.u32 %v7545_v17, 16  ;;  %v3595_v34 = vsel %vm3594_vm1, 1, %v8687_v53  ;;  %v7645_v9 = vadd.s32 352, %v5918_v38  ;;  %vm4181_vm12 = vmand %vm4109_vm10, %vm4037_vm0 }
 0x242   :  { %v3164_v0 = vadd.s32 %v3163_v24, %v3154_v3  ;;  %v3569_v12 = vadd.s32 %v3568_v49, %v3558_v33  ;;  %v7655_v7 = vmul.u32 14564, %v3609_v47  ;;  %v7666_v58 = vsub.s32 %v7432_v10, %v3543_v14  ;;  %v8715_v10 = vld [vmem:[#allocation11_spill] sm:$0xff] }
 0x243   :  { %v7658_v17 = vadd.f32 %v7562_v62, %v4888_v18  ;;  %v5038_v56 = vmul.f32 %v4888_v18, %v7553_v16  ;;  %v3611_v61 = vmul.u32 14564, %v3608_v55  ;;  %v3615_v29 = vshll.u32 %v7633_v39, 16 }
 0x244   :  { %v3165_v40 = vshrl.u32 %v3164_v0, 4  ;;  %v3587_v33 = vshrl.u32 %v7548_v26, 16  ;;  %v3597_v42 = vadd.s32 %v3595_v34, %v3593_v50  ;;  %v3173_v16 = vand.u32 65535, %v7645_v9 }
 0x245   :  { %v7671_v62 = vadd.f32 %v7576_v23, %v5038_v56  ;;  %v7676_v5 = vadd.f32 %v8713_v27, %v8712_v1  ;;  %v7680_v3 = vadd.f32 %v8715_v10, %v8714_v28  ;;  %v3174_v36 = vshrl.u32 %v7645_v9, 16 }
 0x246   :  { %v3166_v55 = vmul.u32 18, %v3165_v40  ;;  %v7686_v26 = vsel %vm7651_vm11, 1.0, %v8686_v41  ;;  %v7689_v23 = vsel %vm4181_vm12, %v4253_v52, %v7606_v22  ;;  %v3570_v49 = vadd.s32 %v3569_v12, %v3560_v25  ;;  %v808_v40 = vpop.f32.mrf.mxu0 }
 0x247   :  { %v3617_v51 = vshll.u32 %v7655_v7, 16  ;;  %vm7692_vm13 = vc.u32 %v3611_v61, %v3615_v29  ;;  %v3621_v4 = vadd.s32 %v3615_v29, %v3611_v61  ;;  %v3177_v50 = vmul.u32 58254, %v3173_v16  ;;  %v1077_v29 = vpop.f32.mrf.mxu1 }
 0x248   :  { %v3167_v24 = vsub.s32 %v7559_v13, %v3166_v55  ;;  %vm4038_vm14 = vcmp.ne.s32.totalorder %v7666_v58, 0  ;;  %v3589_v18 = vshrl.u32 %v7608_v15, 16  ;;  %v3598_v34 = vadd.s32 %v3597_v42, %v3587_v33 }
 0x249   :  { %v3176_v0 = vmul.u32 14564, %v3173_v16  ;;  %v7699_v46 = vmul.u32 14564, %v3174_v36  ;;  %vm4397_vm15 = vcmp.ge.s32.totalorder %v7689_v23, 1  ;;  %vm4469_vm0 = vcmp.le.s32.totalorder %v7689_v23, 16 }
 0x24a   :  { %v3614_v22 = vmul.u32 58254, %v3609_v47  ;;  %vm4025_vm4 = vcmp.ne.s32.totalorder %v3167_v24, 0  ;;  %vm4097_vm5 = vcmp.lt.s32.totalorder %v3167_v24, 0  ;;  %v4241_v52 = vadd.s32 18, %v3167_v24  ;;  %vm4541_vm12 = vmand %vm4397_vm15, %vm4469_vm0 }
 0x24b   :  { %vm4110_vm6 = vcmp.lt.s32.totalorder %v7666_v58, 0  ;;  %v3620_v13 = vsel %vm7692_vm13, 1, %v8687_v53  ;;  %vm4169_vm3 = vmand %vm4097_vm5, %vm4025_vm4  ;;  %v3179_v15 = vmul.u32 58254, %v3174_v36  ;;  %v3180_v25 = vshll.u32 %v3177_v50, 16  ;;  %v1463_v36 = vpop.f32.mrf.mxu2 }
 0x24c   :  { %v3571_v12 = vshrl.u32 %v3570_v49, 4  ;;  %vm3623_vm7 = vc.u32 %v3621_v4, %v3617_v51  ;;  %v4313_v56 = vsel %vm4169_vm3, %v4241_v52, %v3167_v24  ;;  %v3182_v61 = vshll.u32 %v7699_v46, 16  ;;  %v1506_v52 = vpop.f32.mrf.mxu3  ;;  %vm4182_vm11 = vmand %vm4110_vm6, %vm4038_vm14 }
 0x24d   :  { %vm4385_vm8 = vcmp.ge.s32.totalorder %v4313_v56, 1  ;;  %vm4457_vm2 = vcmp.le.s32.totalorder %v4313_v56, 16  ;;  %v1076_v47 = vadd.f32 %v1075_v6, %v806_v48  ;;  %vm3184_vm1 = vc.u32 %v3176_v0, %v3180_v25  ;;  %v8719_v56 = vld [vmem:[#allocation12_spill] sm:$0xff] }
 0x24e   :  { %v3599_v33 = vadd.s32 %v3598_v34, %v3589_v18  ;;  %v3622_v42 = vadd.s32 %v3620_v13, %v3614_v22  ;;  %vm4529_vm9 = vmand %vm4385_vm8, %vm4457_vm2  ;;  %v3185_v16 = vsel %vm3184_vm1, 1, %v8687_v53  ;;  %v3186_v1 = vadd.s32 %v3180_v25, %v3176_v0  ;;  %v8718_v25 = vld [vmem:[#allocation5_spill] sm:$0xff] }
 0x24f   :  { %v3624_v27 = vsel %vm3623_vm7, 1, %v8687_v53  ;;  %v5465_v28 = vsel %vm4529_vm9, 1.0, %v8686_v41  ;;  %v3187_v10 = vadd.s32 %v3185_v16, %v3179_v15  ;;  %v1078_v55 = vadd.f32 %v1077_v29, %v808_v40  ;;  %v8721_v29 = vld [vmem:[#allocation13_spill] sm:$0xff] }
 0x250   :  { %v7712_v49 = vadd.s32 480, %v5918_v38  ;;  %v4889_v51 = vmul.f32 %v5465_v28, %v7556_v57  ;;  %v3181_v6 = vshrl.u32 %v3177_v50, 16  ;;  %vm3188_vm10 = vc.u32 %v3186_v1, %v3182_v61 }
 0x251   :  { %v7715_v48 = vadd.f32 %v1461_v2, %v1076_v47  ;;  %v3189_v14 = vsel %vm3188_vm10, 1, %v8687_v53  ;;  %v7718_v4 = vadd.f32 %v1463_v36, %v1078_v55  ;;  %v7721_v24 = vadd.s32 360, %v5918_v38 }
 0x252   :  { %v7724_v18 = vadd.f32 %v7658_v17, %v4889_v51  ;;  %v5039_v34 = vmul.f32 %v4889_v51, %v7556_v57  ;;  %v3183_v0 = vshrl.u32 %v7699_v46, 16  ;;  %v3191_v22 = vadd.s32 %v3189_v14, %v3187_v10 }
 0x253   :  { %v4254_v50 = vadd.s32 18, %v7666_v58  ;;  %v3572_v2 = vmul.u32 18, %v3571_v12  ;;  %v3616_v13 = vshrl.u32 %v7633_v39, 16  ;;  %v3626_v15 = vadd.s32 %v3624_v27, %v3622_v42  ;;  %v8720_v12 = vld [vmem:[#allocation6_spill] sm:$0xff]  ;;  %v8722_v42 = vld [vmem:[#allocation7_spill] sm:$0xff] }
 0x254   :  { %v7732_v61 = vadd.f32 %v8719_v56, %v8718_v25  ;;  %v7739_v57 = vadd.f32 %v7671_v62, %v5039_v34  ;;  %v3192_v17 = vadd.s32 %v3191_v22, %v3181_v6  ;;  %v5649_v46 = vpack.c.bf16 %v7718_v4, %v7715_v48 }
 0x255   :  { %v7745_v39 = vadd.f32 %v8721_v29, %v8720_v12  ;;  %v3637_v40 = vand.u32 65535, %v7712_v49  ;;  %v3202_v47 = vand.u32 65535, %v7721_v24  ;;  %v3203_v62 = vshrl.u32 %v7721_v24, 16 }
 0x256   :  { %v7756_v16 = vadd.f32 %v7285_v21, %v8722_v42  ;;  %v7760_v1 = vmul.f32 %v7686_v26, %v7342_v35  ;;  %v3600_v27 = vshrl.u32 %v3599_v33, 4  ;;  %v3193_v28 = vadd.s32 %v3192_v17, %v3183_v0  ;;  %5740 = vst [vmem:[%s8622_s2 + $0xb0] sm:$0xff] %v5649_v46   ;;  %v1508_v17 = vpop.f32.mrf.mxu3 }
 0x257   :  { %v4326_v23 = vsel %vm4182_vm11, %v4254_v50, %v7666_v58  ;;  %v7767_v10 = vsub.s32 %v7500_v59, %v3572_v2  ;;  %v3618_v55 = vshrl.u32 %v7655_v7, 16  ;;  %v3627_v36 = vadd.s32 %v3626_v15, %v3616_v13 }
 0x258   :  { %v7771_v21 = vsel %vm4541_vm12, 1.0, %v8686_v41  ;;  %v3638_v26 = vshrl.u32 %v7712_v49, 16  ;;  %v7775_v33 = vadd.s32 488, %v5918_v38  ;;  %v3194_v51 = vshrl.u32 %v3193_v28, 4 }
 0x259   :  { %v7777_v6 = vmul.u32 58254, %v3637_v40  ;;  %v3205_v14 = vmul.u32 14564, %v3202_v47  ;;  %v3206_v34 = vmul.u32 58254, %v3202_v47  ;;  %v3207_v58 = vmul.u32 14564, %v3203_v62 }
 0x25a   :  { %vm4398_vm13 = vcmp.ge.s32.totalorder %v4326_v23, 1  ;;  %vm4470_vm14 = vcmp.le.s32.totalorder %v4326_v23, 16  ;;  %v3601_v59 = vmul.u32 18, %v3600_v27  ;;  %v3195_v0 = vmul.u32 18, %v3194_v51 }
 0x25b   :  { %vm4039_vm15 = vcmp.ne.s32.totalorder %v7767_v10, 0  ;;  %v7780_v7 = vadd.s32 %v3627_v36, %v3618_v55  ;;  %v3640_v22 = vmul.u32 14564, %v3637_v40  ;;  %v3208_v50 = vmul.u32 58254, %v3203_v62  ;;  %vm7821_vm10 = vmand %vm4398_vm13, %vm4470_vm14 }
 0x25c   :  { %v3209_v2 = vshll.u32 %v3206_v34, 16  ;;  %v7784_v13 = vmul.u32 14564, %v3638_v26  ;;  %v3666_v15 = vand.u32 65535, %v7775_v33  ;;  %v3196_v25 = vsub.s32 %v7645_v9, %v3195_v0 }
 0x25d   :  { %v3211_v56 = vshll.u32 %v3207_v58, 16  ;;  %v3644_v46 = vshll.u32 %v7777_v6, 16  ;;  %v3667_v12 = vshrl.u32 %v7775_v33, 16  ;;  %v3210_v62 = vshrl.u32 %v3206_v34, 16 }
 0x25e   :  { %vm3213_vm0 = vc.u32 %v3205_v14, %v3209_v2  ;;  %v3215_v29 = vadd.s32 %v3209_v2, %v3205_v14  ;;  %vm4026_vm4 = vcmp.ne.s32.totalorder %v3196_v25, 0  ;;  %vm4098_vm5 = vcmp.lt.s32.totalorder %v3196_v25, 0 }
 0x25f   :  { %v4242_v40 = vadd.s32 18, %v3196_v25  ;;  %v3214_v47 = vsel %vm3213_vm0, 1, %v8687_v53  ;;  %vm4170_vm6 = vmand %vm4098_vm5, %vm4026_vm4  ;;  %v7792_v27 = vadd.f32 %v1508_v17, %v7582_v45  ;;  %v7794_v9 = vmul.u32 58254, %v3666_v15 }
 0x260   :  { %v3216_v42 = vadd.s32 %v3214_v47, %v3208_v50  ;;  %vm3217_vm3 = vc.u32 %v3215_v29, %v3211_v56  ;;  %v7797_v55 = vadd.f32 %v1506_v52, %v7528_v37  ;;  %v3212_v51 = vshrl.u32 %v3207_v58, 16  ;;  %v1080_v47 = vpop.f32.mrf.mxu1 }
 0x261   :  { %8723 = vst [vmem:[#allocation2_spill] sm:$0xff] %v7792_v27  ;;  %v4314_v28 = vsel %vm4170_vm6, %v4242_v40, %v3196_v25  ;;  %v3218_v36 = vsel %vm3217_vm3, 1, %v8687_v53  ;;  %vm4111_vm2 = vcmp.lt.s32.totalorder %v7767_v10, 0  ;;  %v3646_v34 = vshll.u32 %v7784_v13, 16 }
 0x262   :  { %8724 = vst [vmem:[#allocation9_spill] sm:$0xff] %v7797_v55  ;;  %vm4386_vm7 = vcmp.ge.s32.totalorder %v4314_v28, 1  ;;  %vm4458_vm8 = vcmp.le.s32.totalorder %v4314_v28, 16  ;;  %v3220_v14 = vadd.s32 %v3218_v36, %v3216_v42  ;;  %vm7802_vm1 = vc.u32 %v3640_v22, %v3644_v46  ;;  %vm4183_vm11 = vmand %vm4111_vm2, %vm4039_vm15 }
 0x263   :  { %vm4530_vm9 = vmand %vm4386_vm7, %vm4458_vm8  ;;  %v5694_v45 = vpack.c.bf16 %v7792_v27, %v7797_v55  ;;  %v3650_v37 = vadd.s32 %v3644_v46, %v3640_v22  ;;  %v7810_v2 = vadd.s32 368, %v5918_v38  ;;  %v3669_v58 = vmul.u32 14564, %v3666_v15 }
 0x264   :  { %v5466_v52 = vsel %vm4530_vm9, 1.0, %v8686_v41  ;;  %v3221_v50 = vadd.s32 %v3220_v14, %v3210_v62  ;;  %v7812_v25 = vmul.u32 14564, %v3667_v12  ;;  %v3673_v56 = vshll.u32 %v7794_v9, 16  ;;  %v811_v62 = vpop.f32.mrf.mxu0 }
 0x265   :  { %v4890_v17 = vmul.f32 %v5466_v52, %v7715_v48  ;;  %5749 = vst [vmem:[%s8622_s2 + $0xf8] sm:$0xff] %v5694_v45   ;;  %v4255_v46 = vadd.s32 18, %v7767_v10  ;;  %v7827_v15 = vsub.s32 %v7531_v11, %v3601_v59  ;;  %v3629_v29 = vshrl.u32 %v7780_v7, 4  ;;  %v1466_v45 = vpop.f32.mrf.mxu2 }
 0x266   :  { %v3222_v40 = vadd.s32 %v3221_v50, %v3212_v51  ;;  %v3643_v23 = vmul.u32 58254, %v3638_v26  ;;  %v3649_v42 = vsel %vm7802_vm1, 1, %v8687_v53  ;;  %vm3652_vm12 = vc.u32 %v3650_v37, %v3646_v34 }
 0x267   :  { %v7840_v11 = vadd.f32 %v7724_v18, %v4890_v17  ;;  %v5040_v59 = vmul.f32 %v4890_v17, %v7715_v48  ;;  %v3231_v28 = vand.u32 65535, %v7810_v2  ;;  %v3232_v36 = vshrl.u32 %v7810_v2, 16 }
 0x268   :  { %v3223_v7 = vshrl.u32 %v3222_v40, 4  ;;  %v3675_v51 = vshll.u32 %v7812_v25, 16  ;;  %vm3677_vm13 = vc.u32 %v3669_v58, %v3673_v56  ;;  %v3679_v14 = vadd.s32 %v3673_v56, %v3669_v58 }
 0x269   :  { %v7847_v26 = vadd.f32 %v7739_v57, %v5040_v59  ;;  %v7851_v0 = vmul.f32 %v7771_v21, %v7345_v54  ;;  %v7856_v48 = vsel %vm7821_vm10, 1.0, %v8686_v41  ;;  %v7859_v18 = vsel %vm4183_vm11, %v4255_v46, %v7767_v10 }
 0x26a   :  { %v3224_v34 = vmul.u32 18, %v3223_v7  ;;  %v7862_v37 = vadd.s32 18, %v7827_v15  ;;  %v3651_v52 = vadd.s32 %v3649_v42, %v3643_v23  ;;  %v3653_v57 = vsel %vm3652_vm12, 1, %v8687_v53 }
 0x26b   :  { %v3672_v50 = vmul.u32 58254, %v3667_v12  ;;  %v3678_v21 = vsel %vm3677_vm13, 1, %v8687_v53  ;;  %v3235_v56 = vmul.u32 58254, %v3231_v28  ;;  %v7867_v17 = vmul.u32 14564, %v3232_v36 }
 0x26c   :  { %v3225_v58 = vsub.s32 %v7721_v24, %v3224_v34  ;;  %vm4040_vm14 = vcmp.ne.s32.totalorder %v7827_v15, 0  ;;  %vm4112_vm15 = vcmp.lt.s32.totalorder %v7827_v15, 0  ;;  %v3630_v10 = vmul.u32 18, %v3629_v29 }
 0x26d   :  { %v3645_v22 = vshrl.u32 %v7777_v6, 16  ;;  %vm3681_vm0 = vc.u32 %v3679_v14, %v3675_v51  ;;  %v3234_v46 = vmul.u32 14564, %v3231_v28  ;;  %v3655_v23 = vadd.s32 %v3653_v57, %v3651_v52  ;;  %v1082_v51 = vpop.f32.mrf.mxu1  ;;  %v813_v28 = vpop.f32.mrf.mxu0  ;;  %vm4184_vm9 = vmand %vm4112_vm15, %vm4040_vm14 }
 0x26e   :  { %vm4027_vm4 = vcmp.ne.s32.totalorder %v3225_v58, 0  ;;  %vm4099_vm5 = vcmp.lt.s32.totalorder %v3225_v58, 0  ;;  %v4243_v12 = vadd.s32 18, %v3225_v58  ;;  %v3680_v42 = vadd.s32 %v3678_v21, %v3672_v50 }
 0x26f   :  { %vm4171_vm6 = vmand %vm4099_vm5, %vm4027_vm4  ;;  %v3237_v24 = vmul.u32 58254, %v3232_v36  ;;  %v3238_v59 = vshll.u32 %v3235_v56, 16  ;;  %v3682_v7 = vsel %vm3681_vm0, 1, %v8687_v53  ;;  %v7875_v34 = vadd.s32 496, %v5918_v38 }
 0x270   :  { %v4315_v29 = vsel %vm4171_vm6, %v4243_v12, %v3225_v58  ;;  %v3240_v6 = vshll.u32 %v7867_v17, 16  ;;  %v1081_v14 = vadd.f32 %v1080_v47, %v811_v62  ;;  %v3674_v52 = vshrl.u32 %v7794_v9, 16  ;;  %v1468_v62 = vpop.f32.mrf.mxu2 }
 0x271   :  { %vm4387_vm3 = vcmp.ge.s32.totalorder %v4315_v29, 1  ;;  %vm4459_vm7 = vcmp.le.s32.totalorder %v4315_v29, 16  ;;  %vm3242_vm8 = vc.u32 %v3234_v46, %v3238_v59  ;;  %v3244_v57 = vadd.s32 %v3238_v59, %v3234_v46 }
 0x272   :  { %vm4531_vm2 = vmand %vm4387_vm3, %vm4459_vm7  ;;  %v3243_v36 = vsel %vm3242_vm8, 1, %v8687_v53  ;;  %v7881_v50 = vadd.s32 376, %v5918_v38  ;;  %v3684_v21 = vadd.s32 %v3682_v7, %v3680_v42  ;;  %v1083_v40 = vadd.f32 %v1082_v51, %v813_v28  ;;  %v1511_v51 = vpop.f32.mrf.mxu3 }
 0x273   :  { %v5467_v58 = vsel %vm4531_vm2, 1.0, %v8686_v41  ;;  %v3245_v12 = vadd.s32 %v3243_v36, %v3237_v24  ;;  %v3695_v27 = vand.u32 65535, %v7875_v34  ;;  %v3239_v47 = vshrl.u32 %v3235_v56, 16 }
 0x274   :  { %v4891_v29 = vmul.f32 %v5467_v58, %v7718_v4  ;;  %vm3246_vm1 = vc.u32 %v3244_v57, %v3240_v6  ;;  %v7886_v9 = vadd.f32 %v1466_v45, %v1081_v14  ;;  %v3241_v55 = vshrl.u32 %v7867_v17, 16 }
 0x275   :  { %v3247_v46 = vsel %vm3246_vm1, 1, %v8687_v53  ;;  %v7890_v59 = vadd.f32 %v1468_v62, %v1083_v40  ;;  %v3260_v28 = vand.u32 65535, %v7881_v50  ;;  %v3656_v56 = vadd.s32 %v3655_v23, %v3645_v22  ;;  %v8729_v22 = vld [vmem:[#allocation8_spill] sm:$0xff] }
 0x276   :  { %v7893_v42 = vadd.f32 %v7840_v11, %v4891_v29  ;;  %v5041_v24 = vmul.f32 %v4891_v29, %v7718_v4  ;;  %v3249_v7 = vadd.s32 %v3247_v46, %v3245_v12  ;;  %v3676_v6 = vshrl.u32 %v7812_v25, 16 }
 0x277   :  { %v3685_v45 = vadd.s32 %v3684_v21, %v3674_v52  ;;  %v3696_v14 = vshrl.u32 %v7875_v34, 16  ;;  %v5654_v4 = vpack.c.bf16 %v7890_v59, %v7886_v9  ;;  %v3261_v40 = vshrl.u32 %v7881_v50, 16 }
 0x278   :  { %v7904_v11 = vadd.f32 %v7847_v26, %v5041_v24  ;;  %v3250_v17 = vadd.s32 %v3249_v7, %v3239_v47  ;;  %v7911_v25 = vadd.f32 %v7314_v30, %v8729_v22  ;;  %v7915_v23 = vmul.f32 %v7760_v1, %v7342_v35 }
 0x279   :  { %v7919_v52 = vmul.f32 %v7851_v0, %v7345_v54  ;;  %v7921_v26 = vmul.u32 58254, %v3695_v27  ;;  %v7925_v36 = vmul.f32 %v7856_v48, %v7400_v31  ;;  %v7928_v57 = vsub.s32 %v7615_v20, %v3630_v10  ;;  %5741 = vst [vmem:[%s8622_s2 + $0xb8] sm:$0xff] %v5654_v4  }
 0x27a   :  { %v3251_v21 = vadd.s32 %v3250_v17, %v3241_v55  ;;  %v3264_v30 = vmul.u32 58254, %v3260_v28  ;;  %vm4399_vm10 = vcmp.ge.s32.totalorder %v7859_v18, 1  ;;  %v7936_v35 = vsel %vm4184_vm9, %v7862_v37, %v7827_v15 }
 0x27b   :  { %8730 = vst [vmem:[#allocation3_spill] sm:$0xff] %v7919_v52  ;;  %v8731_v54 = vshrl.u32 %v7784_v13, 16  ;;  %v3686_v48 = vadd.s32 %v3685_v45, %v3676_v6  ;;  %v7942_v20 = vmul.u32 14564, %v3696_v14  ;;  %v3263_v10 = vmul.u32 14564, %v3260_v28  ;;  %v1513_v6 = vpop.f32.mrf.mxu3 }
 0x27c   :  { %v3252_v55 = vshrl.u32 %v3251_v21, 4  ;;  %v3265_v12 = vmul.u32 14564, %v3261_v40  ;;  %vm4471_vm11 = vcmp.le.s32.totalorder %v7859_v18, 16  ;;  %v3698_v29 = vmul.u32 14564, %v3695_v27 }
 0x27d   :  { %v3657_v58 = vadd.s32 %v3656_v56, %v8731_v54  ;;  %v3702_v47 = vshll.u32 %v7921_v26, 16  ;;  %v3267_v62 = vshll.u32 %v3264_v30, 16  ;;  %vm4041_vm12 = vcmp.ne.s32.totalorder %v7928_v57, 0  ;;  %vm7970_vm7 = vmand %vm4399_vm10, %vm4471_vm11 }
 0x27e   :  { %vm4113_vm13 = vcmp.lt.s32.totalorder %v7928_v57, 0  ;;  %v4257_v13 = vadd.s32 18, %v7928_v57  ;;  %v3253_v15 = vmul.u32 18, %v3252_v55  ;;  %vm4400_vm14 = vcmp.ge.s32.totalorder %v7936_v35, 1 }
 0x27f   :  { %v3658_v37 = vshrl.u32 %v3657_v58, 4  ;;  %v3687_v46 = vshrl.u32 %v3686_v48, 4  ;;  %v3266_v24 = vmul.u32 58254, %v3261_v40  ;;  %v3269_v7 = vshll.u32 %v3265_v12, 16  ;;  %vm7980_vm8 = vmand %vm4113_vm13, %vm4041_vm12 }
 0x280   :  { %v3704_v28 = vshll.u32 %v7942_v20, 16  ;;  %v7952_v27 = vadd.s32 504, %v5918_v38  ;;  %v3254_v56 = vsub.s32 %v7810_v2, %v3253_v15  ;;  %vm3271_vm15 = vc.u32 %v3263_v10, %v3267_v62 }
 0x281   :  { %vm7955_vm0 = vc.u32 %v3698_v29, %v3702_v47  ;;  %v3708_v17 = vadd.s32 %v3702_v47, %v3698_v29  ;;  %v3272_v4 = vsel %vm3271_vm15, 1, %v8687_v53  ;;  %v3273_v22 = vadd.s32 %v3267_v62, %v3263_v10 }
 0x282   :  { %vm4028_vm4 = vcmp.ne.s32.totalorder %v3254_v56, 0  ;;  %vm4100_vm5 = vcmp.lt.s32.totalorder %v3254_v56, 0  ;;  %v4244_v40 = vadd.s32 18, %v3254_v56  ;;  %v7961_v21 = vadd.f32 %v1511_v51, %v7586_v63 }
 0x283   :  { %vm4172_vm6 = vmand %vm4100_vm5, %vm4028_vm4  ;;  %v3268_v54 = vshrl.u32 %v3264_v30, 16  ;;  %v3274_v58 = vadd.s32 %v3272_v4, %v3266_v24  ;;  %vm3275_vm3 = vc.u32 %v3273_v22, %v3269_v7  ;;  %v7964_v2 = vadd.f32 %v1513_v6, %v7595_v60  ;;  %v1085_v4 = vpop.f32.mrf.mxu1  ;;  %v816_v22 = vpop.f32.mrf.mxu0 }
 0x284   :  { %8734 = vst [vmem:[#allocation10_spill] sm:$0xff] %v7961_v21  ;;  %v3724_v55 = vand.u32 65535, %v7952_v27  ;;  %v4316_v10 = vsel %vm4172_vm6, %v4244_v40, %v3254_v56  ;;  %v3270_v63 = vshrl.u32 %v3265_v12, 16  ;;  %v3276_v51 = vsel %vm3275_vm3, 1, %v8687_v53 }
 0x285   :  { %8735 = vst [vmem:[#allocation4_spill] sm:$0xff] %v7964_v2  ;;  %vm4388_vm2 = vcmp.ge.s32.totalorder %v4316_v10, 1  ;;  %vm4460_vm1 = vcmp.le.s32.totalorder %v4316_v10, 16  ;;  %v3278_v18 = vadd.s32 %v3276_v51, %v3274_v58  ;;  %v5699_v30 = vpack.c.bf16 %v7964_v2, %v7961_v21 }
 0x286   :  { %vm4472_vm9 = vcmp.le.s32.totalorder %v7936_v35, 16  ;;  %v3659_v29 = vmul.u32 18, %v3658_v37  ;;  %v3688_v12 = vmul.u32 18, %v3687_v46  ;;  %v3701_v47 = vmul.u32 58254, %v3696_v14  ;;  %vm4532_vm10 = vmand %vm4388_vm2, %vm4460_vm1 }
 0x287   :  { %v3707_v62 = vsel %vm7955_vm0, 1, %v8687_v53  ;;  %v5468_v15 = vsel %vm4532_vm10, 1.0, %v8686_v41  ;;  %v3279_v24 = vadd.s32 %v3278_v18, %v3268_v54  ;;  %5750 = vst [vmem:[%s8622_s2 + $0x100] sm:$0xff] %v5699_v30   ;;  %v7997_v7 = vadd.s32 384, %v5918_v38  ;;  %vm4544_vm12 = vmand %vm4400_vm14, %vm4472_vm9 }
 0x288   :  { %vm7999_vm11 = vc.u32 %v3708_v17, %v3704_v28  ;;  %v3725_v14 = vshrl.u32 %v7952_v27, 16  ;;  %v8004_v46 = vmul.u32 58254, %v3724_v55  ;;  %v4892_v56 = vmul.f32 %v5468_v15, %v7886_v9 }
 0x289   :  { %v8009_v6 = vmul.f32 %v7925_v36, %v7400_v31  ;;  %v5479_v45 = vsel %vm7970_vm7, 1.0, %v8686_v41  ;;  %v8017_v28 = vsel %vm7980_vm8, %v4257_v13, %v7928_v57  ;;  %v3280_v17 = vadd.s32 %v3279_v24, %v3270_v63 }
 0x28a   :  { %v8024_v31 = vsub.s32 %v7712_v49, %v3659_v29  ;;  %v8027_v40 = vsub.s32 %v7775_v33, %v3688_v12  ;;  %v8030_v54 = vadd.f32 %v7893_v42, %v4892_v56  ;;  %v5042_v57 = vmul.f32 %v4892_v56, %v7886_v9  ;;  %v1471_v42 = vpop.f32.mrf.mxu2 }
 0x28b   :  { %8742 = vst [vmem:[#allocation11_spill] sm:$0xff] %v8009_v6  ;;  %v3709_v13 = vadd.s32 %v3707_v62, %v3701_v47  ;;  %v3711_v58 = vsel %vm7999_vm11, 1, %v8687_v53  ;;  %v3281_v48 = vshrl.u32 %v3280_v17, 4  ;;  %v3289_v35 = vand.u32 65535, %v7997_v7 }
 0x28c   :  { %v3727_v10 = vmul.u32 14564, %v3724_v55  ;;  %v8037_v63 = vmul.u32 14564, %v3725_v14  ;;  %v3731_v49 = vshll.u32 %v8004_v46, 16  ;;  %v8041_v33 = vadd.f32 %v7904_v11, %v5042_v57 }
 0x28d   :  { %v8044_v51 = vmul.f32 %v5479_v45, %v7397_v43  ;;  %v8047_v9 = vsel %vm4544_vm12, 1.0, %v8686_v41  ;;  %v3282_v60 = vmul.u32 18, %v3281_v48  ;;  %v3290_v18 = vshrl.u32 %v7997_v7, 16  ;;  %v1087_v48 = vpop.f32.mrf.mxu1 }
 0x28e   :  { %vm4042_vm13 = vcmp.ne.s32.totalorder %v8024_v31, 0  ;;  %vm4114_vm14 = vcmp.lt.s32.totalorder %v8024_v31, 0  ;;  %v8053_v55 = vadd.s32 18, %v8024_v31  ;;  %v8056_v11 = vadd.s32 512, %v5918_v38 }
 0x28f   :  { %8743 = vst [vmem:[#allocation5_spill] sm:$0xff] %v8044_v51  ;;  %vm4401_vm15 = vcmp.ge.s32.totalorder %v8017_v28, 1  ;;  %vm4473_vm0 = vcmp.le.s32.totalorder %v8017_v28, 16  ;;  %v3703_v30 = vshrl.u32 %v7921_v26, 16  ;;  %v3713_v29 = vadd.s32 %v3711_v58, %v3709_v13 }
 0x290   :  { %v3283_v12 = vsub.s32 %v7881_v50, %v3282_v60  ;;  %v3293_v47 = vmul.u32 58254, %v3289_v35  ;;  %vm4043_vm4 = vcmp.ne.s32.totalorder %v8027_v40, 0  ;;  %vm4115_vm5 = vcmp.lt.s32.totalorder %v8027_v40, 0  ;;  %v818_v60 = vpop.f32.mrf.mxu0 }
 0x291   :  { %v3733_v62 = vshll.u32 %v8037_v63, 16  ;;  %v3737_v15 = vadd.s32 %v3731_v49, %v3727_v10  ;;  %v3294_v24 = vmul.u32 14564, %v3290_v18  ;;  %v3292_v56 = vmul.u32 14564, %v3289_v35 }
 0x292   :  { %vm4029_vm6 = vcmp.ne.s32.totalorder %v3283_v12, 0  ;;  %vm4101_vm3 = vcmp.lt.s32.totalorder %v3283_v12, 0  ;;  %v4245_v37 = vadd.s32 18, %v3283_v12  ;;  %v3705_v45 = vshrl.u32 %v7942_v20, 16 }
 0x293   :  { %vm3735_vm7 = vc.u32 %v3727_v10, %v3731_v49  ;;  %v3753_v26 = vand.u32 65535, %v8056_v11  ;;  %vm4173_vm8 = vmand %vm4101_vm3, %vm4029_vm6  ;;  %v3296_v50 = vshll.u32 %v3293_v47, 16  ;;  %v3714_v17 = vadd.s32 %v3713_v29, %v3703_v30 }
 0x294   :  { %v4317_v57 = vsel %vm4173_vm8, %v4245_v37, %v3283_v12  ;;  %v3295_v13 = vmul.u32 58254, %v3290_v18  ;;  %v3298_v58 = vshll.u32 %v3294_v24, 16  ;;  %v3730_v2 = vmul.u32 58254, %v3725_v14  ;;  %v1473_v14 = vpop.f32.mrf.mxu2  ;;  %vm8089_vm6 = vmand %vm4114_vm14, %vm4042_vm13 }
 0x295   :  { %vm4389_vm2 = vcmp.ge.s32.totalorder %v4317_v57, 1  ;;  %vm4461_vm1 = vcmp.le.s32.totalorder %v4317_v57, 16  ;;  %v1086_v21 = vadd.f32 %v1085_v4, %v816_v22  ;;  %v3736_v6 = vsel %vm3735_vm7, 1, %v8687_v53  ;;  %vm8101_vm3 = vmand %vm4401_vm15, %vm4473_vm0 }
 0x296   :  { %vm8068_vm9 = vc.u32 %v3737_v15, %v3733_v62  ;;  %vm4533_vm10 = vmand %vm4389_vm2, %vm4461_vm1  ;;  %vm3300_vm11 = vc.u32 %v3292_v56, %v3296_v50  ;;  %v3302_v20 = vadd.s32 %v3296_v50, %v3292_v56  ;;  %v8072_v10 = vmul.u32 58254, %v3753_v26 }
 0x297   :  { %v5469_v49 = vsel %vm4533_vm10, 1.0, %v8686_v41  ;;  %v3301_v18 = vsel %vm3300_vm11, 1, %v8687_v53  ;;  %v1088_v30 = vadd.f32 %v1087_v48, %v818_v60  ;;  %v3297_v4 = vshrl.u32 %v3293_v47, 16  ;;  %v1516_v60 = vpop.f32.mrf.mxu3  ;;  %vm4187_vm13 = vmand %vm4115_vm5, %vm4043_vm4 }
 0x298   :  { %v4893_v29 = vmul.f32 %v5469_v49, %v7890_v59  ;;  %v3303_v22 = vadd.s32 %v3301_v18, %v3295_v13  ;;  %vm3304_vm12 = vc.u32 %v3302_v20, %v3298_v58  ;;  %v8077_v12 = vadd.f32 %v1471_v42, %v1086_v21 }
 0x299   :  { %v3305_v62 = vsel %vm3304_vm12, 1, %v8687_v53  ;;  %v8080_v15 = vadd.f32 %v1473_v14, %v1088_v30  ;;  %v8083_v37 = vadd.s32 392, %v5918_v38  ;;  %v3299_v42 = vshrl.u32 %v3294_v24, 16 }
 0x29a   :  { %v8094_v47 = vadd.f32 %v8030_v54, %v4893_v29  ;;  %v5043_v21 = vmul.f32 %v4893_v29, %v7890_v59  ;;  %v3307_v50 = vadd.s32 %v3305_v62, %v3303_v22  ;;  %v4259_v13 = vadd.s32 18, %v8027_v40 }
 0x29b   :  { %v3754_v58 = vshrl.u32 %v8056_v11, 16  ;;  %v3756_v48 = vmul.u32 14564, %v3753_v26  ;;  %v3760_v54 = vshll.u32 %v8072_v10, 16  ;;  %v3738_v59 = vadd.s32 %v3736_v6, %v3730_v2 }
 0x29c   :  { %v8113_v28 = vadd.f32 %v8041_v33, %v5043_v21  ;;  %v3308_v24 = vadd.s32 %v3307_v50, %v3297_v4  ;;  %v5659_v20 = vpack.c.bf16 %v8080_v15, %v8077_v12  ;;  %v8119_v49 = vmul.f32 %v8044_v51, %v7397_v43 }
 0x29d   :  { %v4330_v26 = vsel %vm8089_vm6, %v8053_v55, %v8024_v31  ;;  %v3740_v2 = vsel %vm8068_vm9, 1, %v8687_v53  ;;  %v3318_v6 = vand.u32 65535, %v8083_v37  ;;  %v8131_v33 = vmul.f32 %v8047_v9, %v7481_v44 }
 0x29e   :  { %8750 = vst [vmem:[#allocation12_spill] sm:$0xff] %v8119_v49  ;;  %v5481_v43 = vsel %vm8101_vm3, 1.0, %v8686_v41  ;;  %v3715_v18 = vadd.s32 %v3714_v17, %v3705_v45  ;;  %v3309_v30 = vadd.s32 %v3308_v24, %v3299_v42  ;;  %v4331_v31 = vsel %vm4187_vm13, %v4259_v13, %v8027_v40 }
 0x29f   :  { %8751 = vst [vmem:[#allocation6_spill] sm:$0xff] %v8131_v33  ;;  %v8140_v55 = vmul.u32 14564, %v3754_v58  ;;  %vm3764_vm14 = vc.u32 %v3756_v48, %v3760_v54  ;;  %v3319_v35 = vshrl.u32 %v8083_v37, 16  ;;  %vm4402_vm15 = vcmp.ge.s32.totalorder %v4330_v26, 1 }
 0x2a0   :  { %5742 = vst [vmem:[%s8622_s2 + $0xc0] sm:$0xff] %v5659_v20   ;;  %v3732_v9 = vshrl.u32 %v8004_v46, 16  ;;  %v3742_v14 = vadd.s32 %v3740_v2, %v3738_v59  ;;  %v3310_v29 = vshrl.u32 %v3309_v30, 4  ;;  %vm4474_vm0 = vcmp.le.s32.totalorder %v4330_v26, 16 }
 0x2a1   :  { %v3759_v4 = vmul.u32 58254, %v3754_v58  ;;  %v3321_v45 = vmul.u32 14564, %v3318_v6  ;;  %v3322_v17 = vmul.u32 58254, %v3318_v6  ;;  %vm4403_vm4 = vcmp.ge.s32.totalorder %v4331_v31, 1  ;;  %v1518_v6 = vpop.f32.mrf.mxu3  ;;  %vm4546_vm10 = vmand %vm4402_vm15, %vm4474_vm0 }
 0x2a2   :  { %v3716_v22 = vshrl.u32 %v3715_v18, 4  ;;  %v3765_v62 = vsel %vm3764_vm14, 1, %v8687_v53  ;;  %v3311_v56 = vmul.u32 18, %v3310_v29  ;;  %v3323_v40 = vmul.u32 14564, %v3319_v35 }
 0x2a3   :  { %v3762_v21 = vshll.u32 %v8140_v55, 16  ;;  %v3766_v42 = vadd.s32 %v3760_v54, %v3756_v48  ;;  %v3324_v50 = vmul.u32 58254, %v3319_v35  ;;  %v3325_v57 = vshll.u32 %v3322_v17, 16 }
 0x2a4   :  { %v3734_v13 = vshrl.u32 %v8037_v63, 16  ;;  %v3743_v46 = vadd.s32 %v3742_v14, %v3732_v9  ;;  %v3312_v59 = vsub.s32 %v7997_v7, %v3311_v56  ;;  %v3327_v24 = vshll.u32 %v3323_v40, 16 }
 0x2a5   :  { %v3767_v58 = vadd.s32 %v3765_v62, %v3759_v4  ;;  %v8149_v20 = vadd.s32 520, %v5918_v38  ;;  %vm3329_vm5 = vc.u32 %v3321_v45, %v3325_v57  ;;  %v3331_v2 = vadd.s32 %v3325_v57, %v3321_v45  ;;  %v1090_v57 = vpop.f32.mrf.mxu1 }
 0x2a6   :  { %vm4030_vm7 = vcmp.ne.s32.totalorder %v3312_v59, 0  ;;  %vm4102_vm8 = vcmp.lt.s32.totalorder %v3312_v59, 0  ;;  %v4246_v18 = vadd.s32 18, %v3312_v59  ;;  %v3330_v48 = vsel %vm3329_vm5, 1, %v8687_v53 }
 0x2a7   :  { %vm8152_vm2 = vc.u32 %v3766_v42, %v3762_v21  ;;  %vm4174_vm1 = vmand %vm4102_vm8, %vm4030_vm7  ;;  %v3326_v63 = vshrl.u32 %v3322_v17, 16  ;;  %v3332_v7 = vadd.s32 %v3330_v48, %v3324_v50  ;;  %vm3333_vm9 = vc.u32 %v3331_v2, %v3327_v24 }
 0x2a8   :  { %v4318_v30 = vsel %vm4174_vm1, %v4246_v18, %v3312_v59  ;;  %v8157_v35 = vadd.f32 %v1516_v60, %v7676_v5  ;;  %v3334_v9 = vsel %vm3333_vm9, 1, %v8687_v53  ;;  %v8161_v14 = vadd.f32 %v1518_v6, %v7680_v3  ;;  %v821_v59 = vpop.f32.mrf.mxu0 }
 0x2a9   :  { %vm4390_vm11 = vcmp.ge.s32.totalorder %v4318_v30, 1  ;;  %vm4462_vm12 = vcmp.le.s32.totalorder %v4318_v30, 16  ;;  %v3328_v29 = vshrl.u32 %v3323_v40, 16  ;;  %v3336_v4 = vadd.s32 %v3334_v9, %v3332_v7 }
 0x2aa   :  { %8754 = vst [vmem:[#allocation13_spill] sm:$0xff] %v8157_v35  ;;  %vm4475_vm6 = vcmp.le.s32.totalorder %v4331_v31, 16  ;;  %v3717_v45 = vmul.u32 18, %v3716_v22  ;;  %v3769_v17 = vsel %vm8152_vm2, 1, %v8687_v53  ;;  %vm4534_vm3 = vmand %vm4390_vm11, %vm4462_vm12  ;;  %v5704_v5 = vpack.c.bf16 %v8161_v14, %v8157_v35 }
 0x2ab   :  { %8755 = vst [vmem:[#allocation7_spill] sm:$0xff] %v8161_v14  ;;  %v8171_v3 = vmul.f32 %v5481_v43, %v7483_v19  ;;  %v3782_v60 = vand.u32 65535, %v8149_v20  ;;  %v5470_v26 = vsel %vm4534_vm3, 1.0, %v8686_v41  ;;  %v3337_v62 = vadd.s32 %v3336_v4, %v3326_v63  ;;  %vm4547_vm13 = vmand %vm4403_vm4, %vm4475_vm6 }
 0x2ac   :  { %v8177_v56 = vmul.f32 %v8131_v33, %v7481_v44  ;;  %v5482_v22 = vsel %vm4546_vm10, 1.0, %v8686_v41  ;;  %v3744_v40 = vadd.s32 %v3743_v46, %v3734_v13  ;;  %v4894_v21 = vmul.f32 %v5470_v26, %v8077_v12  ;;  %5751 = vst [vmem:[%s8622_s2 + $0x108] sm:$0xff] %v5704_v5  }
 0x2ad   :  { %8756 = vst [vmem:[#allocation8_spill] sm:$0xff] %v8171_v3  ;;  %v3761_v43 = vshrl.u32 %v8072_v10, 16  ;;  %v3771_v42 = vadd.s32 %v3769_v17, %v3767_v58  ;;  %v3338_v50 = vadd.s32 %v3337_v62, %v3328_v29  ;;  %v8187_v44 = vadd.s32 400, %v5918_v38 }
 0x2ae   :  { %8757 = vst [vmem:[#allocation14_spill] sm:$0xff] %v8177_v56  ;;  %v8190_v24 = vsub.s32 %v7875_v34, %v3717_v45  ;;  %v3783_v13 = vshrl.u32 %v8149_v20, 16  ;;  %v8194_v46 = vadd.f32 %v8094_v47, %v4894_v21  ;;  %v5044_v31 = vmul.f32 %v4894_v21, %v8077_v12  ;;  %v1476_v47 = vpop.f32.mrf.mxu2 }
 0x2af   :  { %v8199_v10 = vmul.f32 %v8171_v3, %v7483_v19  ;;  %v8202_v58 = vmul.f32 %v5482_v22, %v7624_v32  ;;  %v8204_v2 = vmul.u32 58254, %v3782_v60  ;;  %v3339_v6 = vshrl.u32 %v3338_v50, 4 }
 0x2b0   :  { %v8207_v34 = vsel %vm4547_vm13, 1.0, %v8686_v41  ;;  %v3745_v18 = vshrl.u32 %v3744_v40, 4  ;;  %v8210_v48 = vadd.f32 %v8113_v28, %v5044_v31  ;;  %v3347_v12 = vand.u32 65535, %v8187_v44 }
 0x2b1   :  { %8758 = vst [vmem:[#allocation15_spill] sm:$0xff] %v8199_v10  ;;  %v3763_v54 = vshrl.u32 %v8140_v55, 16  ;;  %v3772_v19 = vadd.s32 %v3771_v42, %v3761_v43  ;;  %v3340_v63 = vmul.u32 18, %v3339_v6  ;;  %v3348_v7 = vshrl.u32 %v8187_v44, 16  ;;  %v1092_v6 = vpop.f32.mrf.mxu1 }
 0x2b2   :  { %8759 = vst [vmem:[#allocation16_spill] sm:$0xff] %v8202_v58  ;;  %vm4044_vm14 = vcmp.ne.s32.totalorder %v8190_v24, 0  ;;  %vm4116_vm15 = vcmp.lt.s32.totalorder %v8190_v24, 0  ;;  %v3785_v30 = vmul.u32 14564, %v3782_v60  ;;  %v8217_v9 = vmul.u32 14564, %v3783_v13 }
 0x2b3   :  { %v3789_v29 = vshll.u32 %v8204_v2, 16  ;;  %v8221_v28 = vadd.s32 528, %v5918_v38  ;;  %v3341_v4 = vsub.s32 %v8083_v37, %v3340_v63  ;;  %v3351_v45 = vmul.u32 58254, %v3347_v12  ;;  %vm4188_vm11 = vmand %vm4116_vm15, %vm4044_vm14 }
 0x2b4   :  { %v4260_v55 = vadd.s32 18, %v8190_v24  ;;  %v8225_v17 = vmul.u32 18, %v3745_v18  ;;  %v3350_v5 = vmul.u32 14564, %v3347_v12  ;;  %v3352_v26 = vmul.u32 14564, %v3348_v7  ;;  %v823_v18 = vpop.f32.mrf.mxu0 }
 0x2b5   :  { %v3773_v62 = vadd.s32 %v3772_v19, %v3763_v54  ;;  %vm4031_vm0 = vcmp.ne.s32.totalorder %v3341_v4, 0  ;;  %vm4103_vm4 = vcmp.lt.s32.totalorder %v3341_v4, 0  ;;  %v4247_v60 = vadd.s32 18, %v3341_v4 }
 0x2b6   :  { %v3788_v22 = vmul.u32 58254, %v3783_v13  ;;  %v3791_v40 = vshll.u32 %v8217_v9, 16  ;;  %vm4175_vm5 = vmand %vm4103_vm4, %vm4031_vm0  ;;  %v3353_v21 = vmul.u32 58254, %v3348_v7  ;;  %v3354_v43 = vshll.u32 %v3351_v45, 16  ;;  %v1478_v35 = vpop.f32.mrf.mxu2 }
 0x2b7   :  { %vm8228_vm7 = vc.u32 %v3785_v30, %v3789_v29  ;;  %v3811_v37 = vand.u32 65535, %v8221_v28  ;;  %v4319_v50 = vsel %vm4175_vm5, %v4247_v60, %v3341_v4  ;;  %v3356_v31 = vshll.u32 %v3352_v26, 16 }
 0x2b8   :  { %vm4391_vm8 = vcmp.ge.s32.totalorder %v4319_v50, 1  ;;  %vm4463_vm2 = vcmp.le.s32.totalorder %v4319_v50, 16  ;;  %v1091_v12 = vadd.f32 %v1090_v57, %v821_v59  ;;  %vm3358_vm1 = vc.u32 %v3350_v5, %v3354_v43 }
 0x2b9   :  { %v3795_v13 = vadd.s32 %v3789_v29, %v3785_v30  ;;  %vm4535_vm9 = vmand %vm4391_vm8, %vm4463_vm2  ;;  %v8234_v54 = vadd.s32 536, %v5918_v38  ;;  %v3359_v19 = vsel %vm3358_vm1, 1, %v8687_v53  ;;  %v3360_v63 = vadd.s32 %v3354_v43, %v3350_v5  ;;  %v1521_v43 = vpop.f32.mrf.mxu3 }
 0x2ba   :  { %v3812_v7 = vshrl.u32 %v8221_v28, 16  ;;  %v5471_v14 = vsel %vm4535_vm9, 1.0, %v8686_v41  ;;  %v3361_v4 = vadd.s32 %v3359_v19, %v3353_v21  ;;  %v1093_v60 = vadd.f32 %v1092_v6, %v823_v18 }
 0x2bb   :  { %v8239_v10 = vmul.u32 58254, %v3811_v37  ;;  %v4895_v57 = vmul.f32 %v5471_v14, %v8080_v15  ;;  %v3355_v59 = vshrl.u32 %v3351_v45, 16  ;;  %vm3362_vm10 = vc.u32 %v3360_v63, %v3356_v31 }
 0x2bc   :  { %v8242_v30 = vadd.f32 %v1476_v47, %v1091_v12  ;;  %v3363_v29 = vsel %vm3362_vm10, 1, %v8687_v53  ;;  %v8245_v50 = vadd.f32 %v1478_v35, %v1093_v60  ;;  %v8248_v5 = vadd.s32 408, %v5918_v38 }
 0x2bd   :  { %v8255_v21 = vadd.f32 %v8194_v46, %v4895_v57  ;;  %v5045_v14 = vmul.f32 %v4895_v57, %v8080_v15  ;;  %v3357_v45 = vshrl.u32 %v3352_v26, 16  ;;  %v3365_v47 = vadd.s32 %v3363_v29, %v3361_v4 }
 0x2be   :  { %v3774_v31 = vshrl.u32 %v3773_v62, 4  ;;  %v3794_v35 = vsel %vm8228_vm7, 1, %v8687_v53  ;;  %vm8261_vm12 = vc.u32 %v3795_v13, %v3791_v40  ;;  %v3814_v18 = vmul.u32 14564, %v3811_v37 }
 0x2bf   :  { %v3818_v12 = vshll.u32 %v8239_v10, 16  ;;  %v8267_v46 = vadd.f32 %v8210_v48, %v5045_v14  ;;  %v3366_v19 = vadd.s32 %v3365_v47, %v3355_v59  ;;  %v5664_v15 = vpack.c.bf16 %v8245_v50, %v8242_v30 }
 0x2c0   :  { %v4332_v26 = vsel %vm4188_vm11, %v4260_v55, %v8190_v24  ;;  %v3840_v62 = vand.u32 65535, %v8234_v54  ;;  %v3376_v42 = vand.u32 65535, %v8248_v5  ;;  %v3377_v40 = vshrl.u32 %v8248_v5, 16 }
 0x2c1   :  { %v8277_v37 = vmul.f32 %v8202_v58, %v7624_v32  ;;  %v3796_v13 = vadd.s32 %v3794_v35, %v3788_v22  ;;  %v8279_v63 = vmul.u32 14564, %v3812_v7  ;;  %v3367_v48 = vadd.s32 %v3366_v19, %v3357_v45  ;;  %5743 = vst [vmem:[%s8622_s2 + $0xc8] sm:$0xff] %v5664_v15   ;;  %v1523_v58 = vpop.f32.mrf.mxu3 }
 0x2c2   :  { %v8286_v24 = vmul.f32 %v8207_v34, %v7628_v8  ;;  %v8290_v55 = vsub.s32 %v7952_v27, %v8225_v17  ;;  %v8292_v4 = vmul.u32 18, %v3774_v31  ;;  %v3798_v32 = vsel %vm8261_vm12, 1, %v8687_v53 }
 0x2c3   :  { %8764 = vst [vmem:[#allocation17_spill] sm:$0xff] %v8277_v37  ;;  %vm4404_vm6 = vcmp.ge.s32.totalorder %v4332_v26, 1  ;;  %vm4476_vm3 = vcmp.le.s32.totalorder %v4332_v26, 16  ;;  %v3790_v22 = vshrl.u32 %v8204_v2, 16  ;;  %vm3822_vm13 = vc.u32 %v3814_v18, %v3818_v12 }
 0x2c4   :  { %8765 = vst [vmem:[#allocation18_spill] sm:$0xff] %v8286_v24  ;;  %v3841_v60 = vshrl.u32 %v8234_v54, 16  ;;  %v3368_v57 = vshrl.u32 %v3367_v48, 4  ;;  %v8299_v34 = vmul.u32 58254, %v3840_v62  ;;  %v3379_v59 = vmul.u32 14564, %v3376_v42  ;;  %vm8324_vm2 = vmand %vm4404_vm6, %vm4476_vm3 }
 0x2c5   :  { %v3380_v29 = vmul.u32 58254, %v3376_v42  ;;  %v3381_v27 = vmul.u32 14564, %v3377_v40  ;;  %v3800_v17 = vadd.s32 %v3798_v32, %v3796_v13  ;;  %v3817_v14 = vmul.u32 58254, %v3812_v7 }
 0x2c6   :  { %v3820_v45 = vshll.u32 %v8279_v63, 16  ;;  %v3369_v47 = vmul.u32 18, %v3368_v57  ;;  %v3823_v31 = vsel %vm3822_vm13, 1, %v8687_v53  ;;  %v3824_v35 = vadd.s32 %v3818_v12, %v3814_v18 }
 0x2c7   :  { %v3382_v6 = vmul.u32 58254, %v3377_v40  ;;  %v3383_v19 = vshll.u32 %v3380_v29, 16  ;;  %v3843_v2 = vmul.u32 14564, %v3840_v62  ;;  %v8303_v15 = vmul.u32 14564, %v3841_v60 }
 0x2c8   :  { %v3370_v48 = vsub.s32 %v8187_v44, %v3369_v47  ;;  %v3385_v37 = vshll.u32 %v3381_v27, 16  ;;  %v3847_v42 = vshll.u32 %v8299_v34, 16  ;;  %v8308_v13 = vadd.s32 544, %v5918_v38 }
 0x2c9   :  { %vm3387_vm14 = vc.u32 %v3379_v59, %v3383_v19  ;;  %v3389_v7 = vadd.s32 %v3383_v19, %v3379_v59  ;;  %v3384_v12 = vshrl.u32 %v3380_v29, 16  ;;  %v8312_v44 = vadd.f32 %v1523_v58, %v7745_v39 }
 0x2ca   :  { %vm4032_vm15 = vcmp.ne.s32.totalorder %v3370_v48, 0  ;;  %vm4104_vm0 = vcmp.lt.s32.totalorder %v3370_v48, 0  ;;  %v4248_v32 = vadd.s32 18, %v3370_v48  ;;  %v3388_v18 = vsel %vm3387_vm14, 1, %v8687_v53 }
 0x2cb   :  { %vm4176_vm4 = vmand %vm4104_vm0, %vm4032_vm15  ;;  %v3390_v62 = vadd.s32 %v3388_v18, %v3382_v6  ;;  %vm3391_vm5 = vc.u32 %v3389_v7, %v3385_v37  ;;  %8766 = vst [vmem:[#allocation19_spill] sm:$0xff] %v8312_v44  ;;  %v3825_v40 = vadd.s32 %v3823_v31, %v3817_v14  ;;  %v8315_v47 = vadd.f32 %v1521_v43, %v7732_v61  ;;  %v826_v6 = vpop.f32.mrf.mxu0 }
 0x2cc   :  { %v4320_v57 = vsel %vm4176_vm4, %v4248_v32, %v3370_v48  ;;  %v3392_v56 = vsel %vm3391_vm5, 1, %v8687_v53  ;;  %vm3826_vm7 = vc.u32 %v3824_v35, %v3820_v45  ;;  %v3849_v59 = vshll.u32 %v8303_v15, 16  ;;  %v1095_v35 = vpop.f32.mrf.mxu1 }
 0x2cd   :  { %8767 = vst [vmem:[#allocation20_spill] sm:$0xff] %v8315_v47  ;;  %v3386_v19 = vshrl.u32 %v3381_v27, 16  ;;  %v3394_v3 = vadd.s32 %v3392_v56, %v3390_v62  ;;  %vm3851_vm8 = vc.u32 %v3843_v2, %v3847_v42  ;;  %v3853_v49 = vadd.s32 %v3847_v42, %v3843_v2 }
 0x2ce   :  { %v3869_v29 = vand.u32 65535, %v8308_v13  ;;  %v5709_v39 = vpack.c.bf16 %v8312_v44, %v8315_v47  ;;  %vm4392_vm1 = vcmp.ge.s32.totalorder %v4320_v57, 1  ;;  %vm4464_vm9 = vcmp.le.s32.totalorder %v4320_v57, 16 }
 0x2cf   :  { %v3395_v61 = vadd.s32 %v3394_v3, %v3384_v12  ;;  %v8329_v43 = vadd.s32 416, %v5918_v38  ;;  %v3792_v56 = vshrl.u32 %v8217_v9, 16  ;;  %v3801_v37 = vadd.s32 %v3800_v17, %v3790_v22  ;;  %vm4536_vm11 = vmand %vm4392_vm1, %vm4464_vm9 }
 0x2d0   :  { %v3827_v27 = vsel %vm3826_vm7, 1, %v8687_v53  ;;  %v3846_v14 = vmul.u32 58254, %v3841_v60  ;;  %5752 = vst [vmem:[%s8622_s2 + $0x110] sm:$0xff] %v5709_v39   ;;  %v8338_v26 = vmul.f32 %v8286_v24, %v7628_v8  ;;  %v3852_v45 = vsel %vm3851_vm8, 1, %v8687_v53 }
 0x2d1   :  { %v8656_v3 = vshrl.u32 %v8308_v13, 16  ;;  %v3396_v31 = vadd.s32 %v3395_v61, %v3386_v19  ;;  %v8345_v9 = vsel %vm8324_vm2, 1.0, %v8686_v41  ;;  %v3819_v22 = vshrl.u32 %v8239_v10, 16 }
 0x2d2   :  { %8770 = vst [vmem:[#allocation21_spill] sm:$0xff] %v8338_v26  ;;  %vm3855_vm10 = vc.u32 %v3853_v49, %v3849_v59  ;;  %v8350_v8 = vmul.u32 58254, %v3869_v29  ;;  %v3829_v60 = vadd.s32 %v3827_v27, %v3825_v40  ;;  %v3405_v2 = vand.u32 65535, %v8329_v43  ;;  %v1481_v40 = vpop.f32.mrf.mxu2 }
 0x2d3   :  { %v3397_v17 = vshrl.u32 %v3396_v31, 4  ;;  %v3406_v48 = vshrl.u32 %v8329_v43, 16  ;;  %v8355_v42 = vadd.s32 18, %v8290_v55  ;;  %v8359_v7 = vsub.s32 %v8056_v11, %v8292_v4 }
 0x2d4   :  { %v8361_v10 = vadd.s32 %v3801_v37, %v3792_v56  ;;  %v3854_v49 = vadd.s32 %v3852_v45, %v3846_v14  ;;  %v3856_v32 = vsel %vm3855_vm10, 1, %v8687_v53  ;;  %v5472_v18 = vsel %vm4536_vm11, 1.0, %v8686_v41 }
 0x2d5   :  { %v8367_v12 = vmul.u32 14564, %v8656_v3  ;;  %v3398_v62 = vmul.u32 18, %v3397_v17  ;;  %v3872_v59 = vmul.u32 14564, %v3869_v29  ;;  %v3876_v19 = vshll.u32 %v8350_v8, 16 }
 0x2d6   :  { %v8372_v11 = vadd.s32 552, %v5918_v38  ;;  %v8374_v4 = vadd.s32 %v3829_v60, %v3819_v22  ;;  %v3409_v58 = vmul.u32 58254, %v3405_v2  ;;  %v8377_v61 = vmul.u32 14564, %v3406_v48 }
 0x2d7   :  { %v3399_v39 = vsub.s32 %v8248_v5, %v3398_v62  ;;  %v3848_v56 = vshrl.u32 %v8299_v34, 16  ;;  %v3858_v37 = vadd.s32 %v3856_v32, %v3854_v49  ;;  %v8381_v27 = vmul.f32 %v5472_v18, %v8242_v30  ;;  %v1097_v18 = vpop.f32.mrf.mxu1  ;;  %v828_v62 = vpop.f32.mrf.mxu0 }
 0x2d8   :  { %v3408_v14 = vmul.u32 14564, %v3405_v2  ;;  %v3878_v29 = vshll.u32 %v8367_v12, 16  ;;  %vm8384_vm3 = vc.u32 %v3872_v59, %v3876_v19  ;;  %v3882_v5 = vadd.s32 %v3876_v19, %v3872_v59 }
 0x2d9   :  { %vm4033_vm12 = vcmp.ne.s32.totalorder %v3399_v39, 0  ;;  %vm4105_vm6 = vcmp.lt.s32.totalorder %v3399_v39, 0  ;;  %v4249_v45 = vadd.s32 18, %v3399_v39  ;;  %v3898_v22 = vand.u32 65535, %v8372_v11 }
 0x2da   :  { %vm4177_vm13 = vmand %vm4105_vm6, %vm4033_vm12  ;;  %v3411_v60 = vmul.u32 58254, %v3406_v48  ;;  %v3412_v34 = vshll.u32 %v3409_v58, 16  ;;  %v1096_v49 = vadd.f32 %v1095_v35, %v826_v6  ;;  %v3899_v32 = vshrl.u32 %v8372_v11, 16 }
 0x2db   :  { %v4321_v17 = vsel %vm4177_vm13, %v4249_v45, %v3399_v39  ;;  %v3414_v2 = vshll.u32 %v8377_v61, 16  ;;  %v5046_v57 = vmul.f32 %v8381_v27, %v8242_v30  ;;  %v8395_v48 = vadd.s32 560, %v5918_v38 }
 0x2dc   :  { %vm4393_vm14 = vcmp.ge.s32.totalorder %v4321_v17, 1  ;;  %vm4465_vm15 = vcmp.le.s32.totalorder %v4321_v17, 16  ;;  %vm3416_vm0 = vc.u32 %v3408_v14, %v3412_v34  ;;  %v3418_v19 = vadd.s32 %v3412_v34, %v3408_v14  ;;  %v1526_v14 = vpop.f32.mrf.mxu3  ;;  %v1483_v34 = vpop.f32.mrf.mxu2 }
 0x2dd   :  { %vm4537_vm4 = vmand %vm4393_vm14, %vm4465_vm15  ;;  %v3417_v59 = vsel %vm3416_vm0, 1, %v8687_v53  ;;  %8773 = vst [vmem:[#allocation22_spill] sm:$0xff] %v8395_v48  ;;  %v8398_v35 = vadd.s32 424, %v5918_v38  ;;  %v8401_v39 = vmul.u32 58254, %v3898_v22  ;;  %v1098_v3 = vadd.f32 %v1097_v18, %v828_v62 }
 0x2de   :  { %v5473_v6 = vsel %vm4537_vm4, 1.0, %v8686_v41  ;;  %v3419_v45 = vadd.s32 %v3417_v59, %v3411_v60  ;;  %v8406_v17 = vadd.f32 %v1481_v40, %v1096_v49  ;;  %v3413_v44 = vshrl.u32 %v3409_v58, 16 }
 0x2df   :  { %v8404_v30 = vmul.f32 %v5473_v6, %v8245_v50  ;;  %vm3420_vm5 = vc.u32 %v3418_v19, %v3414_v2  ;;  %v5117_v47 = vadd.f32 %v8267_v46, %v5046_v57  ;;  %v3927_v24 = vand.u32 65535, %v8395_v48 }
 0x2e0   :  { %v3421_v26 = vsel %vm3420_vm5, 1, %v8687_v53  ;;  %v8411_v33 = vadd.f32 %v1483_v34, %v1098_v3  ;;  %v3415_v18 = vshrl.u32 %v8377_v61, 16  ;;  %v3434_v40 = vand.u32 65535, %v8398_v35 }
 0x2e1   :  { %v5047_v60 = vmul.f32 %v8404_v30, %v8245_v50  ;;  %v3423_v62 = vadd.s32 %v3421_v26, %v3419_v45  ;;  %v3901_v58 = vmul.u32 14564, %v3898_v22  ;;  %v8417_v49 = vmul.u32 14564, %v3899_v32 }
 0x2e2   :  { %v3905_v2 = vshll.u32 %v8401_v39, 16  ;;  %v3928_v46 = vshrl.u32 %v8395_v48, 16  ;;  %v5669_v3 = vpack.c.bf16 %v8411_v33, %v8406_v17  ;;  %v3435_v50 = vshrl.u32 %v8398_v35, 16 }
 0x2e3   :  { %v8421_v57 = vadd.f32 %v5117_v47, %v5047_v60  ;;  %v3424_v59 = vadd.s32 %v3423_v62, %v3413_v44  ;;  %v8427_v26 = vadd.s32 %v3858_v37, %v3848_v56  ;;  %v8774_v22 = vshrl.u32 %v8308_v13, 16 }
 0x2e4   :  { %v8431_v6 = vmul.u32 58254, %v3927_v24  ;;  %v3881_v44 = vsel %vm8384_vm3, 1, %v8687_v53  ;;  %5744 = vst [vmem:[%s8622_s2 + $0xd0] sm:$0xff] %v5669_v3   ;;  %v3438_v34 = vmul.u32 58254, %v3434_v40  ;;  %vm3884_vm7 = vc.u32 %v3882_v5, %v3878_v29  ;;  %v1528_v5 = vpop.f32.mrf.mxu3 }
 0x2e5   :  { %v3875_v19 = vmul.u32 58254, %v8774_v22  ;;  %v3425_v47 = vadd.s32 %v3424_v59, %v3415_v18  ;;  %v3907_v56 = vshll.u32 %v8417_v49, 16  ;;  %vm3909_vm8 = vc.u32 %v3901_v58, %v3905_v2 }
 0x2e6   :  { %v3911_v37 = vadd.s32 %v3905_v2, %v3901_v58  ;;  %v8441_v62 = vmul.u32 14564, %v3928_v46  ;;  %v3437_v22 = vmul.u32 14564, %v3434_v40  ;;  %v3439_v61 = vmul.u32 14564, %v3435_v50 }
 0x2e7   :  { %v3426_v60 = vshrl.u32 %v3425_v47, 4  ;;  %v3883_v45 = vadd.s32 %v3881_v44, %v3875_v19  ;;  %v3930_v51 = vmul.u32 14564, %v3927_v24  ;;  %v3934_v31 = vshll.u32 %v8431_v6, 16 }
 0x2e8   :  { %v3441_v18 = vshll.u32 %v3438_v34, 16  ;;  %v3885_v59 = vsel %vm3884_vm7, 1, %v8687_v53  ;;  %v3904_v48 = vmul.u32 58254, %v3899_v32  ;;  %v3910_v3 = vsel %vm3909_vm8, 1, %v8687_v53 }
 0x2e9   :  { %v3427_v29 = vmul.u32 18, %v3426_v60  ;;  %vm8446_vm2 = vc.u32 %v3911_v37, %v3907_v56  ;;  %v8451_v58 = vadd.f32 %v1526_v14, %v7756_v16  ;;  %v3440_v40 = vmul.u32 58254, %v3435_v50 }
 0x2ea   :  { %v3443_v2 = vshll.u32 %v3439_v61, 16  ;;  %v3936_v19 = vshll.u32 %v8441_v62, 16  ;;  %vm3445_vm1 = vc.u32 %v3437_v22, %v3441_v18  ;;  %v8456_v32 = vadd.s32 568, %v5918_v38 }
 0x2eb   :  { %v3428_v24 = vsub.s32 %v8329_v43, %v3427_v29  ;;  %vm4045_vm9 = vcmp.ne.s32.totalorder %v8290_v55, 0  ;;  %vm4117_vm10 = vcmp.lt.s32.totalorder %v8290_v55, 0  ;;  %vm3938_vm11 = vc.u32 %v3930_v51, %v3934_v31 }
 0x2ec   :  { %v3446_v44 = vsel %vm3445_vm1, 1, %v8687_v53  ;;  %v3447_v47 = vadd.s32 %v3441_v18, %v3437_v22  ;;  %v8462_v16 = vadd.f32 %v1528_v5, %v7911_v25  ;;  %v3940_v14 = vadd.s32 %v3934_v31, %v3930_v51  ;;  %vm4189_vm7 = vmand %vm4117_vm10, %vm4045_vm9 }
 0x2ed   :  { %vm4034_vm12 = vcmp.ne.s32.totalorder %v3428_v24, 0  ;;  %vm4106_vm6 = vcmp.lt.s32.totalorder %v3428_v24, 0  ;;  %v4250_v43 = vadd.s32 18, %v3428_v24  ;;  %v3442_v50 = vshrl.u32 %v3438_v34, 16 }
 0x2ee   :  { %vm4178_vm3 = vmand %vm4106_vm6, %vm4034_vm12  ;;  %v3448_v56 = vadd.s32 %v3446_v44, %v3440_v40  ;;  %vm3449_vm13 = vc.u32 %v3447_v47, %v3443_v2  ;;  %v5714_v38 = vpack.c.bf16 %v8462_v16, %v8451_v58  ;;  %v3933_v37 = vmul.u32 58254, %v3928_v46 }
 0x2ef   :  { %v3939_v60 = vsel %vm3938_vm11, 1, %v8687_v53  ;;  %v3450_v29 = vsel %vm3449_vm13, 1, %v8687_v53  ;;  %v3956_v22 = vand.u32 65535, %v8456_v32  ;;  %v4322_v25 = vsel %vm4178_vm3, %v4250_v43, %v3428_v24 }
 0x2f0   :  { %v3444_v18 = vshrl.u32 %v3439_v61, 16  ;;  %v3452_v5 = vadd.s32 %v3450_v29, %v3448_v56  ;;  %5753 = vst [vmem:[%s8622_s2 + $0x118] sm:$0xff] %v5714_v38   ;;  %v3957_v51 = vshrl.u32 %v8456_v32, 16  ;;  %v3912_v34 = vadd.s32 %v3910_v3, %v3904_v48 }
 0x2f1   :  { %vm3942_vm14 = vc.u32 %v3940_v14, %v3936_v19  ;;  %v3959_v31 = vmul.u32 14564, %v3956_v22  ;;  %v3960_v40 = vmul.u32 58254, %v3956_v22  ;;  %v3887_v46 = vadd.s32 %v3885_v59, %v3883_v45 }
 0x2f2   :  { %v3914_v2 = vsel %vm8446_vm2, 1, %v8687_v53  ;;  %v3453_v44 = vadd.s32 %v3452_v5, %v3442_v50  ;;  %v8476_v47 = vmul.u32 14564, %v3957_v51  ;;  %vm4394_vm15 = vcmp.ge.s32.totalorder %v4322_v25, 1 }
 0x2f3   :  { %vm4466_vm0 = vcmp.le.s32.totalorder %v4322_v25, 16  ;;  %v3941_v61 = vadd.s32 %v3939_v60, %v3933_v37  ;;  %v3963_v24 = vshll.u32 %v3960_v40, 16  ;;  %v3943_v43 = vsel %vm3942_vm14, 1, %v8687_v53 }
 0x2f4   :  { %v3454_v56 = vadd.s32 %v3453_v44, %v3444_v18  ;;  %v3962_v38 = vmul.u32 58254, %v3957_v51  ;;  %v3965_v48 = vshll.u32 %v8476_v47, 16  ;;  %v3803_v3 = vshrl.u32 %v8361_v10, 4  ;;  %vm4538_vm5 = vmand %vm4394_vm15, %vm4466_vm0 }
 0x2f5   :  { %v3906_v45 = vshrl.u32 %v8401_v39, 16  ;;  %v3916_v59 = vadd.s32 %v3914_v2, %v3912_v34  ;;  %vm3967_vm4 = vc.u32 %v3959_v31, %v3963_v24  ;;  %v8777_v52 = vshrl.u32 %v8279_v63, 16 }
 0x2f6   :  { %v3455_v14 = vshrl.u32 %v3454_v56, 4  ;;  %v3968_v50 = vsel %vm3967_vm4, 1, %v8687_v53  ;;  %v3969_v37 = vadd.s32 %v3963_v24, %v3959_v31  ;;  %v3879_v10 = vshrl.u32 %v8367_v12, 16 }
 0x2f7   :  { %v3831_v19 = vadd.s32 %v8374_v4, %v8777_v52  ;;  %v8778_v39 = vshrl.u32 %v8350_v8, 16  ;;  %v3935_v29 = vshrl.u32 %v8431_v6, 16  ;;  %v3945_v63 = vadd.s32 %v3943_v43, %v3941_v61 }
 0x2f8   :  { %v8779_v4 = vshrl.u32 %v8303_v15, 16  ;;  %v3456_v25 = vmul.u32 18, %v3455_v14  ;;  %v3970_v18 = vadd.s32 %v3968_v50, %v3962_v38  ;;  %vm3971_vm8 = vc.u32 %v3969_v37, %v3965_v48 }
 0x2f9   :  { %v3888_v60 = vadd.s32 %v3887_v46, %v8778_v39  ;;  %v3908_v5 = vshrl.u32 %v8417_v49, 16  ;;  %v3917_v51 = vadd.s32 %v3916_v59, %v3906_v45  ;;  %v5474_v34 = vsel %vm4538_vm5, 1.0, %v8686_v41  ;;  %v8780_v39 = vld [vmem:[#allocation9_spill] sm:$0xff] }
 0x2fa   :  { %v3860_v22 = vadd.s32 %v8427_v26, %v8779_v4  ;;  %v3972_v12 = vsel %vm3971_vm8, 1, %v8687_v53  ;;  %v4333_v8 = vsel %vm4189_vm7, %v8355_v42, %v8290_v55  ;;  %v3457_v6 = vsub.s32 %v8398_v35, %v3456_v25 }
 0x2fb   :  { %v3964_v31 = vshrl.u32 %v3960_v40, 16  ;;  %v3974_v46 = vadd.s32 %v3972_v12, %v3970_v18  ;;  %v3832_v15 = vshrl.u32 %v3831_v19, 4  ;;  %v3889_v2 = vadd.s32 %v3888_v60, %v3879_v10 }
 0x2fc   :  { %v3937_v26 = vshrl.u32 %v8441_v62, 16  ;;  %v3946_v44 = vadd.s32 %v3945_v63, %v3935_v29  ;;  %v4898_v61 = vmul.f32 %v5474_v34, %v8406_v17  ;;  %vm4035_vm2 = vcmp.ne.s32.totalorder %v3457_v6, 0  ;;  %v8781_v34 = vld [vmem:[#allocation3_spill] sm:$0xff] }
 0x2fd   :  { %vm4107_vm1 = vcmp.lt.s32.totalorder %v3457_v6, 0  ;;  %v4251_v49 = vadd.s32 18, %v3457_v6  ;;  %vm4046_vm9 = vcmp.ne.s32.totalorder %v8359_v7, 0  ;;  %v3804_v53 = vmul.u32 18, %v3803_v3 }
 0x2fe   :  { %v3861_v24 = vshrl.u32 %v3860_v22, 4  ;;  %v3918_v43 = vadd.s32 %v3917_v51, %v3908_v5  ;;  %vm4179_vm10 = vmand %vm4107_vm1, %vm4035_vm2  ;;  %v4967_v55 = vadd.f32 %v8255_v21, %v8381_v27  ;;  %v3966_v35 = vshrl.u32 %v8476_v47, 16 }
 0x2ff   :  { %v4323_v42 = vsel %vm4179_vm10, %v4251_v49, %v3457_v6  ;;  %v3975_v40 = vadd.s32 %v3974_v46, %v3964_v31  ;;  %v3833_v62 = vmul.u32 18, %v3832_v15  ;;  %v3890_v56 = vshrl.u32 %v3889_v2, 4  ;;  %v8783_v31 = vld [vmem:[#allocation5_spill] sm:$0xff]  ;;  %v8784_v15 = vld [vmem:[#allocation11_spill] sm:$0xff]  ;;  %v8788_v49 = vld [vmem:[#allocation12_spill] sm:$0xff] }
 0x300   :  { %vm4395_vm11 = vcmp.ge.s32.totalorder %v4323_v42, 1  ;;  %vm4467_vm12 = vcmp.le.s32.totalorder %v4323_v42, 16  ;;  %vm4118_vm6 = vcmp.lt.s32.totalorder %v8359_v7, 0  ;;  %v4968_v38 = vadd.f32 %v4967_v55, %v8404_v30 }
 0x301   :  { %v5048_v48 = vmul.f32 %v4898_v61, %v8406_v17  ;;  %v3947_v3 = vadd.s32 %v3946_v44, %v3937_v26  ;;  %vm4539_vm3 = vmand %vm4395_vm11, %vm4467_vm12  ;;  %v3805_v45 = vsub.s32 %v8149_v20, %v3804_v53  ;;  %v3862_v59 = vmul.u32 18, %v3861_v24  ;;  %v8787_v44 = vld [vmem:[#allocation6_spill] sm:$0xff] }
 0x302   :  { %v3919_v21 = vshrl.u32 %v3918_v43, 4  ;;  %v5475_v27 = vsel %vm4539_vm3, 1.0, %v8686_v41  ;;  %vm4405_vm13 = vcmp.ge.s32.totalorder %v4333_v8, 1  ;;  %v4969_v47 = vadd.f32 %v4968_v38, %v4898_v61  ;;  %vm4190_vm15 = vmand %vm4118_vm6, %vm4046_vm9 }
 0x303   :  { %v4899_v52 = vmul.f32 %v5475_v27, %v8411_v33  ;;  %v3976_v19 = vadd.s32 %v3975_v40, %v3966_v35  ;;  %vm4477_vm14 = vcmp.le.s32.totalorder %v4333_v8, 16  ;;  %v4262_v14 = vadd.s32 18, %v8359_v7  ;;  %v8791_v35 = vld [vmem:[#allocation8_spill] sm:$0xff]  ;;  %v8797_v27 = vld [vmem:[#allocation2_spill] sm:$0xff] }
 0x304   :  { %v3834_v30 = vsub.s32 %v8221_v28, %v3833_v62  ;;  %v3891_v50 = vmul.u32 18, %v3890_v56  ;;  %v5119_v20 = vadd.f32 %v8421_v57, %v5048_v48  ;;  %v3948_v17 = vshrl.u32 %v3947_v3, 4  ;;  %vm4549_vm5 = vmand %vm4405_vm13, %vm4477_vm14  ;;  %v8792_v62 = vld [vmem:[#allocation14_spill] sm:$0xff]  ;;  %v8795_v3 = vld [vmem:[#allocation16_spill] sm:$0xff] }
 0x305   :  { %v4970_v37 = vadd.f32 %v4969_v47, %v4899_v52  ;;  %v5049_v10 = vmul.f32 %v4899_v52, %v8411_v33  ;;  %v8525_v60 = vmul.f32 %v8345_v9, %v8780_v39  ;;  %vm4047_vm0 = vcmp.ne.s32.totalorder %v3805_v45, 0 }
 0x306   :  { %v3863_v29 = vsub.s32 %v8234_v54, %v3862_v59  ;;  %v3920_v28 = vmul.u32 18, %v3919_v21  ;;  %vm4119_vm4 = vcmp.lt.s32.totalorder %v3805_v45, 0  ;;  %v3977_v22 = vshrl.u32 %v3976_v19, 4  ;;  %v8796_v59 = vld [vmem:[#allocation15_spill] sm:$0xff] }
 0x307   :  { %v4971_v63 = vadd.f32 %v4970_v37, %v7760_v1  ;;  %v5120_v4 = vadd.f32 %v5119_v20, %v5049_v10  ;;  %v4334_v57 = vsel %vm4190_vm15, %v4262_v14, %v8359_v7  ;;  %vm4048_vm7 = vcmp.ne.s32.totalorder %v3834_v30, 0  ;;  %vm4191_vm2 = vmand %vm4119_vm4, %vm4047_vm0  ;;  %v8801_v20 = vld [vmem:[#allocation17_spill] sm:$0xff] }
 0x308   :  { %vm4120_vm8 = vcmp.lt.s32.totalorder %v3834_v30, 0  ;;  %v3892_v33 = vsub.s32 %v8308_v13, %v3891_v50  ;;  %v4263_v9 = vadd.s32 18, %v3805_v45  ;;  %v3949_v25 = vmul.u32 18, %v3948_v17 }
 0x309   :  { %v4972_v18 = vadd.f32 %v4971_v63, %v7851_v0  ;;  %v5121_v54 = vadd.f32 %v5120_v4, %v7915_v23  ;;  %v4264_v1 = vadd.s32 18, %v3834_v30  ;;  %vm4049_vm1 = vcmp.ne.s32.totalorder %v3863_v29, 0  ;;  %vm4192_vm10 = vmand %vm4120_vm8, %vm4048_vm7  ;;  %v8782_v23 = vld [vmem:[#allocation22_spill] sm:$0xff] }
 0x30a   :  { %vm4121_vm9 = vcmp.lt.s32.totalorder %v3863_v29, 0  ;;  %v3921_v5 = vsub.s32 %v8372_v11, %v3920_v28  ;;  %v5485_v51 = vsel %vm4549_vm5, 1.0, %v8686_v41  ;;  %v3978_v12 = vmul.u32 18, %v3977_v22  ;;  %v8802_v28 = vld [vmem:[#allocation10_spill] sm:$0xff]  ;;  %v8803_v22 = vld [vmem:[#allocation21_spill] sm:$0xff] }
 0x30b   :  { %v4973_v7 = vadd.f32 %v4972_v18, %v7925_v36  ;;  %v5122_v13 = vadd.f32 %v5121_v54, %v8781_v34  ;;  %vm4406_vm11 = vcmp.ge.s32.totalorder %v4334_v57, 1  ;;  %v4265_v8 = vadd.s32 18, %v3863_v29  ;;  %vm4193_vm3 = vmand %vm4121_vm9, %vm4049_vm1 }
 0x30c   :  { %vm4050_vm12 = vcmp.ne.s32.totalorder %v3892_v33, 0  ;;  %vm4122_vm6 = vcmp.lt.s32.totalorder %v3892_v33, 0  ;;  %v4335_v0 = vsel %vm4191_vm2, %v4263_v9, %v3805_v45  ;;  %v3950_v6 = vsub.s32 %v8782_v23, %v3949_v25  ;;  %v8804_v25 = vld [vmem:[#allocation4_spill] sm:$0xff]  ;;  %v8806_v23 = vld [vmem:[#allocation7_spill] sm:$0xff] }
 0x30d   :  { %v4974_v46 = vadd.f32 %v4973_v7, %v8783_v31  ;;  %v5123_v11 = vadd.f32 %v5122_v13, %v8784_v15  ;;  %vm4478_vm13 = vcmp.le.s32.totalorder %v4334_v57, 16  ;;  %v4336_v2 = vsel %vm4192_vm10, %v4264_v1, %v3834_v30  ;;  %vm8543_vm15 = vmand %vm4122_vm6, %vm4050_vm12  ;;  %v8800_v30 = vld [vmem:[#allocation18_spill] sm:$0xff]  ;;  %v8805_v7 = vld [vmem:[#allocation13_spill] sm:$0xff] }
 0x30e   :  { %v4266_v26 = vadd.s32 18, %v3892_v33  ;;  %vm4051_vm14 = vcmp.ne.s32.totalorder %v3921_v5, 0  ;;  %vm4123_vm0 = vcmp.lt.s32.totalorder %v3921_v5, 0  ;;  %v3979_v24 = vsub.s32 %v8456_v32, %v3978_v12  ;;  %vm8551_vm7 = vmand %vm4406_vm11, %vm4478_vm13 }
 0x30f   :  { %v4975_v61 = vadd.f32 %v4974_v46, %v8787_v44  ;;  %v5124_v53 = vadd.f32 %v5123_v11, %v8788_v49  ;;  %vm4407_vm4 = vcmp.ge.s32.totalorder %v4335_v0, 1  ;;  %vm4479_vm5 = vcmp.le.s32.totalorder %v4335_v0, 16  ;;  %vm4195_vm10 = vmand %vm4123_vm0, %vm4051_vm14 }
 0x310   :  { %v4337_v43 = vsel %vm4193_vm3, %v4265_v8, %v3863_v29  ;;  %v4267_v55 = vadd.s32 18, %v3921_v5  ;;  %vm4052_vm8 = vcmp.ne.s32.totalorder %v3950_v6, 0  ;;  %vm4124_vm2 = vcmp.lt.s32.totalorder %v3950_v6, 0  ;;  %vm8561_vm12 = vmand %vm4407_vm4, %vm4479_vm5 }
 0x311   :  { %v4976_v40 = vadd.f32 %v4975_v61, %v8791_v35  ;;  %v5125_v56 = vadd.f32 %v5124_v53, %v8792_v62  ;;  %vm4408_vm1 = vcmp.ge.s32.totalorder %v4336_v2, 1  ;;  %vm4480_vm9 = vcmp.le.s32.totalorder %v4336_v2, 16  ;;  %vm4196_vm14 = vmand %vm4124_vm2, %vm4052_vm8  ;;  %v8807_v2 = vld [vmem:[#allocation20_spill] sm:$0xff]  ;;  %v8808_v53 = vld [vmem:[#allocation19_spill] sm:$0xff] }
 0x312   :  { %v4338_v32 = vsel %vm8543_vm15, %v4266_v26, %v3892_v33  ;;  %v4268_v38 = vadd.s32 18, %v3950_v6  ;;  %vm4053_vm11 = vcmp.ne.s32.totalorder %v3979_v24, 0  ;;  %vm4125_vm6 = vcmp.lt.s32.totalorder %v3979_v24, 0  ;;  %vm8574_vm15 = vmand %vm4408_vm1, %vm4480_vm9 }
 0x313   :  { %v4977_v45 = vadd.f32 %v4976_v40, %v8795_v3  ;;  %v5126_v21 = vadd.f32 %v5125_v56, %v8796_v59  ;;  %v4909_v47 = vmul.f32 %v5485_v51, %v8797_v27  ;;  %v5486_v52 = vsel %vm8551_vm7, 1.0, %v8686_v41  ;;  %vm4197_vm5 = vmand %vm4125_vm6, %vm4053_vm11 }
 0x314   :  { %vm4409_vm3 = vcmp.ge.s32.totalorder %v4337_v43, 1  ;;  %vm4481_vm13 = vcmp.le.s32.totalorder %v4337_v43, 16  ;;  %v4339_v14 = vsel %vm4195_vm10, %v4267_v55, %v3921_v5  ;;  %v4269_v37 = vadd.s32 18, %v3979_v24 }
 0x315   :  { %v4978_v50 = vadd.f32 %v4977_v45, %v8800_v30  ;;  %v5127_v17 = vadd.f32 %v5126_v21, %v8801_v20  ;;  %v5058_v10 = vmul.f32 %v8525_v60, %v8780_v39  ;;  %v5487_v29 = vsel %vm8561_vm12, 1.0, %v8686_v41  ;;  %vm4553_vm7 = vmand %vm4409_vm3, %vm4481_vm13 }
 0x316   :  { %vm4410_vm0 = vcmp.ge.s32.totalorder %v4338_v32, 1  ;;  %vm4482_vm4 = vcmp.le.s32.totalorder %v4338_v32, 16  ;;  %v4910_v63 = vmul.f32 %v5486_v52, %v8802_v28  ;;  %v4340_v4 = vsel %vm4196_vm14, %v4268_v38, %v3950_v6 }
 0x317   :  { %v5128_v57 = vadd.f32 %v5127_v17, %v8803_v22  ;;  %v4979_v33 = vadd.f32 %v4978_v50, %v8525_v60  ;;  %v5059_v9 = vmul.f32 %v4909_v47, %v8797_v27  ;;  %v5488_v39 = vsel %vm8574_vm15, 1.0, %v8686_v41  ;;  %vm4554_vm1 = vmand %vm4410_vm0, %vm4482_vm4 }
 0x318   :  { %vm4411_vm8 = vcmp.ge.s32.totalorder %v4339_v14, 1  ;;  %vm4483_vm2 = vcmp.le.s32.totalorder %v4339_v14, 16  ;;  %v4911_v18 = vmul.f32 %v5487_v29, %v8804_v25  ;;  %v4341_v54 = vsel %vm4197_vm5, %v4269_v37, %v3979_v24 }
 0x319   :  { %v4980_v1 = vadd.f32 %v4979_v33, %v4909_v47  ;;  %v5129_v5 = vadd.f32 %v5128_v57, %v5058_v10  ;;  %v5489_v51 = vsel %vm4553_vm7, 1.0, %v8686_v41  ;;  %vm4412_vm9 = vcmp.ge.s32.totalorder %v4340_v4, 1  ;;  %vm4555_vm12 = vmand %vm4411_vm8, %vm4483_vm2 }
 0x31a   :  { %vm4484_vm10 = vcmp.le.s32.totalorder %v4340_v4, 16  ;;  %v5060_v60 = vmul.f32 %v4910_v63, %v8802_v28  ;;  %v4912_v34 = vmul.f32 %v5488_v39, %v8805_v7  ;;  %v5490_v8 = vsel %vm4554_vm1, 1.0, %v8686_v41 }
 0x31b   :  { %v4981_v13 = vadd.f32 %v4980_v1, %v4910_v63  ;;  %v5130_v12 = vadd.f32 %v5129_v5, %v5059_v9  ;;  %vm4413_vm11 = vcmp.ge.s32.totalorder %v4341_v54, 1  ;;  %vm4485_vm6 = vcmp.le.s32.totalorder %v4341_v54, 16  ;;  %vm4556_vm3 = vmand %vm4412_vm9, %vm4484_vm10 }
 0x31c   :  { %v5061_v0 = vmul.f32 %v4911_v18, %v8804_v25  ;;  %v4913_v6 = vmul.f32 %v5489_v51, %v8806_v23  ;;  %v5491_v15 = vsel %vm4555_vm12, 1.0, %v8686_v41  ;;  %v5062_v11 = vmul.f32 %v4912_v34, %v8805_v7  ;;  %vm4557_vm13 = vmand %vm4413_vm11, %vm4485_vm6 }
 0x31d   :  { %v4982_v31 = vadd.f32 %v4981_v13, %v4911_v18  ;;  %v5131_v46 = vadd.f32 %v5130_v12, %v5060_v60  ;;  %v4914_v26 = vmul.f32 %v5490_v8, %v8807_v2  ;;  %v5492_v61 = vsel %vm4556_vm3, 1.0, %v8686_v41 }
 0x31e   :  { %v5063_v49 = vmul.f32 %v4913_v6, %v8806_v23  ;;  %v4915_v24 = vmul.f32 %v5491_v15, %v8808_v53  ;;  %v5493_v42 = vsel %vm4557_vm13, 1.0, %v8686_v41  ;;  %v4916_v40 = vmul.f32 %v5492_v61, %v8451_v58 }
 0x31f   :  { %v4983_v36 = vadd.f32 %v4982_v31, %v4912_v34  ;;  %v5132_v44 = vadd.f32 %v5131_v46, %v5061_v0  ;;  %v5064_v35 = vmul.f32 %v4914_v26, %v8807_v2  ;;  %v4917_v38 = vmul.f32 %v5493_v42, %v8462_v16 }
 0x320   :  { %v5065_v32 = vmul.f32 %v4915_v24, %v8808_v53  ;;  %v5066_v45 = vmul.f32 %v4916_v40, %v8451_v58 }
 0x321   :  { %v4984_v43 = vadd.f32 %v4983_v36, %v4913_v6  ;;  %v5133_v55 = vadd.f32 %v5132_v44, %v5062_v11  ;;  %v5067_v47 = vmul.f32 %v4917_v38, %v8462_v16 }
 0x323   :  { %v4985_v62 = vadd.f32 %v4984_v43, %v4914_v26  ;;  %v5134_v56 = vadd.f32 %v5133_v55, %v5063_v49 }
 0x325   :  { %v4986_v48 = vadd.f32 %v4985_v62, %v4915_v24  ;;  %v5135_v3 = vadd.f32 %v5134_v56, %v5064_v35 }
 0x327   :  { %v4987_v59 = vadd.f32 %v4986_v48, %v4916_v40  ;;  %v5136_v21 = vadd.f32 %v5135_v3, %v5065_v32 }
 0x329   :  { %v4988_v27 = vadd.f32 %v4987_v59, %v4917_v38  ;;  %v5137_v41 = vadd.f32 %v5136_v21, %v5066_v45 }
 0x32b   :  { %v4989_v52 = vrot.slane %v4988_v27, 4  ;;  %v5138_v19 = vadd.f32 %v5137_v41, %v5067_v47 }
 0x32d   :  { %v4990_v14 = vadd.f32 %v4989_v52, %v4988_v27  ;;  %v5139_v30 = vrot.slane %v5138_v19, 4 }
 0x32f   :  { %v4991_v50 = vrot.slane %v4990_v14, 2  ;;  %v5140_v20 = vadd.f32 %v5139_v30, %v5138_v19 }
 0x331   :  { %v4992_v17 = vadd.f32 %v4991_v50, %v4990_v14  ;;  %v5141_v37 = vrot.slane %v5140_v20, 2 }
 0x333   :  { %v4993_v10 = vrot.slane %v4992_v17, 1  ;;  %v5142_v29 = vadd.f32 %v5141_v37, %v5140_v20 }
 0x335   :  { %v4994_v28 = vadd.f32 %v4993_v10, %v4992_v17  ;;  %v5143_v63 = vrot.slane %v5142_v29, 1 }
 0x337   :  { %4995 = vst [vmem:[%s8623_s3] sm:$0x1] %v4994_v28  ;;  %v5144_v58 = vadd.f32 %v5143_v63, %v5142_v29 }
 0x339   :  { %5145 = vst [vmem:[%s8624_s4] sm:$0x1] %v5144_v58 }

</bundles_post_ra>
